<compile_context>
chip_gen: v5e
topology: v5e:2x2
jax: 0.10.0
libtpu: 0.0.40
codegen_flags: <defaults>
</compile_context>

<pallas_src>
import functools

import jax
import jax.numpy as jnp
from jax.experimental import pallas as pl
from jax.experimental.pallas import tpu as pltpu

# Model dims (from the PyTorch module)
D_IN = 28 * 28                               # 784
DIMS = [D_IN, 128, 64, 32, 64, 128, D_IN]    # 6 Linear layers


def _ae_kernel(x_ref,
               w1_ref, b1_ref, w2_ref, b2_ref, w3_ref, b3_ref,
               w4_ref, b4_ref, w5_ref, b5_ref, w6_ref, b6_ref,
               o_ref):
    """Fused encoder+decoder forward for one (tile_b, 784) batch tile.

    MXU matmuls in bf16 with f32 accumulation; bias add / ReLU on the VPU and sigmoid
    on the EUP in f32.  Activations are re-rounded to bf16 before every matmul, so the
    result matches the "mixed" reference below (not exact f32 PyTorch arithmetic).
    """
    def linear(h, w_ref, b_ref):
        return jnp.dot(h.astype(jnp.bfloat16), w_ref[...],
                       preferred_element_type=jnp.float32) + b_ref[...]

    h = x_ref[...]
    # encoder
    h = jnp.maximum(linear(h, w1_ref, b1_ref), 0.0)   # 784 -> 128, ReLU
    h = jnp.maximum(linear(h, w2_ref, b2_ref), 0.0)   # 128 -> 64,  ReLU
    h = jnp.maximum(linear(h, w3_ref, b3_ref), 0.0)   # 64  -> 32,  ReLU
    # decoder
    h = jnp.maximum(linear(h, w4_ref, b4_ref), 0.0)   # 32  -> 64,  ReLU
    h = jnp.maximum(linear(h, w5_ref, b5_ref), 0.0)   # 64  -> 128, ReLU
    h = linear(h, w6_ref, b6_ref)                     # 128 -> 784
    o_ref[...] = jax.nn.sigmoid(h).astype(o_ref.dtype)


def prepare_params(params):
    """One-time parameter prep OUTSIDE the per-call forward.

    params: list of 6 (W [in, out], b [out]) pairs (any float dtype).
    Returns bf16 weights and f32 (1, out) biases, ready for autoencoder_forward.
    """
    prepped = []
    for w, b in params:
        prepped.append((jnp.asarray(w, jnp.bfloat16),
                        jnp.asarray(b, jnp.float32).reshape(1, -1)))
    return prepped


def _round_up(x, m):
    return ((x + m - 1) // m) * m


@functools.partial(jax.jit, static_argnames=("tile_b",))
def autoencoder_forward(x, prepped_params, *, tile_b=512):
    """x: [B, 784] (bf16 preferred; f32 also works). Output: [B, 784] in x.dtype.

    prepped_params: output of prepare_params().
    tile_b: max batch rows per grid step.  512 fits v5e's 16 MiB scoped-VMEM default;
    push to 1024 on v6e/v7x (add vmem_limit_bytes if the compiler complains).
    """
    B, D = x.shape
    assert D == D_IN

    # Batch tile: multiple of 8 (sublane granularity), capped at tile_b, and shrunk so
    # the grid has >= 2 steps whenever possible (keeps both v7x TensorCores busy).
    if B > 8:
        tile = max(8, min(tile_b, _round_up(-(-B // 2), 8)))
    else:
        tile = 8
    grid = (pl.cdiv(B, tile),)   # ragged last tile handled by Pallas masked writes

    in_specs = [pl.BlockSpec((tile, D_IN), lambda i: (i, 0))]
    flat_params = []
    for w, b in prepped_params:
        # Constant index_map -> same block every grid step (weights stay VMEM-resident).
        in_specs.append(pl.BlockSpec(w.shape, lambda i: (0, 0)))
        in_specs.append(pl.BlockSpec(b.shape, lambda i: (0, 0)))
        flat_params.extend([w, b])

    # Advisory cost estimate for the XLA scheduler.
    flops_per_row = 2 * sum(DIMS[i] * DIMS[i + 1] for i in range(6))
    param_bytes = sum(int(p.size) * p.dtype.itemsize for p in flat_params)
    io_bytes = B * D_IN * 2 * x.dtype.itemsize          # read x + write out
    cost = pl.CostEstimate(
        flops=B * flops_per_row,
        transcendentals=B * D_IN,                        # sigmoid
        bytes_accessed=io_bytes + param_bytes,
    )

    out = pl.pallas_call(
        _ae_kernel,
        out_shape=jax.ShapeDtypeStruct((B, D_IN), x.dtype),
        grid_spec=pltpu.PrefetchScalarGridSpec(
            num_scalar_prefetch=0,
            grid=grid,
            in_specs=in_specs,
            out_specs=pl.BlockSpec((tile, D_IN), lambda i: (i, 0)),
        ),
        compiler_params=pltpu.CompilerParams(
            dimension_semantics=("parallel",)),
        cost_estimate=cost,
    )(x, *flat_params)

    return out   # no slicing / un-padding needed


def init_params(key):
    """Deterministic init mirroring nn.Linear shapes (W stored as [in, out], f32)."""
    params = []
    for li in range(6):
        fan_in, fan_out = DIMS[li], DIMS[li + 1]
        key, kw, kb = jax.random.split(key, 3)
        bound = 1.0 / jnp.sqrt(fan_in)
        w = jax.random.uniform(kw, (fan_in, fan_out), jnp.float32, -bound, bound)
        b = jax.random.uniform(kb, (fan_out,), jnp.float32, -bound, bound)
        params.append((w, b))
    return params


def reference_forward(x, params, *, mixed=True):
    """Pure-JAX reference. mixed=True mirrors the kernel's bf16 matmuls / f32 accum."""
    h = x.astype(jnp.float32)
    for li, (w, b) in enumerate(params):
        w32 = jnp.asarray(w, jnp.float32)
        b32 = jnp.asarray(b, jnp.float32).reshape(1, -1)
        if mixed:
            h = jnp.dot(h.astype(jnp.bfloat16), w32.astype(jnp.bfloat16),
                        preferred_element_type=jnp.float32) + b32
        else:
            h = h @ w32 + b32
        h = jax.nn.sigmoid(h) if li == 5 else jnp.maximum(h, 0.0)
    return h


if __name__ == "__main__":
    key = jax.random.PRNGKey(0)
    kx, kp = jax.random.split(key)

    # Small demo batch: B=300 exercises a 2-step grid (tile auto-picked as 152) and a
    # ragged last tile handled by Pallas' masked writes (no wrapper pad/slice).
    B = 300
    # Producer emits bf16 activations (part of the API contract; no wrapper-side cast).
    x = jax.random.uniform(kx, (B, D_IN), jnp.float32).astype(jnp.bfloat16)

    params = init_params(kp)
    prepped = prepare_params(params)          # one-time weight prep outside the forward

    out = autoencoder_forward(x, prepped)
    out = jax.block_until_ready(out)
    assert out.shape == (B, D_IN)
    assert out.dtype == x.dtype

    out_f32 = out.astype(jnp.float32)
    ref_mixed = reference_forward(x, params, mixed=True)   # same bf16 casts as kernel
    ref_f32 = reference_forward(x, params, mixed=False)    # pure-f32 PyTorch semantics
    assert jnp.allclose(out_f32, ref_mixed, atol=1.5e-2, rtol=0.0), \
        "mismatch vs bf16 (mixed) reference"
    assert jnp.allclose(out_f32, ref_f32, atol=5e-2, rtol=0.0), \
        "mismatch vs f32 reference"

    print("KERNEL_OK")
</pallas_src>

<mosaic_0001>
module attributes {stable_mosaic.version = 11 : i64} {
  func.func @_ae_kernel(%arg0: i32, %arg1: memref<152x784xbf16, #tpu.memory_space<vmem>>, %arg2: memref<784x128xbf16, #tpu.memory_space<vmem>>, %arg3: memref<1x128xf32, #tpu.memory_space<vmem>>, %arg4: memref<128x64xbf16, #tpu.memory_space<vmem>>, %arg5: memref<1x64xf32, #tpu.memory_space<vmem>>, %arg6: memref<64x32xbf16, #tpu.memory_space<vmem>>, %arg7: memref<1x32xf32, #tpu.memory_space<vmem>>, %arg8: memref<32x64xbf16, #tpu.memory_space<vmem>>, %arg9: memref<1x64xf32, #tpu.memory_space<vmem>>, %arg10: memref<64x128xbf16, #tpu.memory_space<vmem>>, %arg11: memref<1x128xf32, #tpu.memory_space<vmem>>, %arg12: memref<128x784xbf16, #tpu.memory_space<vmem>>, %arg13: memref<1x784xf32, #tpu.memory_space<vmem>>, %arg14: memref<152x784xbf16, #tpu.memory_space<vmem>>) attributes {dimension_semantics = [#tpu.dimension_semantics<parallel>], iteration_bounds = array<i64: 2>, scalar_prefetch = 0 : i64, scratch_operands = 0 : i64, tpu.core_type = #tpu.core_type<tc>, window_params = [{transform_indices = @transform_0, window_bounds = array<i64: 152, 784>}, {pipeline_mode = #tpu.pipeline_mode<synchronous>, transform_indices = @transform_1, window_bounds = array<i64: 784, 128>}, {pipeline_mode = #tpu.pipeline_mode<synchronous>, transform_indices = @transform_2, window_bounds = array<i64: 1, 128>}, {pipeline_mode = #tpu.pipeline_mode<synchronous>, transform_indices = @transform_3, window_bounds = array<i64: 128, 64>}, {pipeline_mode = #tpu.pipeline_mode<synchronous>, transform_indices = @transform_4, window_bounds = array<i64: 1, 64>}, {pipeline_mode = #tpu.pipeline_mode<synchronous>, transform_indices = @transform_5, window_bounds = array<i64: 64, 32>}, {pipeline_mode = #tpu.pipeline_mode<synchronous>, transform_indices = @transform_6, window_bounds = array<i64: 1, 32>}, {pipeline_mode = #tpu.pipeline_mode<synchronous>, transform_indices = @transform_7, window_bounds = array<i64: 32, 64>}, {pipeline_mode = #tpu.pipeline_mode<synchronous>, transform_indices = @transform_8, window_bounds = array<i64: 1, 64>}, {pipeline_mode = #tpu.pipeline_mode<synchronous>, transform_indices = @transform_9, window_bounds = array<i64: 64, 128>}, {pipeline_mode = #tpu.pipeline_mode<synchronous>, transform_indices = @transform_10, window_bounds = array<i64: 1, 128>}, {pipeline_mode = #tpu.pipeline_mode<synchronous>, transform_indices = @transform_11, window_bounds = array<i64: 128, 784>}, {pipeline_mode = #tpu.pipeline_mode<synchronous>, transform_indices = @transform_12, window_bounds = array<i64: 1, 784>}, {transform_indices = @transform_13, window_bounds = array<i64: 152, 784>}]} {
    %c0 = arith.constant 0 : index
    %c0_0 = arith.constant 0 : index
    %0 = vector.load %arg1[%c0, %c0_0] : memref<152x784xbf16, #tpu.memory_space<vmem>>, vector<152x784xbf16>
    %c0_1 = arith.constant 0 : index
    %c0_2 = arith.constant 0 : index
    %1 = vector.load %arg2[%c0_1, %c0_2] : memref<784x128xbf16, #tpu.memory_space<vmem>>, vector<784x128xbf16>
    %cst = arith.constant dense<0.000000e+00> : vector<152x128xf32>
    %2 = tpu.matmul %0, %1, %cst {dimension_numbers = #tpu.dot_dimension_numbers<[1], [0], [0], [1], [0, 0, 1, 1], [], []>} : vector<152x784xbf16>, vector<784x128xbf16>, vector<152x128xf32> -> vector<152x128xf32>
    %c0_3 = arith.constant 0 : index
    %c0_4 = arith.constant 0 : index
    %3 = vector.load %arg3[%c0_3, %c0_4] : memref<1x128xf32, #tpu.memory_space<vmem>>, vector<1x128xf32>
    %4 = vector.broadcast %3 : vector<1x128xf32> to vector<152x128xf32>
    %5 = arith.addf %2, %4 : vector<152x128xf32>
    %cst_5 = arith.constant 0.000000e+00 : f32
    %6 = vector.broadcast %cst_5 : f32 to vector<152x128xf32>
    %7 = arith.maximumf %5, %6 : vector<152x128xf32>
    %8 = arith.truncf %7 : vector<152x128xf32> to vector<152x128xbf16>
    %c0_6 = arith.constant 0 : index
    %c0_7 = arith.constant 0 : index
    %9 = vector.load %arg4[%c0_6, %c0_7] : memref<128x64xbf16, #tpu.memory_space<vmem>>, vector<128x64xbf16>
    %cst_8 = arith.constant dense<0.000000e+00> : vector<152x64xf32>
    %10 = tpu.matmul %8, %9, %cst_8 {dimension_numbers = #tpu.dot_dimension_numbers<[1], [0], [0], [1], [0, 0, 1, 1], [], []>} : vector<152x128xbf16>, vector<128x64xbf16>, vector<152x64xf32> -> vector<152x64xf32>
    %c0_9 = arith.constant 0 : index
    %c0_10 = arith.constant 0 : index
    %11 = vector.load %arg5[%c0_9, %c0_10] : memref<1x64xf32, #tpu.memory_space<vmem>>, vector<1x64xf32>
    %12 = vector.broadcast %11 : vector<1x64xf32> to vector<152x64xf32>
    %13 = arith.addf %10, %12 : vector<152x64xf32>
    %cst_11 = arith.constant 0.000000e+00 : f32
    %14 = vector.broadcast %cst_11 : f32 to vector<152x64xf32>
    %15 = arith.maximumf %13, %14 : vector<152x64xf32>
    %16 = arith.truncf %15 : vector<152x64xf32> to vector<152x64xbf16>
    %c0_12 = arith.constant 0 : index
    %c0_13 = arith.constant 0 : index
    %17 = vector.load %arg6[%c0_12, %c0_13] : memref<64x32xbf16, #tpu.memory_space<vmem>>, vector<64x32xbf16>
    %cst_14 = arith.constant dense<0.000000e+00> : vector<152x32xf32>
    %18 = tpu.matmul %16, %17, %cst_14 {dimension_numbers = #tpu.dot_dimension_numbers<[1], [0], [0], [1], [0, 0, 1, 1], [], []>} : vector<152x64xbf16>, vector<64x32xbf16>, vector<152x32xf32> -> vector<152x32xf32>
    %c0_15 = arith.constant 0 : index
    %c0_16 = arith.constant 0 : index
    %19 = vector.load %arg7[%c0_15, %c0_16] : memref<1x32xf32, #tpu.memory_space<vmem>>, vector<1x32xf32>
    %20 = vector.broadcast %19 : vector<1x32xf32> to vector<152x32xf32>
    %21 = arith.addf %18, %20 : vector<152x32xf32>
    %cst_17 = arith.constant 0.000000e+00 : f32
    %22 = vector.broadcast %cst_17 : f32 to vector<152x32xf32>
    %23 = arith.maximumf %21, %22 : vector<152x32xf32>
    %24 = arith.truncf %23 : vector<152x32xf32> to vector<152x32xbf16>
    %c0_18 = arith.constant 0 : index
    %c0_19 = arith.constant 0 : index
    %25 = vector.load %arg8[%c0_18, %c0_19] : memref<32x64xbf16, #tpu.memory_space<vmem>>, vector<32x64xbf16>
    %cst_20 = arith.constant dense<0.000000e+00> : vector<152x64xf32>
    %26 = tpu.matmul %24, %25, %cst_20 {dimension_numbers = #tpu.dot_dimension_numbers<[1], [0], [0], [1], [0, 0, 1, 1], [], []>} : vector<152x32xbf16>, vector<32x64xbf16>, vector<152x64xf32> -> vector<152x64xf32>
    %c0_21 = arith.constant 0 : index
    %c0_22 = arith.constant 0 : index
    %27 = vector.load %arg9[%c0_21, %c0_22] : memref<1x64xf32, #tpu.memory_space<vmem>>, vector<1x64xf32>
    %28 = vector.broadcast %27 : vector<1x64xf32> to vector<152x64xf32>
    %29 = arith.addf %26, %28 : vector<152x64xf32>
    %cst_23 = arith.constant 0.000000e+00 : f32
    %30 = vector.broadcast %cst_23 : f32 to vector<152x64xf32>
    %31 = arith.maximumf %29, %30 : vector<152x64xf32>
    %32 = arith.truncf %31 : vector<152x64xf32> to vector<152x64xbf16>
    %c0_24 = arith.constant 0 : index
    %c0_25 = arith.constant 0 : index
    %33 = vector.load %arg10[%c0_24, %c0_25] : memref<64x128xbf16, #tpu.memory_space<vmem>>, vector<64x128xbf16>
    %cst_26 = arith.constant dense<0.000000e+00> : vector<152x128xf32>
    %34 = tpu.matmul %32, %33, %cst_26 {dimension_numbers = #tpu.dot_dimension_numbers<[1], [0], [0], [1], [0, 0, 1, 1], [], []>} : vector<152x64xbf16>, vector<64x128xbf16>, vector<152x128xf32> -> vector<152x128xf32>
    %c0_27 = arith.constant 0 : index
    %c0_28 = arith.constant 0 : index
    %35 = vector.load %arg11[%c0_27, %c0_28] : memref<1x128xf32, #tpu.memory_space<vmem>>, vector<1x128xf32>
    %36 = vector.broadcast %35 : vector<1x128xf32> to vector<152x128xf32>
    %37 = arith.addf %34, %36 : vector<152x128xf32>
    %cst_29 = arith.constant 0.000000e+00 : f32
    %38 = vector.broadcast %cst_29 : f32 to vector<152x128xf32>
    %39 = arith.maximumf %37, %38 : vector<152x128xf32>
    %40 = arith.truncf %39 : vector<152x128xf32> to vector<152x128xbf16>
    %c0_30 = arith.constant 0 : index
    %c0_31 = arith.constant 0 : index
    %41 = vector.load %arg12[%c0_30, %c0_31] : memref<128x784xbf16, #tpu.memory_space<vmem>>, vector<128x784xbf16>
    %cst_32 = arith.constant dense<0.000000e+00> : vector<152x784xf32>
    %42 = tpu.matmul %40, %41, %cst_32 {dimension_numbers = #tpu.dot_dimension_numbers<[1], [0], [0], [1], [0, 0, 1, 1], [], []>} : vector<152x128xbf16>, vector<128x784xbf16>, vector<152x784xf32> -> vector<152x784xf32>
    %c0_33 = arith.constant 0 : index
    %c0_34 = arith.constant 0 : index
    %43 = vector.load %arg13[%c0_33, %c0_34] : memref<1x784xf32, #tpu.memory_space<vmem>>, vector<1x784xf32>
    %44 = vector.broadcast %43 : vector<1x784xf32> to vector<152x784xf32>
    %45 = arith.addf %42, %44 : vector<152x784xf32>
    %46 = arith.negf %45 : vector<152x784xf32>
    %47 = math.exp %46 : vector<152x784xf32>
    %cst_35 = arith.constant 1.000000e+00 : f32
    %48 = vector.broadcast %cst_35 : f32 to vector<152x784xf32>
    %49 = arith.addf %48, %47 : vector<152x784xf32>
    %50 = arith.divf %48, %49 : vector<152x784xf32>
    %51 = arith.truncf %50 : vector<152x784xf32> to vector<152x784xbf16>
    %c0_36 = arith.constant 0 : index
    %c0_37 = arith.constant 0 : index
    %52 = vector.load %arg14[%c0_36, %c0_37] : memref<152x784xbf16, #tpu.memory_space<vmem>>, vector<152x784xbf16>
    tpu.vector_store %arg14[%c0_36, %c0_37], %51 {strides = array<i32>} : memref<152x784xbf16, #tpu.memory_space<vmem>>, vector<152x784xbf16>,
    return
  }
  func.func @transform_0(%arg0: i32) -> (i32, i32) {
    %c0_i32 = arith.constant 0 : i32
    %c0_i32_0 = arith.constant 0 : i32
    return %arg0, %c0_i32 : i32, i32
  }
  func.func @transform_1(%arg0: i32) -> (i32, i32) {
    %c0_i32 = arith.constant 0 : i32
    %c0_i32_0 = arith.constant 0 : i32
    %c0_i32_1 = arith.constant 0 : i32
    return %c0_i32, %c0_i32_0 : i32, i32
  }
  func.func @transform_2(%arg0: i32) -> (i32, i32) {
    %c0_i32 = arith.constant 0 : i32
    %c0_i32_0 = arith.constant 0 : i32
    %c0_i32_1 = arith.constant 0 : i32
    return %c0_i32, %c0_i32_0 : i32, i32
  }
  func.func @transform_3(%arg0: i32) -> (i32, i32) {
    %c0_i32 = arith.constant 0 : i32
    %c0_i32_0 = arith.constant 0 : i32
    %c0_i32_1 = arith.constant 0 : i32
    return %c0_i32, %c0_i32_0 : i32, i32
  }
  func.func @transform_4(%arg0: i32) -> (i32, i32) {
    %c0_i32 = arith.constant 0 : i32
    %c0_i32_0 = arith.constant 0 : i32
    %c0_i32_1 = arith.constant 0 : i32
    return %c0_i32, %c0_i32_0 : i32, i32
  }
  func.func @transform_5(%arg0: i32) -> (i32, i32) {
    %c0_i32 = arith.constant 0 : i32
    %c0_i32_0 = arith.constant 0 : i32
    %c0_i32_1 = arith.constant 0 : i32
    return %c0_i32, %c0_i32_0 : i32, i32
  }
  func.func @transform_6(%arg0: i32) -> (i32, i32) {
    %c0_i32 = arith.constant 0 : i32
    %c0_i32_0 = arith.constant 0 : i32
    %c0_i32_1 = arith.constant 0 : i32
    return %c0_i32, %c0_i32_0 : i32, i32
  }
  func.func @transform_7(%arg0: i32) -> (i32, i32) {
    %c0_i32 = arith.constant 0 : i32
    %c0_i32_0 = arith.constant 0 : i32
    %c0_i32_1 = arith.constant 0 : i32
    return %c0_i32, %c0_i32_0 : i32, i32
  }
  func.func @transform_8(%arg0: i32) -> (i32, i32) {
    %c0_i32 = arith.constant 0 : i32
    %c0_i32_0 = arith.constant 0 : i32
    %c0_i32_1 = arith.constant 0 : i32
    return %c0_i32, %c0_i32_0 : i32, i32
  }
  func.func @transform_9(%arg0: i32) -> (i32, i32) {
    %c0_i32 = arith.constant 0 : i32
    %c0_i32_0 = arith.constant 0 : i32
    %c0_i32_1 = arith.constant 0 : i32
    return %c0_i32, %c0_i32_0 : i32, i32
  }
  func.func @transform_10(%arg0: i32) -> (i32, i32) {
    %c0_i32 = arith.constant 0 : i32
    %c0_i32_0 = arith.constant 0 : i32
    %c0_i32_1 = arith.constant 0 : i32
    return %c0_i32, %c0_i32_0 : i32, i32
  }
  func.func @transform_11(%arg0: i32) -> (i32, i32) {
    %c0_i32 = arith.constant 0 : i32
    %c0_i32_0 = arith.constant 0 : i32
    %c0_i32_1 = arith.constant 0 : i32
    return %c0_i32, %c0_i32_0 : i32, i32
  }
  func.func @transform_12(%arg0: i32) -> (i32, i32) {
    %c0_i32 = arith.constant 0 : i32
    %c0_i32_0 = arith.constant 0 : i32
    %c0_i32_1 = arith.constant 0 : i32
    return %c0_i32, %c0_i32_0 : i32, i32
  }
  func.func @transform_13(%arg0: i32) -> (i32, i32) {
    %c0_i32 = arith.constant 0 : i32
    %c0_i32_0 = arith.constant 0 : i32
    return %arg0, %c0_i32 : i32, i32
  }
}

</mosaic_0001>

<bundles_post_ra>
// kernel: autoencoder_forward.1
= control target key start
LH: loop header
LB: loop body
LE: loop exit
PB: predicated region body
PF: predicated region fallthrough
CT: control target
= control target key end

     0   :  { %s12144_s0 = inlined_call_operand.hbm [shape: bf16[300,784], index: 0, kind: input, shape index: {}]   ;;  %s12145_s1 = inlined_call_operand.vmem [shape: bf16[784,128], index: 1, kind: input, shape index: {}]   ;;  %s12146_s2 = inlined_call_operand.vmem [shape: f32[1,128], index: 2, kind: input, shape index: {}]   ;;  %s12147_s3 = inlined_call_operand.vmem [shape: bf16[128,64], index: 3, kind: input, shape index: {}]   ;;  %s12148_s4 = inlined_call_operand.vmem [shape: f32[1,64], index: 4, kind: input, shape index: {}]   ;;  %s12149_s5 = inlined_call_operand.vmem [shape: bf16[64,32], index: 5, kind: input, shape index: {}]   ;;  %s12150_s6 = inlined_call_operand.vmem [shape: f32[1,32], index: 6, kind: input, shape index: {}]   ;;  %s12151_s7 = inlined_call_operand.vmem [shape: bf16[32,64], index: 7, kind: input, shape index: {}]   ;;  %s12152_s8 = inlined_call_operand.vmem [shape: f32[1,64], index: 8, kind: input, shape index: {}]   ;;  %s12153_s9 = inlined_call_operand.vmem [shape: bf16[64,128], index: 9, kind: input, shape index: {}]   ;;  %s12154_s10 = inlined_call_operand.vmem [shape: f32[1,128], index: 10, kind: input, shape index: {}]   ;;  %s12155_s11 = inlined_call_operand.vmem [shape: bf16[128,784], index: 11, kind: input, shape index: {}]   ;;  %s12156_s12 = inlined_call_operand.vmem [shape: f32[1,784], index: 12, kind: input, shape index: {}]   ;;  %s12157_s13 = inlined_call_operand.hbm [shape: bf16[300,784], index: 13, kind: output, shape index: {}]  }
   0x1   :  { %12167 = sst [smem:[#allocation22_spill]] %s12144_s0 }
   0x2   :  { %12168 = sst [smem:[#allocation23_spill]] %s12157_s13 }
   0x3   :  { %18 = vsyncpa [#allocation3], 0 }
   0x4   :  { %20 = vsyncpa [#allocation3 + $0x1], 0 }
   0x5   :  { %21 = vsyncpa [#allocation4], 0 }
   0x6   :  { %23 = vsyncpa [#allocation4 + $0x1], 0  ;;  %s7779_s25 = smov 0   ;;  %s7781_s26 = smov 0  }
   0x7   :  { %s7783_s27 = smov 0   ;;  %s7785_s28 = smov 0  }
   0x8 LB: > { %12169 = sst [smem:[#allocation8_spill]] %s7691_s25  ;;  %s7800_s29 = sadd.s32 4294967295, %s7703_s28   ;;  %s7703_s28 = sphi %s7785_s28, %s12498_s28   ;;  %s7699_s27 = sphi %s7783_s27, %s12500_s27   ;;  %s7695_s26 = sphi %s7781_s26, %s12502_s26   ;;  %s7691_s25 = sphi %s7779_s25, %s12501_s25  }
   0x9   : > { %12170 = sst [smem:[#allocation9_spill]] %s7699_s27  ;;  %s5886_s30 = sadd.s32 4294967294, %s7703_s28  }
   0xa   : > { %12171 = sst [smem:[#allocation10_spill]] %s7800_s29  ;;  %s7804_s14 = sadd.s32 1, %s7703_s28  }
   0xb   : > { %12172 = sst [smem:[#allocation11_spill]] %s7804_s14  ;;  %s36_s15 = sadd.s32 1, %s7699_s27 }
   0xc   : > { %s33_s16 = ssub.s32 %s7703_s28, %s7804_s14  ;;  %p43_p0 = scmp.ne.s32.totalorder %s7699_s27, %s7695_s26 }
   0xd   : > { %p34_p1 = scmp.eq.s32.totalorder %s33_s16, 0  ;;  %p44_p2 = scmp.eq.s32.totalorder %s7703_s28, 0 }
   0xe   : > { %p49_p3 = scmp.ne.s32.totalorder %s7695_s26, %s7691_s25  ;;  %p50_p4 = scmp.eq.s32.totalorder %s7800_s29, 0 }
   0xf   : > { %s7816_s17 = scalar_select %p34_p1, %s7699_s27, %s36_s15  }
  0x10   : > { %p45_p5 = por %p44_p2, %p43_p0  ;;  %p7818_p6 = por %p50_p4, %p49_p3 }
  0x11   : > { %12173 = sst [smem:[#allocation12_spill]] %s7816_s17  ;;  %p325_p7 = scmp.eq.s32.totalorder %s7800_s29, 1 }
  0x12   : > { %p331_p8 = scmp.eq.s32.totalorder %s5886_s30, 1  ;;  %p5888_p9 = scmp.ge.s32.totalorder %s7703_s28, 2 }
  0x13   : > { %p7029_p10 = scmp.lt.s32.totalorder %s7703_s28, 2  ;;  %p7825_p11 = por %p325_p7, %p43_p0 }
  0x14   : > { %p7829_p12 = por %p331_p8, %p49_p3  ;;  %s387_s21 = sand.u32 1, %s7699_s27  }
  0x15   : > { %s12175_s19 = scalar_select %p7825_p11, 1, 0 }
  0x16   : > { %s12177_s20 = scalar_select %p7829_p12, 1, 0 }
  0x17   : > { %12176 = sst [smem:[#allocation13_spill]] %s12175_s19  ;;  %s7013_s22 = smul.u32 532, %s387_s21 }
  0x18   : > { %12178 = sst [smem:[#allocation14_spill]] %s12177_s20  ;;  %s7030_s23 = smul.u32 532, %s7703_s28 }
  0x19   : > { %p7835_p13 = pnand %p7029_p10, %p45_p5  ;;  %s12180_s0 = sld [smem:[#allocation22_spill]] }
  0x1a   : > { %s391_s17 = scalar_lea.vmem [#allocation2], %s7013_s22  ;;  %p5890_p0 = scmp.ge.s32.totalorder %s7703_s28, 1 }
  0x1b   : > { %s400_s14 = sshll.u32 %s391_s17, 4  ;;  %s388_s19 = scalar_lea.sflag [#allocation3], %s387_s21  ;;  %s401_s14 = int_to_ptr.vmem [resolvable:$true] %s400_s14 }
  0x1c   : > { %p7611_p2 = pneg %p7835_p13 }
  0x1f   : > { %s397_s30 = scalar_lea.hbm %s12180_s0, %s7030_s23  ;;  %s7614_s15 = scalar_lea.hbm %s12180_s0, 1064 }
  0x20   : > { %s398_s25 = sshll.u32 %s397_s30, 4  ;;  %s399_s25 = int_to_ptr.hbm [resolvable:$true] %s398_s25 }
  0x21   : > { %s7607_s20 = sshra.s32 %s399_s25, 4  ;;  %s7608_s20 = int_to_ptr.hbm [resolvable:$true] %s7607_s20 }
  0x22   : > { %s7609_s27 = scalar_lea.hbm %s7608_s20, 532  ;;  %p7615_p5 = scmp.lt.s32.totalorder %s7608_s20, %s12180_s0 }
  0x23   : > { %p7610_p1 = scmp.ne.s32.totalorder %s7608_s20, %s7609_s27  ;;  %p7616_p7 = scmp.lt.s32.totalorder %s7614_s15, %s7609_s27 }
  0x25   : > { %p7612_p3 = pnand %p7611_p2, %p7610_p1  ;;  %p7617_p8 = por %p7616_p7, %p7615_p5 }
  0x27   : > { %p7613_p4 = pneg %p7612_p3 }
  0x29   : > { %p7618_p10 = pnand %p7617_p8, %p7613_p4 }
  0x2b   : > { %7621 = shalt.err (!%p7618_p10)
}
  0x2c   : > { %s7705_s17 = smov 448   ;;  %s7706_s21 = smov 28  }
  0x2d   : > { %7024 = dma.hbm_to_vmem [thread:$0]  (!%p7835_p13), %s399_s25, 8512, %s401_s14, %s388_s19, %s7705_s17, %s7705_s17, %s7706_s21  }
  0x2e   : > { %p408_p1 = scmp.lt.s32.totalorder %s7703_s28, 3 }
  0x30   : > { %p409_p2 = pnand %p5890_p0, %p408_p1 }
  0x32   : > { %412 = sbr.rel (%p409_p2) target bundleno = 1781 (0x6f5), region = 72 }
  0x37   : > { %s7857_s13 = sand.u32 1, %s7695_s26  }
  0x38   : > { %s7015_s27 = smul.u32 532, %s7857_s13  ;;  %s415_s29 = scalar_lea.sflag [#allocation3], %s7857_s13 }
  0x3a   : > { %s7863_s20 = scalar_lea.vmem [#allocation2], %s7015_s27 }
  0x3b   : > { %7682 = dma.done.wait (%p7818_p6), %s415_s29, 8512  }
  0x3c   : > { %7684 = vsyncadd (%p7818_p6), %s415_s29, 4294958784  ;;  %v6881_v0 = vld [vmem:[%s12145_s1 + $0x38] sm:$0xff]  ;;  %v6880_v2 = vld [vmem:[%s12145_s1 + $0x30] sm:$0xff]  ;;  %vm1276_vm0 = vcmask 130048   ;;  %vm1933_vm1 = vcmask 523264   ;;  %vm2071_vm2 = vcmask 261120  }
  0x3d   : > { %v6889_v1 = vld [vmem:[%s12145_s1 + $0x78] sm:$0xff]  ;;  %6997 = vmatpush.bf16.msra.mxu2 %v6881_v0  ;;  %v6888_v3 = vld [vmem:[%s12145_s1 + $0x70] sm:$0xff]  ;;  %1307 = vmatpush.bf16.msra.mxu0 %v6881_v0  ;;  %v6879_v4 = vld [vmem:[%s12145_s1 + $0x28] sm:$0xff]  ;;  %s9052_s14 = scalar_lea.vmem [#allocation5], %s7015_s27  ;;  %s12492_s15 = sld [smem:[#allocation23_spill]] }
  0x3e   : > { %7005 = vmatpush.bf16.msra.mxu3 %v6889_v1  ;;  %1365 = vmatpush.bf16.msra.mxu1 %v6889_v1  ;;  %v6887_v5 = vld [vmem:[%s12145_s1 + $0x68] sm:$0xff]  ;;  %v6878_v6 = vld [vmem:[%s12145_s1 + $0x20] sm:$0xff]  ;;  %v6877_v8 = vld [vmem:[%s12145_s1 + $0x18] sm:$0xff]  ;;  %s5810_s18 = sshll.u32 %s9052_s14, 4  ;;  %s5797_s21 = scalar_lea.sflag [#allocation4], %s7857_s13  ;;  %s5811_s18 = int_to_ptr.vmem [resolvable:$true] %s5810_s18 }
  0x3f   : > { %v6886_v7 = vld [vmem:[%s12145_s1 + $0x60] sm:$0xff]  ;;  %v6885_v9 = vld [vmem:[%s12145_s1 + $0x58] sm:$0xff]  ;;  %v6876_v10 = vld [vmem:[%s12145_s1 + $0x10] sm:$0xff] }
  0x40   : > { %v6884_v11 = vld [vmem:[%s12145_s1 + $0x50] sm:$0xff]  ;;  %v6875_v12 = vld [vmem:[%s12145_s1 + $0x8] sm:$0xff]  ;;  %v6874_v14 = vld [vmem:[%s12145_s1] sm:$0xff] }
  0x41   : > { %6998 = vmatpush.bf16.msra.mxu2 %v6880_v2  ;;  %1308 = vmatpush.bf16.msra.mxu0 %v6880_v2  ;;  %v6883_v13 = vld [vmem:[%s12145_s1 + $0x48] sm:$0xff]  ;;  %v6882_v15 = vld [vmem:[%s12145_s1 + $0x40] sm:$0xff]  ;;  %v6846_v18 = vld [vmem:[%s7863_s20 + $0x11c] sm:$0xf] }
  0x42   : > { %7006 = vmatpush.bf16.msra.mxu3 %v6888_v3  ;;  %1366 = vmatpush.bf16.msra.mxu1 %v6888_v3  ;;  %v6033_v16 = vld [vmem:[%s7863_s20 + $0x118] sm:$0xf]  ;;  %v6849_v17 = vld [vmem:[%s7863_s20 + $0x130] sm:$0xf0]  ;;  %v5893_v21 = vld [vmem:[%s7863_s20] sm:$0xf] }
  0x43   : > { %v6035_v19 = vld [vmem:[%s7863_s20 + $0x134] sm:$0xf0]  ;;  %v6814_v22 = vld [vmem:[%s7863_s20 + $0x18] sm:$0xf0]  ;;  %v6811_v23 = vld [vmem:[%s7863_s20 + $0x4] sm:$0xf]  ;;  %v6034_v25 = vor.u32 %v6849_v17, %v6033_v16 }
  0x44   : > { %v6897_v20 = vld [vmem:[%s12145_s1 + $0xb8] sm:$0xff]  ;;  %v5895_v24 = vld [vmem:[%s7863_s20 + $0x1c] sm:$0xf0]  ;;  %v6038_v26 = vor.u32 %v6846_v18, %v6035_v19  ;;  %v5894_v27 = vor.u32 %v6814_v22, %v5893_v21  ;;  %v6895_v30 = vld [vmem:[%s12145_s1 + $0xa8] sm:$0xff] }
  0x45   : > { %6999 = vmatpush.bf16.msra.mxu2 %v6879_v4  ;;  %1309 = vmatpush.bf16.msra.mxu0 %v6879_v4  ;;  %v6896_v28 = vld [vmem:[%s12145_s1 + $0xb0] sm:$0xff]  ;;  %v5898_v29 = vor.u32 %v6811_v23, %v5895_v24  ;;  %v6894_v31 = vld [vmem:[%s12145_s1 + $0xa0] sm:$0xff]  ;;  %v5921_v36 = vld [vmem:[%s7863_s20 + $0x38] sm:$0xf] }
  0x46   : > { %7007 = vmatpush.bf16.msra.mxu3 %v6887_v5  ;;  %1367 = vmatpush.bf16.msra.mxu1 %v6887_v5  ;;  %v6061_v32 = vld [vmem:[%s7863_s20 + $0x150] sm:$0xf]  ;;  %v6856_v33 = vld [vmem:[%s7863_s20 + $0x168] sm:$0xf0]  ;;  %v6853_v34 = vld [vmem:[%s7863_s20 + $0x154] sm:$0xf] }
  0x47   : > { %v6063_v35 = vld [vmem:[%s7863_s20 + $0x16c] sm:$0xf0]  ;;  %v6821_v37 = vld [vmem:[%s7863_s20 + $0x50] sm:$0xf0]  ;;  %v6893_v38 = vld [vmem:[%s12145_s1 + $0x98] sm:$0xff]  ;;  %v6062_v41 = vor.u32 %v6856_v33, %v6061_v32 }
  0x48   : > { %v6818_v39 = vld [vmem:[%s7863_s20 + $0x3c] sm:$0xf]  ;;  %v5923_v40 = vld [vmem:[%s7863_s20 + $0x54] sm:$0xf0]  ;;  %v6066_v42 = vor.u32 %v6853_v34, %v6063_v35  ;;  %v5922_v43 = vor.u32 %v6821_v37, %v5921_v36  ;;  %v6089_v53 = vld [vmem:[%s7863_s20 + $0x188] sm:$0xf] }
  0x49   : > { %7000 = vmatpush.bf16.msra.mxu2 %v6878_v6  ;;  %1310 = vmatpush.bf16.msra.mxu0 %v6878_v6  ;;  %v5926_v44 = vor.u32 %v6818_v39, %v5923_v40  ;;  %v6892_v45 = vld [vmem:[%s12145_s1 + $0x90] sm:$0xff]  ;;  %v6905_v46 = vld [vmem:[%s12145_s1 + $0xf8] sm:$0xff]  ;;  %v6891_v49 = vld [vmem:[%s12145_s1 + $0x88] sm:$0xff] }
  0x4a   : > { %7008 = vmatpush.bf16.msra.mxu3 %v6886_v7  ;;  %1368 = vmatpush.bf16.msra.mxu1 %v6886_v7  ;;  %v6913_v47 = vld [vmem:[%s12145_s1 + $0x138] sm:$0xff]  ;;  %v6904_v48 = vld [vmem:[%s12145_s1 + $0xf0] sm:$0xff]  ;;  %v6903_v52 = vld [vmem:[%s12145_s1 + $0xe8] sm:$0xff] }
  0x4b   : > { %v6921_v50 = vld [vmem:[%s12145_s1 + $0x178] sm:$0xff]  ;;  %v6912_v51 = vld [vmem:[%s12145_s1 + $0x130] sm:$0xff]  ;;  %v6860_v55 = vld [vmem:[%s7863_s20 + $0x18c] sm:$0xf] }
  0x4c   : > { %v6863_v54 = vld [vmem:[%s7863_s20 + $0x1a0] sm:$0xf0]  ;;  %v6091_v56 = vld [vmem:[%s7863_s20 + $0x1a4] sm:$0xf0]  ;;  %v5949_v57 = vld [vmem:[%s7863_s20 + $0x70] sm:$0xf] }
  0x4d   : > { %7001 = vmatpush.bf16.msra.mxu2 %v6877_v8  ;;  %1311 = vmatpush.bf16.msra.mxu0 %v6877_v8  ;;  %v6828_v58 = vld [vmem:[%s7863_s20 + $0x88] sm:$0xf0]  ;;  %v6825_v59 = vld [vmem:[%s7863_s20 + $0x74] sm:$0xf]  ;;  %v5951_v60 = vld [vmem:[%s7863_s20 + $0x8c] sm:$0xf0]  ;;  %v6090_v62 = vor.u32 %v6863_v54, %v6089_v53  ;;  %v6094_v63 = vor.u32 %v6860_v55, %v6091_v56 }
  0x4e   : > { %7009 = vmatpush.bf16.msra.mxu3 %v6885_v9  ;;  %1369 = vmatpush.bf16.msra.mxu1 %v6885_v9  ;;  %v6902_v61 = vld [vmem:[%s12145_s1 + $0xe0] sm:$0xff]  ;;  %v5950_v0 = vor.u32 %v6828_v58, %v5949_v57  ;;  %v5954_v1 = vor.u32 %v6825_v59, %v5951_v60  ;;  %v6920_v2 = vld [vmem:[%s12145_s1 + $0x170] sm:$0xff]  ;;  %v6901_v3 = vld [vmem:[%s12145_s1 + $0xd8] sm:$0xff] }
  0x4f   : > { %v6911_v4 = vld [vmem:[%s12145_s1 + $0x128] sm:$0xff]  ;;  %v6890_v6 = vld [vmem:[%s12145_s1 + $0x80] sm:$0xff]  ;;  %v6900_v8 = vld [vmem:[%s12145_s1 + $0xd0] sm:$0xff] }
  0x50   : > { %v6919_v5 = vld [vmem:[%s12145_s1 + $0x168] sm:$0xff]  ;;  %v6910_v7 = vld [vmem:[%s12145_s1 + $0x120] sm:$0xff]  ;;  %v6917_v16 = vld [vmem:[%s12145_s1 + $0x158] sm:$0xff] }
  0x51   : > { %7002 = vmatpush.bf16.msra.mxu2 %v6876_v10  ;;  %1312 = vmatpush.bf16.msra.mxu0 %v6876_v10  ;;  %v6918_v9 = vld [vmem:[%s12145_s1 + $0x160] sm:$0xff]  ;;  %v6909_v10 = vld [vmem:[%s12145_s1 + $0x118] sm:$0xff]  ;;  %v6908_v19 = vld [vmem:[%s12145_s1 + $0x110] sm:$0xff] }
  0x52   : > { %7010 = vmatpush.bf16.msra.mxu3 %v6884_v11  ;;  %1370 = vmatpush.bf16.msra.mxu1 %v6884_v11  ;;  %v6899_v11 = vld [vmem:[%s12145_s1 + $0xc8] sm:$0xff]  ;;  %v6835_v18 = vld [vmem:[%s7863_s20 + $0xc0] sm:$0xf0]  ;;  %v6005_v36 = vld [vmem:[%s7863_s20 + $0xe0] sm:$0xf] }
  0x53   : > { %v5977_v17 = vld [vmem:[%s7863_s20 + $0xa8] sm:$0xf]  ;;  %v6898_v22 = vld [vmem:[%s12145_s1 + $0xc0] sm:$0xff]  ;;  %v537_v32 = vld [vmem:[%s7863_s20 + $0x1f8] sm:$0xff] }
  0x54   : > { %v5979_v21 = vld [vmem:[%s7863_s20 + $0xc4] sm:$0xf0]  ;;  %v6914_v33 = vld [vmem:[%s12145_s1 + $0x140] sm:$0xff]  ;;  %v845_v34 = vunpack.c.l.b16 %v537_v32  ;;  %v846_v35 = vunpack.c.h.b16 %v537_v32  ;;  %v6842_v37 = vld [vmem:[%s7863_s20 + $0xf8] sm:$0xf0] }
  0x55   : > { %7003 = vmatpush.bf16.msra.mxu2 %v6875_v12  ;;  %1313 = vmatpush.bf16.msra.mxu0 %v6875_v12  ;;  %v6117_v12 = vld [vmem:[%s7863_s20 + $0x1c0] sm:$0xf]  ;;  %v6822_v57 = vld [vmem:[%s7863_s20 + $0x58] sm:$0xf0]  ;;  %v6819_v58 = vld [vmem:[%s7863_s20 + $0x44] sm:$0xf] }
  0x56   : > { %7011 = vmatpush.bf16.msra.mxu3 %v6883_v13  ;;  %1371 = vmatpush.bf16.msra.mxu1 %v6883_v13  ;;  %v6870_v13 = vld [vmem:[%s7863_s20 + $0x1d8] sm:$0xf0]  ;;  %v6007_v39 = vld [vmem:[%s7863_s20 + $0xfc] sm:$0xf0]  ;;  %v915_v40 = vpack.c.b16 %v845_v34, %v845_v34  ;;  %v5937_v60 = vld [vmem:[%s7863_s20 + $0x48] sm:$0xf] }
  0x57   : > { %v6118_v23 = vor.u32 %v6870_v13, %v6117_v12  ;;  %v5929_v56 = vld [vmem:[%s7863_s20 + $0x40] sm:$0xf] }
  0x58   : > { %v5931_v59 = vld [vmem:[%s7863_s20 + $0x5c] sm:$0xf0] }
  0x59   : > { %7004 = vmatpush.bf16.msra.mxu2 %v6874_v14  ;;  %1314 = vmatpush.bf16.msra.mxu0 %v6874_v14  ;;  %v6867_v14 = vld [vmem:[%s7863_s20 + $0x1c4] sm:$0xf] }
  0x5a   : > { %7012 = vmatpush.bf16.msra.mxu3 %v6882_v15  ;;  %1372 = vmatpush.bf16.msra.mxu1 %v6882_v15  ;;  %v6119_v15 = vld [vmem:[%s7863_s20 + $0x1dc] sm:$0xf0] }
  0x5b   : > { %v6122_v24 = vor.u32 %v6867_v14, %v6119_v15 }
  0x5c   : > { %1340 = vmatmul.bf16.vlgmr.msra.gmra.mxu2 %v6034_v25  ;;  %1315 = vmatmul.bf16.vlgmr.msra.gmra.mxu0 %v5894_v27  ;;  %v5978_v25 = vor.u32 %v6835_v18, %v5977_v17  ;;  %v6916_v27 = vld [vmem:[%s12145_s1 + $0x150] sm:$0xff]  ;;  %v6836_v17 = vld [vmem:[%s7863_s20 + $0xc8] sm:$0xf0] }
  0x5d   : > { %1423 = vmatpush.bf16.msrb.mxu2 %v6897_v20  ;;  %1398 = vmatmul.bf16.vlgmr.msra.gmra.mxu3 %v6038_v26  ;;  %v6832_v20 = vld [vmem:[%s7863_s20 + $0xac] sm:$0xf]  ;;  %v6833_v18 = vld [vmem:[%s7863_s20 + $0xb4] sm:$0xf] }
  0x5e   : > { %1373 = vmatmul.bf16.vlgmr.msra.gmra.mxu1 %v5898_v29  ;;  %1481 = vmatpush.bf16.msrb.mxu3 %v6905_v46  ;;  %v5982_v26 = vor.u32 %v6832_v20, %v5979_v21  ;;  %v6907_v29 = vld [vmem:[%s12145_s1 + $0x108] sm:$0xff] }
  0x5f   : > { %1539 = vmatpush.bf16.msrb.mxu0 %v6913_v47  ;;  %1597 = vmatpush.bf16.msrb.mxu1 %v6921_v50  ;;  %v6812_v46 = vld [vmem:[%s7863_s20 + $0xc] sm:$0xf]  ;;  %v5903_v47 = vld [vmem:[%s7863_s20 + $0x24] sm:$0xf0]  ;;  %v6813_v50 = vld [vmem:[%s7863_s20 + $0x14] sm:$0xf] }
  0x60   : > { %v5906_v53 = vor.u32 %v6812_v46, %v5903_v47  ;;  %v5993_v20 = vld [vmem:[%s7863_s20 + $0xb8] sm:$0xf]  ;;  %v6837_v21 = vld [vmem:[%s7863_s20 + $0xd0] sm:$0xf0]  ;;  %v6844_v46 = vld [vmem:[%s7863_s20 + $0x108] sm:$0xf0] }
  0x61   : > { %1424 = vmatpush.bf16.msrb.mxu2 %v6896_v28  ;;  %v6922_v28 = vld [vmem:[%s12145_s1 + $0x180] sm:$0xff] }
  0x62   : > { %1482 = vmatpush.bf16.msrb.mxu3 %v6904_v48  ;;  %v5909_v48 = vld [vmem:[%s7863_s20 + $0x10] sm:$0xf] }
  0x63   : > { %1540 = vmatpush.bf16.msrb.mxu0 %v6912_v51  ;;  %1598 = vmatpush.bf16.msrb.mxu1 %v6920_v2  ;;  %v5911_v51 = vld [vmem:[%s7863_s20 + $0x2c] sm:$0xf0] }
  0x64   : > { %v5914_v55 = vor.u32 %v6813_v50, %v5911_v51  ;;  %v6023_v50 = vld [vmem:[%s7863_s20 + $0x10c] sm:$0xf0] }
  0x65   : > { %1425 = vmatpush.bf16.msrb.mxu2 %v6895_v30  ;;  %v6915_v30 = vld [vmem:[%s12145_s1 + $0x148] sm:$0xff] }
  0x66   : > { %1483 = vmatpush.bf16.msrb.mxu3 %v6903_v52 }
  0x67   : > { %1541 = vmatpush.bf16.msrb.mxu0 %v6911_v4  ;;  %1599 = vmatpush.bf16.msrb.mxu1 %v6919_v5  ;;  %v5957_v4 = vld [vmem:[%s7863_s20 + $0x78] sm:$0xf]  ;;  %v6829_v5 = vld [vmem:[%s7863_s20 + $0x90] sm:$0xf0] }
  0x68   : > { %v5958_v12 = vor.u32 %v6829_v5, %v5957_v4  ;;  %v6041_v4 = vld [vmem:[%s7863_s20 + $0x120] sm:$0xf]  ;;  %v6850_v5 = vld [vmem:[%s7863_s20 + $0x138] sm:$0xf0] }
  0x69   : > { %1426 = vmatpush.bf16.msrb.mxu2 %v6894_v31  ;;  %v6906_v31 = vld [vmem:[%s12145_s1 + $0x100] sm:$0xff] }
  0x6a   : > { %1484 = vmatpush.bf16.msrb.mxu3 %v6902_v61  ;;  %v6823_v61 = vld [vmem:[%s7863_s20 + $0x60] sm:$0xf0] }
  0x6b   : > { %1542 = vmatpush.bf16.msrb.mxu0 %v6910_v7  ;;  %1600 = vmatpush.bf16.msrb.mxu1 %v6918_v9  ;;  %v5938_v2 = vor.u32 %v6823_v61, %v5937_v60  ;;  %v5959_v7 = vld [vmem:[%s7863_s20 + $0x94] sm:$0xf0]  ;;  %v6830_v9 = vld [vmem:[%s7863_s20 + $0x98] sm:$0xf0] }
  0x6c   : > { %1345 = vmatmul.bf16.gmra.mxu2 %v6062_v41  ;;  %1320 = vmatmul.bf16.gmra.mxu0 %v5922_v43  ;;  %v916_v41 = vpack.c.b16 %v846_v35, %v846_v35 }
  0x6d   : > { %1427 = vmatpush.bf16.msrb.mxu2 %v6893_v38  ;;  %1403 = vmatmul.bf16.gmra.mxu3 %v6066_v42  ;;  %v6839_v38 = vld [vmem:[%s7863_s20 + $0xe4] sm:$0xf]  ;;  %v6006_v42 = vor.u32 %v6842_v37, %v6005_v36 }
  0x6e   : > { %1378 = vmatmul.bf16.gmra.mxu1 %v5926_v44  ;;  %1485 = vmatpush.bf16.msrb.mxu3 %v6901_v3  ;;  %v6010_v43 = vor.u32 %v6839_v38, %v6007_v39  ;;  %v5901_v44 = vld [vmem:[%s7863_s20 + $0x8] sm:$0xf] }
  0x6f   : > { %1543 = vmatpush.bf16.msrb.mxu0 %v6909_v10  ;;  %1601 = vmatpush.bf16.msrb.mxu1 %v6917_v16  ;;  %v6827_v10 = vld [vmem:[%s7863_s20 + $0x84] sm:$0xf]  ;;  %v5985_v16 = vld [vmem:[%s7863_s20 + $0xb0] sm:$0xf] }
  0x71   : > { %1428 = vmatpush.bf16.msrb.mxu2 %v6892_v45  ;;  %v6815_v45 = vld [vmem:[%s7863_s20 + $0x20] sm:$0xf0] }
  0x72   : > { %1486 = vmatpush.bf16.msrb.mxu3 %v6900_v8  ;;  %v5902_v52 = vor.u32 %v6815_v45, %v5901_v44  ;;  %v5965_v8 = vld [vmem:[%s7863_s20 + $0x80] sm:$0xf]  ;;  %v6015_v44 = vld [vmem:[%s7863_s20 + $0x104] sm:$0xf0]  ;;  %v6021_v45 = vld [vmem:[%s7863_s20 + $0xf0] sm:$0xf] }
  0x73   : > { %1544 = vmatpush.bf16.msrb.mxu0 %v6908_v19  ;;  %1602 = vmatpush.bf16.msrb.mxu1 %v6916_v27  ;;  %v5966_v14 = vor.u32 %v6830_v9, %v5965_v8  ;;  %v5987_v19 = vld [vmem:[%s7863_s20 + $0xcc] sm:$0xf0]  ;;  %v5994_v27 = vor.u32 %v6837_v21, %v5993_v20  ;;  %v6043_v8 = vld [vmem:[%s7863_s20 + $0x13c] sm:$0xf0]  ;;  %v6049_v9 = vld [vmem:[%s7863_s20 + $0x128] sm:$0xf] }
  0x75   : > { %1429 = vmatpush.bf16.msrb.mxu2 %v6891_v49  ;;  %v6816_v49 = vld [vmem:[%s7863_s20 + $0x28] sm:$0xf0] }
  0x76   : > { %1487 = vmatpush.bf16.msrb.mxu3 %v6899_v11  ;;  %v5910_v54 = vor.u32 %v6816_v49, %v5909_v48  ;;  %v5967_v11 = vld [vmem:[%s7863_s20 + $0x9c] sm:$0xf0]  ;;  %v6841_v49 = vld [vmem:[%s7863_s20 + $0xf4] sm:$0xf] }
  0x77   : > { %1545 = vmatpush.bf16.msrb.mxu0 %v6907_v29  ;;  %1603 = vmatpush.bf16.msrb.mxu1 %v6915_v30  ;;  %v5970_v15 = vor.u32 %v6827_v10, %v5967_v11  ;;  %v6851_v10 = vld [vmem:[%s7863_s20 + $0x140] sm:$0xf0] }
  0x79   : > { %1430 = vmatpush.bf16.msrb.mxu2 %v6890_v6  ;;  %v6826_v6 = vld [vmem:[%s7863_s20 + $0x7c] sm:$0xf] }
  0x7a   : > { %1488 = vmatpush.bf16.msrb.mxu3 %v6898_v22  ;;  %v5962_v13 = vor.u32 %v6826_v6, %v5959_v7  ;;  %v6834_v22 = vld [vmem:[%s7863_s20 + $0xbc] sm:$0xf]  ;;  %v6847_v7 = vld [vmem:[%s7863_s20 + $0x124] sm:$0xf] }
  0x7b   : > { %1546 = vmatpush.bf16.msrb.mxu0 %v6906_v31  ;;  %1604 = vmatpush.bf16.msrb.mxu1 %v6914_v33 }
  0x7c   : > { %1350 = vmatmul.bf16.gmra.mxu2 %v6090_v62  ;;  %1325 = vmatmul.bf16.gmra.mxu0 %v5950_v0  ;;  %v6820_v62 = vld [vmem:[%s7863_s20 + $0x4c] sm:$0xf]  ;;  %v5930_v0 = vor.u32 %v6822_v57, %v5929_v56  ;;  %v6026_v57 = vor.u32 %v6841_v49, %v6023_v50 }
  0x7d   : > { %1408 = vmatmul.bf16.gmra.mxu3 %v6094_v63  ;;  %1662 = vmatpush.bf16.msra.mxu2 %v6922_v28  ;;  %v5939_v63 = vld [vmem:[%s7863_s20 + $0x64] sm:$0xf0] }
  0x7e   : > { %1383 = vmatmul.bf16.gmra.mxu1 %v5954_v1  ;;  %v5934_v1 = vor.u32 %v6819_v58, %v5931_v59  ;;  %v5942_v3 = vor.u32 %v6820_v62, %v5939_v63 }
  0x8c   : > { %1355 = vmatmul.bf16.gmra.mxu2 %v6118_v23  ;;  %1330 = vmatmul.bf16.gmra.mxu0 %v5978_v25  ;;  %v5995_v23 = vld [vmem:[%s7863_s20 + $0xd4] sm:$0xf0]  ;;  %v5990_v25 = vor.u32 %v6833_v18, %v5987_v19  ;;  %v6050_v18 = vor.u32 %v6851_v10, %v6049_v9 }
  0x8d   : > { %1413 = vmatmul.bf16.gmra.mxu3 %v6122_v24  ;;  %v5986_v24 = vor.u32 %v6836_v17, %v5985_v16  ;;  %v5998_v29 = vor.u32 %v6834_v22, %v5995_v23  ;;  %v6042_v16 = vor.u32 %v6850_v5, %v6041_v4  ;;  %v6046_v17 = vor.u32 %v6847_v7, %v6043_v8  ;;  %v6861_v4 = vld [vmem:[%s7863_s20 + $0x194] sm:$0xf]  ;;  %v6099_v5 = vld [vmem:[%s7863_s20 + $0x1ac] sm:$0xf0]  ;;  %v6105_v7 = vld [vmem:[%s7863_s20 + $0x198] sm:$0xf] }
  0x8e   : > { %1388 = vmatmul.bf16.gmra.mxu1 %v5982_v26  ;;  %v8088_v26 = vld [vmem:[%s12146_s2] ss:$0 sm:$0xff]  ;;  %v6865_v8 = vld [vmem:[%s7863_s20 + $0x1b0] sm:$0xf0] }
  0x9c   : > { %1360 = vmatmul.bf16.gmra.mxu2 %v915_v40  ;;  %1335 = vmatmul.bf16.gmra.mxu0 %v6006_v42  ;;  %v6013_v40 = vld [vmem:[%s7863_s20 + $0xe8] sm:$0xf] }
  0x9d   : > { %1418 = vmatmul.bf16.gmra.mxu3 %v916_v41  ;;  %v6843_v41 = vld [vmem:[%s7863_s20 + $0x100] sm:$0xf0] }
  0x9e   : > { %1393 = vmatmul.bf16.gmra.mxu1 %v6010_v43  ;;  %v6840_v43 = vld [vmem:[%s7863_s20 + $0xec] sm:$0xf] }
  0xac   : > { %1431 = vmatmul.bf16.vlgmr.msrb.gmra.mxu2 %v5902_v52  ;;  %1547 = vmatmul.bf16.vlgmr.msrb.gmra.mxu0 %v5910_v54  ;;  %v6014_v52 = vor.u32 %v6843_v41, %v6013_v40  ;;  %v6022_v54 = vor.u32 %v6844_v46, %v6021_v45  ;;  %v6077_v40 = vld [vmem:[%s7863_s20 + $0x160] sm:$0xf]  ;;  %v6858_v41 = vld [vmem:[%s7863_s20 + $0x178] sm:$0xf0]  ;;  %v6855_v45 = vld [vmem:[%s7863_s20 + $0x164] sm:$0xf] }
  0xad   : > { %1489 = vmatmul.bf16.vlgmr.msrb.gmra.mxu3 %v5906_v53  ;;  %v6018_v53 = vor.u32 %v6840_v43, %v6015_v44  ;;  %v6079_v46 = vld [vmem:[%s7863_s20 + $0x17c] sm:$0xf0]  ;;  %v6078_v50 = vor.u32 %v6858_v41, %v6077_v40  ;;  %v6872_v40 = vld [vmem:[%s7863_s20 + $0x1e8] sm:$0xf0] }
  0xae   : > { %1605 = vmatmul.bf16.vlgmr.msrb.gmra.mxu1 %v5914_v55 }
  0xbc   : > { %1436 = vmatmul.bf16.gmra.mxu2 %v5930_v0  ;;  %1552 = vmatmul.bf16.gmra.mxu0 %v5938_v2 }
  0xbd   : > { %1494 = vmatmul.bf16.gmra.mxu3 %v5934_v1 }
  0xbe   : > { %1610 = vmatmul.bf16.gmra.mxu1 %v5942_v3 }
  0xcc   : > { %1441 = vmatmul.bf16.gmra.mxu2 %v5958_v12  ;;  %1557 = vmatmul.bf16.gmra.mxu0 %v5966_v14  ;;  %v6051_v14 = vld [vmem:[%s7863_s20 + $0x144] sm:$0xf0] }
  0xcd   : > { %1499 = vmatmul.bf16.gmra.mxu3 %v5962_v13  ;;  %v6848_v13 = vld [vmem:[%s7863_s20 + $0x12c] sm:$0xf] }
  0xce   : > { %1615 = vmatmul.bf16.gmra.mxu1 %v5970_v15  ;;  %v6054_v21 = vor.u32 %v6848_v13, %v6051_v14  ;;  %v6102_v14 = vor.u32 %v6861_v4, %v6099_v5 }
  0xd9   : > { %v1316_v28 = vpop.f32.mrf.mxu0 }
  0xda   : > { %v1317_v30 = vadd.f32 %v8088_v26, %v1316_v28 }
  0xdb   : > { %v1374_v31 = vpop.f32.mrf.mxu1 }
  0xdc   : > { %1446 = vmatmul.bf16.gmra.mxu2 %v5986_v24  ;;  %v8091_v32 = vadd.f32 %v1374_v31, %v1317_v30  ;;  %1562 = vmatmul.bf16.gmra.mxu0 %v5994_v27 }
  0xdd   : > { %1504 = vmatmul.bf16.gmra.mxu3 %v5990_v25 }
  0xde   : > { %1620 = vmatmul.bf16.gmra.mxu1 %v5998_v29 }
  0xdf   : > { %v1341_v33 = vpop.f32.mrf.mxu2 }
  0xe0   : > { %v1399_v34 = vpop.f32.mrf.mxu3  ;;  %v1342_v35 = vadd.f32 %v8088_v26, %v1341_v33 }
  0xe1   : > { %v1318_v37 = vpop.f32.mrf.mxu0 }
  0xe2   : > { %v8094_v36 = vadd.f32 %v1399_v34, %v1342_v35  ;;  %v1319_v38 = vadd.f32 %v8088_v26, %v1318_v37  ;;  %v6069_v34 = vld [vmem:[%s7863_s20 + $0x158] sm:$0xf]  ;;  %v6857_v35 = vld [vmem:[%s7863_s20 + $0x170] sm:$0xf0] }
  0xe3   : > { %v1376_v39 = vpop.f32.mrf.mxu1 }
  0xe4   : > { %v8099_v42 = vadd.f32 %v1376_v39, %v1319_v38  ;;  %v6854_v38 = vld [vmem:[%s7863_s20 + $0x15c] sm:$0xf]  ;;  %v6071_v39 = vld [vmem:[%s7863_s20 + $0x174] sm:$0xf0] }
  0xe5   : > { %v6074_v49 = vor.u32 %v6854_v38, %v6071_v39  ;;  %v6127_v38 = vld [vmem:[%s7863_s20 + $0x1e4] sm:$0xf0]  ;;  %v6133_v39 = vld [vmem:[%s7863_s20 + $0x1d0] sm:$0xf] }
  0xe7   : > { %v1343_v47 = vpop.f32.mrf.mxu2 }
  0xe8   : > { %v1401_v48 = vpop.f32.mrf.mxu3  ;;  %v1344_v51 = vadd.f32 %v8088_v26, %v1343_v47 }
  0xe9   : > { %v1321_v56 = vpop.f32.mrf.mxu0 }
  0xea   : > { %v8108_v55 = vadd.f32 %v1401_v48, %v1344_v51  ;;  %v1322_v58 = vadd.f32 %v8088_v26, %v1321_v56  ;;  %v6070_v48 = vor.u32 %v6857_v35, %v6069_v34  ;;  %v6871_v34 = vld [vmem:[%s7863_s20 + $0x1e0] sm:$0xf0]  ;;  %v6868_v35 = vld [vmem:[%s7863_s20 + $0x1cc] sm:$0xf] }
  0xeb   : > { %v1379_v59 = vpop.f32.mrf.mxu1 }
  0xec   : > { %1451 = vmatmul.bf16.gmra.mxu2 %v6014_v52  ;;  %v8111_v60 = vadd.f32 %v1379_v59, %v1322_v58  ;;  %1567 = vmatmul.bf16.gmra.mxu0 %v6022_v54 }
  0xed   : > { %1509 = vmatmul.bf16.gmra.mxu3 %v6018_v53  ;;  %v6082_v53 = vor.u32 %v6855_v45, %v6079_v46  ;;  %v6135_v45 = vld [vmem:[%s7863_s20 + $0x1ec] sm:$0xf0] }
  0xee   : > { %1625 = vmatmul.bf16.gmra.mxu1 %v6026_v57 }
  0xef   : > { %v1346_v61 = vpop.f32.mrf.mxu2 }
  0xf0   : > { %v1404_v62 = vpop.f32.mrf.mxu3  ;;  %v1347_v63 = vadd.f32 %v8088_v26, %v1346_v61 }
  0xf1   : > { %v1323_v1 = vpop.f32.mrf.mxu0 }
  0xf2   : > { %v8114_v0 = vadd.f32 %v1404_v62, %v1347_v63  ;;  %v1324_v2 = vadd.f32 %v8088_v26, %v1323_v1 }
  0xf3   : > { %v1381_v3 = vpop.f32.mrf.mxu1 }
  0xf4   : > { %v8119_v6 = vadd.f32 %v1381_v3, %v1324_v2  ;;  %v6097_v2 = vld [vmem:[%s7863_s20 + $0x190] sm:$0xf]  ;;  %v6864_v3 = vld [vmem:[%s7863_s20 + $0x1a8] sm:$0xf0] }
  0xf5   : > { %v6098_v13 = vor.u32 %v6864_v3, %v6097_v2  ;;  %v539_v2 = vld [vmem:[%s7863_s20 + $0x208] sm:$0xff]  ;;  %v6929_v3 = vld [vmem:[%s12147_s3 + $0x30] sm:$0xff] }
  0xf7   : > { %v1348_v11 = vpop.f32.mrf.mxu2 }
  0xf8   : > { %v1406_v12 = vpop.f32.mrf.mxu3  ;;  %v1349_v15 = vadd.f32 %v8088_v26, %v1348_v11  ;;  %v6862_v11 = vld [vmem:[%s7863_s20 + $0x19c] sm:$0xf] }
  0xf9   : > { %v1326_v20 = vpop.f32.mrf.mxu0 }
  0xfa   : > { %v8128_v19 = vadd.f32 %v1406_v12, %v1349_v15  ;;  %v1327_v22 = vadd.f32 %v8088_v26, %v1326_v20  ;;  %v6107_v12 = vld [vmem:[%s7863_s20 + $0x1b4] sm:$0xf0]  ;;  %v6106_v15 = vor.u32 %v6865_v8, %v6105_v7 }
  0xfb   : > { %v1384_v23 = vpop.f32.mrf.mxu1 }
  0xfc   : > { %1456 = vmatmul.bf16.gmra.mxu2 %v6042_v16  ;;  %v8131_v24 = vadd.f32 %v1384_v23, %v1327_v22  ;;  %1572 = vmatmul.bf16.gmra.mxu0 %v6050_v18  ;;  %v6930_v22 = vld [vmem:[%s12147_s3 + $0x38] sm:$0xff] }
  0xfd   : > { %1514 = vmatmul.bf16.gmra.mxu3 %v6046_v17  ;;  %v6110_v17 = vor.u32 %v6862_v11, %v6107_v12  ;;  %v849_v11 = vunpack.c.l.b16 %v539_v2 }
  0xfe   : > { %1630 = vmatmul.bf16.gmra.mxu1 %v6054_v21  ;;  %1810 = vmatpush.bf16.msra.mxu3 %v6930_v22 }
  0xff   : > { %v1351_v25 = vpop.f32.mrf.mxu2 }
 0x100   : > { %v1409_v27 = vpop.f32.mrf.mxu3  ;;  %v1352_v28 = vadd.f32 %v8088_v26, %v1351_v25 }
 0x101   : > { %v1328_v30 = vpop.f32.mrf.mxu0 }
 0x102   : > { %v8134_v29 = vadd.f32 %v1409_v27, %v1352_v28  ;;  %v1329_v31 = vadd.f32 %v8088_v26, %v1328_v30  ;;  %1811 = vmatpush.bf16.msra.mxu3 %v6929_v3 }
 0x103   : > { %v1386_v33 = vpop.f32.mrf.mxu1 }
 0x104   : > { %v8139_v37 = vadd.f32 %v1386_v33, %v1329_v31  ;;  %v6125_v33 = vld [vmem:[%s7863_s20 + $0x1c8] sm:$0xf] }
 0x105   : > { %v6126_v46 = vor.u32 %v6871_v34, %v6125_v33 }
 0x107   : > { %v1353_v43 = vpop.f32.mrf.mxu2 }
 0x108   : > { %v1411_v44 = vpop.f32.mrf.mxu3  ;;  %v1354_v47 = vadd.f32 %v8088_v26, %v1353_v43 }
 0x109   : > { %v1331_v52 = vpop.f32.mrf.mxu0 }
 0x10a   : > { %v8148_v51 = vadd.f32 %v1411_v44, %v1354_v47  ;;  %v1332_v54 = vadd.f32 %v8088_v26, %v1331_v52  ;;  %v6869_v44 = vld [vmem:[%s7863_s20 + $0x1d4] sm:$0xf]  ;;  %v6130_v47 = vor.u32 %v6868_v35, %v6127_v38 }
 0x10b   : > { %v1389_v56 = vpop.f32.mrf.mxu1 }
 0x10c   : > { %1461 = vmatmul.bf16.gmra.mxu2 %v6070_v48  ;;  %v8151_v57 = vadd.f32 %v1389_v56, %v1332_v54  ;;  %1577 = vmatmul.bf16.gmra.mxu0 %v6078_v50  ;;  %v6134_v48 = vor.u32 %v6872_v40, %v6133_v39  ;;  %v6138_v50 = vor.u32 %v6869_v44, %v6135_v45  ;;  %v5917_v39 = vld [vmem:[%s7863_s20 + $0x18] sm:$0xf]  ;;  %v6817_v40 = vld [vmem:[%s7863_s20 + $0x30] sm:$0xf0] }
 0x10d   : > { %1519 = vmatmul.bf16.gmra.mxu3 %v6074_v49 }
 0x10e   : > { %1635 = vmatmul.bf16.gmra.mxu1 %v6082_v53 }
 0x10f   : > { %v1356_v58 = vpop.f32.mrf.mxu2 }
 0x110   : > { %v1414_v59 = vpop.f32.mrf.mxu3  ;;  %v1357_v61 = vadd.f32 %v8088_v26, %v1356_v58  ;;  %v538_v58 = vld [vmem:[%s7863_s20 + $0x200] sm:$0xff] }
 0x111   : > { %v8156_v63 = vpop.f32.mrf.mxu0  ;;  %v847_v7 = vunpack.c.l.b16 %v538_v58  ;;  %v848_v8 = vunpack.c.h.b16 %v538_v58 }
 0x112   : > { %v8154_v62 = vadd.f32 %v1414_v59, %v1357_v61 }
 0x113   : > { %v8158_v1 = vpop.f32.mrf.mxu1 }
 0x117   : > { %v8166_v9 = vpop.f32.mrf.mxu2 }
 0x118   : > { %v8168_v10 = vpop.f32.mrf.mxu3 }
 0x119   : > { %12181 = vst [vmem:[#allocation15_spill] sm:$0xff] %v8168_v10  ;;  %v1336_v16 = vpop.f32.mrf.mxu0 }
 0x11a   : > { %v1337_v18 = vadd.f32 %v8088_v26, %v1336_v16  ;;  %v917_v16 = vpack.c.b16 %v847_v7, %v847_v7 }
 0x11b   : > { %v1394_v20 = vpop.f32.mrf.mxu1 }
 0x11c   : > { %1466 = vmatmul.bf16.gmra.mxu2 %v6098_v13  ;;  %v8173_v21 = vadd.f32 %v1394_v20, %v1337_v18  ;;  %1582 = vmatmul.bf16.gmra.mxu0 %v6106_v15  ;;  %v850_v13 = vunpack.c.h.b16 %v539_v2  ;;  %v919_v18 = vpack.c.b16 %v849_v11, %v849_v11  ;;  %v6927_v11 = vld [vmem:[%s12147_s3 + $0x20] sm:$0xff] }
 0x11d   : > { %1524 = vmatmul.bf16.gmra.mxu3 %v6102_v14 }
 0x11e   : > { %1640 = vmatmul.bf16.gmra.mxu1 %v6110_v17  ;;  %v918_v17 = vpack.c.b16 %v848_v8, %v848_v8  ;;  %v920_v22 = vpack.c.b16 %v850_v13, %v850_v13 }
 0x11f   : > { %v1361_v23 = vpop.f32.mrf.mxu2 }
 0x120   : > { %v1419_v25 = vpop.f32.mrf.mxu3  ;;  %v1362_v27 = vadd.f32 %v8088_v26, %v1361_v23 }
 0x121   : > { %v8181_v30 = vpop.f32.mrf.mxu0 }
 0x122   : > { %v8179_v28 = vadd.f32 %v1419_v25, %v1362_v27 }
 0x123   : > { %v8183_v31 = vpop.f32.mrf.mxu1 }
 0x127   : > { %v1363_v41 = vpop.f32.mrf.mxu2 }
 0x128   : > { %v1421_v43 = vpop.f32.mrf.mxu3 }
 0x129   : > { %v1548_v49 = vpop.f32.mrf.mxu0  ;;  %v6928_v43 = vld [vmem:[%s12147_s3 + $0x28] sm:$0xff] }
 0x12a   : > { %1812 = vmatpush.bf16.msra.mxu3 %v6928_v43 }
 0x12b   : > { %v1606_v52 = vpop.f32.mrf.mxu1 }
 0x12c   : > { %1471 = vmatmul.bf16.gmra.mxu2 %v6126_v46  ;;  %1587 = vmatmul.bf16.gmra.mxu0 %v6134_v48  ;;  %v5918_v46 = vor.u32 %v6817_v40, %v5917_v39 }
 0x12d   : > { %1529 = vmatmul.bf16.gmra.mxu3 %v6130_v47 }
 0x12e   : > { %1645 = vmatmul.bf16.gmra.mxu1 %v6138_v50  ;;  %1813 = vmatpush.bf16.msra.mxu3 %v6927_v11 }
 0x12f   : > { %v1432_v53 = vpop.f32.mrf.mxu2 }
 0x130   : > { %v1490_v54 = vpop.f32.mrf.mxu3  ;;  %v1433_v56 = vadd.f32 %v1432_v53, %v8091_v32 }
 0x131   : > { %v8195_v61 = vpop.f32.mrf.mxu0 }
 0x132   : > { %v1491_v59 = vadd.f32 %v1490_v54, %v1433_v56 }
 0x133   : > { %v8201_v4 = vpop.f32.mrf.mxu1 }
 0x134   : > { %v1549_v5 = vadd.f32 %v1548_v49, %v1491_v59  ;;  %v5945_v59 = vld [vmem:[%s7863_s20 + $0x50] sm:$0xf] }
 0x136   : > { %v8203_v12 = vadd.f32 %v1606_v52, %v1549_v5 }
 0x137   : > { %v1434_v32 = vpop.f32.mrf.mxu2 }
 0x138   : > { %v8205_v14 = vpop.f32.mrf.mxu3  ;;  %v8208_v15 = vadd.f32 %v1434_v32, %v8099_v42 }
 0x139   : > { %v1553_v20 = vpop.f32.mrf.mxu0 }
 0x13b   : > { %v1611_v23 = vpop.f32.mrf.mxu1 }
 0x13c   : > { %1476 = vmatmul.bf16.gmra.mxu2 %v917_v16  ;;  %1592 = vmatmul.bf16.gmra.mxu0 %v919_v18 }
 0x13d   : > { %1534 = vmatmul.bf16.gmra.mxu3 %v918_v17 }
 0x13e   : > { %1650 = vmatmul.bf16.gmra.mxu1 %v920_v22 }
 0x13f   : > { %v1437_v25 = vpop.f32.mrf.mxu2 }
 0x140   : > { %v1495_v27 = vpop.f32.mrf.mxu3  ;;  %v1438_v33 = vadd.f32 %v1437_v25, %v8111_v60  ;;  %v6831_v25 = vld [vmem:[%s7863_s20 + $0xa0] sm:$0xf0] }
 0x141   : > { %v8211_v35 = vpop.f32.mrf.mxu0 }
 0x142   : > { %v1496_v34 = vadd.f32 %v1495_v27, %v1438_v33 }
 0x143   : > { %v8213_v42 = vpop.f32.mrf.mxu1 }
 0x144   : > { %v1554_v38 = vadd.f32 %v1553_v20, %v1496_v34 }
 0x146   : > { %v8217_v41 = vadd.f32 %v1611_v23, %v1554_v38  ;;  %v5973_v23 = vld [vmem:[%s7863_s20 + $0x88] sm:$0xf] }
 0x147   : > { %v1439_v44 = vpop.f32.mrf.mxu2  ;;  %v5974_v38 = vor.u32 %v6831_v25, %v5973_v23  ;;  %v6029_v23 = vld [vmem:[%s7863_s20 + $0xf8] sm:$0xf]  ;;  %v6845_v25 = vld [vmem:[%s7863_s20 + $0x110] sm:$0xf0] }
 0x148   : > { %v8222_v45 = vpop.f32.mrf.mxu3  ;;  %v8225_v60 = vadd.f32 %v1439_v44, %v8119_v6  ;;  %v6824_v6 = vld [vmem:[%s7863_s20 + $0x68] sm:$0xf0] }
 0x149   : > { %v1558_v47 = vpop.f32.mrf.mxu0  ;;  %v5946_v8 = vor.u32 %v6824_v6, %v5945_v59 }
 0x14b   : > { %v1616_v48 = vpop.f32.mrf.mxu1 }
 0x14c   : > { %6339 = vmatmul.msk.bf16.vlgmr.msra.gmra.mxu2 %vm1276_vm0, %v5918_v46 }
 0x14f   : > { %v1442_v49 = vpop.f32.mrf.mxu2 }
 0x150   : > { %v1500_v50 = vpop.f32.mrf.mxu3  ;;  %v1443_v52 = vadd.f32 %v1442_v49, %v8131_v24 }
 0x151   : > { %v8229_v54 = vpop.f32.mrf.mxu0 }
 0x152   : > { %v1501_v53 = vadd.f32 %v1500_v50, %v1443_v52  ;;  %v6001_v52 = vld [vmem:[%s7863_s20 + $0xc0] sm:$0xf] }
 0x153   : > { %v8231_v56 = vpop.f32.mrf.mxu1 }
 0x154   : > { %v1559_v58 = vadd.f32 %v1558_v47, %v1501_v53  ;;  %v6838_v53 = vld [vmem:[%s7863_s20 + $0xd8] sm:$0xf0] }
 0x156   : > { %v8235_v2 = vadd.f32 %v1616_v48, %v1559_v58 }
 0x157   : > { %v1444_v3 = vpop.f32.mrf.mxu2 }
 0x158   : > { %v8237_v5 = vpop.f32.mrf.mxu3  ;;  %v8240_v7 = vadd.f32 %v1444_v3, %v8139_v37  ;;  %v6002_v3 = vor.u32 %v6838_v53, %v6001_v52 }
 0x159   : > { %v1563_v24 = vpop.f32.mrf.mxu0 }
 0x15b   : > { %v1621_v13 = vpop.f32.mrf.mxu1 }
 0x15c   : > { %6340 = vmatmul.msk.bf16.gmra.mxu2 %vm1276_vm0, %v5946_v8 }
 0x15f   : > { %v1447_v32 = vpop.f32.mrf.mxu2 }
 0x160   : > { %v1505_v16 = vpop.f32.mrf.mxu3  ;;  %v1448_v17 = vadd.f32 %v1447_v32, %v8151_v57  ;;  %v6926_v57 = vld [vmem:[%s12147_s3 + $0x18] sm:$0xff] }
 0x161   : > { %v8247_v20 = vpop.f32.mrf.mxu0  ;;  %1814 = vmatpush.bf16.msra.mxu3 %v6926_v57  ;;  %v6030_v57 = vor.u32 %v6845_v25, %v6029_v23 }
 0x162   : > { %v1506_v18 = vadd.f32 %v1505_v16, %v1448_v17  ;;  %v6925_v17 = vld [vmem:[%s12147_s3 + $0x10] sm:$0xff] }
 0x163   : > { %v8249_v22 = vpop.f32.mrf.mxu1 }
 0x164   : > { %v1564_v37 = vadd.f32 %v1563_v24, %v1506_v18 }
 0x165   : > { %1815 = vmatpush.bf16.msra.mxu3 %v6925_v17 }
 0x166   : > { %v8253_v27 = vadd.f32 %v1621_v13, %v1564_v37 }
 0x167   : > { %v8255_v33 = vpop.f32.mrf.mxu2 }
 0x168   : > { %v8257_v34 = vpop.f32.mrf.mxu3 }
 0x169   : > { %v1568_v39 = vpop.f32.mrf.mxu0 }
 0x16b   : > { %v1626_v40 = vpop.f32.mrf.mxu1 }
 0x16c   : > { %6341 = vmatmul.msk.bf16.gmra.mxu2 %vm1276_vm0, %v5974_v38 }
 0x16f   : > { %v1452_v43 = vpop.f32.mrf.mxu2 }
 0x170   : > { %v1510_v44 = vpop.f32.mrf.mxu3  ;;  %v1453_v46 = vadd.f32 %v1452_v43, %v8173_v21 }
 0x171   : > { %v8264_v48 = vpop.f32.mrf.mxu0 }
 0x172   : > { %v1511_v47 = vadd.f32 %v1510_v44, %v1453_v46 }
 0x173   : > { %v8266_v49 = vpop.f32.mrf.mxu1 }
 0x174   : > { %v1569_v50 = vadd.f32 %v1568_v39, %v1511_v47 }
 0x176   : > { %v8270_v58 = vadd.f32 %v1626_v40, %v1569_v50 }
 0x177   : > { %v8272_v59 = vpop.f32.mrf.mxu2 }
 0x178   : > { %v8274_v6 = vpop.f32.mrf.mxu3 }
 0x179   : > { %v1573_v8 = vpop.f32.mrf.mxu0 }
 0x17b   : > { %v1631_v21 = vpop.f32.mrf.mxu1 }
 0x17c   : > { %6342 = vmatmul.msk.bf16.gmra.mxu2 %vm1276_vm0, %v6002_v3 }
 0x17f   : > { %v1457_v24 = vpop.f32.mrf.mxu2 }
 0x180   : > { %v1515_v11 = vpop.f32.mrf.mxu3  ;;  %v1458_v13 = vadd.f32 %v1457_v24, %v8094_v36  ;;  %v6852_v24 = vld [vmem:[%s7863_s20 + $0x148] sm:$0xf0] }
 0x181   : > { %v8278_v16 = vpop.f32.mrf.mxu0 }
 0x182   : > { %v1516_v32 = vadd.f32 %v1515_v11, %v1458_v13 }
 0x183   : > { %v8283_v18 = vpop.f32.mrf.mxu1 }
 0x184   : > { %v1574_v37 = vadd.f32 %v1573_v8, %v1516_v32 }
 0x186   : > { %v8287_v38 = vadd.f32 %v1631_v21, %v1574_v37  ;;  %v6057_v21 = vld [vmem:[%s7863_s20 + $0x130] sm:$0xf] }
 0x187   : > { %v1459_v39 = vpop.f32.mrf.mxu2  ;;  %v6058_v17 = vor.u32 %v6852_v24, %v6057_v21  ;;  %v6923_v24 = vld [vmem:[%s12147_s3] sm:$0xff] }
 0x188   : > { %v8289_v40 = vpop.f32.mrf.mxu3  ;;  %v8292_v36 = vadd.f32 %v1459_v39, %v8108_v55  ;;  %v6924_v55 = vld [vmem:[%s12147_s3 + $0x8] sm:$0xff] }
 0x189   : > { %v1578_v43 = vpop.f32.mrf.mxu0  ;;  %1816 = vmatpush.bf16.msra.mxu3 %v6924_v55 }
 0x18b   : > { %v1636_v44 = vpop.f32.mrf.mxu1 }
 0x18c   : > { %6343 = vmatmul.msk.bf16.gmra.mxu2 %vm1276_vm0, %v6030_v57 }
 0x18d   : > { %1817 = vmatpush.bf16.msra.mxu3 %v6923_v24 }
 0x18f   : > { %v1462_v46 = vpop.f32.mrf.mxu2 }
 0x190   : > { %v1520_v47 = vpop.f32.mrf.mxu3  ;;  %v1463_v50 = vadd.f32 %v1462_v46, %v8114_v0 }
 0x191   : > { %v8296_v53 = vpop.f32.mrf.mxu0 }
 0x192   : > { %v1521_v52 = vadd.f32 %v1520_v47, %v1463_v50  ;;  %v6085_v50 = vld [vmem:[%s7863_s20 + $0x168] sm:$0xf] }
 0x193   : > { %v8298_v3 = vpop.f32.mrf.mxu1 }
 0x194   : > { %v1579_v8 = vadd.f32 %v1578_v43, %v1521_v52  ;;  %v6859_v52 = vld [vmem:[%s7863_s20 + $0x180] sm:$0xf0] }
 0x195   : > { %v6086_v55 = vor.u32 %v6859_v52, %v6085_v50  ;;  %v6113_v50 = vld [vmem:[%s7863_s20 + $0x1a0] sm:$0xf]  ;;  %v6866_v52 = vld [vmem:[%s7863_s20 + $0x1b8] sm:$0xf0] }
 0x196   : > { %v8302_v11 = vadd.f32 %v1636_v44, %v1579_v8 }
 0x197   : > { %v1464_v13 = vpop.f32.mrf.mxu2 }
 0x198   : > { %v8307_v32 = vpop.f32.mrf.mxu3  ;;  %v8310_v0 = vadd.f32 %v1464_v13, %v8128_v19 }
 0x199   : > { %v1583_v37 = vpop.f32.mrf.mxu0 }
 0x19b   : > { %v1641_v23 = vpop.f32.mrf.mxu1 }
 0x19c   : > { %6344 = vmatmul.msk.bf16.gmra.mxu2 %vm1276_vm0, %v6058_v17 }
 0x19f   : > { %v1467_v25 = vpop.f32.mrf.mxu2 }
 0x1a0   : > { %v1525_v39 = vpop.f32.mrf.mxu3  ;;  %v1468_v57 = vadd.f32 %v1467_v25, %v8134_v29 }
 0x1a1   : > { %v8314_v44 = vpop.f32.mrf.mxu0 }
 0x1a2   : > { %v1526_v43 = vadd.f32 %v1525_v39, %v1468_v57 }
 0x1a3   : > { %v8316_v46 = vpop.f32.mrf.mxu1 }
 0x1a4   : > { %v1584_v47 = vadd.f32 %v1583_v37, %v1526_v43  ;;  %v6934_v43 = vld [vmem:[%s12149_s5 + $0x18] sm:$0xff] }
 0x1a5   : > { %1968 = vmatpush.bf16.msra.mxu0 %v6934_v43 }
 0x1a6   : > { %v8320_v19 = vadd.f32 %v1641_v23, %v1584_v47 }
 0x1a7   : > { %v1469_v8 = vpop.f32.mrf.mxu2 }
 0x1a8   : > { %12182 = vst [vmem:[#allocation16_spill] sm:$0xff] %v8320_v19  ;;  %v8322_v21 = vpop.f32.mrf.mxu3  ;;  %v8328_v29 = vadd.f32 %v1469_v8, %v8148_v51  ;;  %v540_v19 = vld [vmem:[%s7863_s20 + $0x210] sm:$0xf] }
 0x1a9   : > { %v1588_v13 = vpop.f32.mrf.mxu0 }
 0x1ab   : > { %v1646_v17 = vpop.f32.mrf.mxu1 }
 0x1ac   : > { %6345 = vmatmul.msk.bf16.gmra.mxu2 %vm1276_vm0, %v6086_v55  ;;  %v6114_v55 = vor.u32 %v6866_v52, %v6113_v50  ;;  %v1493_v52 = vadd.f32 %v8205_v14, %v8208_v15 }
 0x1af   : > { %v1472_v37 = vpop.f32.mrf.mxu2 }
 0x1b0   : > { %v1530_v23 = vpop.f32.mrf.mxu3  ;;  %v1473_v25 = vadd.f32 %v1472_v37, %v8154_v62 }
 0x1b1   : > { %v8332_v57 = vpop.f32.mrf.mxu0 }
 0x1b2   : > { %v1531_v39 = vadd.f32 %v1530_v23, %v1473_v25  ;;  %12183 = vst [vmem:[#allocation17_spill] sm:$0xff] %v8332_v57 }
 0x1b3   : > { %v8337_v51 = vpop.f32.mrf.mxu1 }
 0x1b4   : > { %12184 = vst [vmem:[#allocation18_spill] sm:$0xff] %v8337_v51  ;;  %v1589_v47 = vadd.f32 %v1588_v13, %v1531_v39 }
 0x1b6   : > { %v8341_v8 = vadd.f32 %v1646_v17, %v1589_v47  ;;  %v6141_v17 = vld [vmem:[%s7863_s20 + $0x1d8] sm:$0xf]  ;;  %v6873_v47 = vld [vmem:[%s7863_s20 + $0x1f0] sm:$0xf0]  ;;  %s12491_s20 = sld [smem:[#allocation10_spill]] }
 0x1b7   : > { %v8343_v24 = vpop.f32.mrf.mxu2  ;;  %v6142_v50 = vor.u32 %v6873_v47, %v6141_v17 }
 0x1b8   : > { %12185 = vst [vmem:[#allocation19_spill] sm:$0xff] %v8341_v8  ;;  %v8345_v62 = vpop.f32.mrf.mxu3 }
 0x1b9   : > { %12186 = vst [vmem:[#allocation20_spill] sm:$0xff] %v8343_v24  ;;  %v1593_v37 = vpop.f32.mrf.mxu0 }
 0x1ba   : > { %12187 = vst [vmem:[#allocation21_spill] sm:$0xff] %v8345_v62 }
 0x1bb   : > { %v1651_v23 = vpop.f32.mrf.mxu1 }
 0x1bc   : > { %6346 = vmatmul.msk.bf16.gmra.mxu2 %vm1276_vm0, %v6114_v55  ;;  %s7031_s24 = smul.u32 532, %s12491_s20  ;;  %s7657_s20 = scalar_lea.hbm %s12492_s15, 1064 }
 0x1be   : > { %s5809_s23 = scalar_lea.hbm %s12492_s15, %s7031_s24 }
 0x1bf   : > { %v1477_v25 = vpop.f32.mrf.mxu2  ;;  %s5812_s22 = sshll.u32 %s5809_s23, 4  ;;  %s5813_s22 = int_to_ptr.hbm [resolvable:$true] %s5812_s22 }
 0x1c0   : > { %v1535_v51 = vpop.f32.mrf.mxu3  ;;  %v1478_v13 = vadd.f32 %v1477_v25, %v8179_v28  ;;  %v1551_v28 = vadd.f32 %v8195_v61, %v1493_v52  ;;  %v1498_v61 = vadd.f32 %v8222_v45, %v8225_v60  ;;  %v1503_v52 = vadd.f32 %v8237_v5, %v8240_v7  ;;  %s7651_s29 = sshra.s32 %s5813_s22, 4  ;;  %s7652_s29 = int_to_ptr.hbm [resolvable:$true] %s7651_s29 }
 0x1c1   : > { %v1595_v43 = vpop.f32.mrf.mxu0  ;;  %v1334_v45 = vadd.f32 %v8088_v26, %v8156_v63  ;;  %v1339_v63 = vadd.f32 %v8088_v26, %v8181_v30  ;;  %s7653_s25 = scalar_lea.hbm %s7652_s29, 532  ;;  %p7658_p3 = scmp.lt.s32.totalorder %s7652_s29, %s12492_s15 }
 0x1c2   : > { %v1536_v39 = vadd.f32 %v1535_v51, %v1478_v13  ;;  %v851_v51 = vunpack.c.l.b16 %v540_v19  ;;  %v6933_v13 = vld [vmem:[%s12149_s5 + $0x10] sm:$0xff]  ;;  %v1561_v60 = vadd.f32 %v8229_v54, %v1503_v52  ;;  %v6932_v54 = vld [vmem:[%s12149_s5 + $0x8] sm:$0xff]  ;;  %p7654_p6 = scmp.ne.s32.totalorder %s7652_s29, %s7653_s25  ;;  %p7659_p4 = scmp.lt.s32.totalorder %s7657_s20, %s7653_s25 }
 0x1c3   : > { %v1653_v57 = vpop.f32.mrf.mxu1  ;;  %1969 = vmatpush.bf16.msra.mxu0 %v6933_v13 }
 0x1c4   : > { %v1594_v10 = vadd.f32 %v1593_v37, %v1536_v39  ;;  %v1609_v57 = vadd.f32 %v8201_v4, %v1551_v28  ;;  %p7655_p13 = pnand %p7654_p6, %p7825_p11  ;;  %p7660_p5 = por %p7659_p4, %p7658_p3 }
 0x1c6   : > { %v8351_v8 = vadd.f32 %v1651_v23, %v1594_v10  ;;  %v921_v23 = vpack.c.b16 %v851_v51, %v851_v51  ;;  %p7656_p0 = pneg %p7655_p13 }
 0x1c7   : > { %v1479_v24 = vpop.f32.mrf.mxu2  ;;  %1970 = vmatpush.bf16.msra.mxu0 %v6932_v54 }
 0x1c8   : > { %v1537_v62 = vpop.f32.mrf.mxu3  ;;  %p7661_p7 = pnand %p7660_p5, %p7656_p0 }
 0x1cc   : > { %6347 = vmatmul.msk.bf16.gmra.mxu2 %vm1276_vm0, %v6142_v50 }
 0x1cf   : > { %v1664_v55 = vpop.f32.mrf.mxu2 }
 0x1d0   : > { %v1665_v37 = vadd.f32 %v1664_v55, %v8203_v12  ;;  %v1556_v12 = vadd.f32 %v8211_v35, %v1498_v61  ;;  %v1392_v35 = vadd.f32 %v8158_v1, %v1334_v45 }
 0x1d2   : > { %v1713_v24 = vmax.f32 %v1665_v37, 0.0  ;;  %v1614_v14 = vadd.f32 %v8213_v42, %v1556_v12  ;;  %v1619_v42 = vadd.f32 %v8231_v56, %v1561_v60  ;;  %v1397_v56 = vadd.f32 %v8183_v31, %v1339_v63 }
 0x1d7   : > { %v1666_v25 = vpop.f32.mrf.mxu2 }
 0x1d8   : > { %v1667_v10 = vadd.f32 %v1666_v25, %v1609_v57  ;;  %v1450_v57 = vadd.f32 %v8255_v33, %v1392_v35 }
 0x1da   : > { %v1714_v62 = vmax.f32 %v1667_v10, 0.0  ;;  %v1508_v7 = vadd.f32 %v8257_v34, %v1450_v57 }
 0x1dc   : > { %v1732_v39 = vpack.c.bf16 %v1714_v62, %v1713_v24  ;;  %6348 = vmatmul.msk.bf16.gmra.mxu2 %vm1276_vm0, %v921_v23  ;;  %v1566_v1 = vadd.f32 %v8247_v20, %v1508_v7  ;;  %v1455_v24 = vadd.f32 %v8272_v59, %v1397_v56  ;;  %v1518_v59 = vadd.f32 %v8289_v40, %v8292_v36  ;;  %v12190_v7 = vld [vmem:[#allocation20_spill] sm:$0xff]  ;;  %v12192_v56 = vld [vmem:[#allocation17_spill] sm:$0xff] }
 0x1dd   : > { %v1523_v40 = vadd.f32 %v8307_v32, %v8310_v0  ;;  %v1528_v32 = vadd.f32 %v8322_v21, %v8328_v29  ;;  %v12191_v29 = vld [vmem:[#allocation21_spill] sm:$0xff] }
 0x1de   : > { %1818 = vmatmul.bf16.vlgmr.msra.gmra.mxu3 %v1732_v39  ;;  %v1513_v20 = vadd.f32 %v8274_v6, %v1455_v24  ;;  %v1576_v6 = vadd.f32 %v8278_v16, %v1518_v59 }
 0x1df   : > { %v1669_v4 = vpop.f32.mrf.mxu2  ;;  %v1581_v16 = vadd.f32 %v8296_v53, %v1523_v40  ;;  %v1586_v53 = vadd.f32 %v8314_v44, %v1528_v32 }
 0x1e0   : > { %v1670_v15 = vadd.f32 %v1669_v4, %v8217_v41  ;;  %v1571_v61 = vadd.f32 %v8264_v48, %v1513_v20 }
 0x1e2   : > { %v1715_v17 = vmax.f32 %v1670_v15, 0.0  ;;  %v1629_v4 = vadd.f32 %v8266_v49, %v1571_v61  ;;  %v8426_v61 = vld [vmem:[%s12148_s4] ss:$0 sm:$0xff] }
 0x1e7   : > { %v1671_v19 = vpop.f32.mrf.mxu2 }
 0x1e8   : > { %v1672_v43 = vadd.f32 %v1671_v19, %v1614_v14 }
 0x1ea   : > { %v1716_v47 = vmax.f32 %v1672_v43, 0.0  ;;  %v1634_v43 = vadd.f32 %v8283_v18, %v1576_v6  ;;  %v1639_v18 = vadd.f32 %v8298_v3, %v1581_v16  ;;  %v1359_v3 = vadd.f32 %v8088_v26, %v8166_v9  ;;  %v12193_v26 = vld [vmem:[#allocation18_spill] sm:$0xff] }
 0x1ec   : > { %v1733_v50 = vpack.c.bf16 %v1716_v47, %v1715_v17 }
 0x1ee   : > { %1823 = vmatmul.bf16.gmra.mxu3 %v1733_v50  ;;  %v6931_v50 = vld [vmem:[%s12149_s5] sm:$0xff] }
 0x1ef   : > { %v1674_v55 = vpop.f32.mrf.mxu2  ;;  %1971 = vmatpush.bf16.msra.mxu0 %v6931_v50 }
 0x1f0   : > { %v1675_v41 = vadd.f32 %v1674_v55, %v8235_v2  ;;  %v1624_v2 = vadd.f32 %v8249_v22, %v1566_v1 }
 0x1f2   : > { %v1717_v37 = vmax.f32 %v1675_v41, 0.0 }
 0x1f7   : > { %v1676_v28 = vpop.f32.mrf.mxu2 }
 0x1f8   : > { %v1677_v51 = vadd.f32 %v1676_v28, %v1619_v42  ;;  %v6936_v42 = vld [vmem:[%s12151_s7 + $0x8] sm:$0xff]  ;;  %v12188_v28 = vld [vmem:[#allocation16_spill] sm:$0xff] }
 0x1f9   : > { %2108 = vmatpush.bf16.msra.mxu1 %v6936_v42 }
 0x1fa   : > { %v1718_v25 = vmax.f32 %v1677_v51, 0.0 }
 0x1fc   : > { %v1734_v5 = vpack.c.bf16 %v1718_v25, %v1717_v37  ;;  %v12189_v37 = vld [vmem:[#allocation15_spill] sm:$0xff] }
 0x1fd   : > { %v1417_v25 = vadd.f32 %v12189_v37, %v1359_v3 }
 0x1fe   : > { %1828 = vmatmul.bf16.gmra.mxu3 %v1734_v5 }
 0x1ff   : > { %v1679_v10 = vpop.f32.mrf.mxu2 }
 0x200   : > { %v1680_v33 = vadd.f32 %v1679_v10, %v8253_v27  ;;  %v1475_v10 = vadd.f32 %v12190_v7, %v1417_v25 }
 0x202   : > { %v1719_v62 = vmax.f32 %v1680_v33, 0.0  ;;  %v1533_v54 = vadd.f32 %v12191_v29, %v1475_v10  ;;  %v6940_v29 = vld [vmem:[%s12153_s9 + $0x18] sm:$0xff] }
 0x203   : > { %2259 = vmatpush.bf16.msrb.mxu2 %v6940_v29 }
 0x207   : > { %v1681_v23 = vpop.f32.mrf.mxu2 }
 0x208   : > { %v1682_v34 = vadd.f32 %v1681_v23, %v1624_v2  ;;  %v1591_v2 = vadd.f32 %v12192_v56, %v1533_v54 }
 0x20a   : > { %v1720_v13 = vmax.f32 %v1682_v34, 0.0  ;;  %v1649_v9 = vadd.f32 %v12193_v26, %v1591_v2 }
 0x20c   : > { %v1735_v30 = vpack.c.bf16 %v1720_v13, %v1719_v62 }
 0x20e   : > { %1833 = vmatmul.bf16.gmra.mxu3 %v1735_v30 }
 0x20f   : > { %v1684_v39 = vpop.f32.mrf.mxu2 }
 0x210   : > { %v1685_v31 = vadd.f32 %v1684_v39, %v8270_v58 }
 0x212   : > { %v1721_v27 = vmax.f32 %v1685_v31, 0.0 }
 0x217   : > { %v1686_v22 = vpop.f32.mrf.mxu2 }
 0x218   : > { %v1687_v12 = vadd.f32 %v1686_v22, %v1629_v4 }
 0x21a   : > { %v1722_v14 = vmax.f32 %v1687_v12, 0.0 }
 0x21c   : > { %v1736_v15 = vpack.c.bf16 %v1722_v14, %v1721_v27 }
 0x21e   : > { %1838 = vmatmul.bf16.gmra.mxu3 %v1736_v15 }
 0x21f   : > { %v1689_v19 = vpop.f32.mrf.mxu2 }
 0x220   : > { %v1690_v48 = vadd.f32 %v1689_v19, %v8287_v38 }
 0x222   : > { %v1723_v47 = vmax.f32 %v1690_v48, 0.0 }
 0x227   : > { %v1691_v17 = vpop.f32.mrf.mxu2 }
 0x228   : > { %v1692_v49 = vadd.f32 %v1691_v17, %v1634_v43 }
 0x22a   : > { %v1724_v58 = vmax.f32 %v1692_v49, 0.0 }
 0x22c   : > { %v1737_v52 = vpack.c.bf16 %v1724_v58, %v1723_v47 }
 0x22e   : > { %1843 = vmatmul.bf16.gmra.mxu3 %v1737_v52 }
 0x22f   : > { %v1694_v36 = vpop.f32.mrf.mxu2 }
 0x230   : > { %v1695_v38 = vadd.f32 %v1694_v36, %v8302_v11  ;;  %v1644_v11 = vadd.f32 %v8316_v46, %v1586_v53  ;;  %v12194_v46 = vld [vmem:[#allocation19_spill] sm:$0xff] }
 0x232   : > { %v1725_v60 = vmax.f32 %v1695_v38, 0.0  ;;  %v6935_v38 = vld [vmem:[%s12151_s7] sm:$0xff] }
 0x233   : > { %2109 = vmatpush.bf16.msra.mxu1 %v6935_v38 }
 0x237   : > { %v1696_v55 = vpop.f32.mrf.mxu2 }
 0x238   : > { %v1697_v45 = vadd.f32 %v1696_v55, %v1639_v18 }
 0x23a   : > { %v1726_v35 = vmax.f32 %v1697_v45, 0.0 }
 0x23c   : > { %v1738_v41 = vpack.c.bf16 %v1726_v35, %v1725_v60 }
 0x23e   : > { %1848 = vmatmul.bf16.gmra.mxu3 %v1738_v41 }
 0x23f   : > { %v1699_v0 = vpop.f32.mrf.mxu2 }
 0x240   : > { %v1700_v51 = vadd.f32 %v1699_v0, %v12188_v28 }
 0x242   : > { %v1727_v63 = vmax.f32 %v1700_v51, 0.0 }
 0x247   : > { %v1701_v57 = vpop.f32.mrf.mxu2 }
 0x248   : > { %v1702_v5 = vadd.f32 %v1701_v57, %v1644_v11 }
 0x24a   : > { %v1728_v1 = vmax.f32 %v1702_v5, 0.0 }
 0x24c   : > { %v1739_v21 = vpack.c.bf16 %v1728_v1, %v1727_v63 }
 0x24e   : > { %1853 = vmatmul.bf16.gmra.mxu3 %v1739_v21 }
 0x24f   : > { %v1704_v44 = vpop.f32.mrf.mxu2 }
 0x250   : > { %v1705_v33 = vadd.f32 %v1704_v44, %v12194_v46 }
 0x252   : > { %v1729_v24 = vmax.f32 %v1705_v33, 0.0 }
 0x257   : > { %v1706_v23 = vpop.f32.mrf.mxu2 }
 0x258   : > { %v1707_v34 = vadd.f32 %v1706_v23, %v1649_v9 }
 0x25a   : > { %v1730_v62 = vmax.f32 %v1707_v34, 0.0 }
 0x25c   : > { %v1740_v13 = vpack.c.bf16 %v1730_v62, %v1729_v24 }
 0x25e   : > { %1858 = vmatmul.bf16.gmra.mxu3 %v1740_v13 }
 0x25f   : > { %v1709_v30 = vpop.f32.mrf.mxu2 }
 0x260   : > { %v1710_v39 = vadd.f32 %v1709_v30, %v8351_v8 }
 0x261   : > { %v1819_v20 = vpop.f32.mrf.mxu3 }
 0x262   : > { %v1731_v31 = vmax.f32 %v1710_v39, 0.0  ;;  %v1820_v22 = vadd.f32 %v8426_v61, %v1819_v20 }
 0x264   : > { %v1741_v14 = vpack.c.bf16 %v1731_v31, %v1731_v31  ;;  %v1868_v15 = vmax.f32 %v1820_v22, 0.0 }
 0x267   : > { %v1711_v4 = vpop.f32.mrf.mxu2 }
 0x269   : > { %v1821_v12 = vpop.f32.mrf.mxu3 }
 0x26a   : > { %v1822_v27 = vadd.f32 %v8426_v61, %v1821_v12 }
 0x26c   : > { %v1869_v59 = vmax.f32 %v1822_v27, 0.0 }
 0x26e   : > { %v1887_v19 = vpack.c.bf16 %v1869_v59, %v1868_v15  ;;  %1863 = vmatmul.bf16.gmra.mxu3 %v1741_v14  ;;  %v8463_v14 = vld [vmem:[%s12150_s6] ss:$0 sm:$0xff]  ;;  %v6939_v15 = vld [vmem:[%s12153_s9 + $0x10] sm:$0xff] }
 0x26f   : > { %2260 = vmatpush.bf16.msrb.mxu2 %v6939_v15 }
 0x270   : > { %6397 = vmatmul.msk.bf16.vlgmr.msra.gmra.mxu0 %vm1933_vm1, %v1887_v19 }
 0x271   : > { %v1824_v8 = vpop.f32.mrf.mxu3 }
 0x272   : > { %v1825_v6 = vadd.f32 %v8426_v61, %v1824_v8 }
 0x274   : > { %v1870_v17 = vmax.f32 %v1825_v6, 0.0 }
 0x279   : > { %v1826_v43 = vpop.f32.mrf.mxu3 }
 0x27a   : > { %v1827_v48 = vadd.f32 %v8426_v61, %v1826_v43 }
 0x27c   : > { %v1871_v49 = vmax.f32 %v1827_v48, 0.0 }
 0x27e   : > { %v1888_v47 = vpack.c.bf16 %v1871_v49, %v1870_v17 }
 0x280   : > { %6398 = vmatmul.msk.bf16.gmra.mxu0 %vm1933_vm1, %v1888_v47 }
 0x281   : > { %v1829_v58 = vpop.f32.mrf.mxu3 }
 0x282   : > { %v1830_v50 = vadd.f32 %v8426_v61, %v1829_v58 }
 0x284   : > { %v1872_v36 = vmax.f32 %v1830_v50, 0.0 }
 0x289   : > { %v1831_v52 = vpop.f32.mrf.mxu3 }
 0x28a   : > { %v1832_v40 = vadd.f32 %v8426_v61, %v1831_v52 }
 0x28c   : > { %v1873_v16 = vmax.f32 %v1832_v40, 0.0 }
 0x28e   : > { %v1889_v18 = vpack.c.bf16 %v1873_v16, %v1872_v36 }
 0x290   : > { %6399 = vmatmul.msk.bf16.gmra.mxu0 %vm1933_vm1, %v1889_v18 }
 0x291   : > { %v1834_v55 = vpop.f32.mrf.mxu3 }
 0x292   : > { %v1835_v45 = vadd.f32 %v8426_v61, %v1834_v55 }
 0x294   : > { %v1874_v42 = vmax.f32 %v1835_v45, 0.0 }
 0x299   : > { %v1836_v60 = vpop.f32.mrf.mxu3 }
 0x29a   : > { %v1837_v35 = vadd.f32 %v8426_v61, %v1836_v60 }
 0x29c   : > { %v1875_v41 = vmax.f32 %v1837_v35, 0.0 }
 0x29e   : > { %v1890_v32 = vpack.c.bf16 %v1875_v41, %v1874_v42 }
 0x2a0   : > { %6400 = vmatmul.msk.bf16.gmra.mxu0 %vm1933_vm1, %v1890_v32 }
 0x2a1   : > { %v1839_v0 = vpop.f32.mrf.mxu3 }
 0x2a2   : > { %v1840_v53 = vadd.f32 %v8426_v61, %v1839_v0  ;;  %v6938_v0 = vld [vmem:[%s12153_s9 + $0x8] sm:$0xff] }
 0x2a3   : > { %2261 = vmatpush.bf16.msrb.mxu2 %v6938_v0  ;;  %v8542_v0 = vld [vmem:[%s12152_s8] ss:$0 sm:$0xff] }
 0x2a4   : > { %v1876_v28 = vmax.f32 %v1840_v53, 0.0 }
 0x2a9   : > { %v1841_v3 = vpop.f32.mrf.mxu3 }
 0x2aa   : > { %v1842_v11 = vadd.f32 %v8426_v61, %v1841_v3 }
 0x2ac   : > { %v1877_v51 = vmax.f32 %v1842_v11, 0.0 }
 0x2ae   : > { %v1891_v57 = vpack.c.bf16 %v1877_v51, %v1876_v28 }
 0x2b0   : > { %6401 = vmatmul.msk.bf16.gmra.mxu0 %vm1933_vm1, %v1891_v57 }
 0x2b1   : > { %v1844_v37 = vpop.f32.mrf.mxu3 }
 0x2b2   : > { %v1845_v25 = vadd.f32 %v8426_v61, %v1844_v37 }
 0x2b4   : > { %v1878_v10 = vmax.f32 %v1845_v25, 0.0 }
 0x2b9   : > { %v1846_v5 = vpop.f32.mrf.mxu3 }
 0x2ba   : > { %v1847_v7 = vadd.f32 %v8426_v61, %v1846_v5 }
 0x2bc   : > { %v1879_v63 = vmax.f32 %v1847_v7, 0.0 }
 0x2be   : > { %v1892_v1 = vpack.c.bf16 %v1879_v63, %v1878_v10 }
 0x2c0   : > { %6402 = vmatmul.msk.bf16.gmra.mxu0 %vm1933_vm1, %v1892_v1 }
 0x2c1   : > { %v1849_v21 = vpop.f32.mrf.mxu3 }
 0x2c2   : > { %v1850_v54 = vadd.f32 %v8426_v61, %v1849_v21 }
 0x2c4   : > { %v1880_v2 = vmax.f32 %v1850_v54, 0.0  ;;  %v6937_v54 = vld [vmem:[%s12153_s9] sm:$0xff] }
 0x2c5   : > { %2262 = vmatpush.bf16.msrb.mxu2 %v6937_v54 }
 0x2c9   : > { %v1851_v44 = vpop.f32.mrf.mxu3 }
 0x2ca   : > { %v1852_v56 = vadd.f32 %v8426_v61, %v1851_v44 }
 0x2cc   : > { %v1881_v26 = vmax.f32 %v1852_v56, 0.0 }
 0x2ce   : > { %v1893_v9 = vpack.c.bf16 %v1881_v26, %v1880_v2 }
 0x2d0   : > { %6403 = vmatmul.msk.bf16.gmra.mxu0 %vm1933_vm1, %v1893_v9 }
 0x2d1   : > { %v1854_v46 = vpop.f32.mrf.mxu3 }
 0x2d2   : > { %v1855_v33 = vadd.f32 %v8426_v61, %v1854_v46 }
 0x2d4   : > { %v1882_v24 = vmax.f32 %v1855_v33, 0.0 }
 0x2d9   : > { %v1856_v23 = vpop.f32.mrf.mxu3 }
 0x2da   : > { %v1857_v34 = vadd.f32 %v8426_v61, %v1856_v23 }
 0x2dc   : > { %v1883_v62 = vmax.f32 %v1857_v34, 0.0 }
 0x2de   : > { %v1894_v13 = vpack.c.bf16 %v1883_v62, %v1882_v24 }
 0x2e0   : > { %6404 = vmatmul.msk.bf16.gmra.mxu0 %vm1933_vm1, %v1894_v13 }
 0x2e1   : > { %v1859_v30 = vpop.f32.mrf.mxu3 }
 0x2e2   : > { %v1860_v20 = vadd.f32 %v8426_v61, %v1859_v30 }
 0x2e4   : > { %v1884_v31 = vmax.f32 %v1860_v20, 0.0  ;;  %v6649_v20 = vld [vmem:[%s12155_s11 + $0x188] sm:$0xf] }
 0x2e9   : > { %v1861_v39 = vpop.f32.mrf.mxu3 }
 0x2ea   : > { %v1862_v4 = vadd.f32 %v8426_v61, %v1861_v39  ;;  %v6993_v39 = vld [vmem:[%s12155_s11 + $0x1a0] sm:$0xf0] }
 0x2ec   : > { %v1885_v22 = vmax.f32 %v1862_v4, 0.0 }
 0x2ed   : > { %v1973_v12 = vpop.f32.mrf.mxu0 }
 0x2ee   : > { %v1895_v27 = vpack.c.bf16 %v1885_v22, %v1884_v31  ;;  %v1974_v19 = vadd.f32 %v8463_v14, %v1973_v12  ;;  %v6650_v31 = vor.u32 %v6993_v39, %v6649_v20  ;;  %v6990_v22 = vld [vmem:[%s12155_s11 + $0x18c] sm:$0xf]  ;;  %v6651_v12 = vld [vmem:[%s12155_s11 + $0x1a4] sm:$0xf0]  ;;  %v6969_v39 = vld [vmem:[%s12155_s11 + $0xe4] sm:$0xf] }
 0x2ef   : > { %v6654_v15 = vor.u32 %v6990_v22, %v6651_v12  ;;  %v6573_v22 = vld [vmem:[%s12155_s11 + $0xe8] sm:$0xf]  ;;  %v6973_v12 = vld [vmem:[%s12155_s11 + $0x100] sm:$0xf0] }
 0x2f0   : > { %6405 = vmatmul.msk.bf16.gmra.mxu0 %vm1933_vm1, %v1895_v27  ;;  %v2022_v48 = vmax.f32 %v1974_v19, 0.0  ;;  %2710 = vmatpush.bf16.msrb.mxu3 %v6650_v31  ;;  %v6657_v27 = vld [vmem:[%s12155_s11 + $0x190] sm:$0xf] }
 0x2f1   : > { %v1864_v59 = vpop.f32.mrf.mxu3  ;;  %2768 = vmatpush.bf16.msrb.mxu0 %v6654_v15 }
 0x2f2   : > { %v1865_v6 = vadd.f32 %v8426_v61, %v1864_v59  ;;  %v6994_v59 = vld [vmem:[%s12155_s11 + $0x1a8] sm:$0xf0] }
 0x2f4   : > { %v1886_v47 = vmax.f32 %v1865_v6, 0.0 }
 0x2f5   : > { %v1975_v8 = vpop.f32.mrf.mxu0 }
 0x2f6   : > { %v1976_v43 = vadd.f32 %v8463_v14, %v1975_v8  ;;  %v1896_v52 = vpack.c.bf16 %v1886_v47, %v1886_v47  ;;  %v6658_v8 = vor.u32 %v6994_v59, %v6657_v27  ;;  %v6621_v47 = vld [vmem:[%s12155_s11 + $0x150] sm:$0xf]  ;;  %v6574_v27 = vor.u32 %v6973_v12, %v6573_v22  ;;  %v6453_v12 = vld [vmem:[%s12155_s11] sm:$0xf] }
 0x2f8   : > { %v2023_v17 = vmax.f32 %v1976_v43, 0.0  ;;  %2826 = vmatpush.bf16.msrb.mxu1 %v6658_v8 }
 0x2f9   : > { %v1866_v49 = vpop.f32.mrf.mxu3 }
 0x2fa   : > { %v2041_v58 = vpack.c.bf16 %v2023_v17, %v2022_v48 }
 0x2fc   : > { %6415 = vmatmul.msk.bf16.vlgmr.msra.gmra.mxu1 %vm2071_vm2, %v2041_v58  ;;  %v6986_v58 = vld [vmem:[%s12155_s11 + $0x168] sm:$0xf0] }
 0x2fd   : > { %v1978_v50 = vpop.f32.mrf.mxu0 }
 0x2fe   : > { %v1979_v40 = vadd.f32 %v8463_v14, %v1978_v50 }
 0x300   : > { %6406 = vmatmul.msk.bf16.gmra.mxu0 %vm1933_vm1, %v1896_v52  ;;  %v2024_v61 = vmax.f32 %v1979_v40, 0.0  ;;  %v6622_v52 = vor.u32 %v6986_v58, %v6621_v47  ;;  %v6962_v58 = vld [vmem:[%s12155_s11 + $0xac] sm:$0xf] }
 0x302   : > { %2711 = vmatpush.bf16.msrb.mxu3 %v6622_v52  ;;  %v6545_v52 = vld [vmem:[%s12155_s11 + $0xb0] sm:$0xf] }
 0x305   : > { %v1980_v36 = vpop.f32.mrf.mxu0 }
 0x306   : > { %v1981_v16 = vadd.f32 %v8463_v14, %v1980_v36 }
 0x308   : > { %v2025_v18 = vmax.f32 %v1981_v16, 0.0 }
 0x30a   : > { %v2042_v38 = vpack.c.bf16 %v2025_v18, %v2024_v61  ;;  %v6983_v61 = vld [vmem:[%s12155_s11 + $0x154] sm:$0xf]  ;;  %v6623_v18 = vld [vmem:[%s12155_s11 + $0x16c] sm:$0xf0] }
 0x30c   : > { %6416 = vmatmul.msk.bf16.gmra.mxu1 %vm2071_vm2, %v2042_v38  ;;  %v6629_v38 = vld [vmem:[%s12155_s11 + $0x158] sm:$0xf] }
 0x30d   : > { %v1983_v55 = vpop.f32.mrf.mxu0 }
 0x30e   : > { %v1984_v45 = vadd.f32 %v8463_v14, %v1983_v55  ;;  %v6626_v55 = vor.u32 %v6983_v61, %v6623_v18 }
 0x310   : > { %v2026_v42 = vmax.f32 %v1984_v45, 0.0  ;;  %v6987_v45 = vld [vmem:[%s12155_s11 + $0x170] sm:$0xf0]  ;;  %2769 = vmatpush.bf16.msrb.mxu0 %v6626_v55 }
 0x315   : > { %v1985_v60 = vpop.f32.mrf.mxu0 }
 0x316   : > { %v1986_v35 = vadd.f32 %v8463_v14, %v1985_v60 }
 0x318   : > { %v2027_v41 = vmax.f32 %v1986_v35, 0.0 }
 0x31a   : > { %v2043_v32 = vpack.c.bf16 %v2027_v41, %v2026_v42  ;;  %v6630_v42 = vor.u32 %v6987_v45, %v6629_v38 }
 0x31c   : > { %6417 = vmatmul.msk.bf16.gmra.mxu1 %vm2071_vm2, %v2043_v32 }
 0x31d   : > { %v1988_v53 = vpop.f32.mrf.mxu0  ;;  %2827 = vmatpush.bf16.msrb.mxu1 %v6630_v42  ;;  %v6509_v42 = vld [vmem:[%s12155_s11 + $0x70] sm:$0xf] }
 0x31e   : > { %v1989_v3 = vadd.f32 %v8463_v14, %v1988_v53 }
 0x320   : > { %v2028_v51 = vmax.f32 %v1989_v3, 0.0 }
 0x325   : > { %v1990_v11 = vpop.f32.mrf.mxu0 }
 0x326   : > { %v1991_v28 = vadd.f32 %v8463_v14, %v1990_v11 }
 0x328   : > { %v2029_v57 = vmax.f32 %v1991_v28, 0.0 }
 0x32a   : > { %v2044_v37 = vpack.c.bf16 %v2029_v57, %v2028_v51 }
 0x32c   : > { %6418 = vmatmul.msk.bf16.gmra.mxu1 %vm2071_vm2, %v2044_v37 }
 0x32d   : > { %v1993_v25 = vpop.f32.mrf.mxu0 }
 0x32e   : > { %v1994_v5 = vadd.f32 %v8463_v14, %v1993_v25 }
 0x330   : > { %v2030_v63 = vmax.f32 %v1994_v5, 0.0 }
 0x335   : > { %v1995_v7 = vpop.f32.mrf.mxu0 }
 0x336   : > { %v1996_v10 = vadd.f32 %v8463_v14, %v1995_v7 }
 0x338   : > { %v2031_v1 = vmax.f32 %v1996_v10, 0.0  ;;  %v6593_v10 = vld [vmem:[%s12155_s11 + $0x118] sm:$0xf] }
 0x33a   : > { %v2045_v21 = vpack.c.bf16 %v2031_v1, %v2030_v63  ;;  %v6979_v63 = vld [vmem:[%s12155_s11 + $0x130] sm:$0xf0] }
 0x33b   : > { %v6594_v1 = vor.u32 %v6979_v63, %v6593_v10  ;;  %v6959_v10 = vld [vmem:[%s12155_s11 + $0x90] sm:$0xf0] }
 0x33c   : > { %6419 = vmatmul.msk.bf16.gmra.mxu1 %vm2071_vm2, %v2045_v21  ;;  %v6595_v21 = vld [vmem:[%s12155_s11 + $0x134] sm:$0xf0] }
 0x33d   : > { %v1998_v29 = vpop.f32.mrf.mxu0  ;;  %2712 = vmatpush.bf16.msrb.mxu3 %v6594_v1 }
 0x33e   : > { %v1999_v44 = vadd.f32 %v8463_v14, %v1998_v29  ;;  %v6601_v29 = vld [vmem:[%s12155_s11 + $0x120] sm:$0xf] }
 0x340   : > { %v2032_v26 = vmax.f32 %v1999_v44, 0.0 }
 0x345   : > { %v2000_v56 = vpop.f32.mrf.mxu0 }
 0x346   : > { %v2001_v2 = vadd.f32 %v8463_v14, %v2000_v56  ;;  %v6980_v56 = vld [vmem:[%s12155_s11 + $0x138] sm:$0xf0] }
 0x348   : > { %v2033_v9 = vmax.f32 %v2001_v2, 0.0 }
 0x34a   : > { %v2046_v46 = vpack.c.bf16 %v2033_v9, %v2032_v26  ;;  %v6602_v26 = vor.u32 %v6980_v56, %v6601_v29 }
 0x34c   : > { %6420 = vmatmul.msk.bf16.gmra.mxu1 %vm2071_vm2, %v2046_v46 }
 0x34d   : > { %v2003_v33 = vpop.f32.mrf.mxu0  ;;  %2828 = vmatpush.bf16.msrb.mxu1 %v6602_v26  ;;  %v6951_v26 = vld [vmem:[%s12155_s11 + $0x50] sm:$0xf0] }
 0x34e   : > { %v2004_v23 = vadd.f32 %v8463_v14, %v2003_v33 }
 0x350   : > { %v2034_v62 = vmax.f32 %v2004_v23, 0.0 }
 0x351   : > { %2829 = vmatpush.bf16.msrb.mxu1 %v6574_v27  ;;  %v6944_v27 = vld [vmem:[%s12155_s11 + $0x18] sm:$0xf0] }
 0x355   : > { %v2005_v34 = vpop.f32.mrf.mxu0 }
 0x356   : > { %v2006_v24 = vadd.f32 %v8463_v14, %v2005_v34 }
 0x358   : > { %v2035_v13 = vmax.f32 %v2006_v24, 0.0 }
 0x35a   : > { %v2047_v30 = vpack.c.bf16 %v2035_v13, %v2034_v62  ;;  %v6565_v62 = vld [vmem:[%s12155_s11 + $0xe0] sm:$0xf]  ;;  %v6972_v13 = vld [vmem:[%s12155_s11 + $0xf8] sm:$0xf0] }
 0x35c   : > { %6421 = vmatmul.msk.bf16.gmra.mxu1 %vm2071_vm2, %v2047_v30  ;;  %v6566_v30 = vor.u32 %v6972_v13, %v6565_v62  ;;  %v6952_v62 = vld [vmem:[%s12155_s11 + $0x58] sm:$0xf0] }
 0x35d   : > { %v2008_v4 = vpop.f32.mrf.mxu0 }
 0x35e   : > { %v2009_v19 = vadd.f32 %v8463_v14, %v2008_v4  ;;  %2713 = vmatpush.bf16.msrb.mxu3 %v6566_v30  ;;  %v6567_v4 = vld [vmem:[%s12155_s11 + $0xfc] sm:$0xf0] }
 0x35f   : > { %v6570_v31 = vor.u32 %v6969_v39, %v6567_v4 }
 0x360   : > { %v2036_v48 = vmax.f32 %v2009_v19, 0.0 }
 0x365   : > { %v2010_v6 = vpop.f32.mrf.mxu0 }
 0x366   : > { %v2011_v43 = vadd.f32 %v8463_v14, %v2010_v6 }
 0x368   : > { %v2037_v17 = vmax.f32 %v2011_v43, 0.0 }
 0x36a   : > { %v2048_v49 = vpack.c.bf16 %v2037_v17, %v2036_v48  ;;  %v6537_v17 = vld [vmem:[%s12155_s11 + $0xa8] sm:$0xf] }
 0x36c   : > { %6422 = vmatmul.msk.bf16.gmra.mxu1 %vm2071_vm2, %v2048_v49  ;;  %v6965_v49 = vld [vmem:[%s12155_s11 + $0xc0] sm:$0xf0] }
 0x36d   : > { %v2013_v50 = vpop.f32.mrf.mxu0  ;;  %v6538_v47 = vor.u32 %v6965_v49, %v6537_v17  ;;  %v6941_v49 = vld [vmem:[%s12155_s11 + $0x4] sm:$0xf] }
 0x36e   : > { %v2014_v40 = vadd.f32 %v8463_v14, %v2013_v50  ;;  %v6539_v50 = vld [vmem:[%s12155_s11 + $0xc4] sm:$0xf0] }
 0x36f   : > { %2714 = vmatpush.bf16.msrb.mxu3 %v6538_v47  ;;  %v6455_v47 = vld [vmem:[%s12155_s11 + $0x1c] sm:$0xf0] }
 0x370   : > { %v2038_v60 = vmax.f32 %v2014_v40, 0.0  ;;  %v6542_v40 = vor.u32 %v6962_v58, %v6539_v50  ;;  %v6461_v58 = vld [vmem:[%s12155_s11 + $0x8] sm:$0xf]  ;;  %v6458_v50 = vor.u32 %v6941_v49, %v6455_v47 }
 0x371   : > { %v6645_v49 = vld [vmem:[%s12155_s11 + $0x168] sm:$0xf] }
 0x375   : > { %v2015_v36 = vpop.f32.mrf.mxu0 }
 0x376   : > { %v2016_v16 = vadd.f32 %v8463_v14, %v2015_v36  ;;  %v6966_v36 = vld [vmem:[%s12155_s11 + $0xc8] sm:$0xf0] }
 0x378   : > { %v2039_v35 = vmax.f32 %v2016_v16, 0.0  ;;  %v6546_v16 = vor.u32 %v6966_v36, %v6545_v52  ;;  %v6945_v52 = vld [vmem:[%s12155_s11 + $0x20] sm:$0xf0]  ;;  %v6603_v36 = vld [vmem:[%s12155_s11 + $0x13c] sm:$0xf0] }
 0x379   : > { %v2111_v41 = vpop.f32.mrf.mxu1 }
 0x37a   : > { %v2049_v32 = vpack.c.bf16 %v2039_v35, %v2038_v60  ;;  %v2112_v3 = vadd.f32 %v8542_v0, %v2111_v41  ;;  %2830 = vmatpush.bf16.msrb.mxu1 %v6546_v16  ;;  %v6958_v41 = vld [vmem:[%s12155_s11 + $0x88] sm:$0xf0] }
 0x37c   : > { %6423 = vmatmul.msk.bf16.gmra.mxu1 %vm2071_vm2, %v2049_v32  ;;  %v2160_v57 = vmax.f32 %v2112_v3, 0.0  ;;  %v6510_v32 = vor.u32 %v6958_v41, %v6509_v42 }
 0x37d   : > { %v2018_v53 = vpop.f32.mrf.mxu0 }
 0x37e   : > { %v2019_v28 = vadd.f32 %v8463_v14, %v2018_v53  ;;  %v6976_v14 = vld [vmem:[%s12155_s11 + $0x11c] sm:$0xf]  ;;  %2715 = vmatpush.bf16.msrb.mxu3 %v6510_v32 }
 0x37f   : > { %v6598_v44 = vor.u32 %v6976_v14, %v6595_v21 }
 0x380   : > { %v2040_v5 = vmax.f32 %v2019_v28, 0.0 }
 0x381   : > { %v2113_v11 = vpop.f32.mrf.mxu1  ;;  %2770 = vmatpush.bf16.msrb.mxu0 %v6598_v44 }
 0x382   : > { %v2114_v51 = vadd.f32 %v8542_v0, %v2113_v11  ;;  %v2050_v2 = vpack.c.bf16 %v2040_v5, %v2040_v5  ;;  %v6517_v5 = vld [vmem:[%s12155_s11 + $0x78] sm:$0xf] }
 0x383   : > { %v6518_v63 = vor.u32 %v6959_v10, %v6517_v5  ;;  %v6519_v5 = vld [vmem:[%s12155_s11 + $0x94] sm:$0xf0]  ;;  %v6992_v10 = vld [vmem:[%s12155_s11 + $0x19c] sm:$0xf] }
 0x384   : > { %v2161_v37 = vmax.f32 %v2114_v51, 0.0 }
 0x385   : > { %v2020_v25 = vpop.f32.mrf.mxu0  ;;  %2771 = vmatpush.bf16.msrb.mxu0 %v6570_v31  ;;  %2831 = vmatpush.bf16.msrb.mxu1 %v6518_v63  ;;  %v6667_v63 = vld [vmem:[%s12155_s11 + $0x1b4] sm:$0xf0] }
 0x386   : > { %v2179_v7 = vpack.c.bf16 %v2161_v37, %v2160_v57  ;;  %v6955_v37 = vld [vmem:[%s12155_s11 + $0x74] sm:$0xf]  ;;  %v6511_v25 = vld [vmem:[%s12155_s11 + $0x8c] sm:$0xf0] }
 0x388   : > { %6441 = vmatmul.msk.bf16.vlgmr.msrb.gmra.mxu2 %vm1933_vm1, %v2179_v7  ;;  %v6514_v7 = vor.u32 %v6955_v37, %v6511_v25  ;;  %v6956_v37 = vld [vmem:[%s12155_s11 + $0x7c] sm:$0xf] }
 0x389   : > { %v2116_v54 = vpop.f32.mrf.mxu1  ;;  %2772 = vmatpush.bf16.msrb.mxu0 %v6542_v40  ;;  %v6977_v40 = vld [vmem:[%s12155_s11 + $0x124] sm:$0xf] }
 0x38a   : > { %v2117_v9 = vadd.f32 %v8542_v0, %v2116_v54 }
 0x38c   : > { %6424 = vmatmul.msk.bf16.gmra.mxu1 %vm2071_vm2, %v2050_v2  ;;  %v2162_v23 = vmax.f32 %v2117_v9, 0.0  ;;  %v6481_v2 = vld [vmem:[%s12155_s11 + $0x38] sm:$0xf] }
 0x38d   : > { %2773 = vmatpush.bf16.msrb.mxu0 %v6514_v7  ;;  %v6482_v9 = vor.u32 %v6951_v26, %v6481_v2  ;;  %v6522_v7 = vor.u32 %v6956_v37, %v6519_v5 }
 0x38f   : > { %2716 = vmatpush.bf16.msrb.mxu3 %v6482_v9 }
 0x391   : > { %v2118_v46 = vpop.f32.mrf.mxu1 }
 0x392   : > { %v2119_v33 = vadd.f32 %v8542_v0, %v2118_v46  ;;  %v6948_v46 = vld [vmem:[%s12155_s11 + $0x3c] sm:$0xf] }
 0x394   : > { %v2163_v34 = vmax.f32 %v2119_v33, 0.0  ;;  %v6483_v33 = vld [vmem:[%s12155_s11 + $0x54] sm:$0xf0] }
 0x396   : > { %v2180_v24 = vpack.c.bf16 %v2163_v34, %v2162_v23  ;;  %v6489_v23 = vld [vmem:[%s12155_s11 + $0x40] sm:$0xf] }
 0x397   : > { %v6490_v13 = vor.u32 %v6952_v62, %v6489_v23 }
 0x398   : > { %6442 = vmatmul.msk.bf16.gmra.mxu2 %vm1933_vm1, %v2180_v24  ;;  %v6486_v24 = vor.u32 %v6948_v46, %v6483_v33  ;;  %v6942_v46 = vld [vmem:[%s12155_s11 + $0xc] sm:$0xf]  ;;  %v6463_v33 = vld [vmem:[%s12155_s11 + $0x24] sm:$0xf0] }
 0x399   : > { %v2121_v20 = vpop.f32.mrf.mxu1  ;;  %2832 = vmatpush.bf16.msrb.mxu1 %v6490_v13 }
 0x39a   : > { %v2122_v15 = vadd.f32 %v8542_v0, %v2121_v20  ;;  %2774 = vmatpush.bf16.msrb.mxu0 %v6486_v24  ;;  %v6466_v24 = vor.u32 %v6942_v46, %v6463_v33 }
 0x39c   : > { %v2164_v8 = vmax.f32 %v2122_v15, 0.0  ;;  %v6991_v15 = vld [vmem:[%s12155_s11 + $0x194] sm:$0xf] }
 0x39e   : > { %2775 = vmatpush.bf16.msrb.mxu0 %v6458_v50 }
 0x3a1   : > { %v2123_v59 = vpop.f32.mrf.mxu1 }
 0x3a2   : > { %v2124_v19 = vadd.f32 %v8542_v0, %v2123_v59  ;;  %v6454_v59 = vor.u32 %v6944_v27, %v6453_v12 }
 0x3a4   : > { %v2165_v6 = vmax.f32 %v2124_v19, 0.0  ;;  %v6659_v19 = vld [vmem:[%s12155_s11 + $0x1ac] sm:$0xf0]  ;;  %2717 = vmatpush.bf16.msrb.mxu3 %v6454_v59 }
 0x3a6   : > { %v2181_v43 = vpack.c.bf16 %v2165_v6, %v2164_v8  ;;  %v6662_v8 = vor.u32 %v6991_v15, %v6659_v19 }
 0x3a8   : > { %6443 = vmatmul.msk.bf16.gmra.mxu2 %vm1933_vm1, %v2181_v43  ;;  %v6984_v43 = vld [vmem:[%s12155_s11 + $0x15c] sm:$0xf] }
 0x3a9   : > { %v2126_v48 = vpop.f32.mrf.mxu1  ;;  %2884 = vmatpush.bf16.msra.mxu2 %v6662_v8 }
 0x3aa   : > { %v2127_v61 = vadd.f32 %v8542_v0, %v2126_v48  ;;  %v6631_v48 = vld [vmem:[%s12155_s11 + $0x174] sm:$0xf0] }
 0x3ab   : > { %v6634_v17 = vor.u32 %v6984_v43, %v6631_v48  ;;  %v6985_v48 = vld [vmem:[%s12155_s11 + $0x164] sm:$0xf] }
 0x3ac   : > { %v2166_v55 = vmax.f32 %v2127_v61, 0.0  ;;  %v6462_v61 = vor.u32 %v6945_v52, %v6461_v58  ;;  %v6989_v58 = vld [vmem:[%s12155_s11 + $0x180] sm:$0xf0] }
 0x3ad   : > { %2885 = vmatpush.bf16.msra.mxu2 %v6634_v17  ;;  %v6639_v17 = vld [vmem:[%s12155_s11 + $0x17c] sm:$0xf0]  ;;  %v6646_v50 = vor.u32 %v6989_v58, %v6645_v49 }
 0x3ae   : > { %2833 = vmatpush.bf16.msrb.mxu1 %v6462_v61  ;;  %v6642_v47 = vor.u32 %v6985_v48, %v6639_v17  ;;  %v6525_v48 = vld [vmem:[%s12155_s11 + $0x80] sm:$0xf]  ;;  %v6960_v17 = vld [vmem:[%s12155_s11 + $0x98] sm:$0xf0] }
 0x3af   : > { %v6526_v49 = vor.u32 %v6960_v17, %v6525_v48 }
 0x3b1   : > { %v2128_v18 = vpop.f32.mrf.mxu1 }
 0x3b2   : > { %v2129_v38 = vadd.f32 %v8542_v0, %v2128_v18  ;;  %v6606_v18 = vor.u32 %v6977_v40, %v6603_v36  ;;  %v6609_v40 = vld [vmem:[%s12155_s11 + $0x128] sm:$0xf]  ;;  %v6981_v36 = vld [vmem:[%s12155_s11 + $0x140] sm:$0xf0] }
 0x3b4   : > { %v2167_v45 = vmax.f32 %v2129_v38, 0.0  ;;  %2886 = vmatpush.bf16.msra.mxu2 %v6606_v18 }
 0x3b6   : > { %v2182_v60 = vpack.c.bf16 %v2167_v45, %v2166_v55  ;;  %v6970_v45 = vld [vmem:[%s12155_s11 + $0xec] sm:$0xf] }
 0x3b8   : > { %6444 = vmatmul.msk.bf16.gmra.mxu2 %vm1933_vm1, %v2182_v60  ;;  %v6575_v60 = vld [vmem:[%s12155_s11 + $0x104] sm:$0xf0] }
 0x3b9   : > { %v2131_v35 = vpop.f32.mrf.mxu1 }
 0x3ba   : > { %v2132_v53 = vadd.f32 %v8542_v0, %v2131_v35  ;;  %v6578_v35 = vor.u32 %v6970_v45, %v6575_v60 }
 0x3bc   : > { %v2168_v28 = vmax.f32 %v2132_v53, 0.0  ;;  %2887 = vmatpush.bf16.msra.mxu2 %v6578_v35  ;;  %v6963_v53 = vld [vmem:[%s12155_s11 + $0xb4] sm:$0xf]  ;;  %v6978_v35 = vld [vmem:[%s12155_s11 + $0x12c] sm:$0xf] }
 0x3c1   : > { %v2133_v3 = vpop.f32.mrf.mxu1 }
 0x3c2   : > { %v2134_v11 = vadd.f32 %v8542_v0, %v2133_v3  ;;  %v6547_v3 = vld [vmem:[%s12155_s11 + $0xcc] sm:$0xf0] }
 0x3c4   : > { %v2169_v51 = vmax.f32 %v2134_v11, 0.0  ;;  %v6550_v11 = vor.u32 %v6963_v53, %v6547_v3  ;;  %v6982_v53 = vld [vmem:[%s12155_s11 + $0x148] sm:$0xf0] }
 0x3c6   : > { %v2183_v57 = vpack.c.bf16 %v2169_v51, %v2168_v28  ;;  %2888 = vmatpush.bf16.msra.mxu2 %v6550_v11  ;;  %v6665_v51 = vld [vmem:[%s12155_s11 + $0x198] sm:$0xf] }
 0x3c8   : > { %6445 = vmatmul.msk.bf16.gmra.mxu2 %vm1933_vm1, %v2183_v57  ;;  %v6995_v57 = vld [vmem:[%s12155_s11 + $0x1b0] sm:$0xf0] }
 0x3c9   : > { %v2136_v1 = vpop.f32.mrf.mxu1  ;;  %v6666_v25 = vor.u32 %v6995_v57, %v6665_v51 }
 0x3ca   : > { %v2137_v14 = vadd.f32 %v8542_v0, %v2136_v1  ;;  %v6673_v1 = vld [vmem:[%s12155_s11 + $0x1a0] sm:$0xf]  ;;  %2889 = vmatpush.bf16.msra.mxu2 %v6522_v7  ;;  %v6581_v7 = vld [vmem:[%s12155_s11 + $0xf0] sm:$0xf] }
 0x3cb   : > { %2942 = vmatpush.bf16.msra.mxu3 %v6666_v25 }
 0x3cc   : > { %v2170_v54 = vmax.f32 %v2137_v14, 0.0  ;;  %v6670_v14 = vor.u32 %v6992_v10, %v6667_v63  ;;  %v6974_v10 = vld [vmem:[%s12155_s11 + $0x108] sm:$0xf0] }
 0x3cd   : > { %v6582_v63 = vor.u32 %v6974_v10, %v6581_v7 }
 0x3ce   : > { %3000 = vmatpush.bf16.msra.mxu0 %v6670_v14  ;;  %v6971_v14 = vld [vmem:[%s12155_s11 + $0xf4] sm:$0xf] }
 0x3d1   : > { %v2138_v21 = vpop.f32.mrf.mxu1 }
 0x3d2   : > { %v2139_v29 = vadd.f32 %v8542_v0, %v2138_v21  ;;  %v6996_v21 = vld [vmem:[%s12155_s11 + $0x1b8] sm:$0xf0]  ;;  %3001 = vmatpush.bf16.msra.mxu0 %v6642_v47 }
 0x3d4   : > { %v2171_v44 = vmax.f32 %v2139_v29, 0.0  ;;  %v6949_v29 = vld [vmem:[%s12155_s11 + $0x44] sm:$0xf] }
 0x3d6   : > { %v2184_v56 = vpack.c.bf16 %v2171_v44, %v2170_v54  ;;  %v6491_v54 = vld [vmem:[%s12155_s11 + $0x5c] sm:$0xf0] }
 0x3d7   : > { %v6494_v2 = vor.u32 %v6949_v29, %v6491_v54  ;;  %v6589_v54 = vld [vmem:[%s12155_s11 + $0xf8] sm:$0xf] }
 0x3d8   : > { %6446 = vmatmul.msk.bf16.gmra.mxu2 %vm1933_vm1, %v2184_v56  ;;  %v6674_v56 = vor.u32 %v6996_v21, %v6673_v1  ;;  %v6583_v21 = vld [vmem:[%s12155_s11 + $0x10c] sm:$0xf0] }
 0x3d9   : > { %v2141_v34 = vpop.f32.mrf.mxu1  ;;  %2890 = vmatpush.bf16.msra.mxu2 %v6494_v2  ;;  %v6586_v29 = vor.u32 %v6971_v14, %v6583_v21 }
 0x3da   : > { %v2142_v30 = vadd.f32 %v8542_v0, %v2141_v34  ;;  %3058 = vmatpush.bf16.msra.mxu1 %v6674_v56 }
 0x3dc   : > { %v2172_v4 = vmax.f32 %v2142_v30, 0.0 }
 0x3dd   : > { %2891 = vmatpush.bf16.msra.mxu2 %v6466_v24  ;;  %v6553_v24 = vld [vmem:[%s12155_s11 + $0xb8] sm:$0xf] }
 0x3de   : > { %3059 = vmatpush.bf16.msra.mxu1 %v6646_v50 }
 0x3e1   : > { %v2143_v20 = vpop.f32.mrf.mxu1 }
 0x3e2   : > { %v2144_v39 = vadd.f32 %v8542_v0, %v2143_v20 }
 0x3e4   : > { %v2173_v31 = vmax.f32 %v2144_v39, 0.0  ;;  %v8752_v39 = vld [vmem:[%s12154_s10] ss:$0 sm:$0xff] }
 0x3e6   : > { %v2185_v22 = vpack.c.bf16 %v2173_v31, %v2172_v4  ;;  %v6637_v4 = vld [vmem:[%s12155_s11 + $0x160] sm:$0xf]  ;;  %v6988_v31 = vld [vmem:[%s12155_s11 + $0x178] sm:$0xf0] }
 0x3e8   : > { %6447 = vmatmul.msk.bf16.gmra.mxu2 %vm1933_vm1, %v2185_v22  ;;  %v6638_v22 = vor.u32 %v6988_v31, %v6637_v4  ;;  %v6561_v31 = vld [vmem:[%s12155_s11 + $0xc0] sm:$0xf] }
 0x3e9   : > { %v2146_v6 = vpop.f32.mrf.mxu1 }
 0x3ea   : > { %v2147_v16 = vadd.f32 %v8542_v0, %v2146_v6  ;;  %2943 = vmatpush.bf16.msra.mxu3 %v6638_v22  ;;  %v6968_v22 = vld [vmem:[%s12155_s11 + $0xd8] sm:$0xf0] }
 0x3ec   : > { %v2174_v42 = vmax.f32 %v2147_v16, 0.0  ;;  %v6610_v16 = vor.u32 %v6981_v36, %v6609_v40 }
 0x3ee   : > { %2944 = vmatpush.bf16.msra.mxu3 %v6610_v16  ;;  %v6957_v16 = vld [vmem:[%s12155_s11 + $0x84] sm:$0xf] }
 0x3f1   : > { %v2148_v38 = vpop.f32.mrf.mxu1 }
 0x3f2   : > { %v2149_v55 = vadd.f32 %v8542_v0, %v2148_v38  ;;  %2945 = vmatpush.bf16.msra.mxu3 %v6582_v63 }
 0x3f4   : > { %v2175_v41 = vmax.f32 %v2149_v55, 0.0 }
 0x3f6   : > { %v2186_v32 = vpack.c.bf16 %v2175_v41, %v2174_v42  ;;  %v6611_v42 = vld [vmem:[%s12155_s11 + $0x144] sm:$0xf0]  ;;  %v6617_v41 = vld [vmem:[%s12155_s11 + $0x130] sm:$0xf] }
 0x3f7   : > { %v6618_v3 = vor.u32 %v6982_v53, %v6617_v41  ;;  %v6953_v41 = vld [vmem:[%s12155_s11 + $0x60] sm:$0xf0] }
 0x3f8   : > { %6448 = vmatmul.msk.bf16.gmra.mxu2 %vm1933_vm1, %v2186_v32  ;;  %v6614_v32 = vor.u32 %v6978_v35, %v6611_v42  ;;  %v6497_v42 = vld [vmem:[%s12155_s11 + $0x48] sm:$0xf] }
 0x3f9   : > { %v2151_v28 = vpop.f32.mrf.mxu1  ;;  %3060 = vmatpush.bf16.msra.mxu1 %v6618_v3 }
 0x3fa   : > { %v2152_v44 = vadd.f32 %v8542_v0, %v2151_v28  ;;  %3002 = vmatpush.bf16.msra.mxu0 %v6614_v32  ;;  %v6498_v32 = vor.u32 %v6953_v41, %v6497_v42 }
 0x3fc   : > { %v2176_v23 = vmax.f32 %v2152_v44, 0.0  ;;  %v6975_v44 = vld [vmem:[%s12155_s11 + $0x110] sm:$0xf0] }
 0x3fd   : > { %v6590_v56 = vor.u32 %v6975_v44, %v6589_v54  ;;  %v6950_v54 = vld [vmem:[%s12155_s11 + $0x4c] sm:$0xf]  ;;  %v6499_v44 = vld [vmem:[%s12155_s11 + $0x64] sm:$0xf0] }
 0x3fe   : > { %3003 = vmatpush.bf16.msra.mxu0 %v6586_v29  ;;  %v8917_v29 = vld [vmem:[%s12156_s12] sm:$0x7f] }
 0x3ff   : > { %3061 = vmatpush.bf16.msra.mxu1 %v6590_v56  ;;  %v6505_v56 = vld [vmem:[%s12155_s11 + $0x50] sm:$0xf] }
 0x401   : > { %v2153_v26 = vpop.f32.mrf.mxu1 }
 0x402   : > { %v2154_v9 = vadd.f32 %v8542_v0, %v2153_v26 }
 0x404   : > { %v2177_v34 = vmax.f32 %v2154_v9, 0.0 }
 0x406   : > { %v2187_v62 = vpack.c.bf16 %v2177_v34, %v2176_v23 }
 0x408   : > { %6449 = vmatmul.msk.bf16.gmra.mxu2 %vm1933_vm1, %v2187_v62  ;;  %v6967_v62 = vld [vmem:[%s12155_s11 + $0xd0] sm:$0xf0] }
 0x409   : > { %v2156_v13 = vpop.f32.mrf.mxu1 }
 0x40a   : > { %v2157_v20 = vadd.f32 %v8542_v0, %v2156_v13  ;;  %v6554_v13 = vor.u32 %v6967_v62, %v6553_v24  ;;  %v8934_v24 = vperm.slane %v8917_v29, 1  ;;  %v8937_v62 = vperm.slane %v8917_v29, 2 }
 0x40b   : > { %v2264_v30 = vpop.f32.mrf.mxu2 }
 0x40c   : > { %v2178_v27 = vmax.f32 %v2157_v20, 0.0  ;;  %v2265_v15 = vadd.f32 %v8752_v39, %v2264_v30  ;;  %2946 = vmatpush.bf16.msra.mxu3 %v6554_v13  ;;  %v6964_v30 = vld [vmem:[%s12155_s11 + $0xbc] sm:$0xf]  ;;  %v6555_v20 = vld [vmem:[%s12155_s11 + $0xd4] sm:$0xf0] }
 0x40d   : > { %v6558_v4 = vor.u32 %v6964_v30, %v6555_v20 }
 0x40e   : > { %v2188_v19 = vpack.c.bf16 %v2178_v27, %v2178_v27  ;;  %v2313_v8 = vmax.f32 %v2265_v15, 0.0 }
 0x40f   : > { %3004 = vmatpush.bf16.msra.mxu0 %v6558_v4 }
 0x410   : > { %2947 = vmatpush.bf16.msra.mxu3 %v6526_v49 }
 0x411   : > { %v2158_v12 = vpop.f32.mrf.mxu1 }
 0x412   : > { %v6562_v12 = vor.u32 %v6968_v22, %v6561_v31 }
 0x413   : > { %v2266_v0 = vpop.f32.mrf.mxu2 }
 0x414   : > { %v2267_v59 = vadd.f32 %v8752_v39, %v2266_v0  ;;  %3062 = vmatpush.bf16.msra.mxu1 %v6562_v12  ;;  %2948 = vmatpush.bf16.msra.mxu3 %v6498_v32 }
 0x416   : > { %v2314_v6 = vmax.f32 %v2267_v59, 0.0 }
 0x418   : > { %v8762_v43 = vpack.c.bf16 %v2314_v6, %v2313_v8  ;;  %6450 = vmatmul.msk.bf16.gmra.mxu2 %vm1933_vm1, %v2188_v19 }
 0x41a   : > { %2718 = vmatmul.bf16.vlgmr.msrb.gmra.mxu3 %v8762_v43  ;;  %2776 = vmatmul.bf16.vlgmr.msrb.gmra.mxu0 %v8762_v43 }
 0x41b   : > { %2834 = vmatmul.bf16.vlgmr.msrb.gmra.mxu1 %v8762_v43  ;;  %v2269_v52 = vpop.f32.mrf.mxu2 }
 0x41c   : > { %v2270_v61 = vadd.f32 %v8752_v39, %v2269_v52 }
 0x41e   : > { %v2315_v55 = vmax.f32 %v2270_v61, 0.0  ;;  %v6527_v61 = vld [vmem:[%s12155_s11 + $0x9c] sm:$0xf0] }
 0x423   : > { %v2271_v18 = vpop.f32.mrf.mxu2 }
 0x424   : > { %v2272_v38 = vadd.f32 %v8752_v39, %v2271_v18  ;;  %v6533_v18 = vld [vmem:[%s12155_s11 + $0x88] sm:$0xf] }
 0x426   : > { %v2316_v45 = vmax.f32 %v2272_v38, 0.0  ;;  %v6530_v38 = vor.u32 %v6957_v16, %v6527_v61 }
 0x428   : > { %v8788_v60 = vpack.c.bf16 %v2316_v45, %v2315_v55  ;;  %2892 = vmatmul.bf16.vlgmr.msra.gmra.mxu2 %v8762_v43  ;;  %v6961_v55 = vld [vmem:[%s12155_s11 + $0xa0] sm:$0xf0]  ;;  %3005 = vmatpush.bf16.msra.mxu0 %v6530_v38 }
 0x429   : > { %v6534_v45 = vor.u32 %v6961_v55, %v6533_v18 }
 0x42a   : > { %2723 = vmatmul.bf16.gmra.mxu3 %v8788_v60  ;;  %2781 = vmatmul.bf16.gmra.mxu0 %v8788_v60 }
 0x42b   : > { %2839 = vmatmul.bf16.gmra.mxu1 %v8788_v60  ;;  %v2274_v11 = vpop.f32.mrf.mxu2 }
 0x42c   : > { %v2275_v28 = vadd.f32 %v8752_v39, %v2274_v11  ;;  %3063 = vmatpush.bf16.msra.mxu1 %v6534_v45 }
 0x42e   : > { %v2317_v37 = vmax.f32 %v2275_v28, 0.0 }
 0x433   : > { %v2276_v51 = vpop.f32.mrf.mxu2 }
 0x434   : > { %v2277_v57 = vadd.f32 %v8752_v39, %v2276_v51 }
 0x436   : > { %v2318_v25 = vmax.f32 %v2277_v57, 0.0 }
 0x438   : > { %v8808_v5 = vpack.c.bf16 %v2318_v25, %v2317_v37  ;;  %2897 = vmatmul.bf16.gmra.mxu2 %v8788_v60 }
 0x43a   : > { %2728 = vmatmul.bf16.gmra.mxu3 %v8808_v5  ;;  %2786 = vmatmul.bf16.gmra.mxu0 %v8808_v5 }
 0x43b   : > { %2844 = vmatmul.bf16.gmra.mxu1 %v8808_v5  ;;  %v2279_v1 = vpop.f32.mrf.mxu2 }
 0x43c   : > { %v2280_v2 = vadd.f32 %v8752_v39, %v2279_v1 }
 0x43e   : > { %v2319_v46 = vmax.f32 %v2280_v2, 0.0 }
 0x443   : > { %v2281_v26 = vpop.f32.mrf.mxu2 }
 0x444   : > { %v2282_v9 = vadd.f32 %v8752_v39, %v2281_v26  ;;  %v6502_v26 = vor.u32 %v6950_v54, %v6499_v44 }
 0x446   : > { %v2320_v33 = vmax.f32 %v2282_v9, 0.0  ;;  %v6954_v9 = vld [vmem:[%s12155_s11 + $0x68] sm:$0xf0]  ;;  %3006 = vmatpush.bf16.msra.mxu0 %v6502_v26 }
 0x448   : > { %v8834_v23 = vpack.c.bf16 %v2320_v33, %v2319_v46  ;;  %2902 = vmatmul.bf16.gmra.mxu2 %v8808_v5  ;;  %v6506_v33 = vor.u32 %v6954_v9, %v6505_v56 }
 0x44a   : > { %2733 = vmatmul.bf16.gmra.mxu3 %v8834_v23  ;;  %2791 = vmatmul.bf16.gmra.mxu0 %v8834_v23 }
 0x44b   : > { %2849 = vmatmul.bf16.gmra.mxu1 %v8834_v23  ;;  %v2284_v34 = vpop.f32.mrf.mxu2 }
 0x44c   : > { %v2285_v27 = vadd.f32 %v8752_v39, %v2284_v34  ;;  %3064 = vmatpush.bf16.msra.mxu1 %v6506_v33  ;;  %v8997_v33 = vperm.slane %v8917_v29, 3 }
 0x44e   : > { %v2321_v59 = vmax.f32 %v2285_v27, 0.0 }
 0x453   : > { %v2286_v15 = vpop.f32.mrf.mxu2 }
 0x454   : > { %v2287_v0 = vadd.f32 %v8752_v39, %v2286_v15  ;;  %v8947_v15 = vperm.slane %v8917_v29, 0 }
 0x456   : > { %v2322_v19 = vmax.f32 %v2287_v0, 0.0 }
 0x458   : > { %v8860_v8 = vpack.c.bf16 %v2322_v19, %v2321_v59  ;;  %2907 = vmatmul.bf16.gmra.mxu2 %v8834_v23  ;;  %v6469_v59 = vld [vmem:[%s12155_s11 + $0x10] sm:$0xf]  ;;  %v6946_v19 = vld [vmem:[%s12155_s11 + $0x28] sm:$0xf0] }
 0x459   : > { %v6470_v48 = vor.u32 %v6946_v19, %v6469_v59 }
 0x45a   : > { %2738 = vmatmul.bf16.gmra.mxu3 %v8860_v8  ;;  %2796 = vmatmul.bf16.gmra.mxu0 %v8860_v8 }
 0x45b   : > { %2854 = vmatmul.bf16.gmra.mxu1 %v8860_v8  ;;  %v2289_v6 = vpop.f32.mrf.mxu2  ;;  %2949 = vmatpush.bf16.msra.mxu3 %v6470_v48 }
 0x45c   : > { %v2290_v47 = vadd.f32 %v8752_v39, %v2289_v6 }
 0x45e   : > { %v2323_v52 = vmax.f32 %v2290_v47, 0.0 }
 0x463   : > { %v2291_v58 = vpop.f32.mrf.mxu2 }
 0x464   : > { %v2292_v50 = vadd.f32 %v8752_v39, %v2291_v58 }
 0x466   : > { %v2324_v40 = vmax.f32 %v2292_v50, 0.0  ;;  %v6943_v50 = vld [vmem:[%s12155_s11 + $0x14] sm:$0xf] }
 0x468   : > { %v8874_v36 = vpack.c.bf16 %v2324_v40, %v2323_v52  ;;  %2912 = vmatmul.bf16.gmra.mxu2 %v8860_v8  ;;  %v6471_v52 = vld [vmem:[%s12155_s11 + $0x2c] sm:$0xf0]  ;;  %v6477_v40 = vld [vmem:[%s12155_s11 + $0x18] sm:$0xf] }
 0x469   : > { %v6474_v38 = vor.u32 %v6943_v50, %v6471_v52 }
 0x46a   : > { %2743 = vmatmul.bf16.gmra.mxu3 %v8874_v36  ;;  %2801 = vmatmul.bf16.gmra.mxu0 %v8874_v36 }
 0x46b   : > { %2859 = vmatmul.bf16.gmra.mxu1 %v8874_v36  ;;  %v2294_v35 = vpop.f32.mrf.mxu2  ;;  %3007 = vmatpush.bf16.msra.mxu0 %v6474_v38 }
 0x46c   : > { %v2295_v53 = vadd.f32 %v8752_v39, %v2294_v35 }
 0x46e   : > { %v2325_v28 = vmax.f32 %v2295_v53, 0.0 }
 0x473   : > { %v2296_v3 = vpop.f32.mrf.mxu2 }
 0x474   : > { %v2297_v11 = vadd.f32 %v8752_v39, %v2296_v3 }
 0x476   : > { %v2326_v51 = vmax.f32 %v2297_v11, 0.0 }
 0x478   : > { %v8900_v57 = vpack.c.bf16 %v2326_v51, %v2325_v28  ;;  %2917 = vmatmul.bf16.gmra.mxu2 %v8874_v36 }
 0x47a   : > { %2748 = vmatmul.bf16.gmra.mxu3 %v8900_v57  ;;  %2806 = vmatmul.bf16.gmra.mxu0 %v8900_v57 }
 0x47b   : > { %2864 = vmatmul.bf16.gmra.mxu1 %v8900_v57  ;;  %v2299_v37 = vpop.f32.mrf.mxu2 }
 0x47c   : > { %v2300_v25 = vadd.f32 %v8752_v39, %v2299_v37 }
 0x47e   : > { %v2327_v63 = vmax.f32 %v2300_v25, 0.0 }
 0x483   : > { %v2301_v7 = vpop.f32.mrf.mxu2 }
 0x484   : > { %v2302_v10 = vadd.f32 %v8752_v39, %v2301_v7 }
 0x486   : > { %v2328_v1 = vmax.f32 %v2302_v10, 0.0 }
 0x488   : > { %v8908_v14 = vpack.c.bf16 %v2328_v1, %v2327_v63  ;;  %2922 = vmatmul.bf16.gmra.mxu2 %v8900_v57 }
 0x48a   : > { %2753 = vmatmul.bf16.gmra.mxu3 %v8908_v14  ;;  %2811 = vmatmul.bf16.gmra.mxu0 %v8908_v14 }
 0x48b   : > { %2869 = vmatmul.bf16.gmra.mxu1 %v8908_v14  ;;  %v2304_v21 = vpop.f32.mrf.mxu2 }
 0x48c   : > { %v2305_v2 = vadd.f32 %v8752_v39, %v2304_v21 }
 0x48e   : > { %v2329_v13 = vmax.f32 %v2305_v2, 0.0 }
 0x493   : > { %v2306_v46 = vpop.f32.mrf.mxu2 }
 0x494   : > { %v2307_v34 = vadd.f32 %v8752_v39, %v2306_v46 }
 0x496   : > { %v2330_v30 = vmax.f32 %v2307_v34, 0.0 }
 0x497   : > { %v2777_v20 = vpop.f32.mrf.mxu0 }
 0x498   : > { %v8939_v4 = vpack.c.bf16 %v2330_v30, %v2329_v13  ;;  %v2778_v31 = vadd.f32 %v2777_v20, %v8934_v24  ;;  %v2835_v22 = vpop.f32.mrf.mxu1  ;;  %2927 = vmatmul.bf16.gmra.mxu2 %v8908_v14 }
 0x499   : > { %v2836_v12 = vadd.f32 %v2835_v22, %v8937_v62 }
 0x49a   : > { %v6676_v27 = vmul.f32 -1.442695, %v2778_v31  ;;  %2758 = vmatmul.bf16.gmra.mxu3 %v8939_v4  ;;  %2816 = vmatmul.bf16.gmra.mxu0 %v8939_v4 }
 0x49b   : > { %2874 = vmatmul.bf16.gmra.mxu1 %v8939_v4  ;;  %v2309_v0 = vpop.f32.mrf.mxu2  ;;  %v6677_v6 = vmul.f32 -1.442695, %v2836_v12 }
 0x49c   : > { %7074 = vpow2.f32 %v6676_v27  ;;  %v2310_v47 = vadd.f32 %v8752_v39, %v2309_v0  ;;  %v6947_v39 = vld [vmem:[%s12155_s11 + $0x30] sm:$0xf0] }
 0x49d   : > { %v2719_v17 = vpop.f32.mrf.mxu3  ;;  %7076 = vpow2.f32 %v6677_v6  ;;  %v6478_v55 = vor.u32 %v6947_v39, %v6477_v40 }
 0x49e   : > { %v2720_v49 = vadd.f32 %v2719_v17, %v8947_v15  ;;  %v2331_v53 = vmax.f32 %v2310_v47, 0.0 }
 0x49f   : > { %v2779_v58 = vpop.f32.mrf.mxu0  ;;  %3065 = vmatpush.bf16.msra.mxu1 %v6478_v55 }
 0x4a0   : > { %v6675_v16 = vmul.f32 -1.442695, %v2720_v49  ;;  %v2780_v61 = vadd.f32 %v2779_v58, %v8934_v24  ;;  %v2837_v18 = vpop.f32.mrf.mxu1  ;;  %v8976_v7 = vpack.c.bf16 %v2331_v53, %v2331_v53 }
 0x4a1   : > { %v2838_v42 = vadd.f32 %v2837_v18, %v8937_v62 }
 0x4a2   : > { %v7075_v45 = vpop.eup %7074  ;;  %7078 = vpow2.f32 %v6675_v16  ;;  %v6683_v35 = vmul.f32 -1.442695, %v2780_v61 }
 0x4a3   : > { %v8972_v41 = vadd.f32 1.0, %v7075_v45  ;;  %v2311_v32 = vpop.f32.mrf.mxu2  ;;  %v7077_v11 = vpop.eup %7076  ;;  %v6684_v28 = vmul.f32 -1.442695, %v2838_v42 }
 0x4a4   : > { %7080 = vpow2.f32 %v6683_v35  ;;  %v8980_v63 = vadd.f32 1.0, %v7077_v11 }
 0x4a5   : > { %7082 = vrcp.f32 %v8972_v41  ;;  %v2721_v3 = vpop.f32.mrf.mxu3  ;;  %vm3668_vm3 = vweird.f32 %v8972_v41  ;;  %v3672_v29 = vand.u32 2147483647, %v8972_v41  ;;  %v3674_v19 = vand.u32 2147483648, %v8972_v41 }
 0x4a6   : > { %v2722_v51 = vadd.f32 %v2721_v3, %v8947_v15  ;;  %7084 = vpow2.f32 %v6684_v28 }
 0x4a7   : > { %v2782_v37 = vpop.f32.mrf.mxu0  ;;  %v3675_v42 = vor.u32 1.1754944e-38, %v3674_v19  ;;  %vm3673_vm9 = vcmp.eq.f32.partialorder %v3672_v29, 8.507059e+37 }
 0x4a8   : > { %v7079_v25 = vpop.eup %7078  ;;  %v2783_v10 = vadd.f32 %v2782_v37, %v8934_v24  ;;  %2932 = vmatmul.bf16.gmra.mxu2 %v8939_v4  ;;  %v6682_v21 = vmul.f32 -1.442695, %v2722_v51  ;;  %v2840_v44 = vpop.f32.mrf.mxu1 }
 0x4a9   : > { %v8982_v1 = vadd.f32 1.0, %v7079_v25  ;;  %v2841_v46 = vadd.f32 %v2840_v44, %v8937_v62  ;;  %v3689_v44 = vand.u32 2147483648, %v8980_v63 }
 0x4aa   : > { %v7081_v54 = vpop.eup %7080  ;;  %2763 = vmatmul.bf16.gmra.mxu3 %v8976_v7  ;;  %2821 = vmatmul.bf16.gmra.mxu0 %v8976_v7  ;;  %v6690_v2 = vmul.f32 -1.442695, %v2783_v10 }
 0x4ab   : > { %v8986_v56 = vpop.eup %7082  ;;  %7086 = vrcp.f32 %v8982_v1  ;;  %2879 = vmatmul.bf16.gmra.mxu1 %v8976_v7  ;;  %v8992_v9 = vadd.f32 1.0, %v7081_v54  ;;  %v2893_v13 = vpop.f32.mrf.mxu2  ;;  %v6691_v22 = vmul.f32 -1.442695, %v2841_v46  ;;  %v3659_v50 = vand.u32 2147483648, %v8982_v1 }
 0x4ac   : > { %v3664_v26 = vmul.f32 %v8986_v56, %v8972_v41  ;;  %7088 = vpow2.f32 %v6682_v21  ;;  %v7085_v30 = vpop.eup %7084  ;;  %v2894_v12 = vadd.f32 %v2893_v13, %v8997_v33  ;;  %vm3669_vm4 = vweird.f32 %v8986_v56 }
 0x4ad   : > { %7090 = vrcp.f32 %v8980_v63  ;;  %v9014_v47 = vadd.f32 1.0, %v7085_v30  ;;  %v3657_v61 = vand.u32 2147483647, %v8982_v1  ;;  %vm9023_vm6 = vmor %vm3668_vm3, %vm3669_vm4  ;;  %vm3653_vm7 = vweird.f32 %v8982_v1  ;;  %v2724_v32 = vpop.f32.mrf.mxu3 }
 0x4ae   : > { %v3665_v34 = vsub.f32 1.0, %v3664_v26  ;;  %7092 = vrcp.f32 %v8992_v9  ;;  %v6678_v40 = vmul.f32 -1.442695, %v2894_v12  ;;  %v3660_v41 = vor.u32 1.1754944e-38, %v3659_v50 }
 0x4af   : > { %7094 = vpow2.f32 %v6690_v2  ;;  %vm3658_vm10 = vcmp.eq.f32.partialorder %v3657_v61, 8.507059e+37  ;;  %v2784_v37 = vpop.f32.mrf.mxu0  ;;  %v2725_v21 = vadd.f32 %v2724_v32, %v8947_v15  ;;  %v3687_v54 = vand.u32 2147483647, %v8980_v63 }
 0x4b0   : > { %v3666_v20 = vmul.f32 %v8986_v56, %v3665_v34  ;;  %7096 = vpow2.f32 %v6691_v22  ;;  %vm3773_vm12 = vweird.f32 %v8992_v9  ;;  %vm3683_vm4 = vweird.f32 %v8980_v63 }
 0x4b1   : > { %v7087_v31 = vpop.eup %7086 }
 0x4b2   : > { %v7089_v27 = vpop.eup %7088  ;;  %v3649_v0 = vmul.f32 %v7087_v31, %v8982_v1  ;;  %v3667_v17 = vadd.f32 %v8986_v56, %v3666_v20  ;;  %vm3654_vm5 = vweird.f32 %v7087_v31 }
 0x4b3   : > { %v9003_v59 = vpop.eup %7090  ;;  %v9008_v6 = vadd.f32 1.0, %v7089_v27  ;;  %vm3655_vm8 = vmor %vm3653_vm7, %vm3654_vm5  ;;  %v6689_v27 = vmul.f32 -1.442695, %v2725_v21  ;;  %vm3788_vm7 = vweird.f32 %v9014_v47 }
 0x4b4   : > { %v9010_v48 = vpop.eup %7092  ;;  %v3650_v49 = vsub.f32 1.0, %v3649_v0  ;;  %v3679_v38 = vmul.f32 %v9003_v59, %v8980_v63  ;;  %v3671_v55 = vsel %vm9023_vm6, %v8986_v56, %v3667_v17  ;;  %v3779_v56 = vand.u32 2147483648, %v8992_v9 }
 0x4b5   : > { %v7095_v58 = vpop.eup %7094  ;;  %v3769_v52 = vmul.f32 %v9010_v48, %v8992_v9  ;;  %7098 = vrcp.f32 %v9008_v6  ;;  %v3676_v11 = vsel %vm3673_vm9, %v3675_v42, %v3671_v55  ;;  %vm3684_vm11 = vweird.f32 %v9003_v59 }
 0x4b6   : > { %v3651_v16 = vmul.f32 %v7087_v31, %v3650_v49  ;;  %7100 = vrcp.f32 %v9014_v47  ;;  %v9034_v35 = vadd.f32 1.0, %v7095_v58  ;;  %v7097_v3 = vpop.eup %7096  ;;  %v3680_v10 = vsub.f32 1.0, %v3679_v38  ;;  %v2842_v49 = vpop.f32.mrf.mxu1  ;;  %vm9097_vm5 = vmor %vm3683_vm4, %vm3684_vm11 }
 0x4b7   : > { %v3770_v39 = vsub.f32 1.0, %v3769_v52  ;;  %7102 = vpow2.f32 %v6678_v40  ;;  %v3764_v46 = vand.u32 2147483648, %v9008_v6  ;;  %vm3774_vm13 = vweird.f32 %v9010_v48  ;;  %v2895_v58 = vpop.f32.mrf.mxu2 }
 0x4b8   : > { %v3652_v45 = vadd.f32 %v7087_v31, %v3651_v16  ;;  %2937 = vmatmul.bf16.gmra.mxu2 %v8976_v7  ;;  %7104 = vrcp.f32 %v9034_v35  ;;  %v9060_v20 = vadd.f32 1.0, %v7097_v3  ;;  %v3681_v22 = vmul.f32 %v9003_v59, %v3680_v10  ;;  %vm9071_vm15 = vmor %vm3773_vm12, %vm3774_vm13 }
 0x4b9   : > { %v3771_v51 = vmul.f32 %v9010_v48, %v3770_v39  ;;  %v2785_v0 = vadd.f32 %v2784_v37, %v8934_v24  ;;  %v3780_v29 = vor.u32 1.1754944e-38, %v3779_v56  ;;  %v3762_v17 = vand.u32 2147483647, %v9008_v6 }
 0x4ba   : > { %v3656_v53 = vsel %vm3655_vm8, %v7087_v31, %v3652_v45  ;;  %2950 = vmatmul.bf16.vlgmr.msra.gmra.mxu3 %v8762_v43  ;;  %3008 = vmatmul.bf16.vlgmr.msra.gmra.mxu0 %v8762_v43  ;;  %vm3758_vm0 = vweird.f32 %v9008_v6  ;;  %v3765_v40 = vor.u32 1.1754944e-38, %v3764_v46  ;;  %v2843_v38 = vadd.f32 %v2842_v49, %v8937_v62  ;;  %v2787_v45 = vpop.f32.mrf.mxu0 }
 0x4bb   : > { %v3661_v28 = vsel %vm3658_vm10, %v3660_v41, %v3656_v53  ;;  %3066 = vmatmul.bf16.vlgmr.msra.gmra.mxu1 %v8762_v43  ;;  %v7099_v25 = vpop.eup %7098  ;;  %v3777_v43 = vand.u32 2147483647, %v8992_v9  ;;  %v3772_v13 = vadd.f32 %v9010_v48, %v3771_v51  ;;  %v6697_v18 = vmul.f32 -1.442695, %v2785_v0 }
 0x4bc   : > { %v5643_v1 = vpack.c.bf16 %v3676_v11, %v3661_v28  ;;  %v3754_v2 = vmul.f32 %v7099_v25, %v9008_v6  ;;  %v9047_v26 = vpop.eup %7100  ;;  %vm3759_vm14 = vweird.f32 %v7099_v25  ;;  %v2896_v6 = vadd.f32 %v2895_v58, %v8997_v33 }
 0x4bd   : > { %v7103_v34 = vpop.eup %7102  ;;  %v3784_v52 = vmul.f32 %v9047_v26, %v9014_v47  ;;  %v3776_v16 = vsel %vm9071_vm15, %v9010_v48, %v3772_v13  ;;  %vm3760_vm1 = vmor %vm3758_vm0, %vm3759_vm14  ;;  %v9088_v39 = vadd.f32 %v9003_v59, %v3681_v22  ;;  %vm3778_vm2 = vcmp.eq.f32.partialorder %v3777_v43, 8.507059e+37  ;;  %v2726_v48 = vpop.f32.mrf.mxu3 }
 0x4be   : > { %5719 = vst [vmem:[%s9052_s14] sm:$0xff] %v5643_v1  ;;  %v3755_v30 = vsub.f32 1.0, %v3754_v2  ;;  %v9062_v31 = vpop.eup %7104  ;;  %v9065_v12 = vadd.f32 1.0, %v7103_v34  ;;  %vm3763_vm3 = vcmp.eq.f32.partialorder %v3762_v17, 8.507059e+37  ;;  %v3781_v42 = vsel %vm3778_vm2, %v3780_v29, %v3776_v16 }
 0x4bf   : > { %v3874_v9 = vmul.f32 %v9062_v31, %v9034_v35  ;;  %v3785_v41 = vsub.f32 1.0, %v3784_v52  ;;  %v6698_v3 = vmul.f32 -1.442695, %v2843_v38  ;;  %v6685_v51 = vmul.f32 -1.442695, %v2896_v6 }
 0x4c0   : > { %v3756_v19 = vmul.f32 %v7099_v25, %v3755_v30  ;;  %7106 = vrcp.f32 %v9065_v12  ;;  %v2727_v37 = vadd.f32 %v2726_v48, %v8947_v15  ;;  %v2788_v10 = vadd.f32 %v2787_v45, %v8934_v24 }
 0x4c1   : > { %7108 = vrcp.f32 %v9060_v20  ;;  %v3875_v28 = vsub.f32 1.0, %v3874_v9  ;;  %vm9101_vm6 = vcmp.eq.f32.partialorder %v3687_v54, 8.507059e+37  ;;  %v3690_v63 = vor.u32 1.1754944e-38, %v3689_v44 }
 0x4c2   : > { %v3757_v61 = vadd.f32 %v7099_v25, %v3756_v19  ;;  %7110 = vpow2.f32 %v6689_v27  ;;  %v3792_v56 = vand.u32 2147483647, %v9014_v47  ;;  %v3794_v2 = vand.u32 2147483648, %v9014_v47  ;;  %v2845_v27 = vpop.f32.mrf.mxu1 }
 0x4c3   : > { %7112 = vpow2.f32 %v6697_v18  ;;  %v3686_v34 = vsel %vm9097_vm5, %v9003_v59, %v9088_v39  ;;  %v3786_v13 = vmul.f32 %v9047_v26, %v3785_v41  ;;  %v6696_v54 = vmul.f32 -1.442695, %v2727_v37 }
 0x4c4   : > { %v3761_v55 = vsel %vm3760_vm1, %v7099_v25, %v3757_v61  ;;  %7114 = vpow2.f32 %v6698_v3  ;;  %v6704_v22 = vmul.f32 -1.442695, %v2788_v10  ;;  %v3876_v59 = vmul.f32 %v9062_v31, %v3875_v28 }
 0x4c5   : > { %v3766_v32 = vsel %vm3763_vm3, %v3765_v40, %v3761_v55  ;;  %7116 = vpow2.f32 %v6685_v51  ;;  %v3702_v29 = vand.u32 2147483647, %v9065_v12  ;;  %v3704_v19 = vand.u32 2147483648, %v9065_v12  ;;  %v2729_v21 = vpop.f32.mrf.mxu3 }
 0x4c6   : > { %v5647_v53 = vpack.c.bf16 %v3781_v42, %v3766_v32  ;;  %v7107_v11 = vpop.eup %7106  ;;  %7118 = vpow2.f32 %v6696_v54  ;;  %vm3789_vm9 = vweird.f32 %v9047_v26  ;;  %vm9127_vm10 = vcmp.eq.f32.partialorder %v3792_v56, 8.507059e+37  ;;  %v2898_v32 = vpop.f32.mrf.mxu2 }
 0x4c7   : > { %v9093_v25 = vpop.eup %7108  ;;  %v3694_v43 = vmul.f32 %v7107_v11, %v9065_v12  ;;  %vm3699_vm8 = vweird.f32 %v7107_v11  ;;  %v2846_v52 = vadd.f32 %v2845_v27, %v8937_v62  ;;  %v3884_v40 = vand.u32 2147483648, %v9034_v35  ;;  %vm9149_vm15 = vmor %vm3788_vm7, %vm3789_vm9 }
 0x4c8   : > { %5724 = vst [vmem:[%s9052_s14 + $0x1c] sm:$0xff] %v5647_v53  ;;  %v7111_v46 = vpop.eup %7110  ;;  %v3889_v17 = vmul.f32 %v9093_v25, %v9060_v20  ;;  %vm3698_vm11 = vweird.f32 %v9065_v12  ;;  %v3787_v9 = vadd.f32 %v9047_v26, %v3786_v13  ;;  %vm3879_vm12 = vweird.f32 %v9062_v31 }
 0x4c9   : > { %v3695_v44 = vsub.f32 1.0, %v3694_v43  ;;  %v9117_v30 = vadd.f32 1.0, %v7111_v46  ;;  %v7113_v0 = vpop.eup %7112  ;;  %vm3700_vm13 = vmor %vm3698_vm11, %vm3699_vm8  ;;  %v3705_v18 = vor.u32 1.1754944e-38, %v3704_v19  ;;  %v3877_v6 = vadd.f32 %v9062_v31, %v3876_v59 }
 0x4ca   : > { %2955 = vmatmul.bf16.gmra.mxu3 %v8788_v60  ;;  %3013 = vmatmul.bf16.gmra.mxu0 %v8788_v60  ;;  %v9132_v50 = vadd.f32 1.0, %v7113_v0  ;;  %v7115_v61 = vpop.eup %7114  ;;  %v3890_v39 = vsub.f32 1.0, %v3889_v17  ;;  %vm3703_vm14 = vcmp.eq.f32.partialorder %v3702_v29, 8.507059e+37  ;;  %v3691_v12 = vsel %vm9101_vm6, %v3690_v63, %v3686_v34 }
 0x4cb   : > { %3071 = vmatmul.bf16.gmra.mxu1 %v8788_v60  ;;  %v3696_v49 = vmul.f32 %v7107_v11, %v3695_v44  ;;  %7120 = vrcp.f32 %v9117_v30  ;;  %v3882_v60 = vand.u32 2147483647, %v9034_v35  ;;  %v7117_v38 = vpop.eup %7116  ;;  %v6705_v41 = vmul.f32 -1.442695, %v2846_v52 }
 0x4cc   : > { %7122 = vpow2.f32 %v6704_v22  ;;  %v7119_v48 = vpop.eup %7118  ;;  %v9143_v42 = vadd.f32 1.0, %v7117_v38  ;;  %vm3878_vm0 = vweird.f32 %v9034_v35  ;;  %v3791_v37 = vsel %vm9149_vm15, %v9047_v26, %v3787_v9 }
 0x4cd   : > { %v3697_v16 = vadd.f32 %v7107_v11, %v3696_v49  ;;  %7124 = vrcp.f32 %v9132_v50  ;;  %vm9154_vm1 = vcmp.eq.f32.partialorder %v3882_v60, 8.507059e+37  ;;  %vm9163_vm2 = vmor %vm3878_vm0, %vm3879_vm12  ;;  %v3885_v10 = vor.u32 1.1754944e-38, %v3884_v40 }
 0x4ce   : > { %v3897_v1 = vand.u32 2147483647, %v9060_v20  ;;  %v3881_v56 = vsel %vm9163_vm2, %v9062_v31, %v3877_v6  ;;  %7126 = vrcp.f32 %v9143_v42  ;;  %v2899_v26 = vadd.f32 %v2898_v32, %v8997_v33 }
 0x4cf   : > { %v3701_v55 = vsel %vm3700_vm13, %v7107_v11, %v3697_v16  ;;  %v3795_v11 = vor.u32 1.1754944e-38, %v3794_v2  ;;  %v3891_v2 = vmul.f32 %v9093_v25, %v3890_v39  ;;  %v9178_v34 = vadd.f32 1.0, %v7115_v61  ;;  %v2789_v61 = vpop.f32.mrf.mxu0 }
 0x4d0   : > { %v3706_v45 = vsel %vm3703_vm14, %v3705_v18, %v3701_v55  ;;  %v9180_v13 = vadd.f32 1.0, %v7119_v48  ;;  %7128 = vpow2.f32 %v6705_v41  ;;  %v3869_v31 = vand.u32 2147483648, %v9117_v30 }
 0x4d1   : > { %v7121_v53 = vpop.eup %7120  ;;  %v5644_v51 = vpack.c.bf16 %v3706_v45, %v3691_v12  ;;  %v9184_v54 = vsel %vm9127_vm10, %v3795_v11, %v3791_v37  ;;  %v2730_v22 = vadd.f32 %v2729_v21, %v8947_v15  ;;  %v3867_v0 = vand.u32 2147483647, %v9117_v30 }
 0x4d2   : > { %v3859_v35 = vmul.f32 %v7121_v53, %v9117_v30  ;;  %v7123_v63 = vpop.eup %7122  ;;  %vm3864_vm3 = vweird.f32 %v7121_v53  ;;  %7130 = vrcp.f32 %v9180_v13  ;;  %v3886_v59 = vsel %vm9154_vm1, %v3885_v10, %v3881_v56 }
 0x4d3   : > { %5720 = vst [vmem:[%s9052_s14 + $0x8] sm:$0xff] %v5644_v51  ;;  %v9176_v43 = vpop.eup %7124  ;;  %v9195_v29 = vadd.f32 %v9093_v25, %v3891_v2  ;;  %v9197_v17 = vadd.f32 1.0, %v7123_v63  ;;  %vm3863_vm4 = vweird.f32 %v9117_v30  ;;  %7132 = vrcp.f32 %v9178_v34 }
 0x4d4   : > { %v3860_v46 = vsub.f32 1.0, %v3859_v35  ;;  %v3979_v44 = vmul.f32 %v9176_v43, %v9132_v50  ;;  %v6692_v58 = vmul.f32 -1.442695, %v2899_v26  ;;  %v7127_v60 = vpop.eup %7126  ;;  %vm3865_vm5 = vmor %vm3863_vm4, %vm3864_vm3  ;;  %v3870_v52 = vor.u32 1.1754944e-38, %v3869_v31 }
 0x4d5   : > { %v3987_v40 = vand.u32 2147483647, %v9132_v50  ;;  %v3989_v16 = vand.u32 2147483648, %v9132_v50  ;;  %7134 = vrcp.f32 %v9197_v17  ;;  %vm3868_vm6 = vcmp.eq.f32.partialorder %v3867_v0, 8.507059e+37  ;;  %v2900_v0 = vpop.f32.mrf.mxu2 }
 0x4d6   : > { %v3861_v27 = vmul.f32 %v7121_v53, %v3860_v46  ;;  %v3980_v19 = vsub.f32 1.0, %v3979_v44  ;;  %v7129_v30 = vpop.eup %7128  ;;  %v3799_v18 = vmul.f32 %v7127_v60, %v9143_v42  ;;  %v6703_v38 = vmul.f32 -1.442695, %v2730_v22  ;;  %v2847_v46 = vpop.f32.mrf.mxu1 }
 0x4d7   : > { %v3807_v55 = vand.u32 2147483647, %v9143_v42  ;;  %v3809_v48 = vand.u32 2147483648, %v9143_v42  ;;  %vm3983_vm7 = vweird.f32 %v9132_v50  ;;  %vm3894_vm8 = vweird.f32 %v9093_v25 }
 0x4d8   : > { %v3862_v49 = vadd.f32 %v7121_v53, %v3861_v27  ;;  %v3981_v39 = vmul.f32 %v9176_v43, %v3980_v19  ;;  %v7131_v12 = vpop.eup %7130  ;;  %v3800_v41 = vsub.f32 1.0, %v3799_v18  ;;  %vm9214_vm9 = vcmp.eq.f32.partialorder %v3987_v40, 8.507059e+37 }
 0x4d9   : > { %v3964_v3 = vmul.f32 %v7131_v12, %v9180_v13  ;;  %v9219_v11 = vadd.f32 1.0, %v7129_v30  ;;  %v9221_v28 = vpop.eup %7132  ;;  %vm3984_vm10 = vweird.f32 %v9176_v43  ;;  %vm3803_vm11 = vweird.f32 %v9143_v42 }
 0x4da   : > { %2960 = vmatmul.bf16.gmra.mxu3 %v8808_v5  ;;  %3018 = vmatmul.bf16.gmra.mxu0 %v8808_v5  ;;  %v3866_v9 = vsel %vm3865_vm5, %v7121_v53, %v3862_v49  ;;  %v3990_v53 = vor.u32 1.1754944e-38, %v3989_v16  ;;  %v3801_v51 = vmul.f32 %v7127_v60, %v3800_v41  ;;  %vm3804_vm12 = vweird.f32 %v7127_v60  ;;  %vm9244_vm2 = vmor %vm3983_vm7, %vm3984_vm10 }
 0x4db   : > { %3076 = vmatmul.bf16.gmra.mxu1 %v8808_v5  ;;  %v3871_v6 = vsel %vm3868_vm6, %v3870_v52, %v3866_v9  ;;  %v2790_v5 = vadd.f32 %v2789_v61, %v8934_v24  ;;  %v9226_v37 = vpop.eup %7134  ;;  %vm3893_vm13 = vweird.f32 %v9060_v20  ;;  %v3982_v47 = vadd.f32 %v9176_v43, %v3981_v39  ;;  %vm3805_vm0 = vmor %vm3803_vm11, %vm3804_vm12  ;;  %v2731_v52 = vpop.f32.mrf.mxu3 }
 0x4dc   : > { %v5651_v45 = vpack.c.bf16 %v3886_v59, %v3871_v6  ;;  %vm9230_vm14 = vcmp.eq.f32.partialorder %v3807_v55, 8.507059e+37  ;;  %v3810_v35 = vor.u32 1.1754944e-38, %v3809_v48  ;;  %v3965_v21 = vsub.f32 1.0, %v3964_v3  ;;  %v2792_v55 = vpop.f32.mrf.mxu0  ;;  %vm9271_vm5 = vmor %vm3893_vm13, %vm3894_vm8 }
 0x4dd   : > { %v3802_v63 = vadd.f32 %v7127_v60, %v3801_v51  ;;  %vm3968_vm15 = vweird.f32 %v9180_v13  ;;  %v3972_v56 = vand.u32 2147483647, %v9180_v13  ;;  %v3974_v42 = vand.u32 2147483648, %v9180_v13 }
 0x4de   : > { %5728 = vst [vmem:[%s9052_s14 + $0x38] sm:$0xff] %v5651_v45  ;;  %v3994_v2 = vmul.f32 %v9221_v28, %v9178_v34  ;;  %v3966_v26 = vmul.f32 %v7131_v12, %v3965_v21  ;;  %vm3969_vm1 = vweird.f32 %v7131_v12  ;;  %7136 = vrcp.f32 %v9219_v11 }
 0x4df   : > { %v3806_v44 = vsel %vm3805_vm0, %v7127_v60, %v3802_v63  ;;  %v4084_v22 = vmul.f32 %v9226_v37, %v9197_v17  ;;  %7138 = vpow2.f32 %v6692_v58  ;;  %v6711_v27 = vmul.f32 -1.442695, %v2790_v5  ;;  %vm3970_vm3 = vmor %vm3968_vm15, %vm3969_vm1 }
 0x4e0   : > { %v3986_v59 = vsel %vm9244_vm2, %v9176_v43, %v3982_v47  ;;  %v3811_v19 = vsel %vm9230_vm14, %v3810_v35, %v3806_v44  ;;  %v3967_v50 = vadd.f32 %v7131_v12, %v3966_v26  ;;  %7140 = vpow2.f32 %v6703_v38 }
 0x4e1   : > { %v5648_v49 = vpack.c.bf16 %v3811_v19, %v9184_v54  ;;  %v3975_v60 = vor.u32 1.1754944e-38, %v3974_v42  ;;  %7142 = vpow2.f32 %v6711_v27  ;;  %v2848_v58 = vadd.f32 %v2847_v46, %v8937_v62  ;;  %v2850_v46 = vpop.f32.mrf.mxu1  ;;  %v2903_v27 = vpop.f32.mrf.mxu2 }
 0x4e2   : > { %v3995_v40 = vsub.f32 1.0, %v3994_v2  ;;  %v3971_v16 = vsel %vm3970_vm3, %v7131_v12, %v3967_v50  ;;  %vm3973_vm4 = vcmp.eq.f32.partialorder %v3972_v56, 8.507059e+37  ;;  %v2901_v43 = vadd.f32 %v2900_v0, %v8997_v33 }
 0x4e3   : > { %v3899_v61 = vand.u32 2147483648, %v9060_v20  ;;  %v3991_v30 = vsel %vm9214_vm9, %v3990_v53, %v3986_v59  ;;  %5725 = vst [vmem:[%s9052_s14 + $0x24] sm:$0xff] %v5648_v49  ;;  %v3976_v54 = vsel %vm3973_vm4, %v3975_v60, %v3971_v16  ;;  %v4085_v13 = vsub.f32 1.0, %v4084_v22 }
 0x4e4   : > { %v9264_v9 = vpop.eup %7136  ;;  %v5655_v18 = vpack.c.bf16 %v3991_v30, %v3976_v54  ;;  %v6712_v38 = vmul.f32 -1.442695, %v2848_v58  ;;  %v6699_v6 = vmul.f32 -1.442695, %v2901_v43  ;;  %v2732_v39 = vadd.f32 %v2731_v52, %v8947_v15 }
 0x4e5   : > { %v7139_v48 = vpop.eup %7138  ;;  %vm9277_vm6 = vcmp.eq.f32.partialorder %v3897_v1, 8.507059e+37  ;;  %v3896_v5 = vsel %vm9271_vm5, %v9093_v25, %v9195_v29  ;;  %v3996_v32 = vmul.f32 %v9221_v28, %v3995_v40  ;;  %v3900_v1 = vor.u32 1.1754944e-38, %v3899_v61 }
 0x4e6   : > { %v7141_v41 = vpop.eup %7140  ;;  %5732 = vst [vmem:[%s9052_s14 + $0x54] sm:$0xff] %v5655_v18  ;;  %v9289_v53 = vadd.f32 1.0, %v7139_v48  ;;  %7144 = vpow2.f32 %v6712_v38  ;;  %v2793_v51 = vadd.f32 %v2792_v55, %v8934_v24  ;;  %v4086_v47 = vmul.f32 %v9226_v37, %v4085_v13 }
 0x4e7   : > { %v7143_v20 = vpop.eup %7142  ;;  %v9292_v3 = vadd.f32 1.0, %v7141_v41  ;;  %7146 = vpow2.f32 %v6699_v6  ;;  %v4099_v25 = vmul.f32 %v9264_v9, %v9219_v11  ;;  %v6710_v29 = vmul.f32 -1.442695, %v2732_v39 }
 0x4e8   : > { %7148 = vrcp.f32 %v9289_v53  ;;  %v9301_v10 = vsel %vm9277_vm6, %v3900_v1, %v3896_v5  ;;  %v4094_v35 = vand.u32 2147483648, %v9197_v17  ;;  %v9307_v21 = vadd.f32 %v9221_v28, %v3996_v32 }
 0x4e9   : > { %7150 = vrcp.f32 %v9292_v3  ;;  %vm3999_vm7 = vweird.f32 %v9221_v28  ;;  %v4002_v63 = vand.u32 2147483647, %v9178_v34  ;;  %v9311_v56 = vadd.f32 1.0, %v7143_v20 }
 0x4ea   : > { %2965 = vmatmul.bf16.gmra.mxu3 %v8834_v23  ;;  %3023 = vmatmul.bf16.gmra.mxu0 %v8834_v23  ;;  %vm3998_vm8 = vweird.f32 %v9178_v34  ;;  %v4092_v42 = vand.u32 2147483647, %v9197_v17  ;;  %v4109_v2 = vand.u32 2147483648, %v9219_v11  ;;  %v6718_v26 = vmul.f32 -1.442695, %v2793_v51 }
 0x4eb   : > { %3081 = vmatmul.bf16.gmra.mxu1 %v8834_v23  ;;  %v4004_v23 = vand.u32 2147483648, %v9178_v34  ;;  %v9317_v44 = vadd.f32 %v9226_v37, %v4086_v47  ;;  %vm4089_vm9 = vweird.f32 %v9226_v37  ;;  %v4100_v22 = vsub.f32 1.0, %v4099_v25  ;;  %vm9322_vm10 = vmor %vm3998_vm8, %vm3999_vm7 }
 0x4ec   : > { %v7145_v31 = vpop.eup %7144  ;;  %7152 = vpow2.f32 %v6710_v29  ;;  %vm4088_vm11 = vweird.f32 %v9197_v17  ;;  %v9329_v19 = vor.u32 1.1754944e-38, %v4094_v35  ;;  %v4001_v49 = vsel %vm9322_vm10, %v9221_v28, %v9307_v21 }
 0x4ed   : > { %v7147_v0 = vpop.eup %7146  ;;  %v9326_v59 = vor.u32 1.1754944e-38, %v4004_v23  ;;  %7154 = vrcp.f32 %v9311_v56  ;;  %v4107_v60 = vand.u32 2147483647, %v9219_v11  ;;  %v2851_v52 = vadd.f32 %v2850_v46, %v8937_v62  ;;  %vm9342_vm12 = vmor %vm4088_vm11, %vm4089_vm9  ;;  %v2734_v46 = vpop.f32.mrf.mxu3 }
 0x4ee   : > { %v7149_v50 = vpop.eup %7148  ;;  %v9337_v58 = vadd.f32 1.0, %v7147_v0  ;;  %v9346_v16 = vor.u32 1.1754944e-38, %v4109_v2  ;;  %7156 = vpow2.f32 %v6718_v26  ;;  %v2904_v61 = vadd.f32 %v2903_v27, %v8997_v33 }
 0x4ef   : > { %v7151_v40 = vpop.eup %7150  ;;  %v3904_v43 = vmul.f32 %v7149_v50, %v9289_v53  ;;  %v4091_v30 = vsel %vm9342_vm12, %v9226_v37, %v9317_v44  ;;  %vm9354_vm13 = vcmp.eq.f32.partialorder %v4092_v42, 8.507059e+37  ;;  %v4101_v13 = vmul.f32 %v9264_v9, %v4100_v22 }
 0x4f0   : > { %vm4104_vm14 = vweird.f32 %v9264_v9  ;;  %v4069_v18 = vmul.f32 %v7151_v40, %v9292_v3  ;;  %vm4103_vm15 = vweird.f32 %v9219_v11  ;;  %v3912_v6 = vand.u32 2147483647, %v9289_v53 }
 0x4f1   : > { %v3905_v38 = vsub.f32 1.0, %v3904_v43  ;;  %v3914_v39 = vand.u32 2147483648, %v9289_v53  ;;  %7158 = vrcp.f32 %v9337_v58  ;;  %v4077_v48 = vand.u32 2147483647, %v9292_v3  ;;  %vm9405_vm9 = vmor %vm4103_vm15, %vm4104_vm14 }
 0x4f2   : > { %v7153_v37 = vpop.eup %7152  ;;  %v4070_v55 = vsub.f32 1.0, %v4069_v18  ;;  %v9366_v12 = vadd.f32 1.0, %v7145_v31  ;;  %v6719_v45 = vmul.f32 -1.442695, %v2851_v52  ;;  %vm3909_vm0 = vweird.f32 %v7149_v50 }
 0x4f3   : > { %v9368_v41 = vpop.eup %7154  ;;  %v3906_v5 = vmul.f32 %v7149_v50, %v3905_v38  ;;  %v4079_v32 = vand.u32 2147483648, %v9292_v3  ;;  %v6706_v20 = vmul.f32 -1.442695, %v2904_v61  ;;  %vm9371_vm1 = vcmp.eq.f32.partialorder %v4002_v63, 8.507059e+37  ;;  %v2794_v38 = vpop.f32.mrf.mxu0 }
 0x4f4   : > { %v4102_v51 = vadd.f32 %v9264_v9, %v4101_v13  ;;  %vm3908_vm2 = vweird.f32 %v9289_v53  ;;  %v4071_v47 = vmul.f32 %v7151_v40, %v4070_v55  ;;  %vm4074_vm3 = vweird.f32 %v7151_v40  ;;  %v7157_v25 = vpop.eup %7156 }
 0x4f5   : > { %v3907_v29 = vadd.f32 %v7149_v50, %v3906_v5  ;;  %vm9377_vm4 = vcmp.eq.f32.partialorder %v3912_v6, 8.507059e+37  ;;  %v3915_v35 = vor.u32 1.1754944e-38, %v3914_v39  ;;  %vm4073_vm5 = vweird.f32 %v9292_v3  ;;  %vm3910_vm6 = vmor %vm3908_vm2, %vm3909_vm0 }
 0x4f6   : > { %v4072_v63 = vadd.f32 %v7151_v40, %v4071_v47  ;;  %v4189_v53 = vmul.f32 %v9368_v41, %v9311_v56  ;;  %7160 = vrcp.f32 %v9366_v12  ;;  %v9388_v42 = vadd.f32 1.0, %v7153_v37  ;;  %vm4075_vm7 = vmor %vm4073_vm5, %vm4074_vm3 }
 0x4f7   : > { %v7159_v2 = vpop.eup %7158  ;;  %v3911_v26 = vsel %vm3910_vm6, %v7149_v50, %v3907_v29  ;;  %vm4078_vm8 = vcmp.eq.f32.partialorder %v4077_v48, 8.507059e+37  ;;  %v4080_v3 = vor.u32 1.1754944e-38, %v4079_v32  ;;  %7162 = vpow2.f32 %v6706_v20 }
 0x4f8   : > { %v3916_v31 = vsel %vm9377_vm4, %v3915_v35, %v3911_v26  ;;  %v4076_v44 = vsel %vm4075_vm7, %v7151_v40, %v4072_v63  ;;  %v4009_v22 = vmul.f32 %v7159_v2, %v9337_v58  ;;  %v9395_v27 = vadd.f32 1.0, %v7157_v25 }
 0x4f9   : > { %v5652_v0 = vpack.c.bf16 %v3916_v31, %v9301_v10  ;;  %v4081_v50 = vsel %vm4078_vm8, %v4080_v3, %v4076_v44  ;;  %7164 = vpow2.f32 %v6719_v45  ;;  %v4190_v17 = vsub.f32 1.0, %v4189_v53 }
 0x4fa   : > { %2970 = vmatmul.bf16.gmra.mxu3 %v8860_v8  ;;  %3028 = vmatmul.bf16.gmra.mxu0 %v8860_v8  ;;  %v4010_v43 = vsub.f32 1.0, %v4009_v22  ;;  %7166 = vrcp.f32 %v9388_v42  ;;  %v4197_v10 = vand.u32 2147483647, %v9311_v56  ;;  %v4019_v61 = vand.u32 2147483648, %v9337_v58 }
 0x4fb   : > { %3086 = vmatmul.bf16.gmra.mxu1 %v8860_v8  ;;  %v4096_v8 = vsel %vm9354_vm13, %v9329_v19, %v4091_v30  ;;  %v4106_v19 = vsel %vm9405_vm9, %v9264_v9, %v4102_v51  ;;  %5729 = vst [vmem:[%s9052_s14 + $0x40] sm:$0xff] %v5652_v0  ;;  %v2735_v30 = vadd.f32 %v2734_v46, %v8947_v15  ;;  %vm4014_vm11 = vweird.f32 %v7159_v2  ;;  %v2736_v51 = vpop.f32.mrf.mxu3  ;;  %v2905_v46 = vpop.f32.mrf.mxu2 }
 0x4fc   : > { %v5659_v40 = vpack.c.bf16 %v4096_v8, %v4081_v50  ;;  %v9417_v54 = vpop.eup %7160  ;;  %v4011_v13 = vmul.f32 %v7159_v2, %v4010_v43  ;;  %v4017_v18 = vand.u32 2147483647, %v9337_v58  ;;  %7168 = vrcp.f32 %v9395_v27 }
 0x4fd   : > { %v7163_v6 = vpop.eup %7162  ;;  %v4006_v9 = vsel %vm9371_vm1, %v9326_v59, %v4001_v49  ;;  %vm4108_vm12 = vcmp.eq.f32.partialorder %v4107_v60, 8.507059e+37  ;;  %v4199_v39 = vand.u32 2147483648, %v9311_v56  ;;  %v4191_v55 = vmul.f32 %v9368_v41, %v4190_v17  ;;  %v2852_v59 = vpop.f32.mrf.mxu1 }
 0x4fe   : > { %5736 = vst [vmem:[%s9052_s14 + $0x70] sm:$0xff] %v5659_v40  ;;  %v9434_v37 = vsel %vm4108_vm12, %v9346_v16, %v4106_v19  ;;  %v4012_v48 = vadd.f32 %v7159_v2, %v4011_v13  ;;  %vm4013_vm13 = vweird.f32 %v9337_v58  ;;  %vm4193_vm10 = vweird.f32 %v9311_v56 }
 0x4ff   : > { %v7165_v34 = vpop.eup %7164  ;;  %v4204_v28 = vmul.f32 %v9417_v54, %v9366_v12  ;;  %vm4015_vm14 = vmor %vm4013_vm13, %vm4014_vm11  ;;  %v4020_v11 = vor.u32 1.1754944e-38, %v4019_v61  ;;  %v2795_v21 = vadd.f32 %v2794_v38, %v8934_v24  ;;  %vm9443_vm15 = vcmp.eq.f32.partialorder %v4197_v10, 8.507059e+37  ;;  %v2797_v10 = vpop.f32.mrf.mxu0 }
 0x500   : > { %v7167_v49 = vpop.eup %7166  ;;  %v4016_v16 = vsel %vm4015_vm14, %v7159_v2, %v4012_v48  ;;  %vm4018_vm0 = vcmp.eq.f32.partialorder %v4017_v18, 8.507059e+37  ;;  %v9447_v58 = vadd.f32 1.0, %v7163_v6  ;;  %v6717_v45 = vmul.f32 -1.442695, %v2735_v30 }
 0x501   : > { %v4200_v5 = vor.u32 1.1754944e-38, %v4199_v39  ;;  %v4212_v32 = vand.u32 2147483647, %v9366_v12  ;;  %v4021_v20 = vsel %vm4018_vm0, %v4020_v11, %v4016_v16  ;;  %v4174_v1 = vmul.f32 %v7167_v49, %v9388_v42 }
 0x502   : > { %v9451_v47 = vpop.eup %7168  ;;  %v4192_v25 = vadd.f32 %v9368_v41, %v4191_v55  ;;  %vm4194_vm1 = vweird.f32 %v9368_v41  ;;  %v5656_v29 = vpack.c.bf16 %v4021_v20, %v4006_v9  ;;  %7170 = vrcp.f32 %v9447_v58 }
 0x503   : > { %v4205_v23 = vsub.f32 1.0, %v4204_v28  ;;  %v4175_v35 = vsub.f32 1.0, %v4174_v1  ;;  %v4184_v63 = vand.u32 2147483648, %v9388_v42  ;;  %v9457_v53 = vadd.f32 1.0, %v7165_v34  ;;  %vm9465_vm2 = vmor %vm4193_vm10, %vm4194_vm1  ;;  %v9489_v28 = vpop.f32.mrf.mxu3 }
 0x504   : > { %5733 = vst [vmem:[%s9052_s14 + $0x5c] sm:$0xff] %v5656_v29  ;;  %v4294_v2 = vmul.f32 %v9451_v47, %v9395_v27  ;;  %7172 = vpow2.f32 %v6717_v45  ;;  %v6725_v26 = vmul.f32 -1.442695, %v2795_v21  ;;  %v2853_v3 = vadd.f32 %v2852_v59, %v8937_v62 }
 0x505   : > { %v4214_v44 = vand.u32 2147483648, %v9366_v12  ;;  %v4176_v22 = vmul.f32 %v7167_v49, %v4175_v35  ;;  %vm4179_vm3 = vweird.f32 %v7167_v49  ;;  %v4182_v8 = vand.u32 2147483647, %v9388_v42  ;;  %v2855_v30 = vpop.f32.mrf.mxu1 }
 0x506   : > { %v4196_v0 = vsel %vm9465_vm2, %v9368_v41, %v4192_v25  ;;  %vm4178_vm4 = vweird.f32 %v9388_v42  ;;  %7174 = vpow2.f32 %v6725_v26  ;;  %v6726_v56 = vmul.f32 -1.442695, %v2853_v3 }
 0x507   : > { %v4206_v50 = vmul.f32 %v9417_v54, %v4205_v23  ;;  %v4177_v52 = vadd.f32 %v7167_v49, %v4176_v22  ;;  %7176 = vrcp.f32 %v9457_v53  ;;  %v2906_v40 = vadd.f32 %v2905_v46, %v8997_v33  ;;  %vm4180_vm5 = vmor %vm4178_vm4, %vm4179_vm3 }
 0x508   : > { %v7171_v17 = vpop.eup %7170  ;;  %v4185_v43 = vor.u32 1.1754944e-38, %v4184_v63  ;;  %v4295_v19 = vsub.f32 1.0, %v4294_v2  ;;  %7178 = vpow2.f32 %v6726_v56  ;;  %v2737_v41 = vadd.f32 %v2736_v51, %v8947_v15 }
 0x509   : > { %v4201_v42 = vsel %vm9443_vm15, %v4200_v5, %v4196_v0  ;;  %vm4208_vm6 = vweird.f32 %v9366_v12  ;;  %vm4183_vm7 = vcmp.eq.f32.partialorder %v4182_v8, 8.507059e+37  ;;  %v4114_v61 = vmul.f32 %v7171_v17, %v9447_v58 }
 0x50a   : > { %2975 = vmatmul.bf16.gmra.mxu3 %v8874_v36  ;;  %3033 = vmatmul.bf16.gmra.mxu0 %v8874_v36  ;;  %v7173_v13 = vpop.eup %7172  ;;  %v4122_v38 = vand.u32 2147483647, %v9447_v58  ;;  %v6713_v6 = vmul.f32 -1.442695, %v2906_v40  ;;  %v6724_v9 = vmul.f32 -1.442695, %v2737_v41  ;;  %v2798_v34 = vadd.f32 %v2797_v10, %v8934_v24 }
 0x50b   : > { %3091 = vmatmul.bf16.gmra.mxu1 %v8874_v36  ;;  %v4181_v36 = vsel %vm4180_vm5, %v7167_v49, %v4177_v52  ;;  %v4115_v55 = vsub.f32 1.0, %v4114_v61  ;;  %v4124_v48 = vand.u32 2147483648, %v9447_v58  ;;  %v4296_v21 = vmul.f32 %v9451_v47, %v4295_v19  ;;  %v9535_v52 = vpop.f32.mrf.mxu0  ;;  %v9558_v10 = vpop.f32.mrf.mxu3 }
 0x50c   : > { %v4186_v18 = vsel %vm4183_vm7, %v4185_v43, %v4181_v36  ;;  %v7175_v11 = vpop.eup %7174  ;;  %v9492_v59 = vadd.f32 1.0, %v7173_v13  ;;  %7180 = vpow2.f32 %v6713_v6  ;;  %v2856_v49 = vadd.f32 %v2855_v30, %v8937_v62 }
 0x50d   : > { %v5663_v39 = vpack.c.bf16 %v4201_v42, %v4186_v18  ;;  %v9495_v60 = vpop.eup %7176  ;;  %v4116_v16 = vmul.f32 %v7171_v17, %v4115_v55  ;;  %vm4119_vm8 = vweird.f32 %v7171_v17  ;;  %v9498_v45 = vadd.f32 1.0, %v7175_v11  ;;  %v9537_v40 = vpop.f32.mrf.mxu1 }
 0x50e   : > { %7182 = vpow2.f32 %v6724_v9  ;;  %v7179_v5 = vpop.eup %7178  ;;  %v4207_v20 = vadd.f32 %v9417_v54, %v4206_v50  ;;  %vm4209_vm9 = vweird.f32 %v9417_v54  ;;  %vm9504_vm11 = vcmp.eq.f32.partialorder %v4212_v32, 8.507059e+37  ;;  %v2908_v9 = vpop.f32.mrf.mxu2 }
 0x50f   : > { %5740 = vst [vmem:[%s9052_s14 + $0x8c] sm:$0xff] %v5663_v39  ;;  %v4304_v51 = vand.u32 2147483648, %v9395_v27  ;;  %7184 = vrcp.f32 %v9492_v59  ;;  %v4117_v25 = vadd.f32 %v7171_v17, %v4116_v16  ;;  %vm4118_vm12 = vweird.f32 %v9447_v58  ;;  %vm9523_vm15 = vmor %vm4208_vm6, %vm4209_vm9 }
 0x510   : > { %7186 = vrcp.f32 %v9498_v45  ;;  %v6732_v29 = vmul.f32 -1.442695, %v2798_v34  ;;  %vm4299_vm13 = vweird.f32 %v9451_v47  ;;  %v4309_v23 = vmul.f32 %v9495_v60, %v9457_v53  ;;  %vm4120_vm10 = vmor %vm4118_vm12, %vm4119_vm8 }
 0x511   : > { %v4125_v32 = vor.u32 1.1754944e-38, %v4124_v48  ;;  %v9516_v35 = vadd.f32 1.0, %v7179_v5  ;;  %v4297_v63 = vadd.f32 %v9451_v47, %v4296_v21  ;;  %v4121_v2 = vsel %vm4120_vm10, %v7171_v17, %v4117_v25 }
 0x512   : > { %vm4123_vm14 = vcmp.eq.f32.partialorder %v4122_v38, 8.507059e+37  ;;  %v6733_v26 = vmul.f32 -1.442695, %v2856_v49  ;;  %v7181_v3 = vpop.eup %7180  ;;  %v4215_v46 = vor.u32 1.1754944e-38, %v4214_v44  ;;  %vm4298_vm0 = vweird.f32 %v9395_v27 }
 0x513   : > { %v4302_v31 = vand.u32 2147483647, %v9395_v27  ;;  %v4126_v22 = vsel %vm4123_vm14, %v4125_v32, %v4121_v2  ;;  %v4211_v0 = vsel %vm9523_vm15, %v9417_v54, %v4207_v20  ;;  %v4305_v56 = vor.u32 1.1754944e-38, %v4304_v51  ;;  %vm9541_vm1 = vmor %vm4298_vm0, %vm4299_vm13 }
 0x514   : > { %v7183_v8 = vpop.eup %7182  ;;  %v5660_v50 = vpack.c.bf16 %v4126_v22, %v9434_v37  ;;  %7188 = vpow2.f32 %v6732_v29  ;;  %v4310_v44 = vsub.f32 1.0, %v4309_v23  ;;  %v9546_v17 = vadd.f32 1.0, %v7181_v3 }
 0x515   : > { %v7185_v12 = vpop.eup %7184  ;;  %7190 = vrcp.f32 %v9516_v35  ;;  %v9548_v54 = vadd.f32 1.0, %v7183_v8  ;;  %v4301_v43 = vsel %vm9541_vm1, %v9451_v47, %v4297_v63  ;;  %v4287_v41 = vand.u32 2147483647, %v9492_v59  ;;  %v9604_v3 = vpop.f32.mrf.mxu1 }
 0x516   : > { %v9550_v37 = vpop.eup %7186  ;;  %5737 = vst [vmem:[%s9052_s14 + $0x78] sm:$0xff] %v5660_v50  ;;  %v4279_v19 = vmul.f32 %v7185_v12, %v9492_v59  ;;  %7192 = vpow2.f32 %v6733_v26  ;;  %v4289_v42 = vand.u32 2147483648, %v9492_v59  ;;  %v4409_v61 = vand.u32 2147483648, %v9498_v45  ;;  %v9602_v26 = vpop.f32.mrf.mxu0 }
 0x517   : > { %v4399_v36 = vmul.f32 %v9550_v37, %v9498_v45  ;;  %7194 = vrcp.f32 %v9546_v17  ;;  %v9570_v47 = vsel %vm9504_vm11, %v4215_v46, %v4211_v0  ;;  %vm4303_vm2 = vcmp.eq.f32.partialorder %v4302_v31, 8.507059e+37 }
 0x518   : > { %v4280_v30 = vsub.f32 1.0, %v4279_v19  ;;  %7196 = vrcp.f32 %v9548_v54  ;;  %v4306_v13 = vsel %vm4303_vm2, %v4305_v56, %v4301_v43  ;;  %v9574_v18 = vmul.f32 %v9495_v60, %v4310_v44 }
 0x519   : > { %v4400_v38 = vsub.f32 1.0, %v4399_v36  ;;  %v4407_v6 = vand.u32 2147483647, %v9498_v45  ;;  %vm4283_vm3 = vweird.f32 %v9492_v59  ;;  %vm4284_vm4 = vweird.f32 %v7185_v12 }
 0x51a   : > { %2980 = vmatmul.bf16.gmra.mxu3 %v8900_v57  ;;  %3038 = vmatmul.bf16.gmra.mxu0 %v8900_v57  ;;  %v7189_v39 = vpop.eup %7188  ;;  %v4281_v55 = vmul.f32 %v7185_v12, %v4280_v30  ;;  %vm4403_vm5 = vweird.f32 %v9498_v45  ;;  %vm9581_vm6 = vcmp.eq.f32.partialorder %v4287_v41, 8.507059e+37  ;;  %v4290_v34 = vor.u32 1.1754944e-38, %v4289_v42  ;;  %vm4285_vm9 = vmor %vm4283_vm3, %vm4284_vm4 }
 0x51b   : > { %3096 = vmatmul.bf16.gmra.mxu1 %v8900_v57  ;;  %v9579_v57 = vpop.eup %7190  ;;  %v4401_v11 = vmul.f32 %v9550_v37, %v4400_v38  ;;  %v4410_v21 = vor.u32 1.1754944e-38, %v4409_v61  ;;  %vm4404_vm7 = vweird.f32 %v9550_v37  ;;  %vm4223_vm8 = vweird.f32 %v9546_v17 }
 0x51c   : > { %v7193_v49 = vpop.eup %7192  ;;  %v4282_v16 = vadd.f32 %v7185_v12, %v4281_v55  ;;  %v2909_v59 = vadd.f32 %v2908_v9, %v8997_v33  ;;  %vm9589_vm11 = vcmp.eq.f32.partialorder %v4407_v6, 8.507059e+37  ;;  %v4227_v1 = vand.u32 2147483647, %v9546_v17  ;;  %vm9623_vm13 = vmor %vm4403_vm5, %vm4404_vm7 }
 0x51d   : > { %v7195_v5 = vpop.eup %7194  ;;  %v4229_v51 = vand.u32 2147483648, %v9546_v17  ;;  %vm4388_vm12 = vweird.f32 %v9548_v54  ;;  %v9596_v25 = vadd.f32 1.0, %v7189_v39  ;;  %v4414_v32 = vmul.f32 %v9579_v57, %v9516_v35 }
 0x51e   : > { %v7197_v29 = vpop.eup %7196  ;;  %v4286_v23 = vsel %vm4285_vm9, %v7185_v12, %v4282_v16  ;;  %v4219_v63 = vmul.f32 %v7195_v5, %v9546_v17  ;;  %v4392_v2 = vand.u32 2147483647, %v9548_v54  ;;  %v4402_v46 = vadd.f32 %v9550_v37, %v4401_v11 }
 0x51f   : > { %v4291_v58 = vsel %vm9581_vm6, %v4290_v34, %v4286_v23  ;;  %v4384_v31 = vmul.f32 %v7197_v29, %v9548_v54  ;;  %v4394_v22 = vand.u32 2147483648, %v9548_v54  ;;  %v9611_v56 = vadd.f32 1.0, %v7193_v49 }
 0x520   : > { %v5667_v8 = vpack.c.bf16 %v4306_v13, %v4291_v58  ;;  %v4220_v0 = vsub.f32 1.0, %v4219_v63  ;;  %v6720_v50 = vmul.f32 -1.442695, %v2909_v59  ;;  %7198 = vrcp.f32 %v9596_v25  ;;  %v2910_v13 = vpop.f32.mrf.mxu2  ;;  %v9661_v59 = vpop.f32.mrf.mxu0 }
 0x521   : > { %v4385_v12 = vsub.f32 1.0, %v4384_v31  ;;  %v2740_v27 = vadd.f32 %v9489_v28, %v8947_v15  ;;  %v2800_v44 = vadd.f32 %v9535_v52, %v8934_v24  ;;  %v4415_v19 = vsub.f32 1.0, %v4414_v32 }
 0x522   : > { %5744 = vst [vmem:[%s9052_s14 + $0xa8] sm:$0xff] %v5667_v8  ;;  %v4221_v41 = vmul.f32 %v7195_v5, %v4220_v0  ;;  %vm4224_vm10 = vweird.f32 %v7195_v5  ;;  %vm9627_vm14 = vcmp.eq.f32.partialorder %v4227_v1, 8.507059e+37  ;;  %v4406_v28 = vsel %vm9623_vm13, %v9550_v37, %v4402_v46 }
 0x523   : > { %v4230_v52 = vor.u32 1.1754944e-38, %v4229_v51  ;;  %v4386_v36 = vmul.f32 %v7197_v29, %v4385_v12  ;;  %vm4389_vm15 = vweird.f32 %v7197_v29  ;;  %vm9634_vm0 = vcmp.eq.f32.partialorder %v4392_v2, 8.507059e+37  ;;  %vm4225_vm1 = vmor %vm4223_vm8, %vm4224_vm10 }
 0x524   : > { %v4222_v61 = vadd.f32 %v7195_v5, %v4221_v41  ;;  %v4395_v30 = vor.u32 1.1754944e-38, %v4394_v22  ;;  %7200 = vrcp.f32 %v9611_v56  ;;  %v6731_v6 = vmul.f32 -1.442695, %v2740_v27  ;;  %vm4390_vm2 = vmor %vm4388_vm12, %vm4389_vm15 }
 0x525   : > { %v4387_v38 = vadd.f32 %v7197_v29, %v4386_v36  ;;  %7202 = vpow2.f32 %v6720_v50  ;;  %v6739_v9 = vmul.f32 -1.442695, %v2800_v44  ;;  %v4411_v37 = vsel %vm9589_vm11, %v4410_v21, %v4406_v28  ;;  %v9653_v21 = vpop.f32.mrf.mxu3 }
 0x526   : > { %v4416_v39 = vmul.f32 %v9579_v57, %v4415_v19  ;;  %v4226_v55 = vsel %vm4225_vm1, %v7195_v5, %v4222_v61  ;;  %v2858_v48 = vadd.f32 %v9537_v40, %v8937_v62  ;;  %v9648_v34 = vpop.eup %7198  ;;  %7204 = vpow2.f32 %v6731_v6  ;;  %v9663_v5 = vpop.f32.mrf.mxu1 }
 0x527   : > { %v4231_v17 = vsel %vm9627_vm14, %v4230_v52, %v4226_v55  ;;  %v4391_v11 = vsel %vm4390_vm2, %v7197_v29, %v4387_v38  ;;  %v2911_v49 = vadd.f32 %v2910_v13, %v8997_v33  ;;  %vm4313_vm3 = vweird.f32 %v9457_v53 }
 0x528   : > { %v5664_v54 = vpack.c.bf16 %v4231_v17, %v9570_v47  ;;  %v4396_v16 = vsel %vm9634_vm0, %v4395_v30, %v4391_v11  ;;  %v4504_v40 = vmul.f32 %v9648_v34, %v9596_v25  ;;  %v4317_v20 = vand.u32 2147483647, %v9457_v53  ;;  %v2913_v6 = vpop.f32.mrf.mxu2 }
 0x529   : > { %v4319_v1 = vand.u32 2147483648, %v9457_v53  ;;  %v5671_v47 = vpack.c.bf16 %v4411_v37, %v4396_v16  ;;  %7206 = vpow2.f32 %v6739_v9  ;;  %v6740_v23 = vmul.f32 -1.442695, %v2858_v48 }
 0x52a   : > { %3043 = vmatmul.bf16.gmra.mxu0 %v8908_v14  ;;  %v9669_v51 = vpop.eup %7200  ;;  %5741 = vst [vmem:[%s9052_s14 + $0x94] sm:$0xff] %v5664_v54  ;;  %v4505_v29 = vsub.f32 1.0, %v4504_v40  ;;  %v6727_v32 = vmul.f32 -1.442695, %v2911_v49  ;;  %v2742_v63 = vadd.f32 %v9558_v10, %v8947_v15  ;;  %v4312_v58 = vadd.f32 %v9495_v60, %v9574_v18 }
 0x52b   : > { %3101 = vmatmul.bf16.gmra.mxu1 %v8908_v14  ;;  %v7203_v2 = vpop.eup %7202  ;;  %vm4314_vm4 = vweird.f32 %v9495_v60  ;;  %vm4419_vm5 = vweird.f32 %v9579_v57  ;;  %5748 = vst [vmem:[%s9052_s14 + $0xc4] sm:$0xff] %v5671_v47  ;;  %v2803_v46 = vadd.f32 %v9602_v26, %v8934_v24  ;;  %v4417_v31 = vadd.f32 %v9579_v57, %v4416_v39 }
 0x52c   : > { %v9682_v22 = vadd.f32 1.0, %v7203_v2  ;;  %7208 = vpow2.f32 %v6740_v23  ;;  %v6738_v8 = vmul.f32 -1.442695, %v2742_v63  ;;  %v7205_v0 = vpop.eup %7204  ;;  %v4320_v10 = vor.u32 1.1754944e-38, %v4319_v1  ;;  %vm9687_vm6 = vmor %vm4313_vm3, %vm4314_vm4 }
 0x52d   : > { %v4506_v50 = vmul.f32 %v9648_v34, %v4505_v29  ;;  %7210 = vpow2.f32 %v6727_v32  ;;  %v6746_v18 = vmul.f32 -1.442695, %v2803_v46  ;;  %vm4418_vm7 = vweird.f32 %v9516_v35  ;;  %v9720_v30 = vpop.f32.mrf.mxu3  ;;  %2985 = vmatmul.bf16.gmra.mxu3 %v8908_v14 }
 0x52e   : > { %v4424_v26 = vand.u32 2147483648, %v9516_v35  ;;  %v4519_v27 = vmul.f32 %v9669_v51, %v9611_v56  ;;  %7212 = vrcp.f32 %v9682_v22  ;;  %v4316_v43 = vsel %vm9687_vm6, %v9495_v60, %v4312_v58  ;;  %vm9701_vm8 = vmor %vm4418_vm7, %vm4419_vm5 }
 0x52f   : > { %v7207_v44 = vpop.eup %7206  ;;  %v4422_v19 = vand.u32 2147483647, %v9516_v35  ;;  %v9706_v41 = vadd.f32 1.0, %v7205_v0  ;;  %7214 = vpow2.f32 %v6738_v8  ;;  %v4421_v42 = vsel %vm9701_vm8, %v9579_v57, %v4417_v31 }
 0x530   : > { %v4512_v28 = vand.u32 2147483647, %v9596_v25  ;;  %v9712_v52 = vadd.f32 1.0, %v7207_v44  ;;  %7216 = vpow2.f32 %v6746_v18  ;;  %v4507_v60 = vadd.f32 %v9648_v34, %v4506_v50 }
 0x531   : > { %vm4509_vm9 = vweird.f32 %v9648_v34  ;;  %v4514_v36 = vand.u32 2147483648, %v9596_v25  ;;  %7218 = vrcp.f32 %v9706_v41  ;;  %vm4318_vm11 = vcmp.eq.f32.partialorder %v4317_v20, 8.507059e+37 }
 0x532   : > { %v7209_v35 = vpop.eup %7208  ;;  %v4425_v61 = vor.u32 1.1754944e-38, %v4424_v26  ;;  %v4520_v45 = vsub.f32 1.0, %v4519_v27  ;;  %v2861_v57 = vadd.f32 %v9604_v3, %v8937_v62  ;;  %v9723_v38 = vsel %vm4318_vm11, %v4320_v10, %v4316_v43 }
 0x533   : > { %v7211_v13 = vpop.eup %7210  ;;  %vm4423_vm12 = vcmp.eq.f32.partialorder %v4422_v19, 8.507059e+37  ;;  %vm4508_vm13 = vweird.f32 %v9596_v25  ;;  %7220 = vrcp.f32 %v9712_v52  ;;  %v4332_v14 = vand.u32 2147483647, %v9682_v22 }
 0x534   : > { %v7213_v9 = vpop.eup %7212  ;;  %v9727_v37 = vsel %vm4423_vm12, %v4425_v61, %v4421_v42  ;;  %vm9731_vm10 = vmor %vm4508_vm13, %vm4509_vm9  ;;  %v9736_v39 = vadd.f32 1.0, %v7209_v35  ;;  %v9738_v55 = vadd.f32 1.0, %v7211_v13  ;;  %vm4513_vm14 = vcmp.eq.f32.partialorder %v4512_v28, 8.507059e+37 }
 0x535   : > { %v7215_v48 = vpop.eup %7214  ;;  %v4511_v25 = vsel %vm9731_vm10, %v9648_v34, %v4507_v60  ;;  %v4515_v17 = vor.u32 1.1754944e-38, %v4514_v36  ;;  %v4324_v11 = vmul.f32 %v7213_v9, %v9682_v22  ;;  %v9745_v54 = vmul.f32 %v9669_v51, %v4520_v45 }
 0x536   : > { %v7217_v49 = vpop.eup %7216  ;;  %v4527_v16 = vand.u32 2147483647, %v9611_v56  ;;  %v9748_v40 = vmul.f32 -1.442695, %v2861_v57  ;;  %v9751_v20 = vadd.f32 %v2913_v6, %v8997_v33  ;;  %vm4328_vm15 = vweird.f32 %v9682_v22 }
 0x537   : > { %v7219_v1 = vpop.eup %7218  ;;  %v4325_v47 = vsub.f32 1.0, %v4324_v11  ;;  %v4334_v34 = vand.u32 2147483648, %v9682_v22  ;;  %7222 = vrcp.f32 %v9738_v55  ;;  %v4516_v29 = vsel %vm4513_vm14, %v4515_v17, %v4511_v25 }
 0x538   : > { %vm9756_vm0 = vcmp.eq.f32.partialorder %v4332_v14, 8.507059e+37  ;;  %v4489_v32 = vmul.f32 %v7219_v1, %v9706_v41  ;;  %7224 = vrcp.f32 %v9736_v39  ;;  %vm4329_vm1 = vweird.f32 %v7213_v9 }
 0x539   : > { %v9762_v63 = vpop.eup %7220  ;;  %v4326_v2 = vmul.f32 %v7213_v9, %v4325_v47  ;;  %v4497_v58 = vand.u32 2147483647, %v9706_v41  ;;  %v9765_v46 = vadd.f32 1.0, %v7215_v48  ;;  %v4499_v8 = vand.u32 2147483648, %v9706_v41  ;;  %vm4330_vm3 = vmor %vm4328_vm15, %vm4329_vm1  ;;  %v9811_v47 = vpop.f32.mrf.mxu1 }
 0x53a   : > { %v4490_v31 = vsub.f32 1.0, %v4489_v32  ;;  %v4609_v0 = vmul.f32 %v9762_v63, %v9712_v52  ;;  %v9770_v10 = vadd.f32 1.0, %v7217_v49  ;;  %v4335_v18 = vor.u32 1.1754944e-38, %v4334_v34 }
 0x53b   : > { %v4327_v50 = vadd.f32 %v7213_v9, %v4326_v2  ;;  %vm4493_vm2 = vweird.f32 %v9706_v41  ;;  %7226 = vrcp.f32 %v9765_v46  ;;  %vm4494_vm4 = vweird.f32 %v7219_v1 }
 0x53c   : > { %v4491_v12 = vmul.f32 %v7219_v1, %v4490_v31  ;;  %v4610_v26 = vsub.f32 1.0, %v4609_v0  ;;  %v4619_v27 = vand.u32 2147483648, %v9712_v52  ;;  %vm9777_vm5 = vcmp.eq.f32.partialorder %v4497_v58, 8.507059e+37  ;;  %vm4495_vm7 = vmor %vm4493_vm2, %vm4494_vm4 }
 0x53d   : > { %v7223_v44 = vpop.eup %7222  ;;  %v4331_v43 = vsel %vm4330_vm3, %v7213_v9, %v4327_v50  ;;  %vm4613_vm6 = vweird.f32 %v9712_v52  ;;  %v4617_v19 = vand.u32 2147483647, %v9712_v52  ;;  %7228 = vrcp.f32 %v9770_v10 }
 0x53e   : > { %v9784_v22 = vpop.eup %7224  ;;  %v4336_v42 = vsel %vm9756_vm0, %v4335_v18, %v4331_v43  ;;  %v4492_v28 = vadd.f32 %v7219_v1, %v4491_v12  ;;  %v4500_v60 = vor.u32 1.1754944e-38, %v4499_v8  ;;  %v4429_v36 = vmul.f32 %v7223_v44, %v9738_v55 }
 0x53f   : > { %v5668_v35 = vpack.c.bf16 %v4336_v42, %v9723_v38  ;;  %v4611_v61 = vmul.f32 %v9762_v63, %v4610_v26  ;;  %v4437_v45 = vand.u32 2147483647, %v9738_v55  ;;  %v4439_v57 = vand.u32 2147483648, %v9738_v55 }
 0x540   : > { %v4496_v13 = vsel %vm4495_vm7, %v7219_v1, %v4492_v28  ;;  %v4620_v6 = vor.u32 1.1754944e-38, %v4619_v27  ;;  %v4430_v9 = vsub.f32 1.0, %v4429_v36  ;;  %vm4433_vm8 = vweird.f32 %v9738_v55  ;;  %v9809_v1 = vpop.f32.mrf.mxu0  ;;  %v2915_v55 = vpop.f32.mrf.mxu2 }
 0x541   : > { %v7227_v3 = vpop.eup %7226  ;;  %5745 = vst [vmem:[%s9052_s14 + $0xb0] sm:$0xff] %v5668_v35  ;;  %v4501_v38 = vsel %vm9777_vm5, %v4500_v60, %v4496_v13  ;;  %vm9800_vm9 = vcmp.eq.f32.partialorder %v4617_v19, 8.507059e+37  ;;  %v4624_v14 = vmul.f32 %v9784_v22, %v9736_v39  ;;  %v4602_v48 = vand.u32 2147483647, %v9765_v46 }
 0x542   : > { %v4604_v25 = vand.u32 2147483648, %v9765_v46  ;;  %v5675_v17 = vpack.c.bf16 %v4516_v29, %v4501_v38  ;;  %v4431_v11 = vmul.f32 %v7223_v44, %v4430_v9  ;;  %vm4434_vm11 = vweird.f32 %v7223_v44 }
 0x543   : > { %v4594_v49 = vmul.f32 %v7227_v3, %v9765_v46  ;;  %v9813_v34 = vpop.eup %7228  ;;  %v4612_v23 = vadd.f32 %v9762_v63, %v4611_v61  ;;  %vm4614_vm12 = vweird.f32 %v9762_v63  ;;  %vm9817_vm13 = vcmp.eq.f32.partialorder %v4437_v45, 8.507059e+37  ;;  %vm4435_vm14 = vmor %vm4433_vm8, %vm4434_vm11 }
 0x544   : > { %v4440_v2 = vor.u32 1.1754944e-38, %v4439_v57  ;;  %5752 = vst [vmem:[%s9052_s14 + $0xe0] sm:$0xff] %v5675_v17  ;;  %v4432_v29 = vadd.f32 %v7223_v44, %v4431_v11  ;;  %vm4598_vm10 = vweird.f32 %v9765_v46  ;;  %v4714_v31 = vmul.f32 %v9813_v34, %v9770_v10  ;;  %vm9835_vm0 = vmor %vm4613_vm6, %vm4614_vm12 }
 0x545   : > { %v4595_v58 = vsub.f32 1.0, %v4594_v49  ;;  %v4625_v8 = vsub.f32 1.0, %v4624_v14  ;;  %vm9828_vm15 = vcmp.eq.f32.partialorder %v4602_v48, 8.507059e+37  ;;  %v4605_v50 = vor.u32 1.1754944e-38, %v4604_v25 }
 0x546   : > { %v6734_v18 = vmul.f32 -1.442695, %v9751_v20  ;;  %v4436_v26 = vsel %vm4435_vm14, %v7223_v44, %v4432_v29  ;;  %vm4599_vm1 = vweird.f32 %v7227_v3  ;;  %7230 = vpow2.f32 %v9748_v40 }
 0x547   : > { %v4596_v27 = vmul.f32 %v7227_v3, %v4595_v58  ;;  %v4616_v43 = vsel %vm9835_vm0, %v9762_v63, %v4612_v23  ;;  %v4441_v20 = vsel %vm9817_vm13, %v4440_v2, %v4436_v26  ;;  %v2745_v52 = vadd.f32 %v9653_v21, %v8947_v15  ;;  %vm4600_vm2 = vmor %vm4598_vm10, %vm4599_vm1 }
 0x548   : > { %7232 = vpow2.f32 %v6734_v18  ;;  %v5672_v53 = vpack.c.bf16 %v4441_v20, %v9727_v37  ;;  %v4715_v19 = vsub.f32 1.0, %v4714_v31  ;;  %v2805_v40 = vadd.f32 %v9661_v59, %v8934_v24  ;;  %v9867_v13 = vpop.f32.mrf.mxu0  ;;  %3048 = vmatmul.bf16.gmra.mxu0 %v8939_v4 }
 0x549   : > { %v4597_v44 = vadd.f32 %v7227_v3, %v4596_v27  ;;  %v6745_v42 = vmul.f32 -1.442695, %v2745_v52  ;;  %v2863_v63 = vadd.f32 %v9663_v5, %v8937_v62  ;;  %v2916_v28 = vadd.f32 %v2915_v55, %v8997_v33  ;;  %v9863_v5 = vpop.f32.mrf.mxu3 }
 0x54a   : > { %v2747_v60 = vadd.f32 %v9720_v30, %v8947_v15  ;;  %v4621_v21 = vsel %vm9800_vm9, %v4620_v6, %v4616_v43  ;;  %v4626_v37 = vmul.f32 %v9784_v22, %v4625_v8  ;;  %5749 = vst [vmem:[%s9052_s14 + $0xcc] sm:$0xff] %v5672_v53  ;;  %v6753_v59 = vmul.f32 -1.442695, %v2805_v40  ;;  %v9869_v6 = vpop.f32.mrf.mxu1  ;;  %3106 = vmatmul.bf16.gmra.mxu1 %v8939_v4 }
 0x54b   : > { %v4601_v36 = vsel %vm4600_vm2, %v7227_v3, %v4597_v44  ;;  %7234 = vpow2.f32 %v6745_v42  ;;  %v6754_v35 = vmul.f32 -1.442695, %v2863_v63  ;;  %v6741_v61 = vmul.f32 -1.442695, %v2916_v28 }
 0x54c   : > { %v4606_v46 = vsel %vm9828_vm15, %v4605_v50, %v4601_v36  ;;  %v7231_v45 = vpop.eup %7230  ;;  %vm4523_vm3 = vweird.f32 %v9611_v56  ;;  %v4716_v57 = vmul.f32 %v9813_v34, %v4715_v19  ;;  %7236 = vpow2.f32 %v6753_v59 }
 0x54d   : > { %v5679_v30 = vpack.c.bf16 %v4621_v21, %v4606_v46  ;;  %vm4524_vm4 = vweird.f32 %v9669_v51  ;;  %vm9876_vm5 = vcmp.eq.f32.partialorder %v4527_v16, 8.507059e+37  ;;  %v4529_v38 = vand.u32 2147483648, %v9611_v56 }
 0x54e   : > { %v7233_v9 = vpop.eup %7232  ;;  %v6752_v41 = vmul.f32 -1.442695, %v2747_v60  ;;  %v4522_v14 = vadd.f32 %v9669_v51, %v9745_v54  ;;  %vm4629_vm6 = vweird.f32 %v9784_v22  ;;  %v4634_v48 = vand.u32 2147483648, %v9736_v39  ;;  %vm9899_vm8 = vmor %vm4523_vm3, %vm4524_vm4 }
 0x54f   : > { %5756 = vst [vmem:[%s9052_s14 + $0xfc] sm:$0xff] %v5679_v30  ;;  %7238 = vpow2.f32 %v6754_v35  ;;  %v4627_v25 = vadd.f32 %v9784_v22, %v4626_v37  ;;  %v9887_v17 = vadd.f32 1.0, %v7231_v45  ;;  %v9889_v16 = vadd.f32 1.0, %v7233_v9 }
 0x550   : > { %7240 = vpow2.f32 %v6741_v61  ;;  %v4717_v11 = vadd.f32 %v9813_v34, %v4716_v57  ;;  %vm4719_vm7 = vweird.f32 %v9813_v34  ;;  %v2808_v54 = vadd.f32 %v9809_v1, %v8934_v24 }
 0x551   : > { %7242 = vpow2.f32 %v6752_v41  ;;  %v7235_v49 = vpop.eup %7234  ;;  %vm4628_vm9 = vweird.f32 %v9736_v39  ;;  %v4632_v32 = vand.u32 2147483647, %v9736_v39  ;;  %v4724_v2 = vand.u32 2147483648, %v9770_v10  ;;  %v9939_v43 = vpop.f32.mrf.mxu3  ;;  %2990 = vmatmul.bf16.gmra.mxu3 %v8939_v4 }
 0x552   : > { %7244 = vrcp.f32 %v9889_v16  ;;  %v7237_v29 = vpop.eup %7236  ;;  %v4530_v58 = vor.u32 1.1754944e-38, %v4529_v38  ;;  %vm9909_vm11 = vmor %vm4628_vm9, %vm4629_vm6  ;;  %vm4718_vm12 = vweird.f32 %v9770_v10  ;;  %v4722_v56 = vand.u32 2147483647, %v9770_v10  ;;  %v2918_v10 = vpop.f32.mrf.mxu2 }
 0x553   : > { %v9915_v31 = vadd.f32 1.0, %v7235_v49  ;;  %v4526_v39 = vsel %vm9899_vm8, %v9669_v51, %v4522_v14  ;;  %v4631_v8 = vsel %vm9909_vm11, %v9784_v22, %v4627_v25  ;;  %vm9925_vm13 = vmor %vm4718_vm12, %vm4719_vm7  ;;  %7246 = vrcp.f32 %v9887_v17 }
 0x554   : > { %v9930_v50 = vadd.f32 1.0, %v7237_v29  ;;  %v4635_v12 = vor.u32 1.1754944e-38, %v4634_v48  ;;  %v4721_v51 = vsel %vm9925_vm13, %v9813_v34, %v4717_v11  ;;  %v6760_v22 = vmul.f32 -1.442695, %v2808_v54 }
 0x555   : > { %v7239_v18 = vpop.eup %7238  ;;  %7248 = vrcp.f32 %v9915_v31  ;;  %vm4633_vm10 = vcmp.eq.f32.partialorder %v4632_v32, 8.507059e+37  ;;  %v4725_v27 = vor.u32 1.1754944e-38, %v4724_v2  ;;  %v2866_v55 = vadd.f32 %v9811_v47, %v8937_v62 }
 0x556   : > { %v7241_v26 = vpop.eup %7240  ;;  %7250 = vrcp.f32 %v9930_v50  ;;  %v9944_v52 = vsel %vm9876_vm5, %v4530_v58, %v4526_v39  ;;  %v9946_v34 = vsel %vm4633_vm10, %v4635_v12, %v4631_v8  ;;  %vm4723_vm14 = vcmp.eq.f32.partialorder %v4722_v56, 8.507059e+37 }
 0x557   : > { %v7243_v20 = vpop.eup %7242  ;;  %v2919_v53 = vadd.f32 %v2918_v10, %v8997_v33  ;;  %v9949_v19 = vsel %vm4723_vm14, %v4725_v27, %v4721_v51  ;;  %v4542_v40 = vand.u32 2147483647, %v9889_v16  ;;  %v9952_v47 = vadd.f32 1.0, %v7239_v18 }
 0x558   : > { %v7245_v44 = vpop.eup %7244  ;;  %v9954_v42 = vadd.f32 1.0, %v7241_v26  ;;  %v4739_v4 = vand.u32 2147483648, %v9887_v17  ;;  %7252 = vpow2.f32 %v6760_v22  ;;  %v2750_v28 = vadd.f32 %v9863_v5, %v8947_v15 }
 0x559   : > { %v4534_v63 = vmul.f32 %v7245_v44, %v9889_v16  ;;  %v9960_v60 = vpop.eup %7246  ;;  %vm4538_vm15 = vweird.f32 %v9889_v16  ;;  %v4544_v21 = vand.u32 2147483648, %v9889_v16  ;;  %7254 = vrcp.f32 %v9952_v47 }
 0x55a   : > { %v9965_v37 = vmul.f32 -1.442695, %v2866_v55  ;;  %7256 = vrcp.f32 %v9954_v42  ;;  %v9968_v46 = vadd.f32 1.0, %v7243_v20  ;;  %v9970_v35 = vmul.f32 -1.442695, %v2919_v53 }
 0x55b   : > { %v7249_v36 = vpop.eup %7248  ;;  %v4535_v59 = vsub.f32 1.0, %v4534_v63  ;;  %vm9974_vm0 = vcmp.eq.f32.partialorder %v4542_v40, 8.507059e+37  ;;  %v4707_v30 = vand.u32 2147483647, %v9915_v31  ;;  %v4709_v57 = vand.u32 2147483648, %v9915_v31  ;;  %v10023_v40 = vpop.f32.mrf.mxu0 }
 0x55c   : > { %v9972_v61 = vpop.eup %7250  ;;  %v4699_v45 = vmul.f32 %v7249_v36, %v9915_v31  ;;  %v4729_v9 = vmul.f32 %v9960_v60, %v9887_v17  ;;  %vm4539_vm1 = vweird.f32 %v7245_v44  ;;  %v4545_v41 = vor.u32 1.1754944e-38, %v4544_v21  ;;  %v10025_v63 = vpop.f32.mrf.mxu1 }
 0x55d   : > { %v4536_v3 = vmul.f32 %v7245_v44, %v4535_v59  ;;  %v4819_v38 = vmul.f32 %v9972_v61, %v9930_v50  ;;  %vm4703_vm2 = vweird.f32 %v9915_v31  ;;  %v9986_v48 = vmul.f32 -1.442695, %v2750_v28  ;;  %vm4540_vm3 = vmor %vm4538_vm15, %vm4539_vm1 }
 0x55e   : > { %v4700_v14 = vsub.f32 1.0, %v4699_v45  ;;  %v7253_v25 = vpop.eup %7252  ;;  %v4829_v49 = vand.u32 2147483648, %v9930_v50  ;;  %7258 = vrcp.f32 %v9968_v46  ;;  %vm4704_vm4 = vweird.f32 %v7249_v36 }
 0x55f   : > { %v4537_v11 = vadd.f32 %v7245_v44, %v4536_v3  ;;  %v4820_v54 = vsub.f32 1.0, %v4819_v38  ;;  %v9990_v23 = vpop.eup %7254  ;;  %vm9994_vm5 = vcmp.eq.f32.partialorder %v4707_v30, 8.507059e+37  ;;  %vm4823_vm6 = vweird.f32 %v9930_v50  ;;  %vm4705_vm7 = vmor %vm4703_vm2, %vm4704_vm4 }
 0x560   : > { %v4701_v32 = vmul.f32 %v7249_v36, %v4700_v14  ;;  %v7257_v29 = vpop.eup %7256  ;;  %v4730_v58 = vsub.f32 1.0, %v4729_v9  ;;  %v4710_v56 = vor.u32 1.1754944e-38, %v4709_v57  ;;  %v4827_v0 = vand.u32 2147483647, %v9930_v50 }
 0x561   : > { %v4541_v1 = vsel %vm4540_vm3, %v7245_v44, %v4537_v11  ;;  %v4821_v39 = vmul.f32 %v9972_v61, %v4820_v54  ;;  %v4639_v10 = vmul.f32 %v7257_v29, %v9954_v42  ;;  %v10007_v12 = vor.u32 1.1754944e-38, %v4829_v49 }
 0x562   : > { %v4546_v8 = vsel %vm9974_vm0, %v4545_v41, %v4541_v1  ;;  %v4702_v16 = vadd.f32 %v7249_v36, %v4701_v32  ;;  %v4834_v51 = vmul.f32 %v9990_v23, %v9952_v47  ;;  %v4647_v22 = vand.u32 2147483647, %v9954_v42 }
 0x563   : > { %v5676_v18 = vpack.c.bf16 %v4546_v8, %v9944_v52  ;;  %v4640_v27 = vsub.f32 1.0, %v4639_v10  ;;  %v4649_v55 = vand.u32 2147483648, %v9954_v42  ;;  %v10013_v20 = vadd.f32 1.0, %v7253_v25  ;;  %v2920_v25 = vpop.f32.mrf.mxu2  ;;  %v10080_v8 = vpop.f32.mrf.mxu0  ;;  %3053 = vmatmul.bf16.gmra.mxu0 %v8976_v7 }
 0x564   : > { %v4706_v26 = vsel %vm4705_vm7, %v7249_v36, %v4702_v16  ;;  %v7259_v53 = vpop.eup %7258  ;;  %v10016_v44 = vmul.f32 %v9960_v60, %v4730_v58  ;;  %v4822_v52 = vadd.f32 %v9972_v61, %v4821_v39  ;;  %vm4824_vm8 = vweird.f32 %v9972_v61 }
 0x565   : > { %5753 = vst [vmem:[%s9052_s14 + $0xe8] sm:$0xff] %v5676_v18  ;;  %v4711_v31 = vsel %vm9994_vm5, %v4710_v56, %v4706_v26  ;;  %vm10028_vm9 = vcmp.eq.f32.partialorder %v4827_v0, 8.507059e+37  ;;  %v4641_v36 = vmul.f32 %v7257_v29, %v4640_v27  ;;  %vm4644_vm11 = vweird.f32 %v7257_v29  ;;  %vm10042_vm10 = vmor %vm4823_vm6, %vm4824_vm8 }
 0x566   : > { %v5683_v28 = vpack.c.bf16 %v9949_v19, %v4711_v31  ;;  %v4804_v59 = vmul.f32 %v7259_v53, %v9968_v46  ;;  %v4835_v5 = vsub.f32 1.0, %v4834_v51  ;;  %vm4643_vm12 = vweird.f32 %v9954_v42 }
 0x567   : > { %vm10034_vm13 = vcmp.eq.f32.partialorder %v4647_v22, 8.507059e+37  ;;  %7260 = vrcp.f32 %v10013_v20  ;;  %v4642_v30 = vadd.f32 %v7257_v29, %v4641_v36  ;;  %v4650_v57 = vor.u32 1.1754944e-38, %v4649_v55  ;;  %vm4645_vm15 = vmor %vm4643_vm12, %vm4644_vm11 }
 0x568   : > { %5760 = vst [vmem:[%s9052_s14 + $0x118] sm:$0xff] %v5683_v28  ;;  %v4805_v9 = vsub.f32 1.0, %v4804_v59  ;;  %vm4808_vm14 = vweird.f32 %v9968_v46  ;;  %v4826_v42 = vsel %vm10042_vm10, %v9972_v61, %v4822_v52  ;;  %v4812_v3 = vand.u32 2147483647, %v9968_v46 }
 0x569   : > { %v4814_v38 = vand.u32 2147483648, %v9968_v46  ;;  %v2810_v50 = vadd.f32 %v9867_v13, %v8934_v24  ;;  %v4646_v41 = vsel %vm4645_vm15, %v7257_v29, %v4642_v30  ;;  %vm4809_vm0 = vweird.f32 %v7259_v53 }
 0x56a   : > { %v4806_v14 = vmul.f32 %v7259_v53, %v4805_v9  ;;  %7262 = vpow2.f32 %v9965_v37  ;;  %vm4733_vm1 = vweird.f32 %v9887_v17  ;;  %v4836_v11 = vmul.f32 %v9990_v23, %v4835_v5  ;;  %vm4810_vm2 = vmor %vm4808_vm14, %vm4809_vm0 }
 0x56b   : > { %v4651_v61 = vsel %vm10034_vm13, %v4650_v57, %v4646_v41  ;;  %7264 = vpow2.f32 %v9970_v35  ;;  %v6767_v54 = vmul.f32 -1.442695, %v2810_v50  ;;  %v2868_v37 = vadd.f32 %v9869_v6, %v8937_v62  ;;  %v10074_v6 = vpop.f32.mrf.mxu3 }
 0x56c   : > { %v5680_v49 = vpack.c.bf16 %v4651_v61, %v9946_v34  ;;  %v4807_v13 = vadd.f32 %v7259_v53, %v4806_v14  ;;  %7266 = vpow2.f32 %v9986_v48  ;;  %v4815_v2 = vor.u32 1.1754944e-38, %v4814_v38 }
 0x56d   : > { %v10064_v32 = vpop.eup %7260  ;;  %7268 = vpow2.f32 %v6767_v54  ;;  %v2921_v29 = vadd.f32 %v2920_v25, %v8997_v33  ;;  %v2752_v35 = vadd.f32 %v9939_v43, %v8947_v15  ;;  %vm4813_vm3 = vcmp.eq.f32.partialorder %v4812_v3, 8.507059e+37  ;;  %v10082_v43 = vpop.f32.mrf.mxu1  ;;  %3111 = vmatmul.bf16.gmra.mxu1 %v8976_v7 }
 0x56e   : > { %5757 = vst [vmem:[%s9052_s14 + $0x104] sm:$0xff] %v5680_v49  ;;  %v4811_v34 = vsel %vm4810_vm2, %v7259_v53, %v4807_v13  ;;  %v4924_v48 = vmul.f32 %v10064_v32, %v10013_v20  ;;  %v6768_v58 = vmul.f32 -1.442695, %v2868_v37  ;;  %v4737_v1 = vand.u32 2147483647, %v9887_v17 }
 0x56f   : > { %v4831_v46 = vsel %vm10028_vm9, %v10007_v12, %v4826_v42  ;;  %v4816_v56 = vsel %vm4813_vm3, %v4815_v2, %v4811_v34  ;;  %v6755_v39 = vmul.f32 -1.442695, %v2921_v29  ;;  %v6766_v18 = vmul.f32 -1.442695, %v2752_v35  ;;  %v2923_v42 = vpop.f32.mrf.mxu2 }
 0x570   : > { %v7263_v16 = vpop.eup %7262  ;;  %v5687_v0 = vpack.c.bf16 %v4831_v46, %v4816_v56  ;;  %v4925_v10 = vsub.f32 1.0, %v4924_v48  ;;  %7270 = vpow2.f32 %v6768_v58  ;;  %v4732_v12 = vadd.f32 %v9960_v60, %v10016_v44 }
 0x571   : > { %v7265_v51 = vpop.eup %7264  ;;  %vm4734_vm4 = vweird.f32 %v9960_v60  ;;  %v4740_v22 = vor.u32 1.1754944e-38, %v4739_v4  ;;  %7272 = vpow2.f32 %v6755_v39  ;;  %v4837_v27 = vadd.f32 %v9990_v23, %v4836_v11 }
 0x572   : > { %v7267_v26 = vpop.eup %7266  ;;  %vm4839_vm5 = vweird.f32 %v9990_v23  ;;  %v4844_v55 = vand.u32 2147483648, %v9952_v47  ;;  %5764 = vst [vmem:[%s9052_s14 + $0x134] sm:$0xff] %v5687_v0  ;;  %v4926_v53 = vmul.f32 %v10064_v32, %v4925_v10  ;;  %v10096_v52 = vadd.f32 1.0, %v7263_v16  ;;  %vm10106_vm6 = vmor %vm4733_vm1, %vm4734_vm4 }
 0x573   : > { %v7269_v31 = vpop.eup %7268  ;;  %v10098_v44 = vadd.f32 1.0, %v7265_v51  ;;  %v10100_v28 = vadd.f32 1.0, %v7267_v26  ;;  %v2813_v4 = vadd.f32 %v10023_v40, %v8934_v24  ;;  %vm4838_vm7 = vweird.f32 %v9952_v47 }
 0x574   : > { %v4842_v36 = vand.u32 2147483647, %v9952_v47  ;;  %v10112_v59 = vadd.f32 1.0, %v7269_v31  ;;  %7274 = vpow2.f32 %v6766_v18  ;;  %v4736_v5 = vsel %vm10106_vm6, %v9960_v60, %v4732_v12  ;;  %vm10119_vm8 = vmor %vm4838_vm7, %vm4839_vm5 }
 0x575   : > { %v4932_v17 = vand.u32 2147483647, %v10013_v20  ;;  %v4934_v45 = vand.u32 2147483648, %v10013_v20  ;;  %7276 = vrcp.f32 %v10098_v44  ;;  %v4841_v19 = vsel %vm10119_vm8, %v9990_v23, %v4837_v27  ;;  %v10137_v23 = vpop.f32.mrf.mxu3  ;;  %2995 = vmatmul.bf16.gmra.mxu3 %v8976_v7 }
 0x576   : > { %v7271_v47 = vpop.eup %7270  ;;  %v4927_v30 = vadd.f32 %v10064_v32, %v4926_v53  ;;  %vm4929_vm9 = vweird.f32 %v10064_v32  ;;  %7278 = vrcp.f32 %v10100_v28  ;;  %vm4738_vm11 = vcmp.eq.f32.partialorder %v4737_v1, 8.507059e+37 }
 0x577   : > { %v7273_v60 = vpop.eup %7272  ;;  %v4845_v57 = vor.u32 1.1754944e-38, %v4844_v55  ;;  %7280 = vrcp.f32 %v10096_v52  ;;  %v6774_v9 = vmul.f32 -1.442695, %v2813_v4  ;;  %v10133_v3 = vsel %vm4738_vm11, %v4740_v22, %v4736_v5 }
 0x578   : > { %vm4843_vm12 = vcmp.eq.f32.partialorder %v4842_v36, 8.507059e+37  ;;  %vm4928_vm13 = vweird.f32 %v10013_v20  ;;  %7282 = vrcp.f32 %v10112_v59  ;;  %vm10148_vm14 = vcmp.eq.f32.partialorder %v4932_v17, 8.507059e+37 }
 0x579   : > { %v10140_v38 = vsel %vm4843_vm12, %v4845_v57, %v4841_v19  ;;  %vm10144_vm10 = vmor %vm4928_vm13, %vm4929_vm9  ;;  %v4935_v14 = vor.u32 1.1754944e-38, %v4934_v45  ;;  %v2871_v20 = vadd.f32 %v10025_v63, %v8937_v62  ;;  %v10157_v11 = vadd.f32 1.0, %v7271_v47 }
 0x57a   : > { %v7275_v25 = vpop.eup %7274  ;;  %v4931_v7 = vsel %vm10144_vm10, %v10064_v32, %v4927_v30  ;;  %v10159_v61 = vadd.f32 1.0, %v7273_v60  ;;  %v10162_v54 = vadd.f32 %v2923_v42, %v8997_v33  ;;  %v4947_v13 = vand.u32 2147483647, %v10096_v52 }
 0x57b   : > { %v7277_v49 = vpop.eup %7276  ;;  %v4752_v37 = vand.u32 2147483647, %v10098_v44  ;;  %7284 = vpow2.f32 %v6774_v9  ;;  %v10168_v63 = vadd.f32 %v10074_v6, %v8947_v15  ;;  %v4949_v32 = vand.u32 2147483648, %v10096_v52 }
 0x57c   : > { %v7279_v2 = vpop.eup %7278  ;;  %v4744_v29 = vmul.f32 %v7277_v49, %v10098_v44  ;;  %v4754_v35 = vand.u32 2147483648, %v10098_v44  ;;  %7286 = vrcp.f32 %v10157_v11  ;;  %v4936_v48 = vsel %vm10148_vm14, %v4935_v14, %v4931_v7 }
 0x57d   : > { %v10174_v34 = vpop.eup %7280  ;;  %vm4748_vm15 = vweird.f32 %v10098_v44  ;;  %v4909_v58 = vmul.f32 %v7279_v2, %v10100_v28  ;;  %vm4913_vm0 = vweird.f32 %v10100_v28  ;;  %v4917_v46 = vand.u32 2147483647, %v10100_v28 }
 0x57e   : > { %v10181_v6 = vpop.eup %7282  ;;  %v4745_v1 = vsub.f32 1.0, %v4744_v29  ;;  %7288 = vrcp.f32 %v10159_v61  ;;  %v10185_v56 = vadd.f32 1.0, %v7275_v25  ;;  %vm10187_vm1 = vcmp.eq.f32.partialorder %v4752_v37, 8.507059e+37 }
 0x57f   : > { %v4910_v16 = vsub.f32 1.0, %v4909_v58  ;;  %v4919_v0 = vand.u32 2147483648, %v10100_v28  ;;  %v5029_v10 = vmul.f32 %v10181_v6, %v10112_v59  ;;  %v4939_v18 = vmul.f32 %v10174_v34, %v10096_v52 }
 0x580   : > { %v4746_v51 = vmul.f32 %v7277_v49, %v4745_v1  ;;  %vm4749_vm2 = vweird.f32 %v7277_v49  ;;  %v4755_v12 = vor.u32 1.1754944e-38, %v4754_v35  ;;  %vm4914_vm3 = vweird.f32 %v7279_v2 }
 0x581   : > { %v7285_v22 = vpop.eup %7284  ;;  %v4911_v26 = vmul.f32 %v7279_v2, %v4910_v16  ;;  %v5030_v27 = vsub.f32 1.0, %v5029_v10  ;;  %vm5033_vm4 = vweird.f32 %v10112_v59  ;;  %vm10199_vm5 = vcmp.eq.f32.partialorder %v4917_v46, 8.507059e+37  ;;  %vm4750_vm6 = vmor %vm4748_vm15, %vm4749_vm2 }
 0x582   : > { %v10197_v55 = vpop.eup %7286  ;;  %v4747_v53 = vadd.f32 %v7277_v49, %v4746_v51  ;;  %v5037_v4 = vand.u32 2147483647, %v10112_v59  ;;  %7290 = vrcp.f32 %v10185_v56  ;;  %v4920_v36 = vor.u32 1.1754944e-38, %v4919_v0  ;;  %vm4915_vm7 = vmor %vm4913_vm0, %vm4914_vm3 }
 0x583   : > { %v4912_v21 = vadd.f32 %v7279_v2, %v4911_v26  ;;  %v5031_v5 = vmul.f32 %v10181_v6, %v5030_v27  ;;  %v5039_v40 = vand.u32 2147483648, %v10112_v59  ;;  %v4940_v45 = vsub.f32 1.0, %v4939_v18  ;;  %v2925_v59 = vpop.f32.mrf.mxu2  ;;  %v2817_v27 = vpop.f32.mrf.mxu0 }
 0x584   : > { %v7289_v17 = vpop.eup %7288  ;;  %v4751_v47 = vsel %vm4750_vm6, %v7277_v49, %v4747_v53  ;;  %v5044_v19 = vmul.f32 %v10197_v55, %v10157_v11  ;;  %v10214_v30 = vadd.f32 1.0, %v7285_v22  ;;  %v4857_v57 = vand.u32 2147483647, %v10159_v61 }
 0x585   : > { %v4756_v44 = vsel %vm10187_vm1, %v4755_v12, %v4751_v47  ;;  %v4916_v60 = vsel %vm4915_vm7, %v7279_v2, %v4912_v21  ;;  %v6775_v9 = vmul.f32 -1.442695, %v2871_v20  ;;  %v4849_v50 = vmul.f32 %v7289_v17, %v10159_v61 }
 0x586   : > { %v5684_v42 = vpack.c.bf16 %v4756_v44, %v10133_v3  ;;  %v4921_v28 = vsel %vm10199_vm5, %v4920_v36, %v4916_v60  ;;  %v4859_v41 = vand.u32 2147483648, %v10159_v61  ;;  %v5032_v25 = vadd.f32 %v10181_v6, %v5031_v5 }
 0x587   : > { %v5691_v14 = vpack.c.bf16 %v4936_v48, %v4921_v28  ;;  %vm5034_vm8 = vweird.f32 %v10181_v6  ;;  %v5040_v7 = vor.u32 1.1754944e-38, %v5039_v40  ;;  %v4941_v37 = vmul.f32 %v10174_v34, %v4940_v45 }
 0x588   : > { %v7291_v49 = vpop.eup %7290  ;;  %5761 = vst [vmem:[%s9052_s14 + $0x120] sm:$0xff] %v5684_v42  ;;  %v5045_v20 = vsub.f32 1.0, %v5044_v19  ;;  %v4850_v2 = vsub.f32 1.0, %v4849_v50  ;;  %7292 = vrcp.f32 %v10214_v30  ;;  %vm10230_vm9 = vcmp.eq.f32.partialorder %v5037_v4, 8.507059e+37  ;;  %vm10243_vm13 = vmor %vm5033_vm4, %vm5034_vm8  ;;  %v10269_v4 = vpop.f32.mrf.mxu1 }
 0x589   : > { %5768 = vst [vmem:[%s9052_s14 + $0x150] sm:$0xff] %v5691_v14  ;;  %vm4853_vm11 = vweird.f32 %v10159_v61  ;;  %vm10235_vm12 = vcmp.eq.f32.partialorder %v4857_v57, 8.507059e+37  ;;  %v5014_v35 = vmul.f32 %v7291_v49, %v10185_v56  ;;  %v5022_v48 = vand.u32 2147483647, %v10185_v56 }
 0x58a   : > { %v4851_v1 = vmul.f32 %v7289_v17, %v4850_v2  ;;  %vm4854_vm10 = vweird.f32 %v7289_v17  ;;  %v4860_v46 = vor.u32 1.1754944e-38, %v4859_v41  ;;  %vm5018_vm14 = vweird.f32 %v10185_v56 }
 0x58b   : > { %vm4944_vm15 = vweird.f32 %v10174_v34  ;;  %v5036_v39 = vsel %vm10243_vm13, %v10181_v6, %v5032_v25  ;;  %v5015_v16 = vsub.f32 1.0, %v5014_v35  ;;  %v5024_v0 = vand.u32 2147483648, %v10185_v56  ;;  %vm4855_vm1 = vmor %vm4853_vm11, %vm4854_vm10 }
 0x58c   : > { %7294 = vpow2.f32 %v6775_v9  ;;  %v5046_v10 = vmul.f32 %v10197_v55, %v5045_v20  ;;  %v4852_v18 = vadd.f32 %v7289_v17, %v4851_v1  ;;  %vm5019_vm0 = vweird.f32 %v7291_v49 }
 0x58d   : > { %v6762_v51 = vmul.f32 -1.442695, %v10162_v54  ;;  %v5016_v12 = vmul.f32 %v7291_v49, %v5015_v16  ;;  %vm10257_vm2 = vcmp.eq.f32.partialorder %v5022_v48, 8.507059e+37  ;;  %v6773_v6 = vmul.f32 -1.442695, %v10168_v63  ;;  %vm5020_vm3 = vmor %vm5018_vm14, %vm5019_vm0 }
 0x58e   : > { %v2815_v26 = vadd.f32 %v10080_v8, %v8934_v24  ;;  %v10264_v53 = vpop.eup %7292  ;;  %v4856_v31 = vsel %vm4855_vm1, %v7289_v17, %v4852_v18  ;;  %v2873_v54 = vadd.f32 %v10082_v43, %v8937_v62  ;;  %v2926_v61 = vadd.f32 %v2925_v59, %v8997_v33 }
 0x58f   : > { %7296 = vpow2.f32 %v6762_v51  ;;  %v4861_v21 = vsel %vm10235_vm12, %v4860_v46, %v4856_v31  ;;  %v5017_v63 = vadd.f32 %v7291_v49, %v5016_v12  ;;  %v5025_v36 = vor.u32 1.1754944e-38, %v5024_v0 }
 0x590   : > { %v5134_v8 = vmul.f32 %v10264_v53, %v10214_v30  ;;  %v5688_v5 = vpack.c.bf16 %v4861_v21, %v10140_v38  ;;  %7298 = vpow2.f32 %v6773_v6  ;;  %v6781_v43 = vmul.f32 -1.442695, %v2815_v26  ;;  %v10338_v58 = vpop.f32.mrf.mxu1 }
 0x591   : > { %v6782_v40 = vmul.f32 -1.442695, %v2873_v54  ;;  %v5021_v45 = vsel %vm5020_vm3, %v7291_v49, %v5017_v63  ;;  %v6769_v19 = vmul.f32 -1.442695, %v2926_v61  ;;  %v2757_v44 = vadd.f32 %v10137_v23, %v8947_v15 }
 0x592   : > { %v7295_v17 = vpop.eup %7294  ;;  %v5135_v47 = vsub.f32 1.0, %v5134_v8  ;;  %v5041_v60 = vsel %vm10230_vm9, %v5040_v7, %v5036_v39  ;;  %5765 = vst [vmem:[%s9052_s14 + $0x13c] sm:$0xff] %v5688_v5  ;;  %v5026_v38 = vsel %vm10257_vm2, %v5025_v36, %v5021_v45  ;;  %7300 = vpow2.f32 %v6781_v43 }
 0x593   : > { %v10286_v56 = vadd.f32 1.0, %v7295_v17  ;;  %v4942_v57 = vadd.f32 %v10174_v34, %v4941_v37  ;;  %v5052_v9 = vand.u32 2147483647, %v10157_v11  ;;  %v5695_v42 = vpack.c.bf16 %v5041_v60, %v5026_v38 }
 0x594   : > { %7302 = vpow2.f32 %v6782_v40  ;;  %vm4943_vm4 = vweird.f32 %v10096_v52  ;;  %v5047_v23 = vadd.f32 %v10197_v55, %v5046_v10  ;;  %vm5049_vm5 = vweird.f32 %v10197_v55  ;;  %v2928_v40 = vpop.f32.mrf.mxu2 }
 0x595   : > { %v7297_v28 = vpop.eup %7296  ;;  %7304 = vrcp.f32 %v10286_v56  ;;  %5772 = vst [vmem:[%s9052_s14 + $0x16c] sm:$0xff] %v5695_v42  ;;  %v5136_v50 = vmul.f32 %v10264_v53, %v5135_v47  ;;  %v6780_v14 = vmul.f32 -1.442695, %v2757_v44  ;;  %vm10300_vm6 = vmor %vm4943_vm4, %vm4944_vm15  ;;  %vm10306_vm7 = vcmp.eq.f32.partialorder %v4947_v13, 8.507059e+37 }
 0x596   : > { %v10296_v41 = vadd.f32 1.0, %v7297_v28  ;;  %7306 = vpow2.f32 %v6769_v19  ;;  %v7299_v25 = vpop.eup %7298  ;;  %vm5048_vm8 = vweird.f32 %v10157_v11  ;;  %v5054_v37 = vand.u32 2147483648, %v10157_v11  ;;  %v10329_v11 = vpop.f32.mrf.mxu0 }
 0x597   : > { %v2818_v20 = vadd.f32 %v2817_v27, %v8934_v24  ;;  %v4946_v2 = vsel %vm10300_vm6, %v10174_v34, %v4942_v57  ;;  %v4950_v3 = vor.u32 1.1754944e-38, %v4949_v32  ;;  %vm10320_vm9 = vmor %vm5048_vm8, %vm5049_vm5  ;;  %vm10324_vm11 = vcmp.eq.f32.partialorder %v5052_v9, 8.507059e+37  ;;  %v10401_v9 = vpop.f32.mrf.mxu3 }
 0x598   : > { %7308 = vrcp.f32 %v10296_v41  ;;  %v7301_v35 = vpop.eup %7300  ;;  %v5051_v52 = vsel %vm10320_vm9, %v10197_v55, %v5047_v23  ;;  %v5142_v32 = vand.u32 2147483647, %v10214_v30  ;;  %v5144_v34 = vand.u32 2147483648, %v10214_v30 }
 0x599   : > { %v10336_v48 = vadd.f32 1.0, %v7299_v25  ;;  %v5137_v46 = vadd.f32 %v10264_v53, %v5136_v50  ;;  %vm5139_vm12 = vweird.f32 %v10264_v53  ;;  %v10342_v39 = vadd.f32 1.0, %v7301_v35 }
 0x59a   : > { %v7303_v1 = vpop.eup %7302  ;;  %7310 = vpow2.f32 %v6780_v14  ;;  %v10348_v55 = vsel %vm10306_vm7, %v4950_v3, %v4946_v2  ;;  %v5055_v0 = vor.u32 1.1754944e-38, %v5054_v37  ;;  %v6788_v59 = vmul.f32 -1.442695, %v2818_v20  ;;  %v10408_v14 = vpop.f32.mrf.mxu1 }
 0x59b   : > { %v10344_v16 = vpop.eup %7304  ;;  %7312 = vrcp.f32 %v10336_v48  ;;  %vm5138_vm13 = vweird.f32 %v10214_v30  ;;  %v5159_v51 = vand.u32 2147483648, %v10286_v56  ;;  %vm10364_vm14 = vcmp.eq.f32.partialorder %v5142_v32, 8.507059e+37 }
 0x59c   : > { %v7307_v10 = vpop.eup %7306  ;;  %v5149_v18 = vmul.f32 %v10344_v16, %v10286_v56  ;;  %7314 = vrcp.f32 %v10342_v39  ;;  %v10358_v12 = vsel %vm10324_vm11, %v5055_v0, %v5051_v52  ;;  %vm10360_vm10 = vmor %vm5138_vm13, %vm5139_vm12  ;;  %v5145_v30 = vor.u32 1.1754944e-38, %v5144_v34 }
 0x59d   : > { %v4962_v26 = vand.u32 2147483647, %v10296_v41  ;;  %v5141_v31 = vsel %vm10360_vm10, %v10264_v53, %v5137_v46  ;;  %v10372_v54 = vadd.f32 1.0, %v7303_v1  ;;  %v10374_v61 = vadd.f32 1.0, %v7307_v10 }
 0x59e   : > { %v7309_v27 = vpop.eup %7308  ;;  %v2876_v21 = vadd.f32 %v10269_v4, %v8937_v62  ;;  %v5150_v63 = vsub.f32 1.0, %v5149_v18  ;;  %v5157_v36 = vand.u32 2147483647, %v10286_v56  ;;  %7316 = vpow2.f32 %v6788_v59  ;;  %v10403_v42 = vpop.f32.mrf.mxu0 }
 0x59f   : > { %v4954_v8 = vmul.f32 %v7309_v27, %v10296_v41  ;;  %v10380_v43 = vor.u32 1.1754944e-38, %v5159_v51  ;;  %vm4958_vm15 = vweird.f32 %v10296_v41  ;;  %v4964_v53 = vand.u32 2147483648, %v10296_v41  ;;  %v2761_v47 = vpop.f32.mrf.mxu3 }
 0x5a0   : > { %v7311_v5 = vpop.eup %7310  ;;  %7318 = vrcp.f32 %v10372_v54  ;;  %v10387_v4 = vsel %vm10364_vm14, %v5145_v30, %v5141_v31  ;;  %vm10389_vm0 = vcmp.eq.f32.partialorder %v4962_v26, 8.507059e+37  ;;  %v5127_v60 = vand.u32 2147483647, %v10336_v48 }
 0x5a1   : > { %v7313_v17 = vpop.eup %7312  ;;  %v4955_v45 = vsub.f32 1.0, %v4954_v8  ;;  %7320 = vrcp.f32 %v10374_v61  ;;  %v5129_v38 = vand.u32 2147483648, %v10336_v48  ;;  %v10399_v57 = vmul.f32 -1.442695, %v2876_v21  ;;  %v2930_v21 = vpop.f32.mrf.mxu2 }
 0x5a2   : > { %v10394_v19 = vpop.eup %7314  ;;  %v5119_v44 = vmul.f32 %v7313_v17, %v10336_v48  ;;  %v5151_v28 = vmul.f32 %v10344_v16, %v5150_v63  ;;  %vm5153_vm1 = vweird.f32 %v10286_v56  ;;  %vm4959_vm2 = vweird.f32 %v7309_v27 }
 0x5a3   : > { %v4956_v23 = vmul.f32 %v7309_v27, %v4955_v45  ;;  %v5249_v50 = vand.u32 2147483648, %v10342_v39  ;;  %v4965_v25 = vor.u32 1.1754944e-38, %v4964_v53  ;;  %v5239_v49 = vmul.f32 %v10394_v19, %v10342_v39  ;;  %vm4960_vm5 = vmor %vm4958_vm15, %vm4959_vm2 }
 0x5a4   : > { %v5120_v7 = vsub.f32 1.0, %v5119_v44  ;;  %v2929_v37 = vadd.f32 %v2928_v40, %v8997_v33  ;;  %v7317_v20 = vpop.eup %7316  ;;  %vm5154_vm3 = vweird.f32 %v10344_v16  ;;  %vm5123_vm4 = vweird.f32 %v10336_v48 }
 0x5a5   : > { %v4957_v2 = vadd.f32 %v7309_v27, %v4956_v23  ;;  %v10415_v3 = vadd.f32 1.0, %v7311_v5  ;;  %vm5124_vm6 = vweird.f32 %v7313_v17  ;;  %vm10421_vm7 = vcmp.eq.f32.partialorder %v5127_v60, 8.507059e+37  ;;  %v2882_v5 = vpop.f32.mrf.mxu1  ;;  %vm10454_vm11 = vmor %vm5153_vm1, %vm5154_vm3 }
 0x5a6   : > { %v10417_v13 = vpop.eup %7318  ;;  %v5121_v29 = vmul.f32 %v7313_v17, %v5120_v7  ;;  %v5247_v52 = vand.u32 2147483647, %v10342_v39  ;;  %v10427_v34 = vadd.f32 %v10344_v16, %v5151_v28  ;;  %v5130_v46 = vor.u32 1.1754944e-38, %v5129_v38  ;;  %vm5125_vm8 = vmor %vm5123_vm4, %vm5124_vm6  ;;  %v2824_v63 = vpop.f32.mrf.mxu0 }
 0x5a7   : > { %v7321_v32 = vpop.eup %7320  ;;  %v4961_v1 = vsel %vm4960_vm5, %v7309_v27, %v4957_v2  ;;  %v10429_v0 = vor.u32 1.1754944e-38, %v5249_v50  ;;  %v5240_v10 = vsub.f32 1.0, %v5239_v49  ;;  %v5254_v22 = vmul.f32 %v10417_v13, %v10372_v54  ;;  %v10525_v63 = vpop.f32.mrf.mxu3 }
 0x5a8   : > { %v4966_v41 = vsel %vm10389_vm0, %v4965_v25, %v4961_v1  ;;  %v5122_v59 = vadd.f32 %v7313_v17, %v5121_v29  ;;  %v5059_v18 = vmul.f32 %v7321_v32, %v10374_v61  ;;  %7322 = vrcp.f32 %v10415_v3 }
 0x5a9   : > { %v5692_v51 = vpack.c.bf16 %v4966_v41, %v10348_v55  ;;  %v10440_v6 = vadd.f32 1.0, %v7317_v20  ;;  %v5067_v27 = vand.u32 2147483647, %v10374_v61  ;;  %v5069_v31 = vand.u32 2147483648, %v10374_v61 }
 0x5aa   : > { %v5126_v30 = vsel %vm5125_vm8, %v7313_v17, %v5122_v59  ;;  %v5060_v26 = vsub.f32 1.0, %v5059_v18  ;;  %v5262_v55 = vand.u32 2147483647, %v10372_v54  ;;  %v5264_v8 = vand.u32 2147483648, %v10372_v54 }
 0x5ab   : > { %5769 = vst [vmem:[%s9052_s14 + $0x158] sm:$0xff] %v5692_v51  ;;  %v5131_v48 = vsel %vm10421_vm7, %v5130_v46, %v5126_v30  ;;  %vm5063_vm9 = vweird.f32 %v10374_v61  ;;  %v5241_v17 = vmul.f32 %v10394_v19, %v5240_v10  ;;  %vm5243_vm12 = vweird.f32 %v10342_v39  ;;  %v10503_v51 = vpop.f32.mrf.mxu2 }
 0x5ac   : > { %v5699_v40 = vpack.c.bf16 %v10387_v4, %v5131_v48  ;;  %v5061_v45 = vmul.f32 %v7321_v32, %v5060_v26  ;;  %vm5064_vm13 = vweird.f32 %v7321_v32  ;;  %v5156_v44 = vsel %vm10454_vm11, %v10344_v16, %v10427_v34 }
 0x5ad   : > { %vm5244_vm10 = vweird.f32 %v10394_v19  ;;  %v5255_v60 = vsub.f32 1.0, %v5254_v22  ;;  %7324 = vrcp.f32 %v10440_v6  ;;  %vm10468_vm14 = vcmp.eq.f32.partialorder %v5067_v27, 8.507059e+37  ;;  %vm5065_vm0 = vmor %vm5063_vm9, %vm5064_vm13 }
 0x5ae   : > { %5776 = vst [vmem:[%s9052_s14 + $0x188] sm:$0xff] %v5699_v40  ;;  %v5062_v38 = vadd.f32 %v7321_v32, %v5061_v45  ;;  %v5070_v28 = vor.u32 1.1754944e-38, %v5069_v31  ;;  %7326 = vpow2.f32 %v10399_v57  ;;  %v7323_v23 = vpop.eup %7322  ;;  %vm5259_vm15 = vweird.f32 %v10417_v13  ;;  %vm10515_vm6 = vmor %vm5243_vm12, %vm5244_vm10 }
 0x5af   : > { %v6776_v50 = vmul.f32 -1.442695, %v2929_v37  ;;  %v2760_v25 = vadd.f32 %v10401_v9, %v8947_v15  ;;  %v2820_v7 = vadd.f32 %v10329_v11, %v8934_v24  ;;  %v5242_v49 = vadd.f32 %v10394_v19, %v5241_v17 }
 0x5b0   : > { %vm10481_vm1 = vcmp.eq.f32.partialorder %v5247_v52, 8.507059e+37  ;;  %vm5258_vm2 = vweird.f32 %v10372_v54  ;;  %v5066_v57 = vsel %vm5065_vm0, %v7321_v32, %v5062_v38  ;;  %v5224_v2 = vmul.f32 %v7323_v23, %v10415_v3 }
 0x5b1   : > { %vm5228_vm3 = vweird.f32 %v10415_v3  ;;  %v5256_v61 = vmul.f32 %v10417_v13, %v5255_v60  ;;  %v5071_v9 = vsel %vm10468_vm14, %v5070_v28, %v5066_v57  ;;  %v5232_v11 = vand.u32 2147483647, %v10415_v3  ;;  %vm10541_vm9 = vmor %vm5258_vm2, %vm5259_vm15 }
 0x5b2   : > { %7328 = vpow2.f32 %v6776_v50  ;;  %v5696_v37 = vpack.c.bf16 %v5071_v9, %v10358_v12  ;;  %v5225_v29 = vsub.f32 1.0, %v5224_v2  ;;  %v6787_v35 = vmul.f32 -1.442695, %v2760_v25  ;;  %v2766_v2 = vpop.f32.mrf.mxu3 }
 0x5b3   : > { %v6795_v52 = vmul.f32 -1.442695, %v2820_v7  ;;  %v10493_v1 = vpop.eup %7324  ;;  %v5234_v32 = vand.u32 2147483648, %v10415_v3  ;;  %v2878_v46 = vadd.f32 %v10338_v58, %v8937_v62  ;;  %v2931_v41 = vadd.f32 %v2930_v21, %v8997_v33  ;;  %v10564_v7 = vpop.f32.mrf.mxu2 }
 0x5b4   : > { %v2762_v59 = vadd.f32 %v2761_v47, %v8947_v15  ;;  %v7327_v10 = vpop.eup %7326  ;;  %5773 = vst [vmem:[%s9052_s14 + $0x174] sm:$0xff] %v5696_v37  ;;  %v5226_v18 = vmul.f32 %v7323_v23, %v5225_v29  ;;  %vm5229_vm4 = vweird.f32 %v7323_v23  ;;  %v5344_v12 = vmul.f32 %v10493_v1, %v10440_v6 }
 0x5b5   : > { %7330 = vpow2.f32 %v6787_v35  ;;  %vm10507_vm5 = vcmp.eq.f32.partialorder %v5157_v36, 8.507059e+37  ;;  %v10519_v30 = vadd.f32 1.0, %v7327_v10  ;;  %v6796_v26 = vmul.f32 -1.442695, %v2878_v46  ;;  %vm5230_vm7 = vmor %vm5228_vm3, %vm5229_vm4 }
 0x5b6   : > { %7332 = vpow2.f32 %v6795_v52  ;;  %v6783_v27 = vmul.f32 -1.442695, %v2931_v41  ;;  %v5246_v56 = vsel %vm10515_vm6, %v10394_v19, %v5242_v49  ;;  %v5257_v36 = vadd.f32 %v10417_v13, %v5256_v61 }
 0x5b7   : > { %v5227_v31 = vadd.f32 %v7323_v23, %v5226_v18  ;;  %v5345_v21 = vsub.f32 1.0, %v5344_v12  ;;  %vm5233_vm8 = vcmp.eq.f32.partialorder %v5232_v11, 8.507059e+37  ;;  %v5235_v48 = vor.u32 1.1754944e-38, %v5234_v32 }
 0x5b8   : > { %v7329_v39 = vpop.eup %7328  ;;  %7334 = vrcp.f32 %v10519_v30  ;;  %v6794_v5 = vmul.f32 -1.442695, %v2762_v59  ;;  %v5251_v45 = vsel %vm10481_vm1, %v10429_v0, %v5246_v56  ;;  %v2823_v60 = vadd.f32 %v10403_v42, %v8934_v24 }
 0x5b9   : > { %v5231_v40 = vsel %vm5230_vm7, %v7323_v23, %v5227_v31  ;;  %v5346_v17 = vmul.f32 %v10493_v1, %v5345_v21  ;;  %v10532_v19 = vadd.f32 1.0, %v7329_v39  ;;  %7336 = vpow2.f32 %v6796_v26 }
 0x5ba   : > { %v5236_v47 = vsel %vm5233_vm8, %v5235_v48, %v5231_v40  ;;  %7338 = vpow2.f32 %v6783_v27  ;;  %v5261_v4 = vsel %vm10541_vm9, %v10417_v13, %v5257_v36  ;;  %v5352_v28 = vand.u32 2147483647, %v10440_v6 }
 0x5bb   : > { %v7331_v38 = vpop.eup %7330  ;;  %v5703_v0 = vpack.c.bf16 %v5251_v45, %v5236_v47  ;;  %7340 = vrcp.f32 %v10532_v19  ;;  %v5347_v50 = vadd.f32 %v10493_v1, %v5346_v17  ;;  %vm5349_vm12 = vweird.f32 %v10493_v1  ;;  %v10622_v27 = vpop.f32.mrf.mxu2 }
 0x5bc   : > { %v7333_v23 = vpop.eup %7332  ;;  %v10554_v25 = vadd.f32 1.0, %v7331_v38  ;;  %7342 = vpow2.f32 %v6794_v5  ;;  %vm5263_vm13 = vcmp.eq.f32.partialorder %v5262_v55, 8.507059e+37  ;;  %v5265_v24 = vor.u32 1.1754944e-38, %v5264_v8 }
 0x5bd   : > { %5780 = vst [vmem:[%s9052_s14 + $0x1a4] sm:$0xff] %v5703_v0  ;;  %v5354_v42 = vand.u32 2147483648, %v10440_v6  ;;  %v10562_v13 = vadd.f32 1.0, %v7333_v23  ;;  %vm5348_vm10 = vweird.f32 %v10440_v6  ;;  %v5369_v20 = vand.u32 2147483648, %v10519_v30 }
 0x5be   : > { %v10566_v49 = vpop.eup %7334  ;;  %7344 = vrcp.f32 %v10554_v25  ;;  %v6802_v57 = vmul.f32 -1.442695, %v2823_v60  ;;  %v10579_v54 = vsel %vm10507_vm5, %v10380_v43, %v5156_v44  ;;  %v10581_v8 = vsel %vm5263_vm13, %v5265_v24, %v5261_v4  ;;  %vm10585_vm14 = vmor %vm5348_vm10, %vm5349_vm12 }
 0x5bf   : > { %v7337_v55 = vpop.eup %7336  ;;  %v5351_v53 = vsel %vm10585_vm14, %v10493_v1, %v5347_v50  ;;  %vm5353_vm11 = vcmp.eq.f32.partialorder %v5352_v28, 8.507059e+37  ;;  %v5172_v16 = vand.u32 2147483647, %v10532_v19  ;;  %7346 = vrcp.f32 %v10562_v13 }
 0x5c0   : > { %v7339_v61 = vpop.eup %7338  ;;  %v5355_v34 = vor.u32 1.1754944e-38, %v5354_v42  ;;  %v5367_v44 = vand.u32 2147483647, %v10519_v30  ;;  %v5174_v9 = vand.u32 2147483648, %v10532_v19  ;;  %v10596_v11 = vadd.f32 1.0, %v7337_v55 }
 0x5c1   : > { %v7341_v43 = vpop.eup %7340  ;;  %v5359_v29 = vmul.f32 %v10566_v49, %v10519_v30  ;;  %v10600_v35 = vor.u32 1.1754944e-38, %v5369_v20  ;;  %7348 = vpow2.f32 %v6802_v57  ;;  %vm5168_vm15 = vweird.f32 %v10532_v19 }
 0x5c2   : > { %v7343_v37 = vpop.eup %7342  ;;  %v5164_v52 = vmul.f32 %v7341_v43, %v10532_v19  ;;  %v10603_v1 = vsel %vm5353_vm11, %v5355_v34, %v5351_v53  ;;  %7350 = vrcp.f32 %v10596_v11  ;;  %v10609_v32 = vadd.f32 %v10408_v14, %v8937_v62 }
 0x5c3   : > { %vm10611_vm0 = vcmp.eq.f32.partialorder %v5172_v16, 8.507059e+37  ;;  %v5337_v10 = vand.u32 2147483647, %v10554_v25  ;;  %v10616_v18 = vadd.f32 1.0, %v7339_v61  ;;  %v5175_v12 = vor.u32 1.1754944e-38, %v5174_v9  ;;  %v2940_v61 = vpop.f32.mrf.mxu2 }
 0x5c4   : > { %v7345_v46 = vpop.eup %7344  ;;  %v5165_v41 = vsub.f32 1.0, %v5164_v52  ;;  %v5339_v58 = vand.u32 2147483648, %v10554_v25  ;;  %v10620_v26 = vadd.f32 1.0, %v7343_v37  ;;  %v5360_v14 = vsub.f32 1.0, %v5359_v29 }
 0x5c5   : > { %v5329_v22 = vmul.f32 %v7345_v46, %v10554_v25  ;;  %v10624_v62 = vpop.eup %7346  ;;  %vm5169_vm1 = vweird.f32 %v7341_v43  ;;  %7352 = vrcp.f32 %v10616_v18  ;;  %vm5333_vm2 = vweird.f32 %v10554_v25 }
 0x5c6   : > { %v5166_v56 = vmul.f32 %v7341_v43, %v5165_v41  ;;  %v5449_v31 = vmul.f32 %v10624_v62, %v10562_v13  ;;  %v5457_v21 = vand.u32 2147483647, %v10562_v13  ;;  %vm10631_vm3 = vcmp.eq.f32.partialorder %v5337_v10, 8.507059e+37  ;;  %vm5170_vm5 = vmor %vm5168_vm15, %vm5169_vm1 }
 0x5c7   : > { %v5330_v36 = vsub.f32 1.0, %v5329_v22  ;;  %v7349_v39 = vpop.eup %7348  ;;  %vm5453_vm4 = vweird.f32 %v10562_v13  ;;  %v5459_v40 = vand.u32 2147483648, %v10562_v13  ;;  %vm5334_vm6 = vweird.f32 %v7345_v46 }
 0x5c8   : > { %v5167_v48 = vadd.f32 %v7341_v43, %v5166_v56  ;;  %v10637_v17 = vpop.eup %7350  ;;  %v5450_v3 = vsub.f32 1.0, %v5449_v31  ;;  %7354 = vrcp.f32 %v10620_v26  ;;  %v5361_v47 = vmul.f32 %v10566_v49, %v5360_v14  ;;  %vm5335_vm8 = vmor %vm5333_vm2, %vm5334_vm6  ;;  %v3067_v31 = vpop.f32.mrf.mxu1 }
 0x5c9   : > { %v5331_v45 = vmul.f32 %v7345_v46, %v5330_v36  ;;  %v5340_v38 = vor.u32 1.1754944e-38, %v5339_v58  ;;  %v5464_v4 = vmul.f32 %v10637_v17, %v10596_v11  ;;  %vm10648_vm7 = vcmp.eq.f32.partialorder %v5457_v21, 8.507059e+37  ;;  %v3009_v36 = vpop.f32.mrf.mxu0 }
 0x5ca   : > { %v5171_v60 = vsel %vm5170_vm5, %v7341_v43, %v5167_v48  ;;  %v5451_v19 = vmul.f32 %v10624_v62, %v5450_v3  ;;  %vm5454_vm9 = vweird.f32 %v10624_v62  ;;  %v5460_v42 = vor.u32 1.1754944e-38, %v5459_v40 }
 0x5cb   : > { %v5176_v0 = vsel %vm10611_vm0, %v5175_v12, %v5171_v60  ;;  %v5332_v28 = vadd.f32 %v7345_v46, %v5331_v45  ;;  %v7353_v50 = vpop.eup %7352  ;;  %v5277_v20 = vand.u32 2147483647, %v10616_v18  ;;  %v5279_v2 = vand.u32 2147483648, %v10616_v18  ;;  %vm10672_vm12 = vmor %vm5453_vm4, %vm5454_vm9 }
 0x5cc   : > { %v5700_v24 = vpack.c.bf16 %v5176_v0, %v10579_v54  ;;  %v5452_v55 = vadd.f32 %v10624_v62, %v5451_v19  ;;  %v5269_v6 = vmul.f32 %v7353_v50, %v10616_v18  ;;  %v10661_v53 = vadd.f32 %v10566_v49, %v5361_v47 }
 0x5cd   : > { %v5336_v57 = vsel %vm5335_vm8, %v7345_v46, %v5332_v28  ;;  %v5465_v54 = vsub.f32 1.0, %v5464_v4  ;;  %v5442_v16 = vand.u32 2147483647, %v10620_v26  ;;  %vm5273_vm13 = vweird.f32 %v10616_v18  ;;  %v7606_v18 = vld [vmem:[%s12156_s12] sm:$0x7f] }
 0x5ce   : > { %5777 = vst [vmem:[%s9052_s14 + $0x190] sm:$0xff] %v5700_v24  ;;  %v5341_v25 = vsel %vm10631_vm3, %v5340_v38, %v5336_v57  ;;  %v7355_v43 = vpop.eup %7354  ;;  %v5270_v37 = vsub.f32 1.0, %v5269_v6  ;;  %v10677_v29 = vadd.f32 1.0, %v7349_v39  ;;  %vm5364_vm10 = vweird.f32 %v10566_v49 }
 0x5cf   : > { %v5707_v34 = vpack.c.bf16 %v10603_v1, %v5341_v25  ;;  %v5456_v52 = vsel %vm10672_vm12, %v10624_v62, %v5452_v55  ;;  %vm10683_vm14 = vcmp.eq.f32.partialorder %v5277_v20, 8.507059e+37  ;;  %v5434_v13 = vmul.f32 %v7355_v43, %v10620_v26 }
 0x5d0   : > { %v5444_v46 = vand.u32 2147483648, %v10620_v26  ;;  %vm5469_vm11 = vweird.f32 %v10637_v17  ;;  %v5271_v41 = vmul.f32 %v7353_v50, %v5270_v37  ;;  %vm5274_vm15 = vweird.f32 %v7353_v50 }
 0x5d1   : > { %5784 = vst [vmem:[%s9052_s14 + $0x1c0] sm:$0xff] %v5707_v34  ;;  %v5280_v59 = vor.u32 1.1754944e-38, %v5279_v2  ;;  %7356 = vrcp.f32 %v10677_v29  ;;  %vm5363_vm0 = vweird.f32 %v10519_v30  ;;  %v5466_v10 = vmul.f32 %v10637_v17, %v5465_v54  ;;  %vm5275_vm3 = vmor %vm5273_vm13, %vm5274_vm15 }
 0x5d2   : > { %v5435_v12 = vsub.f32 1.0, %v5434_v13  ;;  %vm5438_vm1 = vweird.f32 %v10620_v26  ;;  %vm10695_vm2 = vcmp.eq.f32.partialorder %v5442_v16, 8.507059e+37  ;;  %v5461_v58 = vsel %vm10648_vm7, %v5460_v42, %v5456_v52  ;;  %vm10739_vm6 = vmor %vm5363_vm0, %vm5364_vm10  ;;  %v3069_v16 = vpop.f32.mrf.mxu1 }
 0x5d3   : > { %v5272_v62 = vadd.f32 %v7353_v50, %v5271_v41  ;;  %v6803_v14 = vmul.f32 -1.442695, %v10609_v32  ;;  %v2934_v56 = vadd.f32 %v10503_v51, %v8997_v33  ;;  %vm5439_vm4 = vweird.f32 %v7355_v43 }
 0x5d4   : > { %v5436_v21 = vmul.f32 %v7355_v43, %v5435_v12  ;;  %v5445_v39 = vor.u32 1.1754944e-38, %v5444_v46  ;;  %v2765_v48 = vadd.f32 %v10525_v63, %v8947_v15  ;;  %v2936_v32 = vadd.f32 %v10564_v7, %v8997_v33  ;;  %vm5440_vm5 = vmor %vm5438_vm1, %vm5439_vm4  ;;  %v2951_v12 = vpop.f32.mrf.mxu3 }
 0x5d5   : > { %v5276_v5 = vsel %vm5275_vm3, %v7353_v50, %v5272_v62  ;;  %7358 = vpow2.f32 %v6803_v14  ;;  %v6790_v40 = vmul.f32 -1.442695, %v2934_v56  ;;  %v10715_v47 = vperm.slane %v7606_v18, 5 }
 0x5d6   : > { %v5281_v51 = vsel %vm10683_vm14, %v5280_v59, %v5276_v5  ;;  %v5437_v45 = vadd.f32 %v7355_v43, %v5436_v21  ;;  %v6801_v3 = vmul.f32 -1.442695, %v2765_v48  ;;  %v6797_v63 = vmul.f32 -1.442695, %v2936_v32 }
 0x5d7   : > { %v10717_v60 = vpop.eup %7356  ;;  %v5704_v15 = vpack.c.bf16 %v5281_v51, %v10581_v8  ;;  %7360 = vpow2.f32 %v6790_v40  ;;  %v10722_v7 = vperm.slane %v7606_v18, 6  ;;  %v5467_v38 = vadd.f32 %v10637_v17, %v5466_v10 }
 0x5d8   : > { %v5441_v4 = vsel %vm5440_vm5, %v7355_v43, %v5437_v45  ;;  %v5554_v0 = vmul.f32 %v10717_v60, %v10677_v29  ;;  %7362 = vpow2.f32 %v6801_v3  ;;  %v3010_v8 = vadd.f32 %v3009_v36, %v10715_v47 }
 0x5d9   : > { %5781 = vst [vmem:[%s9052_s14 + $0x1ac] sm:$0xff] %v5704_v15  ;;  %v5446_v28 = vsel %vm10695_vm2, %v5445_v39, %v5441_v4  ;;  %7364 = vpow2.f32 %v6797_v63  ;;  %v3068_v26 = vadd.f32 %v3067_v31, %v10722_v7  ;;  %v5472_v19 = vand.u32 2147483647, %v10596_v11 }
 0x5da   : > { %v5711_v23 = vpack.c.bf16 %v5461_v58, %v5446_v28  ;;  %v5555_v50 = vsub.f32 1.0, %v5554_v0  ;;  %v2939_v24 = vadd.f32 %v10622_v27, %v8997_v33  ;;  %vm5468_vm7 = vweird.f32 %v10596_v11 }
 0x5db   : > { %v7359_v42 = vpop.eup %7358  ;;  %v5474_v57 = vand.u32 2147483648, %v10596_v11  ;;  %v6680_v55 = vmul.f32 -1.442695, %v3010_v8  ;;  %v6681_v6 = vmul.f32 -1.442695, %v3068_v26  ;;  %v5366_v33 = vsel %vm10739_vm6, %v10566_v49, %v10661_v53  ;;  %vm10751_vm8 = vmor %vm5468_vm7, %vm5469_vm11  ;;  %v3011_v53 = vpop.f32.mrf.mxu0 }
 0x5dc   : > { %5788 = vst [vmem:[%s9052_s14 + $0x1dc] sm:$0xff] %v5711_v23  ;;  %v5556_v2 = vmul.f32 %v10717_v60, %v5555_v50  ;;  %v10757_v61 = vadd.f32 1.0, %v7359_v42  ;;  %v6804_v25 = vmul.f32 -1.442695, %v2939_v24  ;;  %v5471_v54 = vsel %vm10751_vm8, %v10637_v17, %v5467_v38 }
 0x5dd   : > { %v7361_v11 = vpop.eup %7360  ;;  %vm5558_vm9 = vweird.f32 %v10677_v29  ;;  %v5562_v49 = vand.u32 2147483647, %v10677_v29  ;;  %7366 = vpow2.f32 %v6680_v55  ;;  %vm5559_vm12 = vweird.f32 %v10717_v60 }
 0x5de   : > { %v7363_v43 = vpop.eup %7362  ;;  %v5557_v34 = vadd.f32 %v10717_v60, %v5556_v2  ;;  %v5564_v9 = vand.u32 2147483648, %v10677_v29  ;;  %7368 = vrcp.f32 %v10757_v61  ;;  %v10768_v52 = vadd.f32 1.0, %v7361_v11  ;;  %vm10784_vm14 = vmor %vm5558_vm9, %vm5559_vm12 }
 0x5df   : > { %v7365_v37 = vpop.eup %7364  ;;  %v10770_v17 = vadd.f32 1.0, %v7363_v43  ;;  %7370 = vpow2.f32 %v6681_v6  ;;  %v10772_v1 = vperm.slane %v7606_v18, 4  ;;  %v3012_v46 = vadd.f32 %v3011_v53, %v10715_v47 }
 0x5e0   : > { %v10774_v13 = vadd.f32 1.0, %v7365_v37  ;;  %7372 = vpow2.f32 %v6804_v25  ;;  %v3070_v41 = vadd.f32 %v3069_v16, %v10722_v7  ;;  %vm5368_vm13 = vcmp.eq.f32.partialorder %v5367_v44, 8.507059e+37 }
 0x5e1   : > { %vm5473_vm10 = vcmp.eq.f32.partialorder %v5472_v19, 8.507059e+37  ;;  %v5475_v59 = vor.u32 1.1754944e-38, %v5474_v57  ;;  %7374 = vrcp.f32 %v10768_v52  ;;  %v10790_v22 = vsel %vm5368_vm13, %v10600_v35, %v5366_v33 }
 0x5e2   : > { %v5561_v30 = vsel %vm10784_vm14, %v10717_v60, %v5557_v34  ;;  %v5579_v44 = vand.u32 2147483648, %v10757_v61  ;;  %7376 = vrcp.f32 %v10770_v17  ;;  %vm5563_vm11 = vcmp.eq.f32.partialorder %v5562_v49, 8.507059e+37 }
 0x5e3   : > { %v7367_v58 = vpop.eup %7366  ;;  %v10797_v29 = vsel %vm5473_vm10, %v5475_v59, %v5471_v54  ;;  %v5565_v62 = vor.u32 1.1754944e-38, %v5564_v9  ;;  %7378 = vrcp.f32 %v10774_v13  ;;  %v5382_v35 = vand.u32 2147483647, %v10768_v52  ;;  %v2953_v54 = vpop.f32.mrf.mxu3 }
 0x5e4   : > { %v10800_v14 = vpop.eup %7368  ;;  %v2952_v56 = vadd.f32 %v2951_v12, %v10772_v1  ;;  %v6687_v36 = vmul.f32 -1.442695, %v3012_v46  ;;  %v10804_v31 = vmul.f32 -1.442695, %v3070_v41  ;;  %v5577_v5 = vand.u32 2147483647, %v10757_v61 }
 0x5e5   : > { %v7371_v21 = vpop.eup %7370  ;;  %v10806_v39 = vsel %vm5563_vm11, %v5565_v62, %v5561_v30  ;;  %v5569_v48 = vmul.f32 %v10800_v14, %v10757_v61  ;;  %v5384_v40 = vand.u32 2147483648, %v10768_v52  ;;  %v10812_v51 = vor.u32 1.1754944e-38, %v5579_v44 }
 0x5e6   : > { %v7373_v32 = vpop.eup %7372  ;;  %vm5378_vm15 = vweird.f32 %v10768_v52  ;;  %v5547_v45 = vand.u32 2147483647, %v10770_v17  ;;  %v10816_v3 = vadd.f32 1.0, %v7367_v58  ;;  %vm5543_vm0 = vweird.f32 %v10770_v17 }
 0x5e7   : > { %v7375_v18 = vpop.eup %7374  ;;  %v5570_v60 = vsub.f32 1.0, %v5569_v48  ;;  %v5549_v15 = vand.u32 2147483648, %v10770_v17  ;;  %v10820_v63 = vadd.f32 1.0, %v7371_v21  ;;  %vm10823_vm1 = vcmp.eq.f32.partialorder %v5382_v35, 8.507059e+37 }
 0x5e8   : > { %v7377_v38 = vpop.eup %7376  ;;  %v5374_v4 = vmul.f32 %v7375_v18, %v10768_v52  ;;  %vm5483_vm2 = vweird.f32 %v10774_v13  ;;  %v5487_v28 = vand.u32 2147483647, %v10774_v13  ;;  %7380 = vrcp.f32 %v10816_v3 }
 0x5e9   : > { %v7379_v8 = vpop.eup %7378  ;;  %vm5573_vm3 = vweird.f32 %v10757_v61  ;;  %vm5574_vm4 = vweird.f32 %v10800_v14  ;;  %v5385_v26 = vor.u32 1.1754944e-38, %v5384_v40  ;;  %v5539_v19 = vmul.f32 %v7377_v38, %v10770_v17 }
 0x5ea   : > { %v5489_v23 = vand.u32 2147483648, %v10774_v13  ;;  %v5375_v50 = vsub.f32 1.0, %v5374_v4  ;;  %vm10834_vm5 = vcmp.eq.f32.partialorder %v5547_v45, 8.507059e+37  ;;  %v5479_v42 = vmul.f32 %v7379_v8, %v10774_v13  ;;  %vm10873_vm11 = vmor %vm5573_vm3, %vm5574_vm4 }
 0x5eb   : > { %v10839_v20 = vadd.f32 1.0, %v7373_v32  ;;  %v5571_v57 = vmul.f32 %v10800_v14, %v5570_v60  ;;  %v5540_v55 = vsub.f32 1.0, %v5539_v19  ;;  %v5550_v6 = vor.u32 1.1754944e-38, %v5549_v15 }
 0x5ec   : > { %7382 = vrcp.f32 %v10820_v63  ;;  %v5376_v33 = vmul.f32 %v7375_v18, %v5375_v50  ;;  %vm5379_vm6 = vweird.f32 %v7375_v18  ;;  %v5480_v27 = vsub.f32 1.0, %v5479_v42 }
 0x5ed   : > { %vm10843_vm7 = vcmp.eq.f32.partialorder %v5487_v28, 8.507059e+37  ;;  %v5541_v25 = vmul.f32 %v7377_v38, %v5540_v55  ;;  %vm5544_vm8 = vweird.f32 %v7377_v38  ;;  %v5490_v11 = vor.u32 1.1754944e-38, %v5489_v23  ;;  %vm5380_vm12 = vmor %vm5378_vm15, %vm5379_vm6 }
 0x5ee   : > { %7384 = vpow2.f32 %v6687_v36  ;;  %v10847_v49 = vpop.eup %7380  ;;  %v5377_v53 = vadd.f32 %v7375_v18, %v5376_v33  ;;  %v5481_v16 = vmul.f32 %v7379_v8, %v5480_v27  ;;  %vm5484_vm9 = vweird.f32 %v7379_v8  ;;  %vm5545_vm13 = vmor %vm5543_vm0, %vm5544_vm8 }
 0x5ef   : > { %7386 = vrcp.f32 %v10839_v20  ;;  %v10851_v43 = vadd.f32 %v10800_v14, %v5571_v57  ;;  %v5542_v34 = vadd.f32 %v7377_v38, %v5541_v25  ;;  %v3724_v9 = vmul.f32 %v10847_v49, %v10816_v3  ;;  %vm5485_vm10 = vmor %vm5483_vm2, %vm5484_vm9 }
 0x5f0   : > { %v6679_v37 = vmul.f32 -1.442695, %v2952_v56  ;;  %v5381_v46 = vsel %vm5380_vm12, %v7375_v18, %v5377_v53  ;;  %v5482_v41 = vadd.f32 %v7379_v8, %v5481_v16  ;;  %v3732_v59 = vand.u32 2147483647, %v10816_v3 }
 0x5f1   : > { %v3734_v10 = vand.u32 2147483648, %v10816_v3  ;;  %v5386_v52 = vsel %vm10823_vm1, %v5385_v26, %v5381_v46  ;;  %v5546_v30 = vsel %vm5545_vm13, %v7377_v38, %v5542_v34  ;;  %vm3743_vm14 = vweird.f32 %v10820_v63  ;;  %v2956_v26 = vpop.f32.mrf.mxu3 }
 0x5f2   : > { %v7383_v12 = vpop.eup %7382  ;;  %v3747_v17 = vand.u32 2147483647, %v10820_v63  ;;  %v5708_v58 = vpack.c.bf16 %v5386_v52, %v10790_v22  ;;  %v5551_v62 = vsel %vm10834_vm5, %v5550_v6, %v5546_v30  ;;  %v5486_v13 = vsel %vm5485_vm10, %v7379_v8, %v5482_v41  ;;  %v3014_v22 = vpop.f32.mrf.mxu0 }
 0x5f3   : > { %v3739_v35 = vmul.f32 %v7383_v12, %v10820_v63  ;;  %v5576_v36 = vsel %vm10873_vm11, %v10800_v14, %v10851_v43  ;;  %v5715_v21 = vpack.c.bf16 %v10806_v39, %v5551_v62  ;;  %v5491_v48 = vsel %vm10843_vm7, %v5490_v11, %v5486_v13  ;;  %v3072_v8 = vpop.f32.mrf.mxu1 }
 0x5f4   : > { %v7385_v56 = vpop.eup %7384  ;;  %v3725_v40 = vsub.f32 1.0, %v3724_v9  ;;  %vm5722_vm15 = vcmask 125952   ;;  %5785 = vst [vmem:[%s9052_s14 + $0x1c8] sm:$0xff] %v5708_v58  ;;  %v5712_v45 = vpack.c.bf16 %v5491_v48, %v10797_v29  ;;  %vm3729_vm0 = vweird.f32 %v10847_v49 }
 0x5f5   : > { %v7387_v32 = vpop.eup %7386  ;;  %v3740_v18 = vsub.f32 1.0, %v3739_v35  ;;  %v3749_v60 = vand.u32 2147483648, %v10820_v63  ;;  %vm10894_vm1 = vcmp.eq.f32.partialorder %v5577_v5, 8.507059e+37  ;;  %5792 = vst [vmem:[%s9052_s14 + $0x1f8] sm:$0xff] %v5715_v21  ;;  %vm3728_vm2 = vweird.f32 %v10816_v3 }
 0x5f6   : > { %vm10900_vm3 = vcmp.eq.f32.partialorder %v3747_v17, 8.507059e+37  ;;  %v5584_v29 = vmul.f32 %v7387_v32, %v10839_v20  ;;  %v5592_v15 = vand.u32 2147483647, %v10839_v20  ;;  %7388 = vpow2.f32 %v6679_v37  ;;  %5789 = vst [vmem:[%s9052_s14 + $0x1e4] sm:$0xff] %v5712_v45  ;;  %vm10940_vm12 = vmor %vm3728_vm2, %vm3729_vm0 }
 0x5f7   : > { %v3741_v38 = vmul.f32 %v7383_v12, %v3740_v18  ;;  %vm3744_vm4 = vweird.f32 %v7383_v12  ;;  %v10907_v61 = vadd.f32 1.0, %v7385_v56  ;;  %7390 = vpow2.f32 %v10804_v31 }
 0x5f8   : > { %v3726_v5 = vmul.f32 %v10847_v49, %v3725_v40  ;;  %v5585_v4 = vsub.f32 1.0, %v5584_v29  ;;  %v2954_v0 = vadd.f32 %v2953_v54, %v10772_v1  ;;  %v3015_v28 = vadd.f32 %v3014_v22, %v10715_v47  ;;  %vm3745_vm5 = vmor %vm3743_vm14, %vm3744_vm4 }
 0x5f9   : > { %v3742_v19 = vadd.f32 %v7383_v12, %v3741_v38  ;;  %v3750_v23 = vor.u32 1.1754944e-38, %v3749_v60  ;;  %v5594_v50 = vand.u32 2147483648, %v10839_v20  ;;  %7392 = vrcp.f32 %v10907_v61  ;;  %v2958_v29 = vpop.f32.mrf.mxu3 }
 0x5fa   : > { %v5586_v24 = vmul.f32 %v7387_v32, %v5585_v4  ;;  %vm5588_vm6 = vweird.f32 %v10839_v20  ;;  %vm5589_vm7 = vweird.f32 %v7387_v32  ;;  %v6686_v31 = vmul.f32 -1.442695, %v2954_v0  ;;  %v3016_v9 = vpop.f32.mrf.mxu0 }
 0x5fb   : > { %v3746_v42 = vsel %vm3745_vm5, %v7383_v12, %v3742_v19  ;;  %v6694_v57 = vmul.f32 -1.442695, %v3015_v28  ;;  %v3073_v55 = vadd.f32 %v3072_v8, %v10722_v7  ;;  %v2957_v6 = vadd.f32 %v2956_v26, %v10772_v1  ;;  %vm5590_vm9 = vmor %vm5588_vm6, %vm5589_vm7 }
 0x5fc   : > { %v7389_v33 = vpop.eup %7388  ;;  %v3727_v27 = vadd.f32 %v10847_v49, %v3726_v5  ;;  %v3751_v2 = vsel %vm10900_vm3, %v3750_v23, %v3746_v42  ;;  %v5587_v25 = vadd.f32 %v7387_v32, %v5586_v24  ;;  %vm10923_vm8 = vcmp.eq.f32.partialorder %v5592_v15, 8.507059e+37 }
 0x5fd   : > { %v7391_v20 = vpop.eup %7390  ;;  %v5646_v11 = vpack.c.bf16 %v3751_v2, %v3751_v2  ;;  %v5595_v54 = vor.u32 1.1754944e-38, %v5594_v50  ;;  %v10927_v53 = vadd.f32 1.0, %v7389_v33  ;;  %7394 = vpow2.f32 %v6686_v31 }
 0x5fe   : > { %v5591_v16 = vsel %vm5590_vm9, %v7387_v32, %v5587_v25  ;;  %v10929_v43 = vadd.f32 1.0, %v7391_v20  ;;  %7396 = vpow2.f32 %v6694_v57  ;;  %v6695_v34 = vmul.f32 -1.442695, %v3073_v55 }
 0x5ff   : > { %v10931_v37 = vpop.eup %7392  ;;  %v5581_v46 = vsel %vm10894_vm1, %v10812_v51, %v5576_v36  ;;  %5723 = vst.msk [vmem:[%s9052_s14 + $0x18] sm:$0xf] %vm5722_vm15, %v5646_v11  ;;  %v5596_v12 = vsel %vm10923_vm8, %v5595_v54, %v5591_v16  ;;  %7398 = vrcp.f32 %v10927_v53  ;;  %v6693_v52 = vmul.f32 -1.442695, %v2957_v6  ;;  %v3074_v36 = vpop.f32.mrf.mxu1 }
 0x600   : > { %v3731_v51 = vsel %vm10940_vm12, %v10847_v49, %v3727_v27  ;;  %v5716_v30 = vpack.c.bf16 %v5596_v12, %v5581_v46  ;;  %v3829_v17 = vmul.f32 %v10931_v37, %v10907_v61  ;;  %v3839_v44 = vand.u32 2147483648, %v10907_v61 }
 0x601   : > { %v3735_v58 = vor.u32 1.1754944e-38, %v3734_v10  ;;  %7400 = vrcp.f32 %v10929_v43  ;;  %vm3733_vm13 = vcmp.eq.f32.partialorder %v3732_v59, 8.507059e+37  ;;  %v3837_v13 = vand.u32 2147483647, %v10907_v61 }
 0x602   : > { %5793 = vst [vmem:[%s9052_s14 + $0x200] sm:$0xff] %v5716_v30  ;;  %v3830_v62 = vsub.f32 1.0, %v3829_v17  ;;  %7402 = vpow2.f32 %v6695_v34  ;;  %vm3833_vm10 = vweird.f32 %v10907_v61  ;;  %v3017_v56 = vadd.f32 %v3016_v9, %v10715_v47  ;;  %v3019_v26 = vpop.f32.mrf.mxu0 }
 0x603   : > { %v7395_v49 = vpop.eup %7394  ;;  %v10962_v35 = vsel %vm3733_vm13, %v3735_v58, %v3731_v51  ;;  %7404 = vpow2.f32 %v6693_v52  ;;  %v3717_v21 = vand.u32 2147483647, %v10927_v53  ;;  %v3840_v59 = vor.u32 1.1754944e-38, %v3839_v44 }
 0x604   : > { %v7397_v10 = vpop.eup %7396  ;;  %v3831_v3 = vmul.f32 %v10931_v37, %v3830_v62  ;;  %v10968_v48 = vadd.f32 1.0, %v7395_v49  ;;  %v3719_v22 = vand.u32 2147483648, %v10927_v53  ;;  %v3852_v32 = vand.u32 2147483647, %v10929_v43 }
 0x605   : > { %v7399_v40 = vpop.eup %7398  ;;  %v3854_v45 = vand.u32 2147483648, %v10929_v43  ;;  %v10973_v18 = vadd.f32 1.0, %v7397_v10  ;;  %vm3713_vm14 = vweird.f32 %v10927_v53  ;;  %vm10977_vm11 = vcmp.eq.f32.partialorder %v3837_v13, 8.507059e+37 }
 0x606   : > { %v3709_v60 = vmul.f32 %v7399_v40, %v10927_v53  ;;  %7406 = vrcp.f32 %v10968_v48  ;;  %v3075_v39 = vadd.f32 %v3074_v36, %v10722_v7  ;;  %v3832_v38 = vadd.f32 %v10931_v37, %v3831_v3 }
 0x607   : > { %v7401_v15 = vpop.eup %7400  ;;  %vm3834_vm0 = vweird.f32 %v10931_v37  ;;  %7408 = vrcp.f32 %v10973_v18  ;;  %v6701_v5 = vmul.f32 -1.442695, %v3017_v56  ;;  %vm10986_vm1 = vcmp.eq.f32.partialorder %v3717_v21, 8.507059e+37 }
 0x608   : > { %v7403_v4 = vpop.eup %7402  ;;  %v3710_v0 = vsub.f32 1.0, %v3709_v60  ;;  %v3844_v8 = vmul.f32 %v7401_v15, %v10929_v43  ;;  %vm3848_vm2 = vweird.f32 %v10929_v43  ;;  %v3720_v23 = vor.u32 1.1754944e-38, %v3719_v22  ;;  %vm11001_vm5 = vmor %vm3833_vm10, %vm3834_vm0 }
 0x609   : > { %v7405_v19 = vpop.eup %7404  ;;  %vm10992_vm3 = vcmp.eq.f32.partialorder %v3852_v32, 8.507059e+37  ;;  %v3855_v24 = vor.u32 1.1754944e-38, %v3854_v45  ;;  %v2959_v31 = vadd.f32 %v2958_v29, %v10772_v1  ;;  %vm3714_vm4 = vweird.f32 %v7399_v40 }
 0x60a   : > { %v3711_v42 = vmul.f32 %v7399_v40, %v3710_v0  ;;  %v3845_v55 = vsub.f32 1.0, %v3844_v8  ;;  %v6702_v6 = vmul.f32 -1.442695, %v3075_v39  ;;  %v3836_v33 = vsel %vm11001_vm5, %v10931_v37, %v3832_v38  ;;  %vm3715_vm7 = vmor %vm3713_vm14, %vm3714_vm4  ;;  %v2961_v38 = vpop.f32.mrf.mxu3 }
 0x60b   : > { %v11008_v27 = vadd.f32 1.0, %v7403_v4  ;;  %7410 = vpow2.f32 %v6701_v5  ;;  %v11011_v2 = vadd.f32 %v3019_v26, %v10715_v47  ;;  %vm3849_vm6 = vweird.f32 %v7401_v15 }
 0x60c   : > { %v7407_v25 = vpop.eup %7406  ;;  %v3712_v63 = vadd.f32 %v7399_v40, %v3711_v42  ;;  %v3846_v20 = vmul.f32 %v7401_v15, %v3845_v55  ;;  %v11013_v61 = vadd.f32 1.0, %v7405_v19  ;;  %vm3818_vm8 = vweird.f32 %v10968_v48  ;;  %vm3850_vm9 = vmor %vm3848_vm2, %vm3849_vm6  ;;  %v3021_v42 = vpop.f32.mrf.mxu0 }
 0x60d   : > { %v11015_v11 = vpop.eup %7408  ;;  %v3814_v54 = vmul.f32 %v7407_v25, %v10968_v48  ;;  %v3822_v16 = vand.u32 2147483647, %v10968_v48  ;;  %7412 = vrcp.f32 %v11008_v27  ;;  %v3824_v37 = vand.u32 2147483648, %v10968_v48 }
 0x60e   : > { %v3716_v34 = vsel %vm3715_vm7, %v7399_v40, %v3712_v63  ;;  %v3847_v9 = vadd.f32 %v7401_v15, %v3846_v20  ;;  %v3934_v46 = vmul.f32 %v11015_v11, %v10973_v18  ;;  %v3841_v41 = vsel %vm10977_vm11, %v3840_v59, %v3836_v33 }
 0x60f   : > { %v3721_v53 = vsel %vm10986_vm1, %v3720_v23, %v3716_v34  ;;  %v3815_v12 = vsub.f32 1.0, %v3814_v54  ;;  %v3944_v52 = vand.u32 2147483648, %v10973_v18  ;;  %7414 = vrcp.f32 %v11013_v61 }
 0x610   : > { %v5645_v51 = vpack.c.bf16 %v10962_v35, %v3721_v53  ;;  %v3851_v30 = vsel %vm3850_vm9, %v7401_v15, %v3847_v9  ;;  %v3935_v17 = vsub.f32 1.0, %v3934_v46  ;;  %vm3819_vm12 = vweird.f32 %v7407_v25  ;;  %v3077_v15 = vpop.f32.mrf.mxu1 }
 0x611   : > { %v7411_v44 = vpop.eup %7410  ;;  %v3856_v58 = vsel %vm10992_vm3, %v3855_v24, %v3851_v30  ;;  %v3816_v62 = vmul.f32 %v7407_v25, %v3815_v12  ;;  %vm11037_vm13 = vcmp.eq.f32.partialorder %v3822_v16, 8.507059e+37  ;;  %v3825_v49 = vor.u32 1.1754944e-38, %v3824_v37  ;;  %vm3820_vm14 = vmor %vm3818_vm8, %vm3819_vm12 }
 0x612   : > { %5721 = vst [vmem:[%s9052_s14 + $0x10] sm:$0xff] %v5645_v51  ;;  %v5650_v43 = vpack.c.bf16 %v3856_v58, %v3856_v58  ;;  %v3957_v35 = vand.u32 2147483647, %v11008_v27  ;;  %v3959_v56 = vand.u32 2147483648, %v11008_v27  ;;  %vm3938_vm10 = vweird.f32 %v10973_v18  ;;  %v2963_v4 = vpop.f32.mrf.mxu3 }
 0x613   : > { %v7413_v36 = vpop.eup %7412  ;;  %v3817_v10 = vadd.f32 %v7407_v25, %v3816_v62  ;;  %v3942_v21 = vand.u32 2147483647, %v10973_v18  ;;  %v11046_v3 = vadd.f32 1.0, %v7411_v44  ;;  %7416 = vpow2.f32 %v6702_v6 }
 0x614   : > { %5727 = vst.msk [vmem:[%s9052_s14 + $0x34] sm:$0xf] %vm5722_vm15, %v5650_v43  ;;  %v3936_v59 = vmul.f32 %v11015_v11, %v3935_v17  ;;  %v3945_v40 = vor.u32 1.1754944e-38, %v3944_v52  ;;  %v3949_v22 = vmul.f32 %v7413_v36, %v11008_v27  ;;  %v6700_v32 = vmul.f32 -1.442695, %v2959_v31 }
 0x615   : > { %v3821_v45 = vsel %vm3820_vm14, %v7407_v25, %v3817_v10  ;;  %vm3939_vm11 = vweird.f32 %v11015_v11  ;;  %vm3953_vm0 = vweird.f32 %v11008_v27  ;;  %7418 = vrcp.f32 %v11046_v3  ;;  %v7415_v60 = vpop.eup %7414 }
 0x616   : > { %v3826_v14 = vsel %vm11037_vm13, %v3825_v49, %v3821_v45  ;;  %v3950_v48 = vsub.f32 1.0, %v3949_v22  ;;  %vm11059_vm1 = vcmp.eq.f32.partialorder %v3957_v35, 8.507059e+37  ;;  %v3960_v29 = vor.u32 1.1754944e-38, %v3959_v56  ;;  %vm11086_vm7 = vmor %vm3938_vm10, %vm3939_vm11 }
 0x617   : > { %v5649_v5 = vpack.c.bf16 %v3841_v41, %v3826_v14  ;;  %vm11063_vm2 = vcmp.eq.f32.partialorder %v3942_v21, 8.507059e+37  ;;  %v3919_v0 = vmul.f32 %v7415_v60, %v11013_v61  ;;  %vm3923_vm3 = vweird.f32 %v11013_v61 }
 0x618   : > { %v3927_v28 = vand.u32 2147483647, %v11013_v61  ;;  %v3937_v8 = vadd.f32 %v11015_v11, %v3936_v59  ;;  %v3951_v26 = vmul.f32 %v7413_v36, %v3950_v48  ;;  %vm3954_vm4 = vweird.f32 %v7413_v36 }
 0x619   : > { %7420 = vpow2.f32 %v6700_v32  ;;  %v7417_v19 = vpop.eup %7416  ;;  %5726 = vst [vmem:[%s9052_s14 + $0x2c] sm:$0xff] %v5649_v5  ;;  %v3920_v23 = vsub.f32 1.0, %v3919_v0  ;;  %v6708_v50 = vmul.f32 -1.442695, %v11011_v2  ;;  %v3078_v24 = vadd.f32 %v3077_v15, %v10722_v7  ;;  %vm3955_vm6 = vmor %vm3953_vm0, %vm3954_vm4 }
 0x61a   : > { %v2962_v31 = vadd.f32 %v2961_v38, %v10772_v1  ;;  %v3952_v57 = vadd.f32 %v7413_v36, %v3951_v26  ;;  %vm3924_vm5 = vweird.f32 %v7415_v60  ;;  %v3929_v55 = vand.u32 2147483648, %v11013_v61  ;;  %v3024_v26 = vpop.f32.mrf.mxu0 }
 0x61b   : > { %v11076_v6 = vadd.f32 1.0, %v7417_v19  ;;  %v11078_v33 = vpop.eup %7418  ;;  %v3921_v25 = vmul.f32 %v7415_v60, %v3920_v23  ;;  %7422 = vpow2.f32 %v6708_v50  ;;  %v6709_v63 = vmul.f32 -1.442695, %v3078_v24  ;;  %vm3925_vm9 = vmor %vm3923_vm3, %vm3924_vm5 }
 0x61c   : > { %v6707_v2 = vmul.f32 -1.442695, %v2962_v31  ;;  %v3956_v54 = vsel %vm3955_vm6, %v7413_v36, %v3952_v57  ;;  %v4039_v16 = vmul.f32 %v11078_v33, %v11046_v3  ;;  %v3022_v27 = vadd.f32 %v3021_v42, %v10715_v47  ;;  %v3079_v36 = vpop.f32.mrf.mxu1 }
 0x61d   : > { %7424 = vrcp.f32 %v11076_v6  ;;  %v3941_v34 = vsel %vm11086_vm7, %v11015_v11, %v3937_v8  ;;  %v3961_v18 = vsel %vm11059_vm1, %v3960_v29, %v3956_v54  ;;  %v3922_v9 = vadd.f32 %v7415_v60, %v3921_v25 }
 0x61e   : > { %vm3928_vm8 = vcmp.eq.f32.partialorder %v3927_v28, 8.507059e+37  ;;  %v5654_v46 = vpack.c.bf16 %v3961_v18, %v3961_v18  ;;  %v3930_v53 = vor.u32 1.1754944e-38, %v3929_v55  ;;  %v4040_v41 = vsub.f32 1.0, %v4039_v16 }
 0x61f   : > { %v7421_v37 = vpop.eup %7420  ;;  %7426 = vpow2.f32 %v6709_v63  ;;  %v3926_v12 = vsel %vm3925_vm9, %v7415_v60, %v3922_v9  ;;  %v4047_v52 = vand.u32 2147483647, %v11046_v3  ;;  %v3946_v11 = vsel %vm11063_vm2, %v3945_v40, %v3941_v34 }
 0x620   : > { %v11103_v51 = vadd.f32 1.0, %v7421_v37  ;;  %7428 = vpow2.f32 %v6707_v2  ;;  %5731 = vst.msk [vmem:[%s9052_s14 + $0x50] sm:$0xf] %vm5722_vm15, %v5654_v46  ;;  %v3931_v30 = vsel %vm3928_vm8, %v3930_v53, %v3926_v12  ;;  %v4049_v17 = vand.u32 2147483648, %v11046_v3 }
 0x621   : > { %v6715_v61 = vmul.f32 -1.442695, %v3022_v27  ;;  %v7423_v44 = vpop.eup %7422  ;;  %v5653_v58 = vpack.c.bf16 %v3946_v11, %v3931_v30  ;;  %v4041_v62 = vmul.f32 %v11078_v33, %v4040_v41  ;;  %vm4043_vm12 = vweird.f32 %v11046_v3 }
 0x622   : > { %7430 = vrcp.f32 %v11103_v51  ;;  %v11113_v43 = vadd.f32 1.0, %v7423_v44  ;;  %v4062_v35 = vand.u32 2147483647, %v11076_v6  ;;  %v4064_v56 = vand.u32 2147483648, %v11076_v6  ;;  %v3026_v38 = vpop.f32.mrf.mxu0 }
 0x623   : > { %v7425_v13 = vpop.eup %7424  ;;  %5730 = vst [vmem:[%s9052_s14 + $0x48] sm:$0xff] %v5653_v58  ;;  %7432 = vpow2.f32 %v6715_v61  ;;  %vm11119_vm13 = vcmp.eq.f32.partialorder %v4047_v52, 8.507059e+37  ;;  %v4050_v59 = vor.u32 1.1754944e-38, %v4049_v17  ;;  %v4032_v40 = vand.u32 2147483647, %v11103_v51 }
 0x624   : > { %v4054_v49 = vmul.f32 %v7425_v13, %v11076_v6  ;;  %7434 = vrcp.f32 %v11113_v43  ;;  %v4042_v32 = vadd.f32 %v11078_v33, %v4041_v62  ;;  %vm4044_vm10 = vweird.f32 %v11078_v33 }
 0x625   : > { %v7427_v10 = vpop.eup %7426  ;;  %v4034_v60 = vand.u32 2147483648, %v11103_v51  ;;  %vm4058_vm14 = vweird.f32 %v11076_v6  ;;  %v3080_v39 = vadd.f32 %v3079_v36, %v10722_v7  ;;  %vm4059_vm11 = vweird.f32 %v7425_v13  ;;  %vm11140_vm1 = vmor %vm4043_vm12, %vm4044_vm10  ;;  %v2966_v36 = vpop.f32.mrf.mxu3 }
 0x626   : > { %v7429_v22 = vpop.eup %7428  ;;  %v4055_v45 = vsub.f32 1.0, %v4054_v49  ;;  %v11129_v14 = vadd.f32 1.0, %v7427_v10  ;;  %vm11134_vm0 = vcmp.eq.f32.partialorder %v4062_v35, 8.507059e+37  ;;  %v4065_v5 = vor.u32 1.1754944e-38, %v4064_v56  ;;  %vm4060_vm4 = vmor %vm4058_vm14, %vm4059_vm11 }
 0x627   : > { %v11131_v48 = vadd.f32 1.0, %v7429_v22  ;;  %vm4028_vm2 = vweird.f32 %v11103_v51  ;;  %vm11146_vm3 = vcmp.eq.f32.partialorder %v4032_v40, 8.507059e+37  ;;  %v4046_v3 = vsel %vm11140_vm1, %v11078_v33, %v4042_v32 }
 0x628   : > { %v7431_v29 = vpop.eup %7430  ;;  %v4056_v15 = vmul.f32 %v7425_v13, %v4055_v45  ;;  %7436 = vrcp.f32 %v11129_v14  ;;  %v4035_v50 = vor.u32 1.1754944e-38, %v4034_v60  ;;  %v4154_v42 = vand.u32 2147483648, %v11113_v43 }
 0x629   : > { %v4024_v28 = vmul.f32 %v7431_v29, %v11103_v51  ;;  %v7433_v19 = vpop.eup %7432  ;;  %7438 = vrcp.f32 %v11131_v48  ;;  %v6716_v57 = vmul.f32 -1.442695, %v3080_v39  ;;  %v2964_v55 = vadd.f32 %v2963_v4, %v10772_v1 }
 0x62a   : > { %v4057_v23 = vadd.f32 %v7425_v13, %v4056_v15  ;;  %v11155_v24 = vpop.eup %7434  ;;  %v4152_v63 = vand.u32 2147483647, %v11113_v43  ;;  %v3025_v2 = vadd.f32 %v3024_v26, %v10715_v47  ;;  %vm4029_vm5 = vweird.f32 %v7431_v29 }
 0x62b   : > { %v4025_v31 = vsub.f32 1.0, %v4024_v28  ;;  %v4144_v33 = vmul.f32 %v11155_v24, %v11113_v43  ;;  %vm4148_vm6 = vweird.f32 %v11113_v43  ;;  %v4051_v54 = vsel %vm11119_vm13, %v4050_v59, %v4046_v3  ;;  %vm4030_vm7 = vmor %vm4028_vm2, %vm4029_vm5 }
 0x62c   : > { %v4061_v25 = vsel %vm4060_vm4, %v7425_v13, %v4057_v23  ;;  %v11171_v34 = vadd.f32 1.0, %v7433_v19  ;;  %v4155_v37 = vor.u32 1.1754944e-38, %v4154_v42  ;;  %7440 = vpow2.f32 %v6716_v57  ;;  %v3082_v13 = vpop.f32.mrf.mxu1 }
 0x62d   : > { %v4066_v20 = vsel %vm11134_vm0, %v4065_v5, %v4061_v25  ;;  %v4026_v6 = vmul.f32 %v7431_v29, %v4025_v31  ;;  %v4145_v27 = vsub.f32 1.0, %v4144_v33  ;;  %v6714_v46 = vmul.f32 -1.442695, %v2964_v55 }
 0x62e   : > { %v5658_v16 = vpack.c.bf16 %v4066_v20, %v4066_v20  ;;  %v7437_v18 = vpop.eup %7436  ;;  %vm11178_vm8 = vcmp.eq.f32.partialorder %v4152_v63, 8.507059e+37  ;;  %7442 = vrcp.f32 %v11171_v34  ;;  %v6722_v11 = vmul.f32 -1.442695, %v3025_v2 }
 0x62f   : > { %v4027_v9 = vadd.f32 %v7431_v29, %v4026_v6  ;;  %v7439_v53 = vpop.eup %7438  ;;  %v4146_v41 = vmul.f32 %v11155_v24, %v4145_v27  ;;  %v4159_v52 = vmul.f32 %v7437_v18, %v11129_v14  ;;  %v4167_v17 = vand.u32 2147483647, %v11129_v14  ;;  %v2968_v6 = vpop.f32.mrf.mxu3 }
 0x630   : > { %5735 = vst.msk [vmem:[%s9052_s14 + $0x6c] sm:$0xf] %vm5722_vm15, %v5658_v16  ;;  %v4169_v61 = vand.u32 2147483648, %v11129_v14  ;;  %v4129_v44 = vmul.f32 %v7439_v53, %v11131_v48  ;;  %vm4149_vm9 = vweird.f32 %v11155_v24  ;;  %v4137_v56 = vand.u32 2147483647, %v11131_v48 }
 0x631   : > { %v4031_v30 = vsel %vm4030_vm7, %v7431_v29, %v4027_v9  ;;  %v4147_v58 = vadd.f32 %v11155_v24, %v4146_v41  ;;  %v4160_v62 = vsub.f32 1.0, %v4159_v52  ;;  %7444 = vpow2.f32 %v6714_v46  ;;  %vm11196_vm13 = vmor %vm4148_vm6, %vm4149_vm9 }
 0x632   : > { %v4036_v51 = vsel %vm11146_vm3, %v4035_v50, %v4031_v30  ;;  %v4130_v35 = vsub.f32 1.0, %v4129_v44  ;;  %vm4164_vm12 = vweird.f32 %v7437_v18  ;;  %v4139_v21 = vand.u32 2147483648, %v11131_v48  ;;  %v7441_v59 = vpop.eup %7440 }
 0x633   : > { %v5657_v49 = vpack.c.bf16 %v4051_v54, %v4036_v51  ;;  %v4161_v10 = vmul.f32 %v7437_v18, %v4160_v62  ;;  %7446 = vpow2.f32 %v6722_v11  ;;  %vm4163_vm10 = vweird.f32 %v11129_v14 }
 0x634   : > { %v4131_v22 = vmul.f32 %v7439_v53, %v4130_v35  ;;  %vm4134_vm14 = vweird.f32 %v7439_v53  ;;  %v3083_v32 = vadd.f32 %v3082_v13, %v10722_v7  ;;  %v11202_v45 = vpop.eup %7442  ;;  %v4151_v60 = vsel %vm11196_vm13, %v11155_v24, %v4147_v58  ;;  %vm4165_vm0 = vmor %vm4163_vm10, %vm4164_vm12  ;;  %v3084_v20 = vpop.f32.mrf.mxu1 }
 0x635   : > { %5734 = vst [vmem:[%s9052_s14 + $0x64] sm:$0xff] %v5657_v49  ;;  %v4162_v39 = vadd.f32 %v7437_v18, %v4161_v10  ;;  %vm4133_vm11 = vweird.f32 %v11131_v48  ;;  %v11208_v43 = vadd.f32 1.0, %v7441_v59  ;;  %vm4168_vm1 = vcmp.eq.f32.partialorder %v4167_v17, 8.507059e+37  ;;  %v3029_v17 = vpop.f32.mrf.mxu0 }
 0x636   : > { %v4170_v29 = vor.u32 1.1754944e-38, %v4169_v61  ;;  %v4132_v14 = vadd.f32 %v7439_v53, %v4131_v22  ;;  %v4249_v15 = vmul.f32 %v11202_v45, %v11171_v34  ;;  %vm4135_vm2 = vmor %vm4133_vm11, %vm4134_vm14  ;;  %vm4138_vm3 = vcmp.eq.f32.partialorder %v4137_v56, 8.507059e+37 }
 0x637   : > { %v4166_v5 = vsel %vm4165_vm0, %v7437_v18, %v4162_v39  ;;  %v4140_v4 = vor.u32 1.1754944e-38, %v4139_v21  ;;  %7448 = vrcp.f32 %v11208_v43  ;;  %v7445_v0 = vpop.eup %7444  ;;  %v4156_v48 = vsel %vm11178_vm8, %v4155_v37, %v4151_v60 }
 0x638   : > { %v4171_v28 = vsel %vm4168_vm1, %v4170_v29, %v4166_v5  ;;  %v4136_v8 = vsel %vm4135_vm2, %v7439_v53, %v4132_v14  ;;  %v6723_v26 = vmul.f32 -1.442695, %v3083_v32  ;;  %v4250_v50 = vsub.f32 1.0, %v4249_v15 }
 0x639   : > { %v7447_v19 = vpop.eup %7446  ;;  %v5662_v3 = vpack.c.bf16 %v4171_v28, %v4171_v28  ;;  %v4141_v23 = vsel %vm4138_vm3, %v4140_v4, %v4136_v8  ;;  %v11216_v24 = vadd.f32 1.0, %v7445_v0  ;;  %v4259_v42 = vand.u32 2147483648, %v11171_v34 }
 0x63a   : > { %v5661_v31 = vpack.c.bf16 %v4156_v48, %v4141_v23  ;;  %v4272_v57 = vand.u32 2147483647, %v11208_v43  ;;  %v11220_v55 = vadd.f32 1.0, %v7447_v19  ;;  %v2967_v25 = vadd.f32 %v2966_v36, %v10772_v1 }
 0x63b   : > { %5739 = vst.msk [vmem:[%s9052_s14 + $0x88] sm:$0xf] %vm5722_vm15, %v5662_v3  ;;  %7450 = vrcp.f32 %v11216_v24  ;;  %v3027_v33 = vadd.f32 %v3026_v38, %v10715_v47  ;;  %v4257_v63 = vand.u32 2147483647, %v11171_v34  ;;  %v4274_v2 = vand.u32 2147483648, %v11208_v43  ;;  %v2971_v38 = vpop.f32.mrf.mxu3 }
 0x63c   : > { %5738 = vst [vmem:[%s9052_s14 + $0x80] sm:$0xff] %v5661_v31  ;;  %7452 = vrcp.f32 %v11220_v55  ;;  %v4251_v16 = vmul.f32 %v11202_v45, %v4250_v50  ;;  %vm4253_vm4 = vweird.f32 %v11171_v34  ;;  %vm4254_vm5 = vweird.f32 %v11202_v45  ;;  %v3087_v15 = vpop.f32.mrf.mxu1 }
 0x63d   : > { %v7449_v54 = vpop.eup %7448  ;;  %7454 = vpow2.f32 %v6723_v26  ;;  %v4260_v27 = vor.u32 1.1754944e-38, %v4259_v42  ;;  %vm11235_vm6 = vcmp.eq.f32.partialorder %v4272_v57, 8.507059e+37  ;;  %vm4268_vm7 = vweird.f32 %v11208_v43  ;;  %vm11264_vm10 = vmor %vm4253_vm4, %vm4254_vm5  ;;  %v3031_v57 = vpop.f32.mrf.mxu0 }
 0x63e   : > { %v4264_v18 = vmul.f32 %v7449_v54, %v11208_v43  ;;  %v4242_v37 = vand.u32 2147483647, %v11216_v24  ;;  %v6721_v46 = vmul.f32 -1.442695, %v2967_v25  ;;  %v6729_v53 = vmul.f32 -1.442695, %v3027_v33 }
 0x63f   : > { %vm11241_vm8 = vcmp.eq.f32.partialorder %v4257_v63, 8.507059e+37  ;;  %v4275_v52 = vor.u32 1.1754944e-38, %v4274_v2  ;;  %v3085_v11 = vadd.f32 %v3084_v20, %v10722_v7  ;;  %v2969_v30 = vadd.f32 %v2968_v6, %v10772_v1 }
 0x640   : > { %v4265_v12 = vsub.f32 1.0, %v4264_v18  ;;  %v4252_v44 = vadd.f32 %v11202_v45, %v4251_v16  ;;  %vm4238_vm9 = vweird.f32 %v11216_v24  ;;  %v4244_v51 = vand.u32 2147483648, %v11216_v24 }
 0x641   : > { %v7451_v61 = vpop.eup %7450  ;;  %7456 = vpow2.f32 %v6721_v46  ;;  %vm4269_vm12 = vweird.f32 %v7449_v54  ;;  %vm11253_vm13 = vcmp.eq.f32.partialorder %v4242_v37, 8.507059e+37  ;;  %v4362_v36 = vand.u32 2147483647, %v11220_v55 }
 0x642   : > { %v11250_v58 = vpop.eup %7452  ;;  %v4266_v62 = vmul.f32 %v7449_v54, %v4265_v12  ;;  %v4234_v13 = vmul.f32 %v7451_v61, %v11216_v24  ;;  %7458 = vpow2.f32 %v6729_v53  ;;  %v6730_v10 = vmul.f32 -1.442695, %v3085_v11  ;;  %vm4270_vm14 = vmor %vm4268_vm7, %vm4269_vm12 }
 0x643   : > { %v7455_v49 = vpop.eup %7454  ;;  %v4354_v56 = vmul.f32 %v11250_v58, %v11220_v55  ;;  %v6728_v32 = vmul.f32 -1.442695, %v2969_v30  ;;  %v4256_v60 = vsel %vm11264_vm10, %v11202_v45, %v4252_v44  ;;  %vm4358_vm11 = vweird.f32 %v11220_v55 }
 0x644   : > { %v4267_v59 = vadd.f32 %v7449_v54, %v4266_v62  ;;  %v4235_v40 = vsub.f32 1.0, %v4234_v13  ;;  %v11268_v22 = vadd.f32 1.0, %v7455_v49  ;;  %7460 = vpow2.f32 %v6730_v10 }
 0x645   : > { %v4355_v39 = vsub.f32 1.0, %v4354_v56  ;;  %v3030_v34 = vadd.f32 %v3029_v17, %v10715_v47  ;;  %vm4239_vm0 = vweird.f32 %v7451_v61  ;;  %v4245_v43 = vor.u32 1.1754944e-38, %v4244_v51 }
 0x646   : > { %v4271_v29 = vsel %vm4270_vm14, %v7449_v54, %v4267_v59  ;;  %v4236_v14 = vmul.f32 %v7451_v61, %v4235_v40  ;;  %7462 = vrcp.f32 %v11268_v22  ;;  %v4364_v0 = vand.u32 2147483648, %v11220_v55  ;;  %vm4240_vm1 = vmor %vm4238_vm9, %vm4239_vm0 }
 0x647   : > { %v7457_v5 = vpop.eup %7456  ;;  %v4276_v45 = vsel %vm11235_vm6, %v4275_v52, %v4271_v29  ;;  %v4356_v4 = vmul.f32 %v11250_v58, %v4355_v39  ;;  %7464 = vpow2.f32 %v6728_v32  ;;  %v4261_v19 = vsel %vm11241_vm8, %v4260_v27, %v4256_v60 }
 0x648   : > { %v7459_v48 = vpop.eup %7458  ;;  %v5666_v28 = vpack.c.bf16 %v4276_v45, %v4276_v45  ;;  %v4237_v8 = vadd.f32 %v7451_v61, %v4236_v14  ;;  %v11282_v26 = vadd.f32 1.0, %v7457_v5  ;;  %v3088_v23 = vadd.f32 %v3087_v15, %v10722_v7  ;;  %v3089_v5 = vpop.f32.mrf.mxu1 }
 0x649   : > { %v11289_v3 = vadd.f32 1.0, %v7459_v48  ;;  %v2972_v50 = vadd.f32 %v2971_v38, %v10772_v1  ;;  %vm4359_vm2 = vweird.f32 %v11250_v58  ;;  %v6736_v42 = vmul.f32 -1.442695, %v3030_v34 }
 0x64a   : > { %5743 = vst.msk [vmem:[%s9052_s14 + $0xa4] sm:$0xf] %vm5722_vm15, %v5666_v28  ;;  %v4241_v31 = vsel %vm4240_vm1, %v7451_v61, %v4237_v8  ;;  %7466 = vrcp.f32 %v11282_v26  ;;  %v7461_v25 = vpop.eup %7460  ;;  %v4357_v33 = vadd.f32 %v11250_v58, %v4356_v4  ;;  %v4377_v63 = vand.u32 2147483647, %v11268_v22  ;;  %vm11314_vm4 = vmor %vm4358_vm11, %vm4359_vm2 }
 0x64b   : > { %v4246_v24 = vsel %vm11253_vm13, %v4245_v43, %v4241_v31  ;;  %7468 = vrcp.f32 %v11289_v3  ;;  %vm11302_vm3 = vcmp.eq.f32.partialorder %v4362_v36, 8.507059e+37  ;;  %v4365_v54 = vor.u32 1.1754944e-38, %v4364_v0 }
 0x64c   : > { %v7463_v2 = vpop.eup %7462  ;;  %v5665_v20 = vpack.c.bf16 %v4261_v19, %v4246_v24  ;;  %v4379_v16 = vand.u32 2147483648, %v11268_v22  ;;  %v6737_v18 = vmul.f32 -1.442695, %v3088_v23  ;;  %v6735_v9 = vmul.f32 -1.442695, %v2972_v50 }
 0x64d   : > { %v4369_v27 = vmul.f32 %v7463_v2, %v11268_v22  ;;  %v3032_v37 = vadd.f32 %v3031_v57, %v10715_v47  ;;  %v7465_v46 = vpop.eup %7464  ;;  %vm4373_vm5 = vweird.f32 %v11268_v22  ;;  %v4347_v41 = vand.u32 2147483647, %v11282_v26 }
 0x64e   : > { %5742 = vst [vmem:[%s9052_s14 + $0x9c] sm:$0xff] %v5665_v20  ;;  %v11320_v12 = vadd.f32 1.0, %v7461_v25  ;;  %7470 = vpow2.f32 %v6736_v42  ;;  %v4361_v52 = vsel %vm11314_vm4, %v11250_v58, %v4357_v33  ;;  %vm11325_vm6 = vcmp.eq.f32.partialorder %v4377_v63, 8.507059e+37 }
 0x64f   : > { %v4370_v11 = vsub.f32 1.0, %v4369_v27  ;;  %v11329_v55 = vadd.f32 1.0, %v7465_v46  ;;  %v4380_v61 = vor.u32 1.1754944e-38, %v4379_v16  ;;  %vm4343_vm7 = vweird.f32 %v11282_v26 }
 0x650   : > { %v7467_v17 = vpop.eup %7466  ;;  %v4349_v44 = vand.u32 2147483648, %v11282_v26  ;;  %7472 = vrcp.f32 %v11320_v12  ;;  %vm4374_vm8 = vweird.f32 %v7463_v2  ;;  %v6743_v13 = vmul.f32 -1.442695, %v3032_v37 }
 0x651   : > { %v11334_v51 = vpop.eup %7468  ;;  %v4371_v62 = vmul.f32 %v7463_v2, %v4370_v11  ;;  %v4339_v58 = vmul.f32 %v7467_v17, %v11282_v26  ;;  %v4366_v49 = vsel %vm11302_vm3, %v4365_v54, %v4361_v52  ;;  %vm11339_vm9 = vcmp.eq.f32.partialorder %v4347_v41, 8.507059e+37  ;;  %vm4375_vm12 = vmor %vm4373_vm5, %vm4374_vm8  ;;  %v2973_v54 = vpop.f32.mrf.mxu3 }
 0x652   : > { %v4459_v56 = vmul.f32 %v11334_v51, %v11289_v3  ;;  %7474 = vrcp.f32 %v11329_v55  ;;  %v4469_v21 = vand.u32 2147483648, %v11289_v3  ;;  %vm4344_vm13 = vweird.f32 %v7467_v17  ;;  %v3034_v41 = vpop.f32.mrf.mxu0 }
 0x653   : > { %v4372_v36 = vadd.f32 %v7463_v2, %v4371_v62  ;;  %v4340_v10 = vsub.f32 1.0, %v4339_v58  ;;  %7476 = vpow2.f32 %v6737_v18  ;;  %vm4463_vm10 = vweird.f32 %v11289_v3  ;;  %vm4345_vm14 = vmor %vm4343_vm7, %vm4344_vm13 }
 0x654   : > { %v7471_v59 = vpop.eup %7470  ;;  %v4460_v40 = vsub.f32 1.0, %v4459_v56  ;;  %v4467_v32 = vand.u32 2147483647, %v11289_v3  ;;  %7478 = vpow2.f32 %v6735_v9  ;;  %v4350_v15 = vor.u32 1.1754944e-38, %v4349_v44 }
 0x655   : > { %v4376_v60 = vsel %vm4375_vm12, %v7463_v2, %v4372_v36  ;;  %v4341_v39 = vmul.f32 %v7467_v17, %v4340_v10  ;;  %v11351_v34 = vadd.f32 1.0, %v7471_v59  ;;  %7480 = vpow2.f32 %v6743_v13  ;;  %v3092_v13 = vpop.f32.mrf.mxu1 }
 0x656   : > { %v7473_v29 = vpop.eup %7472  ;;  %v4381_v14 = vsel %vm11325_vm6, %v4380_v61, %v4376_v60  ;;  %v4461_v22 = vmul.f32 %v11334_v51, %v4460_v40  ;;  %v4482_v38 = vand.u32 2147483647, %v11320_v12  ;;  %v4470_v4 = vor.u32 1.1754944e-38, %v4469_v21 }
 0x657   : > { %v5670_v45 = vpack.c.bf16 %v4381_v14, %v4381_v14  ;;  %v4342_v43 = vadd.f32 %v7467_v17, %v4341_v39  ;;  %v4474_v0 = vmul.f32 %v7473_v29, %v11320_v12  ;;  %vm4464_vm11 = vweird.f32 %v11334_v51 }
 0x658   : > { %v7475_v48 = vpop.eup %7474  ;;  %vm4478_vm0 = vweird.f32 %v11320_v12  ;;  %v4484_v28 = vand.u32 2147483648, %v11320_v12  ;;  %7482 = vrcp.f32 %v11351_v34  ;;  %vm11367_vm1 = vcmp.eq.f32.partialorder %v4467_v32, 8.507059e+37  ;;  %vm11391_vm5 = vmor %vm4463_vm10, %vm4464_vm11 }
 0x659   : > { %v7477_v8 = vpop.eup %7476  ;;  %5747 = vst.msk [vmem:[%s9052_s14 + $0xc0] sm:$0xf] %vm5722_vm15, %v5670_v45  ;;  %v4346_v19 = vsel %vm4345_vm14, %v7467_v17, %v4342_v43  ;;  %v4475_v50 = vsub.f32 1.0, %v4474_v0  ;;  %v4444_v26 = vmul.f32 %v7475_v48, %v11329_v55  ;;  %v4452_v31 = vand.u32 2147483647, %v11329_v55 }
 0x65a   : > { %v7479_v42 = vpop.eup %7478  ;;  %v4351_v57 = vsel %vm11339_vm9, %v4350_v15, %v4346_v19  ;;  %v4462_v25 = vadd.f32 %v11334_v51, %v4461_v22  ;;  %vm11376_vm2 = vcmp.eq.f32.partialorder %v4482_v38, 8.507059e+37  ;;  %v4454_v33 = vand.u32 2147483648, %v11329_v55  ;;  %v3036_v23 = vpop.f32.mrf.mxu0 }
 0x65b   : > { %v7481_v63 = vpop.eup %7480  ;;  %v5669_v2 = vpack.c.bf16 %v4366_v49, %v4351_v57  ;;  %v4476_v20 = vmul.f32 %v7473_v29, %v4475_v50  ;;  %vm4479_vm3 = vweird.f32 %v7473_v29  ;;  %v4445_v6 = vsub.f32 1.0, %v4444_v26 }
 0x65c   : > { %v4485_v16 = vor.u32 1.1754944e-38, %v4484_v28  ;;  %vm4448_vm4 = vweird.f32 %v11329_v55  ;;  %v11382_v27 = vadd.f32 1.0, %v7477_v8  ;;  %v11384_v18 = vadd.f32 1.0, %v7479_v42  ;;  %vm4480_vm8 = vmor %vm4478_vm0, %vm4479_vm3 }
 0x65d   : > { %5746 = vst [vmem:[%s9052_s14 + $0xb8] sm:$0xff] %v5669_v2  ;;  %v4477_v37 = vadd.f32 %v7473_v29, %v4476_v20  ;;  %v4446_v46 = vmul.f32 %v7475_v48, %v4445_v6  ;;  %vm4449_vm6 = vweird.f32 %v7475_v48  ;;  %vm11395_vm7 = vcmp.eq.f32.partialorder %v4452_v31, 8.507059e+37  ;;  %v3094_v20 = vpop.f32.mrf.mxu1 }
 0x65e   : > { %v11399_v52 = vpop.eup %7482  ;;  %v4466_v11 = vsel %vm11391_vm5, %v11334_v51, %v4462_v25  ;;  %v4455_v3 = vor.u32 1.1754944e-38, %v4454_v33  ;;  %7484 = vrcp.f32 %v11382_v27  ;;  %v11408_v30 = vadd.f32 1.0, %v7481_v63  ;;  %vm4450_vm9 = vmor %vm4448_vm4, %vm4449_vm6 }
 0x65f   : > { %v4481_v17 = vsel %vm4480_vm8, %v7473_v29, %v4477_v37  ;;  %v4447_v61 = vadd.f32 %v7475_v48, %v4446_v46  ;;  %v4564_v44 = vmul.f32 %v11399_v52, %v11351_v34  ;;  %v4574_v62 = vand.u32 2147483648, %v11351_v34 }
 0x660   : > { %v4486_v51 = vsel %vm11376_vm2, %v4485_v16, %v4481_v17  ;;  %v4587_v12 = vand.u32 2147483647, %v11382_v27  ;;  %7486 = vrcp.f32 %v11384_v18  ;;  %v3090_v58 = vadd.f32 %v3089_v5, %v10722_v7  ;;  %v2976_v5 = vpop.f32.mrf.mxu3 }
 0x661   : > { %v5674_v49 = vpack.c.bf16 %v4486_v51, %v4486_v51  ;;  %v4451_v35 = vsel %vm4450_vm9, %v7475_v48, %v4447_v61  ;;  %v4565_v56 = vsub.f32 1.0, %v4564_v44  ;;  %v4589_v36 = vand.u32 2147483648, %v11382_v27 }
 0x662   : > { %v4471_v10 = vsel %vm11367_vm1, %v4470_v4, %v4466_v11  ;;  %v4456_v55 = vsel %vm11395_vm7, %v4455_v3, %v4451_v35  ;;  %7488 = vrcp.f32 %v11408_v30  ;;  %v2974_v21 = vadd.f32 %v2973_v54, %v10772_v1 }
 0x663   : > { %5751 = vst.msk [vmem:[%s9052_s14 + $0xdc] sm:$0xf] %vm5722_vm15, %v5674_v49  ;;  %v5673_v59 = vpack.c.bf16 %v4471_v10, %v4456_v55  ;;  %vm4568_vm12 = vweird.f32 %v11351_v34  ;;  %v4572_v40 = vand.u32 2147483647, %v11351_v34  ;;  %v4557_v32 = vand.u32 2147483647, %v11384_v18 }
 0x664   : > { %v7485_v60 = vpop.eup %7484  ;;  %v4566_v39 = vmul.f32 %v11399_v52, %v4565_v56  ;;  %v11433_v29 = vor.u32 1.1754944e-38, %v4574_v62  ;;  %vm4583_vm13 = vweird.f32 %v11382_v27  ;;  %v6744_v14 = vmul.f32 -1.442695, %v3090_v58 }
 0x665   : > { %5750 = vst [vmem:[%s9052_s14 + $0xd4] sm:$0xff] %v5673_v59  ;;  %vm4569_vm10 = vweird.f32 %v11399_v52  ;;  %v4579_v15 = vmul.f32 %v7485_v60, %v11382_v27  ;;  %vm11439_vm14 = vcmp.eq.f32.partialorder %v4587_v12, 8.507059e+37  ;;  %v4590_v38 = vor.u32 1.1754944e-38, %v4589_v36 }
 0x666   : > { %v7487_v45 = vpop.eup %7486  ;;  %vm4553_vm11 = vweird.f32 %v11384_v18  ;;  %7490 = vpow2.f32 %v6744_v14  ;;  %v6742_v43 = vmul.f32 -1.442695, %v2974_v21  ;;  %v3035_v4 = vadd.f32 %v3034_v41, %v10715_v47  ;;  %vm11468_vm4 = vmor %vm4568_vm12, %vm4569_vm10  ;;  %v3039_v14 = vpop.f32.mrf.mxu0 }
 0x667   : > { %vm11445_vm0 = vcmp.eq.f32.partialorder %v4572_v40, 8.507059e+37  ;;  %v4580_v48 = vsub.f32 1.0, %v4579_v15  ;;  %v4549_v28 = vmul.f32 %v7487_v45, %v11384_v18  ;;  %vm11450_vm1 = vcmp.eq.f32.partialorder %v4557_v32, 8.507059e+37  ;;  %v11519_v15 = vpop.f32.mrf.mxu1 }
 0x668   : > { %v4559_v19 = vand.u32 2147483648, %v11384_v18  ;;  %v11455_v50 = vpop.eup %7488  ;;  %v4567_v26 = vadd.f32 %v11399_v52, %v4566_v39  ;;  %7492 = vpow2.f32 %v6742_v43  ;;  %v6750_v31 = vmul.f32 -1.442695, %v3035_v4  ;;  %v2978_v12 = vpop.f32.mrf.mxu3 }
 0x669   : > { %v3093_v42 = vadd.f32 %v3092_v13, %v10722_v7  ;;  %v4581_v57 = vmul.f32 %v7485_v60, %v4580_v48  ;;  %vm4584_vm2 = vweird.f32 %v7485_v60  ;;  %v4550_v25 = vsub.f32 1.0, %v4549_v28 }
 0x66a   : > { %v4669_v24 = vmul.f32 %v11455_v50, %v11408_v30  ;;  %vm4673_vm3 = vweird.f32 %v11408_v30  ;;  %7494 = vpow2.f32 %v6750_v31  ;;  %v2977_v63 = vadd.f32 %v2976_v5, %v10772_v1  ;;  %vm4585_vm6 = vmor %vm4583_vm13, %vm4584_vm2 }
 0x66b   : > { %v6751_v33 = vmul.f32 -1.442695, %v3093_v42  ;;  %v3037_v2 = vadd.f32 %v3036_v23, %v10715_v47  ;;  %v4582_v54 = vadd.f32 %v7485_v60, %v4581_v57  ;;  %v4551_v16 = vmul.f32 %v7487_v45, %v4550_v25 }
 0x66c   : > { %vm4554_vm5 = vweird.f32 %v7487_v45  ;;  %v4670_v9 = vsub.f32 1.0, %v4669_v24  ;;  %v7491_v37 = vpop.eup %7490  ;;  %v4571_v46 = vsel %vm11468_vm4, %v11399_v52, %v4567_v26  ;;  %v4560_v53 = vor.u32 1.1754944e-38, %v4559_v19 }
 0x66d   : > { %7496 = vpow2.f32 %v6751_v33  ;;  %v6749_v34 = vmul.f32 -1.442695, %v2977_v63  ;;  %v4586_v41 = vsel %vm4585_vm6, %v7485_v60, %v4582_v54  ;;  %v4552_v11 = vadd.f32 %v7487_v45, %v4551_v16  ;;  %vm4555_vm7 = vmor %vm4553_vm11, %vm4554_vm5 }
 0x66e   : > { %v4671_v3 = vmul.f32 %v11455_v50, %v4670_v9  ;;  %v11479_v17 = vadd.f32 1.0, %v7491_v37  ;;  %v7493_v61 = vpop.eup %7492  ;;  %v4591_v44 = vsel %vm11439_vm14, %v4590_v38, %v4586_v41  ;;  %vm4674_vm8 = vweird.f32 %v11455_v50 }
 0x66f   : > { %7498 = vpow2.f32 %v6749_v34  ;;  %v6757_v27 = vmul.f32 -1.442695, %v3037_v2  ;;  %v5678_v52 = vpack.c.bf16 %v4591_v44, %v4591_v44  ;;  %v4556_v62 = vsel %vm4555_vm7, %v7487_v45, %v4552_v11  ;;  %vm11506_vm9 = vmor %vm4673_vm3, %vm4674_vm8 }
 0x670   : > { %v4672_v51 = vadd.f32 %v11455_v50, %v4671_v3  ;;  %7500 = vrcp.f32 %v11479_v17  ;;  %v7495_v58 = vpop.eup %7494  ;;  %v4576_v13 = vsel %vm11445_vm0, %v11433_v29, %v4571_v46  ;;  %v4561_v18 = vsel %vm11450_vm1, %v4560_v53, %v4556_v62  ;;  %v2981_v46 = vpop.f32.mrf.mxu3 }
 0x671   : > { %v4677_v49 = vand.u32 2147483647, %v11408_v30  ;;  %v4679_v35 = vand.u32 2147483648, %v11408_v30  ;;  %5755 = vst.msk [vmem:[%s9052_s14 + $0xf8] sm:$0xf] %vm5722_vm15, %v5678_v52  ;;  %v5677_v56 = vpack.c.bf16 %v4576_v13, %v4561_v18  ;;  %v11497_v36 = vadd.f32 1.0, %v7493_v61  ;;  %v3041_v62 = vpop.f32.mrf.mxu0 }
 0x672   : > { %v11499_v10 = vadd.f32 1.0, %v7495_v58  ;;  %v3095_v55 = vadd.f32 %v3094_v20, %v10722_v7  ;;  %7502 = vpow2.f32 %v6757_v27  ;;  %v2979_v40 = vadd.f32 %v2978_v12, %v10772_v1 }
 0x673   : > { %v7497_v21 = vpop.eup %7496  ;;  %5754 = vst [vmem:[%s9052_s14 + $0xf0] sm:$0xff] %v5677_v56  ;;  %v4676_v32 = vsel %vm11506_vm9, %v11455_v50, %v4672_v51  ;;  %v4692_v60 = vand.u32 2147483647, %v11479_v17  ;;  %7504 = vrcp.f32 %v11497_v36  ;;  %v4680_v29 = vor.u32 1.1754944e-38, %v4679_v35 }
 0x674   : > { %v4694_v30 = vand.u32 2147483648, %v11479_v17  ;;  %7506 = vrcp.f32 %v11499_v10  ;;  %vm4678_vm12 = vcmp.eq.f32.partialorder %v4677_v49, 8.507059e+37  ;;  %v11521_v38 = vadd.f32 1.0, %v7497_v21 }
 0x675   : > { %v7499_v39 = vpop.eup %7498  ;;  %v6758_v45 = vmul.f32 -1.442695, %v3095_v55  ;;  %v11525_v43 = vsel %vm4678_vm12, %v4680_v29, %v4676_v32  ;;  %vm4688_vm13 = vweird.f32 %v11479_v17  ;;  %v6756_v0 = vmul.f32 -1.442695, %v2979_v40 }
 0x676   : > { %v7501_v22 = vpop.eup %7500  ;;  %v11523_v5 = vadd.f32 1.0, %v7499_v39  ;;  %vm11529_vm10 = vcmp.eq.f32.partialorder %v4692_v60, 8.507059e+37  ;;  %v4662_v28 = vand.u32 2147483647, %v11497_v36  ;;  %v4664_v8 = vand.u32 2147483648, %v11497_v36 }
 0x677   : > { %v4684_v4 = vmul.f32 %v7501_v22, %v11479_v17  ;;  %7508 = vrcp.f32 %v11521_v38  ;;  %v4695_v50 = vor.u32 1.1754944e-38, %v4694_v30  ;;  %v4784_v26 = vand.u32 2147483648, %v11499_v10  ;;  %v3099_v17 = vpop.f32.mrf.mxu1 }
 0x678   : > { %v7503_v19 = vpop.eup %7502  ;;  %7510 = vrcp.f32 %v11523_v5  ;;  %vm4658_vm14 = vweird.f32 %v11497_v36  ;;  %v4782_v42 = vand.u32 2147483647, %v11499_v10  ;;  %v4799_v57 = vand.u32 2147483648, %v11521_v38 }
 0x679   : > { %v4685_v23 = vsub.f32 1.0, %v4684_v4  ;;  %v7505_v31 = vpop.eup %7504  ;;  %v11541_v25 = vadd.f32 1.0, %v7503_v19  ;;  %vm4689_vm11 = vweird.f32 %v7501_v22  ;;  %vm4778_vm0 = vweird.f32 %v11499_v10 }
 0x67a   : > { %v11543_v24 = vpop.eup %7506  ;;  %v4654_v63 = vmul.f32 %v7505_v31, %v11497_v36  ;;  %v4797_v2 = vand.u32 2147483647, %v11521_v38  ;;  %vm11548_vm1 = vcmp.eq.f32.partialorder %v4662_v28, 8.507059e+37  ;;  %v4665_v6 = vor.u32 1.1754944e-38, %v4664_v8  ;;  %vm4690_vm3 = vmor %vm4688_vm13, %vm4689_vm11 }
 0x67b   : > { %v4686_v33 = vmul.f32 %v7501_v22, %v4685_v23  ;;  %v4774_v54 = vmul.f32 %v11543_v24, %v11499_v10  ;;  %7512 = vrcp.f32 %v11541_v25  ;;  %v11555_v37 = vor.u32 1.1754944e-38, %v4784_v26 }
 0x67c   : > { %v4655_v9 = vsub.f32 1.0, %v4654_v63  ;;  %vm4793_vm2 = vweird.f32 %v11521_v38  ;;  %v4800_v41 = vor.u32 1.1754944e-38, %v4799_v57  ;;  %vm4763_vm4 = vweird.f32 %v11523_v5 }
 0x67d   : > { %v4687_v16 = vadd.f32 %v7501_v22, %v4686_v33  ;;  %v7509_v53 = vpop.eup %7508  ;;  %v4775_v34 = vsub.f32 1.0, %v4774_v54  ;;  %v4767_v11 = vand.u32 2147483647, %v11523_v5  ;;  %7514 = vpow2.f32 %v6758_v45 }
 0x67e   : > { %v7511_v3 = vpop.eup %7510  ;;  %v4656_v44 = vmul.f32 %v7505_v31, %v4655_v9  ;;  %vm4659_vm5 = vweird.f32 %v7505_v31  ;;  %v4789_v27 = vmul.f32 %v7509_v53, %v11521_v38  ;;  %vm11563_vm6 = vcmp.eq.f32.partialorder %v4797_v2, 8.507059e+37  ;;  %v2983_v38 = vpop.f32.mrf.mxu3 }
 0x67f   : > { %v4691_v61 = vsel %vm4690_vm3, %v7501_v22, %v4687_v16  ;;  %v4776_v12 = vmul.f32 %v11543_v24, %v4775_v34  ;;  %vm11570_vm7 = vcmp.eq.f32.partialorder %v4782_v42, 8.507059e+37  ;;  %v4759_v13 = vmul.f32 %v7511_v3, %v11523_v5  ;;  %vm4660_vm9 = vmor %vm4658_vm14, %vm4659_vm5  ;;  %v3102_v33 = vpop.f32.mrf.mxu1 }
 0x680   : > { %v4696_v51 = vsel %vm11529_vm10, %v4695_v50, %v4691_v61  ;;  %v3040_v18 = vadd.f32 %v3039_v14, %v10715_v47  ;;  %v4657_v35 = vadd.f32 %v7505_v31, %v4656_v44  ;;  %vm4779_vm8 = vweird.f32 %v11543_v24 }
 0x681   : > { %v5682_v49 = vpack.c.bf16 %v4696_v51, %v4696_v51  ;;  %v4790_v56 = vsub.f32 1.0, %v4789_v27  ;;  %v11577_v55 = vpop.eup %7512  ;;  %v4777_v21 = vadd.f32 %v11543_v24, %v4776_v12  ;;  %v4760_v59 = vsub.f32 1.0, %v4759_v13  ;;  %vm11594_vm13 = vmor %vm4778_vm0, %vm4779_vm8 }
 0x682   : > { %v4769_v40 = vand.u32 2147483648, %v11523_v5  ;;  %7516 = vpow2.f32 %v6756_v0  ;;  %v4661_v32 = vsel %vm4660_vm9, %v7505_v31, %v4657_v35  ;;  %vm4794_vm12 = vweird.f32 %v7509_v53 }
 0x683   : > { %5759 = vst.msk [vmem:[%s9052_s14 + $0x114] sm:$0xf] %vm5722_vm15, %v5682_v49  ;;  %v4791_v60 = vmul.f32 %v7509_v53, %v4790_v56  ;;  %v4879_v39 = vmul.f32 %v11577_v55, %v11541_v25  ;;  %v7515_v29 = vpop.eup %7514  ;;  %v4666_v36 = vsel %vm11548_vm1, %v4665_v6, %v4661_v32  ;;  %v4761_v14 = vmul.f32 %v7511_v3, %v4760_v59  ;;  %vm4795_vm14 = vmor %vm4793_vm2, %vm4794_vm12 }
 0x684   : > { %vm4764_vm10 = vweird.f32 %v7511_v3  ;;  %v6764_v22 = vmul.f32 -1.442695, %v3040_v18  ;;  %v5681_v45 = vpack.c.bf16 %v11525_v43, %v4666_v36  ;;  %v4781_v4 = vsel %vm11594_vm13, %v11543_v24, %v4777_v21  ;;  %v3044_v24 = vpop.f32.mrf.mxu0 }
 0x685   : > { %v4792_v0 = vadd.f32 %v7509_v53, %v4791_v60  ;;  %v4880_v48 = vsub.f32 1.0, %v4879_v39  ;;  %v4762_v28 = vadd.f32 %v7511_v3, %v4761_v14  ;;  %v11604_v10 = vadd.f32 1.0, %v7515_v29  ;;  %vm4765_vm11 = vmor %vm4763_vm4, %vm4764_vm10 }
 0x686   : > { %7518 = vpow2.f32 %v6764_v22  ;;  %v3098_v8 = vadd.f32 %v11519_v15, %v10722_v7  ;;  %5758 = vst [vmem:[%s9052_s14 + $0x10c] sm:$0xff] %v5681_v45  ;;  %v4770_v43 = vor.u32 1.1754944e-38, %v4769_v40  ;;  %v2982_v50 = vadd.f32 %v2981_v46, %v10772_v1  ;;  %v11647_v58 = vpop.f32.mrf.mxu3 }
 0x687   : > { %v4796_v19 = vsel %vm4795_vm14, %v7509_v53, %v4792_v0  ;;  %v4881_v23 = vmul.f32 %v11577_v55, %v4880_v48  ;;  %v4766_v42 = vsel %vm4765_vm11, %v7511_v3, %v4762_v28  ;;  %vm4768_vm0 = vcmp.eq.f32.partialorder %v4767_v11, 8.507059e+37  ;;  %v11659_v40 = vpop.f32.mrf.mxu1 }
 0x688   : > { %v7517_v26 = vpop.eup %7516  ;;  %v4801_v31 = vsel %vm11563_vm6, %v4800_v41, %v4796_v19  ;;  %7520 = vrcp.f32 %v11604_v10  ;;  %v4786_v15 = vsel %vm11570_vm7, %v11555_v37, %v4781_v4  ;;  %v4771_v57 = vsel %vm4768_vm0, %v4770_v43, %v4766_v42 }
 0x689   : > { %v5686_v5 = vpack.c.bf16 %v4801_v31, %v4801_v31  ;;  %v5685_v63 = vpack.c.bf16 %v4786_v15, %v4771_v57  ;;  %v11619_v2 = vadd.f32 1.0, %v7517_v26  ;;  %v6765_v20 = vmul.f32 -1.442695, %v3098_v8 }
 0x68a   : > { %v3042_v6 = vadd.f32 %v3041_v62, %v10715_v47  ;;  %v4882_v54 = vadd.f32 %v11577_v55, %v4881_v23  ;;  %vm4884_vm1 = vweird.f32 %v11577_v55  ;;  %v6763_v16 = vmul.f32 -1.442695, %v2982_v50 }
 0x68b   : > { %5763 = vst.msk [vmem:[%s9052_s14 + $0x130] sm:$0xf] %vm5722_vm15, %v5686_v5  ;;  %v3100_v9 = vadd.f32 %v3099_v17, %v10722_v7  ;;  %vm4883_vm2 = vweird.f32 %v11541_v25  ;;  %v4887_v46 = vand.u32 2147483647, %v11541_v25  ;;  %v4889_v53 = vand.u32 2147483648, %v11541_v25 }
 0x68c   : > { %v7519_v37 = vpop.eup %7518  ;;  %5762 = vst [vmem:[%s9052_s14 + $0x128] sm:$0xff] %v5685_v63  ;;  %7522 = vrcp.f32 %v11619_v2  ;;  %v4902_v34 = vand.u32 2147483647, %v11604_v10  ;;  %v4904_v41 = vand.u32 2147483648, %v11604_v10  ;;  %vm11636_vm3 = vmor %vm4883_vm2, %vm4884_vm1  ;;  %v6771_v44 = vmul.f32 -1.442695, %v3042_v6  ;;  %v11657_v59 = vpop.f32.mrf.mxu0 }
 0x68d   : > { %v11634_v11 = vadd.f32 1.0, %v7519_v37  ;;  %7524 = vpow2.f32 %v6765_v20  ;;  %v6772_v27 = vmul.f32 -1.442695, %v3100_v9  ;;  %v2984_v52 = vadd.f32 %v2983_v38, %v10772_v1 }
 0x68e   : > { %v7521_v3 = vpop.eup %7520  ;;  %7526 = vpow2.f32 %v6763_v16  ;;  %v4886_v25 = vsel %vm11636_vm3, %v11577_v55, %v4882_v54  ;;  %vm4888_vm4 = vcmp.eq.f32.partialorder %v4887_v46, 8.507059e+37  ;;  %v4890_v17 = vor.u32 1.1754944e-38, %v4889_v53  ;;  %v11701_v16 = vpop.f32.mrf.mxu3 }
 0x68f   : > { %v4894_v62 = vmul.f32 %v7521_v3, %v11604_v10  ;;  %7528 = vrcp.f32 %v11634_v11  ;;  %vm4898_vm5 = vweird.f32 %v11604_v10  ;;  %v6770_v12 = vmul.f32 -1.442695, %v2984_v52  ;;  %v11713_v61 = vpop.f32.mrf.mxu1 }
 0x690   : > { %7530 = vpow2.f32 %v6771_v44  ;;  %v11649_v18 = vsel %vm4888_vm4, %v4890_v17, %v4886_v25  ;;  %vm11651_vm6 = vcmp.eq.f32.partialorder %v4902_v34, 8.507059e+37  ;;  %v4905_v35 = vor.u32 1.1754944e-38, %v4904_v41 }
 0x691   : > { %v4895_v51 = vsub.f32 1.0, %v4894_v62  ;;  %7532 = vpow2.f32 %v6772_v27  ;;  %vm4899_vm7 = vweird.f32 %v7521_v3  ;;  %vm4868_vm8 = vweird.f32 %v11619_v2 }
 0x692   : > { %v7523_v13 = vpop.eup %7522  ;;  %v4872_v60 = vand.u32 2147483647, %v11619_v2  ;;  %v4874_v39 = vand.u32 2147483648, %v11619_v2  ;;  %v3045_v36 = vadd.f32 %v3044_v24, %v10715_v47  ;;  %7534 = vpow2.f32 %v6770_v12  ;;  %vm4900_vm9 = vmor %vm4898_vm5, %vm4899_vm7 }
 0x693   : > { %v7525_v56 = vpop.eup %7524  ;;  %v4896_v55 = vmul.f32 %v7521_v3, %v4895_v51  ;;  %v4864_v21 = vmul.f32 %v7523_v13, %v11619_v2  ;;  %v4992_v4 = vand.u32 2147483647, %v11634_v11  ;;  %v4994_v0 = vand.u32 2147483648, %v11634_v11 }
 0x694   : > { %v7527_v32 = vpop.eup %7526  ;;  %v11663_v29 = vadd.f32 1.0, %v7525_v56  ;;  %v3103_v48 = vadd.f32 %v3102_v33, %v10722_v7  ;;  %vm4869_vm12 = vweird.f32 %v7523_v13  ;;  %vm11681_vm13 = vcmp.eq.f32.partialorder %v4872_v60, 8.507059e+37 }
 0x695   : > { %v4897_v30 = vadd.f32 %v7521_v3, %v4896_v55  ;;  %v4865_v14 = vsub.f32 1.0, %v4864_v21  ;;  %v11666_v22 = vadd.f32 1.0, %v7527_v32  ;;  %v11668_v45 = vpop.eup %7528  ;;  %v4875_v38 = vor.u32 1.1754944e-38, %v4874_v39  ;;  %vm4870_vm10 = vmor %vm4868_vm8, %vm4869_vm12 }
 0x696   : > { %7536 = vrcp.f32 %v11663_v29  ;;  %v7531_v28 = vpop.eup %7530  ;;  %v4984_v43 = vmul.f32 %v11668_v45, %v11634_v11  ;;  %v6778_v15 = vmul.f32 -1.442695, %v3045_v36  ;;  %vm4988_vm14 = vweird.f32 %v11634_v11 }
 0x697   : > { %v4901_v8 = vsel %vm4900_vm9, %v7521_v3, %v4897_v30  ;;  %v4866_v19 = vmul.f32 %v7523_v13, %v4865_v14  ;;  %v7533_v23 = vpop.eup %7532  ;;  %7538 = vrcp.f32 %v11666_v22  ;;  %v4995_v5 = vor.u32 1.1754944e-38, %v4994_v0  ;;  %v11711_v3 = vpop.f32.mrf.mxu0 }
 0x698   : > { %v4906_v10 = vsel %vm11651_vm6, %v4905_v35, %v4901_v8  ;;  %v4985_v42 = vsub.f32 1.0, %v4984_v43  ;;  %v11689_v57 = vadd.f32 1.0, %v7531_v28  ;;  %v11691_v24 = vadd.f32 1.0, %v7533_v23  ;;  %v7535_v33 = vpop.eup %7534 }
 0x699   : > { %v5690_v26 = vpack.c.bf16 %v4906_v10, %v4906_v10  ;;  %v4867_v31 = vadd.f32 %v7523_v13, %v4866_v19  ;;  %vm11696_vm11 = vcmp.eq.f32.partialorder %v4992_v4, 8.507059e+37  ;;  %v5007_v2 = vand.u32 2147483647, %v11663_v29  ;;  %v11762_v19 = vpop.f32.mrf.mxu3 }
 0x69a   : > { %v4986_v20 = vmul.f32 %v11668_v45, %v4985_v42  ;;  %v6779_v54 = vmul.f32 -1.442695, %v3103_v48  ;;  %vm4989_vm0 = vweird.f32 %v11668_v45  ;;  %v5009_v46 = vand.u32 2147483648, %v11663_v29  ;;  %v11775_v42 = vpop.f32.mrf.mxu1 }
 0x69b   : > { %5767 = vst.msk [vmem:[%s9052_s14 + $0x14c] sm:$0xf] %vm5722_vm15, %v5690_v26  ;;  %v4871_v63 = vsel %vm4870_vm10, %v7523_v13, %v4867_v31  ;;  %7540 = vrcp.f32 %v11689_v57  ;;  %v4977_v27 = vand.u32 2147483647, %v11666_v22  ;;  %v4979_v52 = vand.u32 2147483648, %v11666_v22  ;;  %vm11730_vm1 = vmor %vm4988_vm14, %vm4989_vm0 }
 0x69c   : > { %v7537_v9 = vpop.eup %7536  ;;  %v4876_v37 = vsel %vm11681_vm13, %v4875_v38, %v4871_v63  ;;  %v4987_v34 = vadd.f32 %v11668_v45, %v4986_v20  ;;  %7542 = vpow2.f32 %v6778_v15  ;;  %v11718_v25 = vadd.f32 1.0, %v7535_v33 }
 0x69d   : > { %v5689_v53 = vpack.c.bf16 %v11649_v18, %v4876_v37  ;;  %v4999_v41 = vmul.f32 %v7537_v9, %v11663_v29  ;;  %v7539_v44 = vpop.eup %7538  ;;  %7544 = vrcp.f32 %v11691_v24  ;;  %v2987_v51 = vadd.f32 %v11647_v58, %v10772_v1 }
 0x69e   : > { %v4969_v17 = vmul.f32 %v7539_v44, %v11666_v22  ;;  %v3047_v12 = vadd.f32 %v11657_v59, %v10715_v47  ;;  %vm5003_vm2 = vweird.f32 %v11663_v29  ;;  %vm11735_vm3 = vcmp.eq.f32.partialorder %v5007_v2, 8.507059e+37 }
 0x69f   : > { %5766 = vst [vmem:[%s9052_s14 + $0x144] sm:$0xff] %v5689_v53  ;;  %v5000_v62 = vsub.f32 1.0, %v4999_v41  ;;  %v5010_v49 = vor.u32 1.1754944e-38, %v5009_v46  ;;  %vm4973_vm4 = vweird.f32 %v11666_v22  ;;  %v4991_v58 = vsel %vm11730_vm1, %v11668_v45, %v4987_v34  ;;  %v11773_v31 = vpop.f32.mrf.mxu0 }
 0x6a0   : > { %vm5004_vm5 = vweird.f32 %v7537_v9  ;;  %v4970_v11 = vsub.f32 1.0, %v4969_v17  ;;  %vm11745_vm6 = vcmp.eq.f32.partialorder %v4977_v27, 8.507059e+37  ;;  %v4980_v21 = vor.u32 1.1754944e-38, %v4979_v52 }
 0x6a1   : > { %v5001_v35 = vmul.f32 %v7537_v9, %v5000_v62  ;;  %v11743_v56 = vpop.eup %7540  ;;  %v5097_v59 = vand.u32 2147483647, %v11689_v57  ;;  %7546 = vrcp.f32 %v11718_v25  ;;  %vm4974_vm7 = vweird.f32 %v7539_v44  ;;  %vm5005_vm8 = vmor %vm5003_vm2, %vm5004_vm5 }
 0x6a2   : > { %v7543_v32 = vpop.eup %7542  ;;  %v4971_v39 = vmul.f32 %v7539_v44, %v4970_v11  ;;  %v5089_v36 = vmul.f32 %v11743_v56, %v11689_v57  ;;  %v4996_v14 = vsel %vm11696_vm11, %v4995_v5, %v4991_v58  ;;  %v5099_v45 = vand.u32 2147483648, %v11689_v57  ;;  %vm4975_vm13 = vmor %vm4973_vm4, %vm4974_vm7  ;;  %v11824_v11 = vpop.f32.mrf.mxu3 }
 0x6a3   : > { %v5002_v60 = vadd.f32 %v7537_v9, %v5001_v35  ;;  %v7545_v30 = vpop.eup %7544  ;;  %vm5108_vm9 = vweird.f32 %v11691_v24  ;;  %v5112_v4 = vand.u32 2147483647, %v11691_v24  ;;  %vm5093_vm12 = vweird.f32 %v11689_v57 }
 0x6a4   : > { %v4972_v48 = vadd.f32 %v7539_v44, %v4971_v39  ;;  %v5090_v28 = vsub.f32 1.0, %v5089_v36  ;;  %v5104_v8 = vmul.f32 %v7545_v30, %v11691_v24  ;;  %v5114_v29 = vand.u32 2147483648, %v11691_v24 }
 0x6a5   : > { %v5006_v0 = vsel %vm5005_vm8, %v7537_v9, %v5002_v60  ;;  %v11770_v23 = vadd.f32 1.0, %v7543_v32  ;;  %7548 = vpow2.f32 %v6779_v54  ;;  %vm5078_vm10 = vweird.f32 %v11718_v25  ;;  %v11834_v32 = vpop.f32.mrf.mxu1 }
 0x6a6   : > { %v5011_v43 = vsel %vm11735_vm3, %v5010_v49, %v5006_v0  ;;  %v4976_v50 = vsel %vm4975_vm13, %v7539_v44, %v4972_v48  ;;  %v5091_v38 = vmul.f32 %v11743_v56, %v5090_v28  ;;  %v5105_v26 = vsub.f32 1.0, %v5104_v8 }
 0x6a7   : > { %v5694_v10 = vpack.c.bf16 %v5011_v43, %v5011_v43  ;;  %v7547_v15 = vpop.eup %7546  ;;  %v4981_v22 = vsel %vm11745_vm6, %v4980_v21, %v4976_v50  ;;  %v5082_v5 = vand.u32 2147483647, %v11718_v25  ;;  %7550 = vrcp.f32 %v11770_v23 }
 0x6a8   : > { %v5693_v33 = vpack.c.bf16 %v4996_v14, %v4981_v22  ;;  %vm11784_vm14 = vcmp.eq.f32.partialorder %v5097_v59, 8.507059e+37  ;;  %v5106_v20 = vmul.f32 %v7545_v30, %v5105_v26  ;;  %vm5109_vm11 = vweird.f32 %v7545_v30  ;;  %v11832_v59 = vpop.f32.mrf.mxu0 }
 0x6a9   : > { %5771 = vst.msk [vmem:[%s9052_s14 + $0x168] sm:$0xf] %vm5722_vm15, %v5694_v10  ;;  %v5074_v6 = vmul.f32 %v7547_v15, %v11718_v25  ;;  %vm5094_vm0 = vweird.f32 %v11743_v56  ;;  %vm11790_vm1 = vcmp.eq.f32.partialorder %v5112_v4, 8.507059e+37  ;;  %v5084_v54 = vand.u32 2147483648, %v11718_v25  ;;  %vm5110_vm2 = vmor %vm5108_vm9, %vm5109_vm11 }
 0x6aa   : > { %v6777_v9 = vmul.f32 -1.442695, %v2987_v51  ;;  %5770 = vst [vmem:[%s9052_s14 + $0x160] sm:$0xff] %v5693_v33  ;;  %v5092_v37 = vadd.f32 %v11743_v56, %v5091_v38  ;;  %v5107_v46 = vadd.f32 %v7545_v30, %v5106_v20  ;;  %v6785_v34 = vmul.f32 -1.442695, %v3047_v12  ;;  %vm11809_vm4 = vmor %vm5093_vm12, %vm5094_vm0 }
 0x6ab   : > { %v5075_v53 = vsub.f32 1.0, %v5074_v6  ;;  %v7549_v41 = vpop.eup %7548  ;;  %v5115_v44 = vor.u32 1.1754944e-38, %v5114_v29  ;;  %vm5079_vm3 = vweird.f32 %v7547_v15  ;;  %v3105_v27 = vadd.f32 %v11659_v40, %v10722_v7 }
 0x6ac   : > { %7552 = vpow2.f32 %v6777_v9  ;;  %v5111_v52 = vsel %vm5110_vm2, %v7545_v30, %v5107_v46  ;;  %v11801_v17 = vadd.f32 1.0, %v7549_v41  ;;  %v2989_v13 = vadd.f32 %v11701_v16, %v10772_v1  ;;  %vm5080_vm5 = vmor %vm5078_vm10, %vm5079_vm3 }
 0x6ad   : > { %v5076_v62 = vmul.f32 %v7547_v15, %v5075_v53  ;;  %7554 = vpow2.f32 %v6785_v34  ;;  %v11803_v51 = vpop.eup %7550  ;;  %v5116_v12 = vsel %vm11790_vm1, %v5115_v44, %v5111_v52  ;;  %v6786_v40 = vmul.f32 -1.442695, %v3105_v27  ;;  %v3114_v41 = vpop.f32.mrf.mxu1 }
 0x6ae   : > { %v3050_v18 = vadd.f32 %v11711_v3, %v10715_v47  ;;  %v5096_v49 = vsel %vm11809_vm4, %v11743_v56, %v5092_v37  ;;  %v5698_v57 = vpack.c.bf16 %v5116_v12, %v5116_v12  ;;  %v5194_v35 = vmul.f32 %v11803_v51, %v11770_v23 }
 0x6af   : > { %v5077_v58 = vadd.f32 %v7547_v15, %v5076_v62  ;;  %v5100_v55 = vor.u32 1.1754944e-38, %v5099_v45  ;;  %vm5083_vm6 = vcmp.eq.f32.partialorder %v5082_v5, 8.507059e+37  ;;  %v5085_v16 = vor.u32 1.1754944e-38, %v5084_v54  ;;  %v11872_v54 = vpop.f32.mrf.mxu3 }
 0x6b0   : > { %7556 = vrcp.f32 %v11801_v17  ;;  %5775 = vst.msk [vmem:[%s9052_s14 + $0x184] sm:$0xf] %vm5722_vm15, %v5698_v57  ;;  %v5195_v56 = vsub.f32 1.0, %v5194_v35  ;;  %v6784_v21 = vmul.f32 -1.442695, %v2989_v13  ;;  %v5204_v48 = vand.u32 2147483648, %v11770_v23  ;;  %v3056_v9 = vpop.f32.mrf.mxu0 }
 0x6b1   : > { %v5081_v3 = vsel %vm5080_vm5, %v7547_v15, %v5077_v58  ;;  %7558 = vpow2.f32 %v6786_v40  ;;  %v5101_v25 = vsel %vm11784_vm14, %v5100_v55, %v5096_v49  ;;  %v5202_v36 = vand.u32 2147483647, %v11770_v23 }
 0x6b2   : > { %v7553_v60 = vpop.eup %7552  ;;  %v5086_v39 = vsel %vm5083_vm6, %v5085_v16, %v5081_v3  ;;  %v6792_v30 = vmul.f32 -1.442695, %v3050_v18  ;;  %v5196_v4 = vmul.f32 %v11803_v51, %v5195_v56  ;;  %7560 = vpow2.f32 %v6784_v21 }
 0x6b3   : > { %v7555_v14 = vpop.eup %7554  ;;  %v5697_v45 = vpack.c.bf16 %v5101_v25, %v5086_v39  ;;  %v11840_v0 = vadd.f32 1.0, %v7553_v60  ;;  %v5217_v28 = vand.u32 2147483647, %v11801_v17  ;;  %v5219_v43 = vand.u32 2147483648, %v11801_v17 }
 0x6b4   : > { %v11844_v8 = vadd.f32 1.0, %v7555_v14  ;;  %7562 = vpow2.f32 %v6792_v30  ;;  %v5197_v10 = vadd.f32 %v11803_v51, %v5196_v4  ;;  %vm5199_vm7 = vweird.f32 %v11803_v51 }
 0x6b5   : > { %5774 = vst [vmem:[%s9052_s14 + $0x17c] sm:$0xff] %v5697_v45  ;;  %7564 = vrcp.f32 %v11840_v0  ;;  %vm5198_vm8 = vweird.f32 %v11770_v23  ;;  %vm11853_vm9 = vcmp.eq.f32.partialorder %v5202_v36, 8.507059e+37  ;;  %v5205_v15 = vor.u32 1.1754944e-38, %v5204_v48 }
 0x6b6   : > { %v7557_v29 = vpop.eup %7556  ;;  %7566 = vrcp.f32 %v11844_v8  ;;  %vm5213_vm12 = vweird.f32 %v11801_v17  ;;  %vm11859_vm13 = vcmp.eq.f32.partialorder %v5217_v28, 8.507059e+37  ;;  %v3108_v5 = vadd.f32 %v11713_v61, %v10722_v7  ;;  %vm11865_vm10 = vmor %vm5198_vm8, %vm5199_vm7 }
 0x6b7   : > { %v7559_v50 = vpop.eup %7558  ;;  %v5209_v26 = vmul.f32 %v7557_v29, %v11801_v17  ;;  %v5220_v20 = vor.u32 1.1754944e-38, %v5219_v43  ;;  %v5187_v6 = vand.u32 2147483647, %v11840_v0  ;;  %v5201_v46 = vsel %vm11865_vm10, %v11803_v51, %v5197_v10  ;;  %v2998_v36 = vpop.f32.mrf.mxu3 }
 0x6b8   : > { %v7561_v33 = vpop.eup %7560  ;;  %v11870_v2 = vadd.f32 1.0, %v7559_v50  ;;  %v5189_v61 = vand.u32 2147483648, %v11840_v0  ;;  %v2992_v34 = vadd.f32 %v11762_v19, %v10772_v1  ;;  %vm5214_vm14 = vweird.f32 %v7557_v29 }
 0x6b9   : > { %v5210_v23 = vsub.f32 1.0, %v5209_v26  ;;  %v11878_v53 = vadd.f32 1.0, %v7561_v33  ;;  %v5309_v52 = vand.u32 2147483648, %v11844_v8  ;;  %vm5183_vm11 = vweird.f32 %v11840_v0  ;;  %vm5215_vm1 = vmor %vm5213_vm12, %vm5214_vm14 }
 0x6ba   : > { %v7563_v37 = vpop.eup %7562  ;;  %7568 = vrcp.f32 %v11870_v2  ;;  %v6793_v51 = vmul.f32 -1.442695, %v3108_v5  ;;  %vm11889_vm0 = vcmp.eq.f32.partialorder %v5187_v6, 8.507059e+37  ;;  %v5307_v13 = vand.u32 2147483647, %v11844_v8 }
 0x6bb   : > { %v7565_v44 = vpop.eup %7564  ;;  %v5211_v27 = vmul.f32 %v7557_v29, %v5210_v23  ;;  %7570 = vrcp.f32 %v11878_v53  ;;  %v5206_v18 = vsel %vm11853_vm9, %v5205_v15, %v5201_v46  ;;  %v5190_v57 = vor.u32 1.1754944e-38, %v5189_v61 }
 0x6bc   : > { %v11884_v62 = vpop.eup %7566  ;;  %v5179_v24 = vmul.f32 %v7565_v44, %v11840_v0  ;;  %v6791_v58 = vmul.f32 -1.442695, %v2992_v34  ;;  %vm5303_vm2 = vweird.f32 %v11844_v8  ;;  %v11901_v16 = vor.u32 1.1754944e-38, %v5309_v52 }
 0x6bd   : > { %v5212_v12 = vadd.f32 %v7557_v29, %v5211_v27  ;;  %v5299_v40 = vmul.f32 %v11884_v62, %v11844_v8  ;;  %v11903_v3 = vadd.f32 1.0, %v7563_v37  ;;  %vm5184_vm3 = vweird.f32 %v7565_v44 }
 0x6be   : > { %v5180_v49 = vsub.f32 1.0, %v5179_v24  ;;  %7572 = vpow2.f32 %v6793_v51  ;;  %v5322_v39 = vand.u32 2147483647, %v11870_v2  ;;  %v3052_v4 = vadd.f32 %v11773_v31, %v10715_v47  ;;  %vm5185_vm4 = vmor %vm5183_vm11, %vm5184_vm3 }
 0x6bf   : > { %v5216_v35 = vsel %vm5215_vm1, %v7557_v29, %v5212_v12  ;;  %v5300_v55 = vsub.f32 1.0, %v5299_v40  ;;  %7574 = vrcp.f32 %v11903_v3  ;;  %v3110_v48 = vadd.f32 %v11775_v42, %v10722_v7 }
 0x6c0   : > { %v5221_v56 = vsel %vm11859_vm13, %v5220_v20, %v5216_v35  ;;  %v5181_v21 = vmul.f32 %v7565_v44, %v5180_v49  ;;  %v7569_v17 = vpop.eup %7568  ;;  %vm5304_vm5 = vweird.f32 %v11884_v62  ;;  %vm11920_vm6 = vcmp.eq.f32.partialorder %v5307_v13, 8.507059e+37 }
 0x6c1   : > { %v5702_v60 = vpack.c.bf16 %v5221_v56, %v5221_v56  ;;  %v5301_v25 = vmul.f32 %v11884_v62, %v5300_v55  ;;  %v7571_v30 = vpop.eup %7570  ;;  %v5314_v45 = vmul.f32 %v7569_v17, %v11870_v2  ;;  %vm5318_vm7 = vweird.f32 %v11870_v2  ;;  %vm11945_vm13 = vmor %vm5303_vm2, %vm5304_vm5 }
 0x6c2   : > { %v5182_v14 = vadd.f32 %v7565_v44, %v5181_v21  ;;  %v5324_v43 = vand.u32 2147483648, %v11870_v2  ;;  %v5284_v31 = vmul.f32 %v7571_v30, %v11878_v53  ;;  %v5294_v42 = vand.u32 2147483648, %v11878_v53 }
 0x6c3   : > { %5779 = vst.msk [vmem:[%s9052_s14 + $0x1a0] sm:$0xf] %vm5722_vm15, %v5702_v60  ;;  %v5315_v10 = vsub.f32 1.0, %v5314_v45  ;;  %7576 = vpow2.f32 %v6791_v58  ;;  %v5302_v50 = vadd.f32 %v11884_v62, %v5301_v25  ;;  %vm11931_vm8 = vcmp.eq.f32.partialorder %v5322_v39, 8.507059e+37 }
 0x6c4   : > { %v5186_v29 = vsel %vm5185_vm4, %v7565_v44, %v5182_v14  ;;  %v5285_v26 = vsub.f32 1.0, %v5284_v31  ;;  %v7573_v15 = vpop.eup %7572  ;;  %vm5319_vm9 = vweird.f32 %v7569_v17  ;;  %v5292_v33 = vand.u32 2147483647, %v11878_v53 }
 0x6c5   : > { %v5191_v0 = vsel %vm11889_vm0, %v5190_v57, %v5186_v29  ;;  %v5316_v5 = vmul.f32 %v7569_v17, %v5315_v10  ;;  %v11936_v63 = vpop.eup %7574  ;;  %vm5289_vm12 = vweird.f32 %v7571_v30  ;;  %v11938_v20 = vadd.f32 1.0, %v7573_v15  ;;  %vm5320_vm14 = vmor %vm5318_vm7, %vm5319_vm9 }
 0x6c6   : > { %v5701_v22 = vpack.c.bf16 %v5206_v18, %v5191_v0  ;;  %v5286_v23 = vmul.f32 %v7571_v30, %v5285_v26  ;;  %v6799_v6 = vmul.f32 -1.442695, %v3052_v4  ;;  %v5325_v46 = vor.u32 1.1754944e-38, %v5324_v43 }
 0x6c7   : > { %v5317_v37 = vadd.f32 %v7569_v17, %v5316_v5  ;;  %vm5288_vm10 = vweird.f32 %v11878_v53  ;;  %v5295_v61 = vor.u32 1.1754944e-38, %v5294_v42  ;;  %v5306_v34 = vsel %vm11945_vm13, %v11884_v62, %v5302_v50 }
 0x6c8   : > { %5778 = vst [vmem:[%s9052_s14 + $0x198] sm:$0xff] %v5701_v22  ;;  %v5287_v41 = vadd.f32 %v7571_v30, %v5286_v23  ;;  %7578 = vrcp.f32 %v11938_v20  ;;  %v6800_v8 = vmul.f32 -1.442695, %v3110_v48  ;;  %vm5290_vm11 = vmor %vm5288_vm10, %vm5289_vm12  ;;  %v5404_v53 = vmul.f32 %v11936_v63, %v11903_v3 }
 0x6c9   : > { %v7577_v44 = vpop.eup %7576  ;;  %v5321_v27 = vsel %vm5320_vm14, %v7569_v17, %v5317_v37  ;;  %7580 = vpow2.f32 %v6799_v6  ;;  %v2994_v52 = vadd.f32 %v11824_v11, %v10772_v1  ;;  %vm5293_vm0 = vcmp.eq.f32.partialorder %v5292_v33, 8.507059e+37 }
 0x6ca   : > { %v5326_v2 = vsel %vm11931_vm8, %v5325_v46, %v5321_v27  ;;  %v5291_v62 = vsel %vm5290_vm11, %v7571_v30, %v5287_v41  ;;  %v11963_v24 = vadd.f32 1.0, %v7577_v44  ;;  %v5311_v51 = vsel %vm11920_vm6, %v11901_v16, %v5306_v34 }
 0x6cb   : > { %v5706_v12 = vpack.c.bf16 %v5326_v2, %v5326_v2  ;;  %v5296_v19 = vsel %vm5293_vm0, %v5295_v61, %v5291_v62  ;;  %v5405_v13 = vsub.f32 1.0, %v5404_v53  ;;  %v6798_v11 = vmul.f32 -1.442695, %v2994_v52 }
 0x6cc   : > { %v5705_v40 = vpack.c.bf16 %v5311_v51, %v5296_v19  ;;  %7582 = vrcp.f32 %v11963_v24  ;;  %v3055_v49 = vadd.f32 %v11832_v59, %v10715_v47  ;;  %v3113_v57 = vadd.f32 %v11834_v32, %v10722_v7 }
 0x6cd   : > { %5783 = vst.msk [vmem:[%s9052_s14 + $0x1bc] sm:$0xf] %vm5722_vm15, %v5706_v12  ;;  %7584 = vpow2.f32 %v6800_v8  ;;  %v2997_v58 = vadd.f32 %v11872_v54, %v10772_v1  ;;  %vm5408_vm1 = vweird.f32 %v11903_v3  ;;  %v5412_v55 = vand.u32 2147483647, %v11903_v3 }
 0x6ce   : > { %v7579_v18 = vpop.eup %7578  ;;  %5782 = vst [vmem:[%s9052_s14 + $0x1b4] sm:$0xff] %v5705_v40  ;;  %v5427_v56 = vand.u32 2147483647, %v11938_v20  ;;  %7586 = vpow2.f32 %v6798_v11  ;;  %v6806_v17 = vmul.f32 -1.442695, %v3055_v49  ;;  %v5406_v47 = vmul.f32 %v11936_v63, %v5405_v13 }
 0x6cf   : > { %v7581_v35 = vpop.eup %7580  ;;  %v5419_v16 = vmul.f32 %v7579_v18, %v11938_v20  ;;  %v6807_v7 = vmul.f32 -1.442695, %v3113_v57  ;;  %v6805_v32 = vmul.f32 -1.442695, %v2997_v58  ;;  %vm5409_vm2 = vweird.f32 %v11936_v63 }
 0x6d0   : > { %v11982_v21 = vadd.f32 1.0, %v7581_v35  ;;  %v5414_v1 = vand.u32 2147483648, %v11903_v3  ;;  %v5429_v54 = vand.u32 2147483648, %v11938_v20  ;;  %vm5424_vm3 = vweird.f32 %v7579_v18  ;;  %vm12009_vm8 = vmor %vm5408_vm1, %vm5409_vm2 }
 0x6d1   : > { %v5420_v59 = vsub.f32 1.0, %v5419_v16  ;;  %vm5423_vm4 = vweird.f32 %v11938_v20  ;;  %vm11991_vm5 = vcmp.eq.f32.partialorder %v5427_v56, 8.507059e+37  ;;  %v5407_v45 = vadd.f32 %v11936_v63, %v5406_v47 }
 0x6d2   : > { %v7583_v60 = vpop.eup %7582  ;;  %7588 = vrcp.f32 %v11982_v21  ;;  %vm5425_vm6 = vmor %vm5423_vm4, %vm5424_vm3  ;;  %v5430_v43 = vor.u32 1.1754944e-38, %v5429_v54  ;;  %v5397_v31 = vand.u32 2147483647, %v11963_v24  ;;  %v5399_v29 = vand.u32 2147483648, %v11963_v24 }
 0x6d3   : > { %v7585_v25 = vpop.eup %7584  ;;  %v5421_v39 = vmul.f32 %v7579_v18, %v5420_v59  ;;  %v5389_v36 = vmul.f32 %v7583_v60, %v11963_v24  ;;  %7590 = vpow2.f32 %v6806_v17  ;;  %vm5394_vm7 = vweird.f32 %v7583_v60 }
 0x6d4   : > { %v11995_v14 = vadd.f32 1.0, %v7585_v25  ;;  %7592 = vpow2.f32 %v6807_v7  ;;  %v7587_v28 = vpop.eup %7586  ;;  %vm12013_vm9 = vcmp.eq.f32.partialorder %v5412_v55, 8.507059e+37  ;;  %vm5393_vm12 = vweird.f32 %v11963_v24 }
 0x6d5   : > { %v5422_v4 = vadd.f32 %v7579_v18, %v5421_v39  ;;  %v5390_v48 = vsub.f32 1.0, %v5389_v36  ;;  %7594 = vpow2.f32 %v6805_v32  ;;  %v12001_v0 = vadd.f32 1.0, %v7587_v28  ;;  %vm5395_vm13 = vmor %vm5393_vm12, %vm5394_vm7 }
 0x6d6   : > { %7596 = vrcp.f32 %v11995_v14  ;;  %v5411_v5 = vsel %vm12009_vm8, %v11936_v63, %v5407_v45  ;;  %v5415_v6 = vor.u32 1.1754944e-38, %v5414_v1  ;;  %vm5398_vm10 = vcmp.eq.f32.partialorder %v5397_v31, 8.507059e+37 }
 0x6d7   : > { %v5426_v10 = vsel %vm5425_vm6, %v7579_v18, %v5422_v4  ;;  %v5391_v42 = vmul.f32 %v7583_v60, %v5390_v48  ;;  %v5400_v9 = vor.u32 1.1754944e-38, %v5399_v29  ;;  %7598 = vrcp.f32 %v12001_v0 }
 0x6d8   : > { %v12003_v50 = vpop.eup %7588  ;;  %v5431_v15 = vsel %vm11991_vm5, %v5430_v43, %v5426_v10  ;;  %v5416_v8 = vsel %vm12013_vm9, %v5415_v6, %v5411_v5  ;;  %v5517_v53 = vand.u32 2147483647, %v11982_v21  ;;  %vm5513_vm14 = vweird.f32 %v11982_v21 }
 0x6d9   : > { %v7591_v22 = vpop.eup %7590  ;;  %v5710_v3 = vpack.c.bf16 %v5431_v15, %v5431_v15  ;;  %v5392_v33 = vadd.f32 %v7583_v60, %v5391_v42  ;;  %v5509_v23 = vmul.f32 %v12003_v50, %v11982_v21  ;;  %v5519_v12 = vand.u32 2147483648, %v11982_v21 }
 0x6da   : > { %v7593_v20 = vpop.eup %7592  ;;  %v12028_v34 = vadd.f32 1.0, %v7591_v22  ;;  %v5532_v19 = vand.u32 2147483647, %v11995_v14  ;;  %v5534_v40 = vand.u32 2147483648, %v11995_v14  ;;  %vm12046_vm11 = vcmp.eq.f32.partialorder %v5517_v53, 8.507059e+37 }
 0x6db   : > { %v7595_v37 = vpop.eup %7594  ;;  %5787 = vst.msk [vmem:[%s9052_s14 + $0x1d8] sm:$0xf] %vm5722_vm15, %v5710_v3  ;;  %v5396_v46 = vsel %vm5395_vm13, %v7583_v60, %v5392_v33  ;;  %v5510_v61 = vsub.f32 1.0, %v5509_v23  ;;  %v12030_v63 = vadd.f32 1.0, %v7593_v20  ;;  %vm5528_vm1 = vweird.f32 %v11995_v14 }
 0x6dc   : > { %v7597_v41 = vpop.eup %7596  ;;  %v5401_v44 = vsel %vm5398_vm10, %v5400_v9, %v5396_v46  ;;  %7600 = vrcp.f32 %v12028_v34  ;;  %v12037_v2 = vadd.f32 1.0, %v7595_v37  ;;  %v5502_v49 = vand.u32 2147483647, %v12001_v0 }
 0x6dd   : > { %v5709_v27 = vpack.c.bf16 %v5416_v8, %v5401_v44  ;;  %v5524_v52 = vmul.f32 %v7597_v41, %v11995_v14  ;;  %v5511_v62 = vmul.f32 %v12003_v50, %v5510_v61  ;;  %7602 = vrcp.f32 %v12030_v63  ;;  %v7599_v51 = vpop.eup %7598 }
 0x6de   : > { %vm5529_vm0 = vweird.f32 %v7597_v41  ;;  %v5494_v18 = vmul.f32 %v7599_v51, %v12001_v0  ;;  %v5504_v57 = vand.u32 2147483648, %v12001_v0  ;;  %7604 = vrcp.f32 %v12037_v2 }
 0x6df   : > { %5786 = vst [vmem:[%s9052_s14 + $0x1d0] sm:$0xff] %v5709_v27  ;;  %v5525_v24 = vsub.f32 1.0, %v5524_v52  ;;  %v5512_v58 = vadd.f32 %v12003_v50, %v5511_v62  ;;  %vm5514_vm2 = vweird.f32 %v12003_v50  ;;  %v5520_v56 = vor.u32 1.1754944e-38, %v5519_v12  ;;  %vm5530_vm3 = vmor %vm5528_vm1, %vm5529_vm0 }
 0x6e0   : > { %v5495_v55 = vsub.f32 1.0, %v5494_v18  ;;  %vm5533_vm4 = vcmp.eq.f32.partialorder %v5532_v19, 8.507059e+37  ;;  %v5535_v17 = vor.u32 1.1754944e-38, %v5534_v40  ;;  %vm5498_vm5 = vweird.f32 %v12001_v0  ;;  %vm12064_vm7 = vmor %vm5513_vm14, %vm5514_vm2 }
 0x6e1   : > { %v5526_v11 = vmul.f32 %v7597_v41, %v5525_v24  ;;  %vm5499_vm6 = vweird.f32 %v7599_v51  ;;  %vm12068_vm8 = vcmp.eq.f32.partialorder %v5502_v49, 8.507059e+37  ;;  %v5505_v25 = vor.u32 1.1754944e-38, %v5504_v57 }
 0x6e2   : > { %v12057_v16 = vpop.eup %7600  ;;  %v5496_v7 = vmul.f32 %v7599_v51, %v5495_v55  ;;  %v5516_v36 = vsel %vm12064_vm7, %v12003_v50, %v5512_v58  ;;  %vm5500_vm9 = vmor %vm5498_vm5, %vm5499_vm6  ;;  %vm5618_vm12 = vweird.f32 %v12028_v34  ;;  %v5622_v4 = vand.u32 2147483647, %v12028_v34 }
 0x6e3   : > { %v5527_v35 = vadd.f32 %v7597_v41, %v5526_v11  ;;  %v7603_v47 = vpop.eup %7602  ;;  %v5614_v32 = vmul.f32 %v12057_v16, %v12028_v34  ;;  %v5637_v28 = vand.u32 2147483647, %v12030_v63  ;;  %v5639_v29 = vand.u32 2147483648, %v12030_v63 }
 0x6e4   : > { %v5629_v39 = vmul.f32 %v7603_v47, %v12030_v63  ;;  %v5497_v21 = vadd.f32 %v7599_v51, %v5496_v7  ;;  %v7605_v45 = vpop.eup %7604  ;;  %v5521_v42 = vsel %vm12046_vm11, %v5520_v56, %v5516_v36  ;;  %vm5634_vm13 = vweird.f32 %v7603_v47 }
 0x6e5   : > { %v5531_v59 = vsel %vm5530_vm3, %v7597_v41, %v5527_v35  ;;  %v5615_v14 = vsub.f32 1.0, %v5614_v32  ;;  %v5599_v10 = vmul.f32 %v7605_v45, %v12037_v2  ;;  %vm5619_vm10 = vweird.f32 %v12057_v16 }
 0x6e6   : > { %v5536_v1 = vsel %vm5533_vm4, %v5535_v17, %v5531_v59  ;;  %v5630_v48 = vsub.f32 1.0, %v5629_v39  ;;  %v5501_v43 = vsel %vm5500_vm9, %v7599_v51, %v5497_v21  ;;  %v5624_v22 = vand.u32 2147483648, %v12028_v34  ;;  %vm12103_vm1 = vmor %vm5618_vm12, %vm5619_vm10 }
 0x6e7   : > { %v5714_v30 = vpack.c.bf16 %v5536_v1, %v5536_v1  ;;  %v5616_v31 = vmul.f32 %v12057_v16, %v5615_v14  ;;  %v5506_v0 = vsel %vm12068_vm8, %v5505_v25, %v5501_v43  ;;  %v5600_v15 = vsub.f32 1.0, %v5599_v10 }
 0x6e8   : > { %v5631_v50 = vmul.f32 %v7603_v47, %v5630_v48  ;;  %v5713_v38 = vpack.c.bf16 %v5521_v42, %v5506_v0  ;;  %vm5633_vm14 = vweird.f32 %v12030_v63  ;;  %v5609_v3 = vand.u32 2147483648, %v12037_v2 }
 0x6e9   : > { %5791 = vst.msk [vmem:[%s9052_s14 + $0x1f4] sm:$0xf] %vm5722_vm15, %v5714_v30  ;;  %v5617_v26 = vadd.f32 %v12057_v16, %v5616_v31  ;;  %vm5635_vm11 = vmor %vm5633_vm14, %vm5634_vm13  ;;  %v5640_v33 = vor.u32 1.1754944e-38, %v5639_v29  ;;  %v5601_v23 = vmul.f32 %v7605_v45, %v5600_v15  ;;  %vm5604_vm0 = vweird.f32 %v7605_v45 }
 0x6ea   : > { %v5632_v5 = vadd.f32 %v7603_v47, %v5631_v50  ;;  %5790 = vst [vmem:[%s9052_s14 + $0x1ec] sm:$0xff] %v5713_v38  ;;  %v5607_v20 = vand.u32 2147483647, %v12037_v2  ;;  %vm5638_vm2 = vcmp.eq.f32.partialorder %v5637_v28, 8.507059e+37  ;;  %vm5603_vm3 = vweird.f32 %v12037_v2 }
 0x6eb   : > { %v5621_v37 = vsel %vm12103_vm1, %v12057_v16, %v5617_v26  ;;  %v5602_v61 = vadd.f32 %v7605_v45, %v5601_v23  ;;  %v5625_v63 = vor.u32 1.1754944e-38, %v5624_v22  ;;  %vm5605_vm4 = vmor %vm5603_vm3, %vm5604_vm0  ;;  %v5610_v41 = vor.u32 1.1754944e-38, %v5609_v3 }
 0x6ec   : > { %v5636_v9 = vsel %vm5635_vm11, %v7603_v47, %v5632_v5  ;;  %vm5623_vm5 = vcmp.eq.f32.partialorder %v5622_v4, 8.507059e+37  ;;  %vm5608_vm6 = vcmp.eq.f32.partialorder %v5607_v20, 8.507059e+37 }
 0x6ed   : > { %v5641_v46 = vsel %vm5638_vm2, %v5640_v33, %v5636_v9  ;;  %v5606_v8 = vsel %vm5605_vm4, %v7605_v45, %v5602_v61  ;;  %v5626_v44 = vsel %vm5623_vm5, %v5625_v63, %v5621_v37 }
 0x6ee   : > { %v5718_v34 = vpack.c.bf16 %v5641_v46, %v5641_v46  ;;  %v5611_v27 = vsel %vm5608_vm6, %v5610_v41, %v5606_v8 }
 0x6ef   : > { %v5717_v53 = vpack.c.bf16 %v5626_v44, %v5611_v27 }
 0x6f0   : > { %5795 = vst.msk [vmem:[%s9052_s14 + $0x210] sm:$0xf] %vm5722_vm15, %v5718_v34 }
 0x6f1   : > { %5794 = vst [vmem:[%s9052_s14 + $0x208] sm:$0xff] %v5717_v53 }
 0x6f2   : > { %7664 = shalt.err (!%p7661_p7)
}
 0x6f3   : > { %s7707_s13 = smov 448   ;;  %s7708_s14 = smov 28  }
 0x6f4   : > { %7019 = dma.vmem_to_hbm [thread:$0]  (%p7825_p11), %s5811_s18, 8512, %s5813_s22, %s5797_s21, %s7707_s13, %s7707_s13, %s7708_s14  }
 0x6f5 PF: > { %s12496_s30 = sld [smem:[#allocation8_spill]]  ;;  %p7026_p8 = pnand %p5888_p9, %p7829_p12 }
 0x6f7   : > { %p7027_p10 = pneg %p7026_p8 }
 0x6fb   : > { %s5827_s0 = sand.u32 1, %s12496_s30  }
 0x6fc   : > { %s5828_s27 = scalar_lea.sflag [#allocation4], %s5827_s0 }
 0x6fd   : > { %7686 = dma.done.wait (%p7027_p10), %s5828_s27, 8512  }
 0x6fe   : > { %7688 = vsyncadd (%p7027_p10), %s5828_s27, 4294958784  ;;  %s12498_s28 = sld [smem:[#allocation11_spill]]  ;;  %s12501_s25 = smov %s7695_s26 }
 0x6ff   : > { %s12499_s29 = sld [smem:[#allocation9_spill]] }
 0x700   : > { %s12500_s27 = sld [smem:[#allocation12_spill]] }
 0x704   : > { %p26_p1 = scmp.ge.s32.totalorder %s12498_s28, 4  }
 0x705   : > { %s12502_s26 = smov %s12499_s29 }
 0x706   :  { %28 = sbr.rel (!%p26_p1) target bundleno = 8 (0x8), region = 117 }
 0x70b   :  { %5834 = vsyncpa [#allocation3], 1 }
 0x70c   :  { %5836 = vsyncpa [#allocation3 + $0x1], 1 }
 0x70d   :  { %5837 = vsyncpa [#allocation4], 1 }
 0x70e   :  { %5839 = vsyncpa [#allocation4 + $0x1], 1 }

</bundles_post_ra>
